<compile_context>
chip_gen: v5e
topology: v5e:2x2
jax: 0.10.0
libtpu: 0.0.40
codegen_flags: <defaults>
</compile_context>

<pallas_src>
import functools

import jax
import jax.numpy as jnp
from jax import lax
from jax.experimental import pallas as pl
from jax.experimental.pallas import tpu as pltpu

BN_EPS = 1e-5


def _pick_tile(h, target=32, even=False):
  """Largest divisor of h that is <= target (optionally even)."""
  for d in range(min(h, target), 0, -1):
    if h % d == 0 and (not even or d % 2 == 0):
      return d
  return h


# ---------------------------------------------------------------------------
# Kernel: fused 3x3 conv (pad=1, stride=1, no bias) + folded-BN + ReLU
#         (+ optional fused 2x2/stride-2 maxpool as a second output)
# ---------------------------------------------------------------------------
def conv3x3_bn_relu_kernel(x_ref, w_ref, scale_ref, shift_ref, *refs, pool):
  """Grid = (N, H // TH); each step computes a TH-row tile of one batch element.

    x_ref    : (1, H, W, Cin)          full NHWC image of one batch element
    w_ref    : (9, Cin, Cout)          conv weights, w[ky*3+kx] = HWIO[ky, kx]
    scale_ref: (1, Cout)               folded BN scale = gamma / sqrt(var + eps)
    shift_ref: (1, Cout)               folded BN shift = beta - mean * scale
    o_ref    : (1, TH, W, Cout)        full-resolution output tile
    p_ref    : (1, TH//2, W//2, Cout)  2x2-maxpooled output tile (only if pool=True)
    pad_ref  : (H+2, W+2, Cin)         VMEM scratch: zero-padded image (persists over t)
  """
  if pool:
    o_ref, p_ref, pad_ref = refs
  else:
    o_ref, pad_ref = refs
    p_ref = None

  H = x_ref.shape[1]
  TH = o_ref.shape[1]
  W = o_ref.shape[2]
  Cout = o_ref.shape[3]
  Cin = x_ref.shape[3]

  # Build the zero-padded image once per batch element (t == 0), not per H-tile.
  # Only the 1-pixel border is zeroed; the interior is overwritten by the image.
  # NOTE: the t axis is marked "arbitrary" so every core starts a new n at t == 0.
  @pl.when(pl.program_id(1) == 0)
  def _build_pad():
    zrow = jnp.zeros((1, W + 2, Cin), pad_ref.dtype)
    zcol = jnp.zeros((H + 2, 1, Cin), pad_ref.dtype)
    pad_ref[0:1, :, :] = zrow
    pad_ref[H + 1:H + 2, :, :] = zrow
    pad_ref[:, 0:1, :] = zcol
    pad_ref[:, W + 1:W + 2, :] = zcol
    pad_ref[1:H + 1, 1:W + 1, :] = x_ref[0]

  h0 = pl.multiple_of(pl.program_id(1) * TH, TH)

  # 9 shifted GEMMs accumulated in f32.  Avoids the lane-axis im2col concatenate,
  # which forces XLU relayouts and a (TH*W, 9*Cin) VMEM temp when Cin < 128.
  acc = jnp.zeros((TH * W, Cout), jnp.float32)
  for ky in range(3):
    for kx in range(3):
      blk = pad_ref[pl.ds(h0 + ky, TH), pl.ds(kx, W), :]          # (TH, W, Cin)
      acc = acc + jnp.dot(blk.reshape(TH * W, Cin), w_ref[ky * 3 + kx],
                          preferred_element_type=jnp.float32)

  y = acc * scale_ref[...] + shift_ref[...]       # folded BatchNorm
  y = jnp.maximum(y, 0.0)                         # ReLU
  y3 = y.reshape(TH, W, Cout)
  o_ref[0] = y3.astype(o_ref.dtype)

  if pool:
    HP, WP = TH // 2, W // 2
    r = y3.reshape(HP, 2, W, Cout)                       # leading-dim split only
    r = jnp.maximum(r[:, 0, :, :], r[:, 1, :, :])        # pool along H
    c = r.reshape(HP, WP, 2, Cout)
    pooled = jnp.maximum(c[:, :, 0, :], c[:, :, 1, :])   # pool along W
    p_ref[0] = pooled.astype(p_ref.dtype)


# ---------------------------------------------------------------------------
# Wrappers (glue)
# ---------------------------------------------------------------------------
def conv_bn_relu(x, w, scale, shift, *, pool=False, max_rows=32):
  """x: (N, H, W, Cin) NHWC -> (N, H, W, Cout) [and (N, H//2, W//2, Cout) if pool]."""
  N, H, W, Cin = x.shape
  Cout = w.shape[-1]
  if pool:
    assert H % 2 == 0 and W % 2 == 0, "2x2 maxpool requires even spatial dims"
  TH = _pick_tile(H, max_rows, even=pool)
  w9 = w.reshape(9, Cin, Cout)          # (ky, kx) row-major along the leading axis

  in_specs = [
      pl.BlockSpec((1, H, W, Cin), lambda n, t: (n, 0, 0, 0)),
      pl.BlockSpec((9, Cin, Cout), lambda n, t: (0, 0, 0)),
      pl.BlockSpec((1, Cout), lambda n, t: (0, 0)),
      pl.BlockSpec((1, Cout), lambda n, t: (0, 0)),
  ]
  out_shape = jax.ShapeDtypeStruct((N, H, W, Cout), x.dtype)
  out_spec = pl.BlockSpec((1, TH, W, Cout), lambda n, t: (n, t, 0, 0))
  if pool:
    out_shape = (out_shape,
                 jax.ShapeDtypeStruct((N, H // 2, W // 2, Cout), x.dtype))
    out_spec = (out_spec,
                pl.BlockSpec((1, TH // 2, W // 2, Cout), lambda n, t: (n, t, 0, 0)))

  # Rough VMEM budget: 2x input block + pad scratch + 2x output block(s) + weights
  # + working set.  Clamp to [32 MiB, 64 MiB] so it is valid on every generation.
  itemsize = jnp.dtype(x.dtype).itemsize
  est = itemsize * (2 * H * W * Cin + (H + 2) * (W + 2) * Cin
                    + 4 * TH * W * Cout * (2 if pool else 1)
                    + 9 * Cin * Cout + 4 * Cout
                    + 2 * TH * W * max(Cin, Cout))
  vmem_limit = int(min(max(2 * est, 32 * 1024 * 1024), 64 * 1024 * 1024))

  return pl.pallas_call(
      functools.partial(conv3x3_bn_relu_kernel, pool=pool),
      out_shape=out_shape,
      grid_spec=pltpu.PrefetchScalarGridSpec(
          num_scalar_prefetch=0,
          grid=(N, H // TH),
          in_specs=in_specs,
          out_specs=out_spec,
          scratch_shapes=[pltpu.VMEM((H + 2, W + 2, Cin), x.dtype)],
      ),
      compiler_params=pltpu.CompilerParams(
          # t axis must stay "arbitrary": the pad build is gated on t == 0.
          dimension_semantics=("parallel", "arbitrary"),
          vmem_limit_bytes=vmem_limit),
  )(x, w9, scale, shift)


def double_conv(x, p, *, pool_output=False):
  """DoubleConv; if pool_output, the second conv also emits the 2x2-pooled tensor."""
  x = conv_bn_relu(x, p["w1"], p["s1"], p["b1"])
  return conv_bn_relu(x, p["w2"], p["s2"], p["b2"], pool=pool_output)


def encoder_forward(params, x_nchw):
  """Mirrors Encoder.forward. Input/outputs in NCHW like PyTorch."""
  x = jnp.transpose(x_nchw, (0, 2, 3, 1))              # NCHW -> NHWC
  downs = params["downs"]
  n_downs = len(downs)
  intermediates = []

  if n_downs:
    skip, x = double_conv(x, params["in_layer"], pool_output=True)
    intermediates.append(jnp.transpose(skip, (0, 3, 1, 2)))    # NCHW, like PyTorch
  else:
    x = double_conv(x, params["in_layer"])

  for i, p in enumerate(downs):
    if i + 1 < n_downs:
      skip, x = double_conv(x, p, pool_output=True)
      intermediates.append(jnp.transpose(skip, (0, 3, 1, 2)))
    else:
      x = double_conv(x, p)

  return jnp.transpose(x, (0, 3, 1, 2)), intermediates


# ---------------------------------------------------------------------------
# Deterministic parameter initialization
# ---------------------------------------------------------------------------
def _fold_bn(gamma, beta, mean, var):
  scale = gamma / jnp.sqrt(var + BN_EPS)
  shift = beta - mean * scale
  return scale[None, :], shift[None, :]                # (1, C) each


def _init_conv(key, cin, cout):
  # PyTorch layout (Cout, Cin, 3, 3) -> HWIO (3, 3, Cin, Cout)
  w = jax.random.normal(key, (cout, cin, 3, 3), jnp.float32) / jnp.sqrt(9.0 * cin)
  return jnp.transpose(w, (2, 3, 1, 0))


def _init_bn(key, c):
  k1, k2, k3, k4 = jax.random.split(key, 4)
  gamma = 1.0 + 0.1 * jax.random.normal(k1, (c,), jnp.float32)
  beta = 0.1 * jax.random.normal(k2, (c,), jnp.float32)
  mean = 0.1 * jax.random.normal(k3, (c,), jnp.float32)
  var = 1.0 + 0.1 * jax.random.uniform(k4, (c,), jnp.float32)
  return _fold_bn(gamma, beta, mean, var)


def _init_double_conv(key, cin, cout, mid=None):
  mid = mid or cout
  k1, k2, k3, k4 = jax.random.split(key, 4)
  s1, b1 = _init_bn(k2, mid)
  s2, b2 = _init_bn(k4, cout)
  return dict(w1=_init_conv(k1, cin, mid), s1=s1, b1=b1,
              w2=_init_conv(k3, mid, cout), s2=s2, b2=b2)


def init_encoder(key, in_channels, hidden_channels, bilinear=False):
  factor = 2 if bilinear else 1
  keys = jax.random.split(key, len(hidden_channels))
  params = {"in_layer": _init_double_conv(keys[0], in_channels, hidden_channels[0]),
            "downs": []}
  for i in range(len(hidden_channels) - 2):
    params["downs"].append(
        _init_double_conv(keys[i + 1], hidden_channels[i], hidden_channels[i + 1]))
  params["downs"].append(
      _init_double_conv(keys[-1], hidden_channels[-2], hidden_channels[-1] // factor))
  return params


# ---------------------------------------------------------------------------
# Pure-JAX reference (for correctness check only)
# ---------------------------------------------------------------------------
def _ref_conv_bn_relu(x, w, scale, shift):
  y = lax.conv_general_dilated(x, w, (1, 1), "SAME",
                               dimension_numbers=("NHWC", "HWIO", "NHWC"),
                               precision=lax.Precision.HIGHEST)
  return jnp.maximum(y * scale[0] + shift[0], 0.0)


def _ref_maxpool(x):
  return lax.reduce_window(x, -jnp.inf, lax.max, (1, 2, 2, 1), (1, 2, 2, 1), "VALID")


def _ref_forward(params, x_nchw):
  x = jnp.transpose(x_nchw, (0, 2, 3, 1))
  p = params["in_layer"]
  x = _ref_conv_bn_relu(_ref_conv_bn_relu(x, p["w1"], p["s1"], p["b1"]),
                        p["w2"], p["s2"], p["b2"])
  inters = []
  for p in params["downs"]:
    inters.append(jnp.transpose(x, (0, 3, 1, 2)))
    x = _ref_maxpool(x)
    x = _ref_conv_bn_relu(_ref_conv_bn_relu(x, p["w1"], p["s1"], p["b1"]),
                          p["w2"], p["s2"], p["b2"])
  return jnp.transpose(x, (0, 3, 1, 2)), inters


# ---------------------------------------------------------------------------
if __name__ == "__main__":
  key = jax.random.PRNGKey(0)
  k_params, k_x = jax.random.split(key)

  in_channels = 4
  hidden_channels = [8, 16, 32]          # -> two Down blocks
  params = init_encoder(k_params, in_channels, hidden_channels, bilinear=False)

  x = jax.random.normal(k_x, (2, in_channels, 16, 16), jnp.float32)   # NCHW

  fwd = jax.jit(functools.partial(encoder_forward, params))
  out, inters = fwd(x)
  out = jax.block_until_ready(out)
  inters = [jax.block_until_ready(t) for t in inters]

  # sanity check against a pure-JAX reference
  ref_out, ref_inters = _ref_forward(params, x)
  # final channels = hidden_channels[-1] (= 32), spatial 16 -> 8 -> 4
  assert out.shape == ref_out.shape == (2, hidden_channels[-1], 4, 4), out.shape
  assert inters[0].shape == (2, 8, 16, 16) and inters[1].shape == (2, 16, 8, 8)
  assert jnp.allclose(out, ref_out, atol=2e-3, rtol=2e-3)
  for a, b in zip(inters, ref_inters):
    assert jnp.allclose(a, b, atol=2e-3, rtol=2e-3)

  print("KERNEL_OK")
</pallas_src>

<mosaic_0001>
module attributes {stable_mosaic.version = 11 : i64} {
  func.func @conv3x3_bn_relu_kernel(%arg0: i32, %arg1: i32, %arg2: memref<1x16x16x8xf32, #tpu.memory_space<vmem>>, %arg3: memref<9x8x8xf32, #tpu.memory_space<vmem>>, %arg4: memref<1x8xf32, #tpu.memory_space<vmem>>, %arg5: memref<1x8xf32, #tpu.memory_space<vmem>>, %arg6: memref<1x16x16x8xf32, #tpu.memory_space<vmem>>, %arg7: memref<1x8x8x8xf32, #tpu.memory_space<vmem>>, %arg8: memref<18x18x8xf32, #tpu.memory_space<vmem>>) attributes {dimension_semantics = [#tpu.dimension_semantics<parallel>, #tpu.dimension_semantics<arbitrary>], iteration_bounds = array<i64: 2, 1>, scalar_prefetch = 0 : i64, scratch_operands = 1 : i64, tpu.core_type = #tpu.core_type<tc>, window_params = [{transform_indices = @transform_0, window_bounds = array<i64: 1, 16, 16, 8>}, {pipeline_mode = #tpu.pipeline_mode<synchronous>, transform_indices = @transform_1, window_bounds = array<i64: 9, 8, 8>}, {pipeline_mode = #tpu.pipeline_mode<synchronous>, transform_indices = @transform_2, window_bounds = array<i64: 1, 8>}, {pipeline_mode = #tpu.pipeline_mode<synchronous>, transform_indices = @transform_3, window_bounds = array<i64: 1, 8>}, {transform_indices = @transform_4, window_bounds = array<i64: 1, 16, 16, 8>}, {transform_indices = @transform_5, window_bounds = array<i64: 1, 8, 8, 8>}]} {
    %c0_i32 = arith.constant 0 : i32
    %0 = arith.cmpi eq, %arg1, %c0_i32 : i32
    %1 = arith.extui %0 : i1 to i32
    %c0_i32_0 = arith.constant 0 : i32
    %2 = arith.cmpi ne, %1, %c0_i32_0 : i32
    scf.if %2 {
      %cst_66 = arith.constant 0.000000e+00 : f32
      %105 = vector.broadcast %cst_66 : f32 to vector<1x18x8xf32>
      %cst_67 = arith.constant 0.000000e+00 : f32
      %106 = vector.broadcast %cst_67 : f32 to vector<18x1x8xf32>
      %c0_68 = arith.constant 0 : index
      %c0_69 = arith.constant 0 : index
      %c0_70 = arith.constant 0 : index
      %107 = vector.load %arg8[%c0_68, %c0_69, %c0_70] : memref<18x18x8xf32, #tpu.memory_space<vmem>>, vector<1x18x8xf32>
      tpu.vector_store %arg8[%c0_68, %c0_69, %c0_70], %105 {strides = array<i32>} : memref<18x18x8xf32, #tpu.memory_space<vmem>>, vector<1x18x8xf32>,
      %c17 = arith.constant 17 : index
      %c0_71 = arith.constant 0 : index
      %c0_72 = arith.constant 0 : index
      %108 = vector.load %arg8[%c17, %c0_71, %c0_72] : memref<18x18x8xf32, #tpu.memory_space<vmem>>, vector<1x18x8xf32>
      tpu.vector_store %arg8[%c17, %c0_71, %c0_72], %105 {strides = array<i32>} : memref<18x18x8xf32, #tpu.memory_space<vmem>>, vector<1x18x8xf32>,
      %c0_73 = arith.constant 0 : index
      %c0_74 = arith.constant 0 : index
      %c0_75 = arith.constant 0 : index
      %109 = vector.load %arg8[%c0_73, %c0_74, %c0_75] : memref<18x18x8xf32, #tpu.memory_space<vmem>>, vector<18x1x8xf32>
      tpu.vector_store %arg8[%c0_73, %c0_74, %c0_75], %106 {strides = array<i32>} : memref<18x18x8xf32, #tpu.memory_space<vmem>>, vector<18x1x8xf32>,
      %c0_76 = arith.constant 0 : index
      %c17_77 = arith.constant 17 : index
      %c0_78 = arith.constant 0 : index
      %110 = vector.load %arg8[%c0_76, %c17_77, %c0_78] : memref<18x18x8xf32, #tpu.memory_space<vmem>>, vector<18x1x8xf32>
      tpu.vector_store %arg8[%c0_76, %c17_77, %c0_78], %106 {strides = array<i32>} : memref<18x18x8xf32, #tpu.memory_space<vmem>>, vector<18x1x8xf32>,
      %c0_79 = arith.constant 0 : index
      %c0_80 = arith.constant 0 : index
      %c0_81 = arith.constant 0 : index
      %c0_82 = arith.constant 0 : index
      %111 = vector.load %arg2[%c0_79, %c0_80, %c0_81, %c0_82] : memref<1x16x16x8xf32, #tpu.memory_space<vmem>>, vector<1x16x16x8xf32>
      %112 = vector.shape_cast %111 : vector<1x16x16x8xf32> to vector<16x16x8xf32>
      %c1_83 = arith.constant 1 : index
      %c1_84 = arith.constant 1 : index
      %c0_85 = arith.constant 0 : index
      %113 = vector.load %arg8[%c1_83, %c1_84, %c0_85] : memref<18x18x8xf32, #tpu.memory_space<vmem>>, vector<16x16x8xf32>
      tpu.vector_store %arg8[%c1_83, %c1_84, %c0_85], %112 {strides = array<i32>} : memref<18x18x8xf32, #tpu.memory_space<vmem>>, vector<16x16x8xf32>,
    } else {
    }
    %c16_i32 = arith.constant 16 : i32
    %3 = arith.muli %arg1, %c16_i32 : i32
    %4 = tpu.assume_multiple %3, 16 : i32
    %cst = arith.constant 0.000000e+00 : f32
    %5 = vector.broadcast %cst : f32 to vector<256x8xf32>
    %c0_i32_1 = arith.constant 0 : i32
    %6 = arith.addi %4, %c0_i32_1 : i32
    %7 = arith.index_cast %6 : i32 to index
    %c0 = arith.constant 0 : index
    %c0_2 = arith.constant 0 : index
    %8 = vector.load %arg8[%7, %c0, %c0_2] : memref<18x18x8xf32, #tpu.memory_space<vmem>>, vector<16x16x8xf32>
    %9 = vector.shape_cast %8 : vector<16x16x8xf32> to vector<256x8xf32>
    %c0_3 = arith.constant 0 : index
    %c0_4 = arith.constant 0 : index
    %c0_5 = arith.constant 0 : index
    %10 = vector.load %arg3[%c0_3, %c0_4, %c0_5] : memref<9x8x8xf32, #tpu.memory_space<vmem>>, vector<1x8x8xf32>
    %11 = vector.shape_cast %10 : vector<1x8x8xf32> to vector<8x8xf32>
    %cst_6 = arith.constant dense<0.000000e+00> : vector<256x8xf32>
    %12 = tpu.matmul %9, %11, %cst_6 {dimension_numbers = #tpu.dot_dimension_numbers<[1], [0], [0], [1], [0, 0, 1, 1], [], []>} : vector<256x8xf32>, vector<8x8xf32>, vector<256x8xf32> -> vector<256x8xf32>
    %13 = arith.addf %5, %12 : vector<256x8xf32>
    %c0_i32_7 = arith.constant 0 : i32
    %14 = arith.addi %4, %c0_i32_7 : i32
    %15 = arith.index_cast %14 : i32 to index
    %c1 = arith.constant 1 : index
    %c0_8 = arith.constant 0 : index
    %16 = vector.load %arg8[%15, %c1, %c0_8] : memref<18x18x8xf32, #tpu.memory_space<vmem>>, vector<16x16x8xf32>
    %17 = vector.shape_cast %16 : vector<16x16x8xf32> to vector<256x8xf32>
    %c1_9 = arith.constant 1 : index
    %c0_10 = arith.constant 0 : index
    %c0_11 = arith.constant 0 : index
    %18 = vector.load %arg3[%c1_9, %c0_10, %c0_11] : memref<9x8x8xf32, #tpu.memory_space<vmem>>, vector<1x8x8xf32>
    %19 = vector.shape_cast %18 : vector<1x8x8xf32> to vector<8x8xf32>
    %cst_12 = arith.constant dense<0.000000e+00> : vector<256x8xf32>
    %20 = tpu.matmul %17, %19, %cst_12 {dimension_numbers = #tpu.dot_dimension_numbers<[1], [0], [0], [1], [0, 0, 1, 1], [], []>} : vector<256x8xf32>, vector<8x8xf32>, vector<256x8xf32> -> vector<256x8xf32>
    %21 = arith.addf %13, %20 : vector<256x8xf32>
    %c0_i32_13 = arith.constant 0 : i32
    %22 = arith.addi %4, %c0_i32_13 : i32
    %23 = arith.index_cast %22 : i32 to index
    %c2 = arith.constant 2 : index
    %c0_14 = arith.constant 0 : index
    %24 = vector.load %arg8[%23, %c2, %c0_14] : memref<18x18x8xf32, #tpu.memory_space<vmem>>, vector<16x16x8xf32>
    %25 = vector.shape_cast %24 : vector<16x16x8xf32> to vector<256x8xf32>
    %c2_15 = arith.constant 2 : index
    %c0_16 = arith.constant 0 : index
    %c0_17 = arith.constant 0 : index
    %26 = vector.load %arg3[%c2_15, %c0_16, %c0_17] : memref<9x8x8xf32, #tpu.memory_space<vmem>>, vector<1x8x8xf32>
    %27 = vector.shape_cast %26 : vector<1x8x8xf32> to vector<8x8xf32>
    %cst_18 = arith.constant dense<0.000000e+00> : vector<256x8xf32>
    %28 = tpu.matmul %25, %27, %cst_18 {dimension_numbers = #tpu.dot_dimension_numbers<[1], [0], [0], [1], [0, 0, 1, 1], [], []>} : vector<256x8xf32>, vector<8x8xf32>, vector<256x8xf32> -> vector<256x8xf32>
    %29 = arith.addf %21, %28 : vector<256x8xf32>
    %c1_i32 = arith.constant 1 : i32
    %30 = arith.addi %4, %c1_i32 : i32
    %31 = arith.index_cast %30 : i32 to index
    %c0_19 = arith.constant 0 : index
    %c0_20 = arith.constant 0 : index
    %32 = vector.load %arg8[%31, %c0_19, %c0_20] : memref<18x18x8xf32, #tpu.memory_space<vmem>>, vector<16x16x8xf32>
    %33 = vector.shape_cast %32 : vector<16x16x8xf32> to vector<256x8xf32>
    %c3 = arith.constant 3 : index
    %c0_21 = arith.constant 0 : index
    %c0_22 = arith.constant 0 : index
    %34 = vector.load %arg3[%c3, %c0_21, %c0_22] : memref<9x8x8xf32, #tpu.memory_space<vmem>>, vector<1x8x8xf32>
    %35 = vector.shape_cast %34 : vector<1x8x8xf32> to vector<8x8xf32>
    %cst_23 = arith.constant dense<0.000000e+00> : vector<256x8xf32>
    %36 = tpu.matmul %33, %35, %cst_23 {dimension_numbers = #tpu.dot_dimension_numbers<[1], [0], [0], [1], [0, 0, 1, 1], [], []>} : vector<256x8xf32>, vector<8x8xf32>, vector<256x8xf32> -> vector<256x8xf32>
    %37 = arith.addf %29, %36 : vector<256x8xf32>
    %c1_i32_24 = arith.constant 1 : i32
    %38 = arith.addi %4, %c1_i32_24 : i32
    %39 = arith.index_cast %38 : i32 to index
    %c1_25 = arith.constant 1 : index
    %c0_26 = arith.constant 0 : index
    %40 = vector.load %arg8[%39, %c1_25, %c0_26] : memref<18x18x8xf32, #tpu.memory_space<vmem>>, vector<16x16x8xf32>
    %41 = vector.shape_cast %40 : vector<16x16x8xf32> to vector<256x8xf32>
    %c4 = arith.constant 4 : index
    %c0_27 = arith.constant 0 : index
    %c0_28 = arith.constant 0 : index
    %42 = vector.load %arg3[%c4, %c0_27, %c0_28] : memref<9x8x8xf32, #tpu.memory_space<vmem>>, vector<1x8x8xf32>
    %43 = vector.shape_cast %42 : vector<1x8x8xf32> to vector<8x8xf32>
    %cst_29 = arith.constant dense<0.000000e+00> : vector<256x8xf32>
    %44 = tpu.matmul %41, %43, %cst_29 {dimension_numbers = #tpu.dot_dimension_numbers<[1], [0], [0], [1], [0, 0, 1, 1], [], []>} : vector<256x8xf32>, vector<8x8xf32>, vector<256x8xf32> -> vector<256x8xf32>
    %45 = arith.addf %37, %44 : vector<256x8xf32>
    %c1_i32_30 = arith.constant 1 : i32
    %46 = arith.addi %4, %c1_i32_30 : i32
    %47 = arith.index_cast %46 : i32 to index
    %c2_31 = arith.constant 2 : index
    %c0_32 = arith.constant 0 : index
    %48 = vector.load %arg8[%47, %c2_31, %c0_32] : memref<18x18x8xf32, #tpu.memory_space<vmem>>, vector<16x16x8xf32>
    %49 = vector.shape_cast %48 : vector<16x16x8xf32> to vector<256x8xf32>
    %c5 = arith.constant 5 : index
    %c0_33 = arith.constant 0 : index
    %c0_34 = arith.constant 0 : index
    %50 = vector.load %arg3[%c5, %c0_33, %c0_34] : memref<9x8x8xf32, #tpu.memory_space<vmem>>, vector<1x8x8xf32>
    %51 = vector.shape_cast %50 : vector<1x8x8xf32> to vector<8x8xf32>
    %cst_35 = arith.constant dense<0.000000e+00> : vector<256x8xf32>
    %52 = tpu.matmul %49, %51, %cst_35 {dimension_numbers = #tpu.dot_dimension_numbers<[1], [0], [0], [1], [0, 0, 1, 1], [], []>} : vector<256x8xf32>, vector<8x8xf32>, vector<256x8xf32> -> vector<256x8xf32>
    %53 = arith.addf %45, %52 : vector<256x8xf32>
    %c2_i32 = arith.constant 2 : i32
    %54 = arith.addi %4, %c2_i32 : i32
    %55 = arith.index_cast %54 : i32 to index
    %c0_36 = arith.constant 0 : index
    %c0_37 = arith.constant 0 : index
    %56 = vector.load %arg8[%55, %c0_36, %c0_37] : memref<18x18x8xf32, #tpu.memory_space<vmem>>, vector<16x16x8xf32>
    %57 = vector.shape_cast %56 : vector<16x16x8xf32> to vector<256x8xf32>
    %c6 = arith.constant 6 : index
    %c0_38 = arith.constant 0 : index
    %c0_39 = arith.constant 0 : index
    %58 = vector.load %arg3[%c6, %c0_38, %c0_39] : memref<9x8x8xf32, #tpu.memory_space<vmem>>, vector<1x8x8xf32>
    %59 = vector.shape_cast %58 : vector<1x8x8xf32> to vector<8x8xf32>
    %cst_40 = arith.constant dense<0.000000e+00> : vector<256x8xf32>
    %60 = tpu.matmul %57, %59, %cst_40 {dimension_numbers = #tpu.dot_dimension_numbers<[1], [0], [0], [1], [0, 0, 1, 1], [], []>} : vector<256x8xf32>, vector<8x8xf32>, vector<256x8xf32> -> vector<256x8xf32>
    %61 = arith.addf %53, %60 : vector<256x8xf32>
    %c2_i32_41 = arith.constant 2 : i32
    %62 = arith.addi %4, %c2_i32_41 : i32
    %63 = arith.index_cast %62 : i32 to index
    %c1_42 = arith.constant 1 : index
    %c0_43 = arith.constant 0 : index
    %64 = vector.load %arg8[%63, %c1_42, %c0_43] : memref<18x18x8xf32, #tpu.memory_space<vmem>>, vector<16x16x8xf32>
    %65 = vector.shape_cast %64 : vector<16x16x8xf32> to vector<256x8xf32>
    %c7 = arith.constant 7 : index
    %c0_44 = arith.constant 0 : index
    %c0_45 = arith.constant 0 : index
    %66 = vector.load %arg3[%c7, %c0_44, %c0_45] : memref<9x8x8xf32, #tpu.memory_space<vmem>>, vector<1x8x8xf32>
    %67 = vector.shape_cast %66 : vector<1x8x8xf32> to vector<8x8xf32>
    %cst_46 = arith.constant dense<0.000000e+00> : vector<256x8xf32>
    %68 = tpu.matmul %65, %67, %cst_46 {dimension_numbers = #tpu.dot_dimension_numbers<[1], [0], [0], [1], [0, 0, 1, 1], [], []>} : vector<256x8xf32>, vector<8x8xf32>, vector<256x8xf32> -> vector<256x8xf32>
    %69 = arith.addf %61, %68 : vector<256x8xf32>
    %c2_i32_47 = arith.constant 2 : i32
    %70 = arith.addi %4, %c2_i32_47 : i32
    %71 = arith.index_cast %70 : i32 to index
    %c2_48 = arith.constant 2 : index
    %c0_49 = arith.constant 0 : index
    %72 = vector.load %arg8[%71, %c2_48, %c0_49] : memref<18x18x8xf32, #tpu.memory_space<vmem>>, vector<16x16x8xf32>
    %73 = vector.shape_cast %72 : vector<16x16x8xf32> to vector<256x8xf32>
    %c8 = arith.constant 8 : index
    %c0_50 = arith.constant 0 : index
    %c0_51 = arith.constant 0 : index
    %74 = vector.load %arg3[%c8, %c0_50, %c0_51] : memref<9x8x8xf32, #tpu.memory_space<vmem>>, vector<1x8x8xf32>
    %75 = vector.shape_cast %74 : vector<1x8x8xf32> to vector<8x8xf32>
    %cst_52 = arith.constant dense<0.000000e+00> : vector<256x8xf32>
    %76 = tpu.matmul %73, %75, %cst_52 {dimension_numbers = #tpu.dot_dimension_numbers<[1], [0], [0], [1], [0, 0, 1, 1], [], []>} : vector<256x8xf32>, vector<8x8xf32>, vector<256x8xf32> -> vector<256x8xf32>
    %77 = arith.addf %69, %76 : vector<256x8xf32>
    %c0_53 = arith.constant 0 : index
    %c0_54 = arith.constant 0 : index
    %78 = vector.load %arg4[%c0_53, %c0_54] : memref<1x8xf32, #tpu.memory_space<vmem>>, vector<1x8xf32>
    %79 = vector.broadcast %78 : vector<1x8xf32> to vector<256x8xf32>
    %80 = arith.mulf %77, %79 : vector<256x8xf32>
    %c0_55 = arith.constant 0 : index
    %c0_56 = arith.constant 0 : index
    %81 = vector.load %arg5[%c0_55, %c0_56] : memref<1x8xf32, #tpu.memory_space<vmem>>, vector<1x8xf32>
    %82 = vector.broadcast %81 : vector<1x8xf32> to vector<256x8xf32>
    %83 = arith.addf %80, %82 : vector<256x8xf32>
    %cst_57 = arith.constant 0.000000e+00 : f32
    %84 = vector.broadcast %cst_57 : f32 to vector<256x8xf32>
    %85 = arith.maximumf %83, %84 : vector<256x8xf32>
    %86 = vector.shape_cast %85 : vector<256x8xf32> to vector<16x16x8xf32>
    %c0_58 = arith.constant 0 : index
    %c0_59 = arith.constant 0 : index
    %c0_60 = arith.constant 0 : index
    %c0_61 = arith.constant 0 : index
    %87 = vector.load %arg6[%c0_58, %c0_59, %c0_60, %c0_61] : memref<1x16x16x8xf32, #tpu.memory_space<vmem>>, vector<1x16x16x8xf32>
    %88 = vector.shape_cast %87 : vector<1x16x16x8xf32> to vector<16x16x8xf32>
    %89 = vector.shape_cast %86 : vector<16x16x8xf32> to vector<1x16x16x8xf32>
    tpu.vector_store %arg6[%c0_58, %c0_59, %c0_60, %c0_61], %89 {strides = array<i32>} : memref<1x16x16x8xf32, #tpu.memory_space<vmem>>, vector<1x16x16x8xf32>,
    %90 = vector.shape_cast %86 : vector<16x16x8xf32> to vector<8x2x16x8xf32>
    %91 = vector.extract_strided_slice %90 {offsets = [0, 0, 0, 0], sizes = [8, 1, 16, 8], strides = [1, 1, 1, 1]} : vector<8x2x16x8xf32> to vector<8x1x16x8xf32>
    %92 = vector.shape_cast %91 : vector<8x1x16x8xf32> to vector<8x16x8xf32>
    %93 = vector.extract_strided_slice %90 {offsets = [0, 1, 0, 0], sizes = [8, 1, 16, 8], strides = [1, 1, 1, 1]} : vector<8x2x16x8xf32> to vector<8x1x16x8xf32>
    %94 = vector.shape_cast %93 : vector<8x1x16x8xf32> to vector<8x16x8xf32>
    %95 = arith.maximumf %92, %94 : vector<8x16x8xf32>
    %96 = vector.shape_cast %95 : vector<8x16x8xf32> to vector<8x8x2x8xf32>
    %97 = vector.extract_strided_slice %96 {offsets = [0, 0, 0, 0], sizes = [8, 8, 1, 8], strides = [1, 1, 1, 1]} : vector<8x8x2x8xf32> to vector<8x8x1x8xf32>
    %98 = vector.shape_cast %97 : vector<8x8x1x8xf32> to vector<8x8x8xf32>
    %99 = vector.extract_strided_slice %96 {offsets = [0, 0, 1, 0], sizes = [8, 8, 1, 8], strides = [1, 1, 1, 1]} : vector<8x8x2x8xf32> to vector<8x8x1x8xf32>
    %100 = vector.shape_cast %99 : vector<8x8x1x8xf32> to vector<8x8x8xf32>
    %101 = arith.maximumf %98, %100 : vector<8x8x8xf32>
    %c0_62 = arith.constant 0 : index
    %c0_63 = arith.constant 0 : index
    %c0_64 = arith.constant 0 : index
    %c0_65 = arith.constant 0 : index
    %102 = vector.load %arg7[%c0_62, %c0_63, %c0_64, %c0_65] : memref<1x8x8x8xf32, #tpu.memory_space<vmem>>, vector<1x8x8x8xf32>
    %103 = vector.shape_cast %102 : vector<1x8x8x8xf32> to vector<8x8x8xf32>
    %104 = vector.shape_cast %101 : vector<8x8x8xf32> to vector<1x8x8x8xf32>
    tpu.vector_store %arg7[%c0_62, %c0_63, %c0_64, %c0_65], %104 {strides = array<i32>} : memref<1x8x8x8xf32, #tpu.memory_space<vmem>>, vector<1x8x8x8xf32>,
    return
  }
  func.func @transform_0(%arg0: i32, %arg1: i32) -> (i32, i32, i32, i32) {
    %c0_i32 = arith.constant 0 : i32
    %c0_i32_0 = arith.constant 0 : i32
    %c0_i32_1 = arith.constant 0 : i32
    %c0_i32_2 = arith.constant 0 : i32
    return %arg0, %c0_i32, %c0_i32_0, %c0_i32_1 : i32, i32, i32, i32
  }
  func.func @transform_1(%arg0: i32, %arg1: i32) -> (i32, i32, i32) {
    %c0_i32 = arith.constant 0 : i32
    %c0_i32_0 = arith.constant 0 : i32
    %c0_i32_1 = arith.constant 0 : i32
    %c0_i32_2 = arith.constant 0 : i32
    return %c0_i32, %c0_i32_0, %c0_i32_1 : i32, i32, i32
  }
  func.func @transform_2(%arg0: i32, %arg1: i32) -> (i32, i32) {
    %c0_i32 = arith.constant 0 : i32
    %c0_i32_0 = arith.constant 0 : i32
    %c0_i32_1 = arith.constant 0 : i32
    return %c0_i32, %c0_i32_0 : i32, i32
  }
  func.func @transform_3(%arg0: i32, %arg1: i32) -> (i32, i32) {
    %c0_i32 = arith.constant 0 : i32
    %c0_i32_0 = arith.constant 0 : i32
    %c0_i32_1 = arith.constant 0 : i32
    return %c0_i32, %c0_i32_0 : i32, i32
  }
  func.func @transform_4(%arg0: i32, %arg1: i32) -> (i32, i32, i32, i32) {
    %c0_i32 = arith.constant 0 : i32
    %c0_i32_0 = arith.constant 0 : i32
    %c0_i32_1 = arith.constant 0 : i32
    return %arg0, %arg1, %c0_i32, %c0_i32_0 : i32, i32, i32, i32
  }
  func.func @transform_5(%arg0: i32, %arg1: i32) -> (i32, i32, i32, i32) {
    %c0_i32 = arith.constant 0 : i32
    %c0_i32_0 = arith.constant 0 : i32
    %c0_i32_1 = arith.constant 0 : i32
    return %arg0, %arg1, %c0_i32, %c0_i32_0 : i32, i32, i32, i32
  }
}

module attributes {stable_mosaic.version = 11 : i64} {
  func.func @conv3x3_bn_relu_kernel(%arg0: i32, %arg1: i32, %arg2: memref<1x8x8x8xf32, #tpu.memory_space<vmem>>, %arg3: memref<9x8x16xf32, #tpu.memory_space<vmem>>, %arg4: memref<1x16xf32, #tpu.memory_space<vmem>>, %arg5: memref<1x16xf32, #tpu.memory_space<vmem>>, %arg6: memref<1x8x8x16xf32, #tpu.memory_space<vmem>>, %arg7: memref<10x10x8xf32, #tpu.memory_space<vmem>>) attributes {dimension_semantics = [#tpu.dimension_semantics<parallel>, #tpu.dimension_semantics<arbitrary>], iteration_bounds = array<i64: 2, 1>, scalar_prefetch = 0 : i64, scratch_operands = 1 : i64, tpu.core_type = #tpu.core_type<tc>, window_params = [{transform_indices = @transform_0, window_bounds = array<i64: 1, 8, 8, 8>}, {pipeline_mode = #tpu.pipeline_mode<synchronous>, transform_indices = @transform_1, window_bounds = array<i64: 9, 8, 16>}, {pipeline_mode = #tpu.pipeline_mode<synchronous>, transform_indices = @transform_2, window_bounds = array<i64: 1, 16>}, {pipeline_mode = #tpu.pipeline_mode<synchronous>, transform_indices = @transform_3, window_bounds = array<i64: 1, 16>}, {transform_indices = @transform_4, window_bounds = array<i64: 1, 8, 8, 16>}]} {
    %c0_i32 = arith.constant 0 : i32
    %0 = arith.cmpi eq, %arg1, %c0_i32 : i32
    %1 = arith.extui %0 : i1 to i32
    %c0_i32_0 = arith.constant 0 : i32
    %2 = arith.cmpi ne, %1, %c0_i32_0 : i32
    scf.if %2 {
      %cst_62 = arith.constant 0.000000e+00 : f32
      %90 = vector.broadcast %cst_62 : f32 to vector<1x10x8xf32>
      %cst_63 = arith.constant 0.000000e+00 : f32
      %91 = vector.broadcast %cst_63 : f32 to vector<10x1x8xf32>
      %c0_64 = arith.constant 0 : index
      %c0_65 = arith.constant 0 : index
      %c0_66 = arith.constant 0 : index
      %92 = vector.load %arg7[%c0_64, %c0_65, %c0_66] : memref<10x10x8xf32, #tpu.memory_space<vmem>>, vector<1x10x8xf32>
      tpu.vector_store %arg7[%c0_64, %c0_65, %c0_66], %90 {strides = array<i32>} : memref<10x10x8xf32, #tpu.memory_space<vmem>>, vector<1x10x8xf32>,
      %c9 = arith.constant 9 : index
      %c0_67 = arith.constant 0 : index
      %c0_68 = arith.constant 0 : index
      %93 = vector.load %arg7[%c9, %c0_67, %c0_68] : memref<10x10x8xf32, #tpu.memory_space<vmem>>, vector<1x10x8xf32>
      tpu.vector_store %arg7[%c9, %c0_67, %c0_68], %90 {strides = array<i32>} : memref<10x10x8xf32, #tpu.memory_space<vmem>>, vector<1x10x8xf32>,
      %c0_69 = arith.constant 0 : index
      %c0_70 = arith.constant 0 : index
      %c0_71 = arith.constant 0 : index
      %94 = vector.load %arg7[%c0_69, %c0_70, %c0_71] : memref<10x10x8xf32, #tpu.memory_space<vmem>>, vector<10x1x8xf32>
      tpu.vector_store %arg7[%c0_69, %c0_70, %c0_71], %91 {strides = array<i32>} : memref<10x10x8xf32, #tpu.memory_space<vmem>>, vector<10x1x8xf32>,
      %c0_72 = arith.constant 0 : index
      %c9_73 = arith.constant 9 : index
      %c0_74 = arith.constant 0 : index
      %95 = vector.load %arg7[%c0_72, %c9_73, %c0_74] : memref<10x10x8xf32, #tpu.memory_space<vmem>>, vector<10x1x8xf32>
      tpu.vector_store %arg7[%c0_72, %c9_73, %c0_74], %91 {strides = array<i32>} : memref<10x10x8xf32, #tpu.memory_space<vmem>>, vector<10x1x8xf32>,
      %c0_75 = arith.constant 0 : index
      %c0_76 = arith.constant 0 : index
      %c0_77 = arith.constant 0 : index
      %c0_78 = arith.constant 0 : index
      %96 = vector.load %arg2[%c0_75, %c0_76, %c0_77, %c0_78] : memref<1x8x8x8xf32, #tpu.memory_space<vmem>>, vector<1x8x8x8xf32>
      %97 = vector.shape_cast %96 : vector<1x8x8x8xf32> to vector<8x8x8xf32>
      %c1_79 = arith.constant 1 : index
      %c1_80 = arith.constant 1 : index
      %c0_81 = arith.constant 0 : index
      %98 = vector.load %arg7[%c1_79, %c1_80, %c0_81] : memref<10x10x8xf32, #tpu.memory_space<vmem>>, vector<8x8x8xf32>
      tpu.vector_store %arg7[%c1_79, %c1_80, %c0_81], %97 {strides = array<i32>} : memref<10x10x8xf32, #tpu.memory_space<vmem>>, vector<8x8x8xf32>,
    } else {
    }
    %c8_i32 = arith.constant 8 : i32
    %3 = arith.muli %arg1, %c8_i32 : i32
    %4 = tpu.assume_multiple %3, 8 : i32
    %cst = arith.constant 0.000000e+00 : f32
    %5 = vector.broadcast %cst : f32 to vector<64x16xf32>
    %c0_i32_1 = arith.constant 0 : i32
    %6 = arith.addi %4, %c0_i32_1 : i32
    %7 = arith.index_cast %6 : i32 to index
    %c0 = arith.constant 0 : index
    %c0_2 = arith.constant 0 : index
    %8 = vector.load %arg7[%7, %c0, %c0_2] : memref<10x10x8xf32, #tpu.memory_space<vmem>>, vector<8x8x8xf32>
    %9 = vector.shape_cast %8 : vector<8x8x8xf32> to vector<64x8xf32>
    %c0_3 = arith.constant 0 : index
    %c0_4 = arith.constant 0 : index
    %c0_5 = arith.constant 0 : index
    %10 = vector.load %arg3[%c0_3, %c0_4, %c0_5] : memref<9x8x16xf32, #tpu.memory_space<vmem>>, vector<1x8x16xf32>
    %11 = vector.shape_cast %10 : vector<1x8x16xf32> to vector<8x16xf32>
    %cst_6 = arith.constant dense<0.000000e+00> : vector<64x16xf32>
    %12 = tpu.matmul %9, %11, %cst_6 {dimension_numbers = #tpu.dot_dimension_numbers<[1], [0], [0], [1], [0, 0, 1, 1], [], []>} : vector<64x8xf32>, vector<8x16xf32>, vector<64x16xf32> -> vector<64x16xf32>
    %13 = arith.addf %5, %12 : vector<64x16xf32>
    %c0_i32_7 = arith.constant 0 : i32
    %14 = arith.addi %4, %c0_i32_7 : i32
    %15 = arith.index_cast %14 : i32 to index
    %c1 = arith.constant 1 : index
    %c0_8 = arith.constant 0 : index
    %16 = vector.load %arg7[%15, %c1, %c0_8] : memref<10x10x8xf32, #tpu.memory_space<vmem>>, vector<8x8x8xf32>
    %17 = vector.shape_cast %16 : vector<8x8x8xf32> to vector<64x8xf32>
    %c1_9 = arith.constant 1 : index
    %c0_10 = arith.constant 0 : index
    %c0_11 = arith.constant 0 : index
    %18 = vector.load %arg3[%c1_9, %c0_10, %c0_11] : memref<9x8x16xf32, #tpu.memory_space<vmem>>, vector<1x8x16xf32>
    %19 = vector.shape_cast %18 : vector<1x8x16xf32> to vector<8x16xf32>
    %cst_12 = arith.constant dense<0.000000e+00> : vector<64x16xf32>
    %20 = tpu.matmul %17, %19, %cst_12 {dimension_numbers = #tpu.dot_dimension_numbers<[1], [0], [0], [1], [0, 0, 1, 1], [], []>} : vector<64x8xf32>, vector<8x16xf32>, vector<64x16xf32> -> vector<64x16xf32>
    %21 = arith.addf %13, %20 : vector<64x16xf32>
    %c0_i32_13 = arith.constant 0 : i32
    %22 = arith.addi %4, %c0_i32_13 : i32
    %23 = arith.index_cast %22 : i32 to index
    %c2 = arith.constant 2 : index
    %c0_14 = arith.constant 0 : index
    %24 = vector.load %arg7[%23, %c2, %c0_14] : memref<10x10x8xf32, #tpu.memory_space<vmem>>, vector<8x8x8xf32>
    %25 = vector.shape_cast %24 : vector<8x8x8xf32> to vector<64x8xf32>
    %c2_15 = arith.constant 2 : index
    %c0_16 = arith.constant 0 : index
    %c0_17 = arith.constant 0 : index
    %26 = vector.load %arg3[%c2_15, %c0_16, %c0_17] : memref<9x8x16xf32, #tpu.memory_space<vmem>>, vector<1x8x16xf32>
    %27 = vector.shape_cast %26 : vector<1x8x16xf32> to vector<8x16xf32>
    %cst_18 = arith.constant dense<0.000000e+00> : vector<64x16xf32>
    %28 = tpu.matmul %25, %27, %cst_18 {dimension_numbers = #tpu.dot_dimension_numbers<[1], [0], [0], [1], [0, 0, 1, 1], [], []>} : vector<64x8xf32>, vector<8x16xf32>, vector<64x16xf32> -> vector<64x16xf32>
    %29 = arith.addf %21, %28 : vector<64x16xf32>
    %c1_i32 = arith.constant 1 : i32
    %30 = arith.addi %4, %c1_i32 : i32
    %31 = arith.index_cast %30 : i32 to index
    %c0_19 = arith.constant 0 : index
    %c0_20 = arith.constant 0 : index
    %32 = vector.load %arg7[%31, %c0_19, %c0_20] : memref<10x10x8xf32, #tpu.memory_space<vmem>>, vector<8x8x8xf32>
    %33 = vector.shape_cast %32 : vector<8x8x8xf32> to vector<64x8xf32>
    %c3 = arith.constant 3 : index
    %c0_21 = arith.constant 0 : index
    %c0_22 = arith.constant 0 : index
    %34 = vector.load %arg3[%c3, %c0_21, %c0_22] : memref<9x8x16xf32, #tpu.memory_space<vmem>>, vector<1x8x16xf32>
    %35 = vector.shape_cast %34 : vector<1x8x16xf32> to vector<8x16xf32>
    %cst_23 = arith.constant dense<0.000000e+00> : vector<64x16xf32>
    %36 = tpu.matmul %33, %35, %cst_23 {dimension_numbers = #tpu.dot_dimension_numbers<[1], [0], [0], [1], [0, 0, 1, 1], [], []>} : vector<64x8xf32>, vector<8x16xf32>, vector<64x16xf32> -> vector<64x16xf32>
    %37 = arith.addf %29, %36 : vector<64x16xf32>
    %c1_i32_24 = arith.constant 1 : i32
    %38 = arith.addi %4, %c1_i32_24 : i32
    %39 = arith.index_cast %38 : i32 to index
    %c1_25 = arith.constant 1 : index
    %c0_26 = arith.constant 0 : index
    %40 = vector.load %arg7[%39, %c1_25, %c0_26] : memref<10x10x8xf32, #tpu.memory_space<vmem>>, vector<8x8x8xf32>
    %41 = vector.shape_cast %40 : vector<8x8x8xf32> to vector<64x8xf32>
    %c4 = arith.constant 4 : index
    %c0_27 = arith.constant 0 : index
    %c0_28 = arith.constant 0 : index
    %42 = vector.load %arg3[%c4, %c0_27, %c0_28] : memref<9x8x16xf32, #tpu.memory_space<vmem>>, vector<1x8x16xf32>
    %43 = vector.shape_cast %42 : vector<1x8x16xf32> to vector<8x16xf32>
    %cst_29 = arith.constant dense<0.000000e+00> : vector<64x16xf32>
    %44 = tpu.matmul %41, %43, %cst_29 {dimension_numbers = #tpu.dot_dimension_numbers<[1], [0], [0], [1], [0, 0, 1, 1], [], []>} : vector<64x8xf32>, vector<8x16xf32>, vector<64x16xf32> -> vector<64x16xf32>
    %45 = arith.addf %37, %44 : vector<64x16xf32>
    %c1_i32_30 = arith.constant 1 : i32
    %46 = arith.addi %4, %c1_i32_30 : i32
    %47 = arith.index_cast %46 : i32 to index
    %c2_31 = arith.constant 2 : index
    %c0_32 = arith.constant 0 : index
    %48 = vector.load %arg7[%47, %c2_31, %c0_32] : memref<10x10x8xf32, #tpu.memory_space<vmem>>, vector<8x8x8xf32>
    %49 = vector.shape_cast %48 : vector<8x8x8xf32> to vector<64x8xf32>
    %c5 = arith.constant 5 : index
    %c0_33 = arith.constant 0 : index
    %c0_34 = arith.constant 0 : index
    %50 = vector.load %arg3[%c5, %c0_33, %c0_34] : memref<9x8x16xf32, #tpu.memory_space<vmem>>, vector<1x8x16xf32>
    %51 = vector.shape_cast %50 : vector<1x8x16xf32> to vector<8x16xf32>
    %cst_35 = arith.constant dense<0.000000e+00> : vector<64x16xf32>
    %52 = tpu.matmul %49, %51, %cst_35 {dimension_numbers = #tpu.dot_dimension_numbers<[1], [0], [0], [1], [0, 0, 1, 1], [], []>} : vector<64x8xf32>, vector<8x16xf32>, vector<64x16xf32> -> vector<64x16xf32>
    %53 = arith.addf %45, %52 : vector<64x16xf32>
    %c2_i32 = arith.constant 2 : i32
    %54 = arith.addi %4, %c2_i32 : i32
    %55 = arith.index_cast %54 : i32 to index
    %c0_36 = arith.constant 0 : index
    %c0_37 = arith.constant 0 : index
    %56 = vector.load %arg7[%55, %c0_36, %c0_37] : memref<10x10x8xf32, #tpu.memory_space<vmem>>, vector<8x8x8xf32>
    %57 = vector.shape_cast %56 : vector<8x8x8xf32> to vector<64x8xf32>
    %c6 = arith.constant 6 : index
    %c0_38 = arith.constant 0 : index
    %c0_39 = arith.constant 0 : index
    %58 = vector.load %arg3[%c6, %c0_38, %c0_39] : memref<9x8x16xf32, #tpu.memory_space<vmem>>, vector<1x8x16xf32>
    %59 = vector.shape_cast %58 : vector<1x8x16xf32> to vector<8x16xf32>
    %cst_40 = arith.constant dense<0.000000e+00> : vector<64x16xf32>
    %60 = tpu.matmul %57, %59, %cst_40 {dimension_numbers = #tpu.dot_dimension_numbers<[1], [0], [0], [1], [0, 0, 1, 1], [], []>} : vector<64x8xf32>, vector<8x16xf32>, vector<64x16xf32> -> vector<64x16xf32>
    %61 = arith.addf %53, %60 : vector<64x16xf32>
    %c2_i32_41 = arith.constant 2 : i32
    %62 = arith.addi %4, %c2_i32_41 : i32
    %63 = arith.index_cast %62 : i32 to index
    %c1_42 = arith.constant 1 : index
    %c0_43 = arith.constant 0 : index
    %64 = vector.load %arg7[%63, %c1_42, %c0_43] : memref<10x10x8xf32, #tpu.memory_space<vmem>>, vector<8x8x8xf32>
    %65 = vector.shape_cast %64 : vector<8x8x8xf32> to vector<64x8xf32>
    %c7 = arith.constant 7 : index
    %c0_44 = arith.constant 0 : index
    %c0_45 = arith.constant 0 : index
    %66 = vector.load %arg3[%c7, %c0_44, %c0_45] : memref<9x8x16xf32, #tpu.memory_space<vmem>>, vector<1x8x16xf32>
    %67 = vector.shape_cast %66 : vector<1x8x16xf32> to vector<8x16xf32>
    %cst_46 = arith.constant dense<0.000000e+00> : vector<64x16xf32>
    %68 = tpu.matmul %65, %67, %cst_46 {dimension_numbers = #tpu.dot_dimension_numbers<[1], [0], [0], [1], [0, 0, 1, 1], [], []>} : vector<64x8xf32>, vector<8x16xf32>, vector<64x16xf32> -> vector<64x16xf32>
    %69 = arith.addf %61, %68 : vector<64x16xf32>
    %c2_i32_47 = arith.constant 2 : i32
    %70 = arith.addi %4, %c2_i32_47 : i32
    %71 = arith.index_cast %70 : i32 to index
    %c2_48 = arith.constant 2 : index
    %c0_49 = arith.constant 0 : index
    %72 = vector.load %arg7[%71, %c2_48, %c0_49] : memref<10x10x8xf32, #tpu.memory_space<vmem>>, vector<8x8x8xf32>
    %73 = vector.shape_cast %72 : vector<8x8x8xf32> to vector<64x8xf32>
    %c8 = arith.constant 8 : index
    %c0_50 = arith.constant 0 : index
    %c0_51 = arith.constant 0 : index
    %74 = vector.load %arg3[%c8, %c0_50, %c0_51] : memref<9x8x16xf32, #tpu.memory_space<vmem>>, vector<1x8x16xf32>
    %75 = vector.shape_cast %74 : vector<1x8x16xf32> to vector<8x16xf32>
    %cst_52 = arith.constant dense<0.000000e+00> : vector<64x16xf32>
    %76 = tpu.matmul %73, %75, %cst_52 {dimension_numbers = #tpu.dot_dimension_numbers<[1], [0], [0], [1], [0, 0, 1, 1], [], []>} : vector<64x8xf32>, vector<8x16xf32>, vector<64x16xf32> -> vector<64x16xf32>
    %77 = arith.addf %69, %76 : vector<64x16xf32>
    %c0_53 = arith.constant 0 : index
    %c0_54 = arith.constant 0 : index
    %78 = vector.load %arg4[%c0_53, %c0_54] : memref<1x16xf32, #tpu.memory_space<vmem>>, vector<1x16xf32>
    %79 = vector.broadcast %78 : vector<1x16xf32> to vector<64x16xf32>
    %80 = arith.mulf %77, %79 : vector<64x16xf32>
    %c0_55 = arith.constant 0 : index
    %c0_56 = arith.constant 0 : index
    %81 = vector.load %arg5[%c0_55, %c0_56] : memref<1x16xf32, #tpu.memory_space<vmem>>, vector<1x16xf32>
    %82 = vector.broadcast %81 : vector<1x16xf32> to vector<64x16xf32>
    %83 = arith.addf %80, %82 : vector<64x16xf32>
    %cst_57 = arith.constant 0.000000e+00 : f32
    %84 = vector.broadcast %cst_57 : f32 to vector<64x16xf32>
    %85 = arith.maximumf %83, %84 : vector<64x16xf32>
    %86 = vector.shape_cast %85 : vector<64x16xf32> to vector<8x8x16xf32>
    %c0_58 = arith.constant 0 : index
    %c0_59 = arith.constant 0 : index
    %c0_60 = arith.constant 0 : index
    %c0_61 = arith.constant 0 : index
    %87 = vector.load %arg6[%c0_58, %c0_59, %c0_60, %c0_61] : memref<1x8x8x16xf32, #tpu.memory_space<vmem>>, vector<1x8x8x16xf32>
    %88 = vector.shape_cast %87 : vector<1x8x8x16xf32> to vector<8x8x16xf32>
    %89 = vector.shape_cast %86 : vector<8x8x16xf32> to vector<1x8x8x16xf32>
    tpu.vector_store %arg6[%c0_58, %c0_59, %c0_60, %c0_61], %89 {strides = array<i32>} : memref<1x8x8x16xf32, #tpu.memory_space<vmem>>, vector<1x8x8x16xf32>,
    return
  }
  func.func @transform_0(%arg0: i32, %arg1: i32) -> (i32, i32, i32, i32) {
    %c0_i32 = arith.constant 0 : i32
    %c0_i32_0 = arith.constant 0 : i32
    %c0_i32_1 = arith.constant 0 : i32
    %c0_i32_2 = arith.constant 0 : i32
    return %arg0, %c0_i32, %c0_i32_0, %c0_i32_1 : i32, i32, i32, i32
  }
  func.func @transform_1(%arg0: i32, %arg1: i32) -> (i32, i32, i32) {
    %c0_i32 = arith.constant 0 : i32
    %c0_i32_0 = arith.constant 0 : i32
    %c0_i32_1 = arith.constant 0 : i32
    %c0_i32_2 = arith.constant 0 : i32
    return %c0_i32, %c0_i32_0, %c0_i32_1 : i32, i32, i32
  }
  func.func @transform_2(%arg0: i32, %arg1: i32) -> (i32, i32) {
    %c0_i32 = arith.constant 0 : i32
    %c0_i32_0 = arith.constant 0 : i32
    %c0_i32_1 = arith.constant 0 : i32
    return %c0_i32, %c0_i32_0 : i32, i32
  }
  func.func @transform_3(%arg0: i32, %arg1: i32) -> (i32, i32) {
    %c0_i32 = arith.constant 0 : i32
    %c0_i32_0 = arith.constant 0 : i32
    %c0_i32_1 = arith.constant 0 : i32
    return %c0_i32, %c0_i32_0 : i32, i32
  }
  func.func @transform_4(%arg0: i32, %arg1: i32) -> (i32, i32, i32, i32) {
    %c0_i32 = arith.constant 0 : i32
    %c0_i32_0 = arith.constant 0 : i32
    %c0_i32_1 = arith.constant 0 : i32
    return %arg0, %arg1, %c0_i32, %c0_i32_0 : i32, i32, i32, i32
  }
}

module attributes {stable_mosaic.version = 11 : i64} {
  func.func @conv3x3_bn_relu_kernel(%arg0: i32, %arg1: i32, %arg2: memref<1x16x16x4xf32, #tpu.memory_space<vmem>>, %arg3: memref<9x4x8xf32, #tpu.memory_space<vmem>>, %arg4: memref<1x8xf32, #tpu.memory_space<vmem>>, %arg5: memref<1x8xf32, #tpu.memory_space<vmem>>, %arg6: memref<1x16x16x8xf32, #tpu.memory_space<vmem>>, %arg7: memref<18x18x4xf32, #tpu.memory_space<vmem>>) attributes {dimension_semantics = [#tpu.dimension_semantics<parallel>, #tpu.dimension_semantics<arbitrary>], iteration_bounds = array<i64: 2, 1>, scalar_prefetch = 0 : i64, scratch_operands = 1 : i64, tpu.core_type = #tpu.core_type<tc>, window_params = [{transform_indices = @transform_0, window_bounds = array<i64: 1, 16, 16, 4>}, {pipeline_mode = #tpu.pipeline_mode<synchronous>, transform_indices = @transform_1, window_bounds = array<i64: 9, 4, 8>}, {pipeline_mode = #tpu.pipeline_mode<synchronous>, transform_indices = @transform_2, window_bounds = array<i64: 1, 8>}, {pipeline_mode = #tpu.pipeline_mode<synchronous>, transform_indices = @transform_3, window_bounds = array<i64: 1, 8>}, {transform_indices = @transform_4, window_bounds = array<i64: 1, 16, 16, 8>}]} {
    %c0_i32 = arith.constant 0 : i32
    %0 = arith.cmpi eq, %arg1, %c0_i32 : i32
    %1 = arith.extui %0 : i1 to i32
    %c0_i32_0 = arith.constant 0 : i32
    %2 = arith.cmpi ne, %1, %c0_i32_0 : i32
    scf.if %2 {
      %cst_62 = arith.constant 0.000000e+00 : f32
      %90 = vector.broadcast %cst_62 : f32 to vector<1x18x4xf32>
      %cst_63 = arith.constant 0.000000e+00 : f32
      %91 = vector.broadcast %cst_63 : f32 to vector<18x1x4xf32>
      %c0_64 = arith.constant 0 : index
      %c0_65 = arith.constant 0 : index
      %c0_66 = arith.constant 0 : index
      %92 = vector.load %arg7[%c0_64, %c0_65, %c0_66] : memref<18x18x4xf32, #tpu.memory_space<vmem>>, vector<1x18x4xf32>
      tpu.vector_store %arg7[%c0_64, %c0_65, %c0_66], %90 {strides = array<i32>} : memref<18x18x4xf32, #tpu.memory_space<vmem>>, vector<1x18x4xf32>,
      %c17 = arith.constant 17 : index
      %c0_67 = arith.constant 0 : index
      %c0_68 = arith.constant 0 : index
      %93 = vector.load %arg7[%c17, %c0_67, %c0_68] : memref<18x18x4xf32, #tpu.memory_space<vmem>>, vector<1x18x4xf32>
      tpu.vector_store %arg7[%c17, %c0_67, %c0_68], %90 {strides = array<i32>} : memref<18x18x4xf32, #tpu.memory_space<vmem>>, vector<1x18x4xf32>,
      %c0_69 = arith.constant 0 : index
      %c0_70 = arith.constant 0 : index
      %c0_71 = arith.constant 0 : index
      %94 = vector.load %arg7[%c0_69, %c0_70, %c0_71] : memref<18x18x4xf32, #tpu.memory_space<vmem>>, vector<18x1x4xf32>
      tpu.vector_store %arg7[%c0_69, %c0_70, %c0_71], %91 {strides = array<i32>} : memref<18x18x4xf32, #tpu.memory_space<vmem>>, vector<18x1x4xf32>,
      %c0_72 = arith.constant 0 : index
      %c17_73 = arith.constant 17 : index
      %c0_74 = arith.constant 0 : index
      %95 = vector.load %arg7[%c0_72, %c17_73, %c0_74] : memref<18x18x4xf32, #tpu.memory_space<vmem>>, vector<18x1x4xf32>
      tpu.vector_store %arg7[%c0_72, %c17_73, %c0_74], %91 {strides = array<i32>} : memref<18x18x4xf32, #tpu.memory_space<vmem>>, vector<18x1x4xf32>,
      %c0_75 = arith.constant 0 : index
      %c0_76 = arith.constant 0 : index
      %c0_77 = arith.constant 0 : index
      %c0_78 = arith.constant 0 : index
      %96 = vector.load %arg2[%c0_75, %c0_76, %c0_77, %c0_78] : memref<1x16x16x4xf32, #tpu.memory_space<vmem>>, vector<1x16x16x4xf32>
      %97 = vector.shape_cast %96 : vector<1x16x16x4xf32> to vector<16x16x4xf32>
      %c1_79 = arith.constant 1 : index
      %c1_80 = arith.constant 1 : index
      %c0_81 = arith.constant 0 : index
      %98 = vector.load %arg7[%c1_79, %c1_80, %c0_81] : memref<18x18x4xf32, #tpu.memory_space<vmem>>, vector<16x16x4xf32>
      tpu.vector_store %arg7[%c1_79, %c1_80, %c0_81], %97 {strides = array<i32>} : memref<18x18x4xf32, #tpu.memory_space<vmem>>, vector<16x16x4xf32>,
    } else {
    }
    %c16_i32 = arith.constant 16 : i32
    %3 = arith.muli %arg1, %c16_i32 : i32
    %4 = tpu.assume_multiple %3, 16 : i32
    %cst = arith.constant 0.000000e+00 : f32
    %5 = vector.broadcast %cst : f32 to vector<256x8xf32>
    %c0_i32_1 = arith.constant 0 : i32
    %6 = arith.addi %4, %c0_i32_1 : i32
    %7 = arith.index_cast %6 : i32 to index
    %c0 = arith.constant 0 : index
    %c0_2 = arith.constant 0 : index
    %8 = vector.load %arg7[%7, %c0, %c0_2] : memref<18x18x4xf32, #tpu.memory_space<vmem>>, vector<16x16x4xf32>
    %9 = vector.shape_cast %8 : vector<16x16x4xf32> to vector<256x4xf32>
    %c0_3 = arith.constant 0 : index
    %c0_4 = arith.constant 0 : index
    %c0_5 = arith.constant 0 : index
    %10 = vector.load %arg3[%c0_3, %c0_4, %c0_5] : memref<9x4x8xf32, #tpu.memory_space<vmem>>, vector<1x4x8xf32>
    %11 = vector.shape_cast %10 : vector<1x4x8xf32> to vector<4x8xf32>
    %cst_6 = arith.constant dense<0.000000e+00> : vector<256x8xf32>
    %12 = tpu.matmul %9, %11, %cst_6 {dimension_numbers = #tpu.dot_dimension_numbers<[1], [0], [0], [1], [0, 0, 1, 1], [], []>} : vector<256x4xf32>, vector<4x8xf32>, vector<256x8xf32> -> vector<256x8xf32>
    %13 = arith.addf %5, %12 : vector<256x8xf32>
    %c0_i32_7 = arith.constant 0 : i32
    %14 = arith.addi %4, %c0_i32_7 : i32
    %15 = arith.index_cast %14 : i32 to index
    %c1 = arith.constant 1 : index
    %c0_8 = arith.constant 0 : index
    %16 = vector.load %arg7[%15, %c1, %c0_8] : memref<18x18x4xf32, #tpu.memory_space<vmem>>, vector<16x16x4xf32>
    %17 = vector.shape_cast %16 : vector<16x16x4xf32> to vector<256x4xf32>
    %c1_9 = arith.constant 1 : index
    %c0_10 = arith.constant 0 : index
    %c0_11 = arith.constant 0 : index
    %18 = vector.load %arg3[%c1_9, %c0_10, %c0_11] : memref<9x4x8xf32, #tpu.memory_space<vmem>>, vector<1x4x8xf32>
    %19 = vector.shape_cast %18 : vector<1x4x8xf32> to vector<4x8xf32>
    %cst_12 = arith.constant dense<0.000000e+00> : vector<256x8xf32>
    %20 = tpu.matmul %17, %19, %cst_12 {dimension_numbers = #tpu.dot_dimension_numbers<[1], [0], [0], [1], [0, 0, 1, 1], [], []>} : vector<256x4xf32>, vector<4x8xf32>, vector<256x8xf32> -> vector<256x8xf32>
    %21 = arith.addf %13, %20 : vector<256x8xf32>
    %c0_i32_13 = arith.constant 0 : i32
    %22 = arith.addi %4, %c0_i32_13 : i32
    %23 = arith.index_cast %22 : i32 to index
    %c2 = arith.constant 2 : index
    %c0_14 = arith.constant 0 : index
    %24 = vector.load %arg7[%23, %c2, %c0_14] : memref<18x18x4xf32, #tpu.memory_space<vmem>>, vector<16x16x4xf32>
    %25 = vector.shape_cast %24 : vector<16x16x4xf32> to vector<256x4xf32>
    %c2_15 = arith.constant 2 : index
    %c0_16 = arith.constant 0 : index
    %c0_17 = arith.constant 0 : index
    %26 = vector.load %arg3[%c2_15, %c0_16, %c0_17] : memref<9x4x8xf32, #tpu.memory_space<vmem>>, vector<1x4x8xf32>
    %27 = vector.shape_cast %26 : vector<1x4x8xf32> to vector<4x8xf32>
    %cst_18 = arith.constant dense<0.000000e+00> : vector<256x8xf32>
    %28 = tpu.matmul %25, %27, %cst_18 {dimension_numbers = #tpu.dot_dimension_numbers<[1], [0], [0], [1], [0, 0, 1, 1], [], []>} : vector<256x4xf32>, vector<4x8xf32>, vector<256x8xf32> -> vector<256x8xf32>
    %29 = arith.addf %21, %28 : vector<256x8xf32>
    %c1_i32 = arith.constant 1 : i32
    %30 = arith.addi %4, %c1_i32 : i32
    %31 = arith.index_cast %30 : i32 to index
    %c0_19 = arith.constant 0 : index
    %c0_20 = arith.constant 0 : index
    %32 = vector.load %arg7[%31, %c0_19, %c0_20] : memref<18x18x4xf32, #tpu.memory_space<vmem>>, vector<16x16x4xf32>
    %33 = vector.shape_cast %32 : vector<16x16x4xf32> to vector<256x4xf32>
    %c3 = arith.constant 3 : index
    %c0_21 = arith.constant 0 : index
    %c0_22 = arith.constant 0 : index
    %34 = vector.load %arg3[%c3, %c0_21, %c0_22] : memref<9x4x8xf32, #tpu.memory_space<vmem>>, vector<1x4x8xf32>
    %35 = vector.shape_cast %34 : vector<1x4x8xf32> to vector<4x8xf32>
    %cst_23 = arith.constant dense<0.000000e+00> : vector<256x8xf32>
    %36 = tpu.matmul %33, %35, %cst_23 {dimension_numbers = #tpu.dot_dimension_numbers<[1], [0], [0], [1], [0, 0, 1, 1], [], []>} : vector<256x4xf32>, vector<4x8xf32>, vector<256x8xf32> -> vector<256x8xf32>
    %37 = arith.addf %29, %36 : vector<256x8xf32>
    %c1_i32_24 = arith.constant 1 : i32
    %38 = arith.addi %4, %c1_i32_24 : i32
    %39 = arith.index_cast %38 : i32 to index
    %c1_25 = arith.constant 1 : index
    %c0_26 = arith.constant 0 : index
    %40 = vector.load %arg7[%39, %c1_25, %c0_26] : memref<18x18x4xf32, #tpu.memory_space<vmem>>, vector<16x16x4xf32>
    %41 = vector.shape_cast %40 : vector<16x16x4xf32> to vector<256x4xf32>
    %c4 = arith.constant 4 : index
    %c0_27 = arith.constant 0 : index
    %c0_28 = arith.constant 0 : index
    %42 = vector.load %arg3[%c4, %c0_27, %c0_28] : memref<9x4x8xf32, #tpu.memory_space<vmem>>, vector<1x4x8xf32>
    %43 = vector.shape_cast %42 : vector<1x4x8xf32> to vector<4x8xf32>
    %cst_29 = arith.constant dense<0.000000e+00> : vector<256x8xf32>
    %44 = tpu.matmul %41, %43, %cst_29 {dimension_numbers = #tpu.dot_dimension_numbers<[1], [0], [0], [1], [0, 0, 1, 1], [], []>} : vector<256x4xf32>, vector<4x8xf32>, vector<256x8xf32> -> vector<256x8xf32>
    %45 = arith.addf %37, %44 : vector<256x8xf32>
    %c1_i32_30 = arith.constant 1 : i32
    %46 = arith.addi %4, %c1_i32_30 : i32
    %47 = arith.index_cast %46 : i32 to index
    %c2_31 = arith.constant 2 : index
    %c0_32 = arith.constant 0 : index
    %48 = vector.load %arg7[%47, %c2_31, %c0_32] : memref<18x18x4xf32, #tpu.memory_space<vmem>>, vector<16x16x4xf32>
    %49 = vector.shape_cast %48 : vector<16x16x4xf32> to vector<256x4xf32>
    %c5 = arith.constant 5 : index
    %c0_33 = arith.constant 0 : index
    %c0_34 = arith.constant 0 : index
    %50 = vector.load %arg3[%c5, %c0_33, %c0_34] : memref<9x4x8xf32, #tpu.memory_space<vmem>>, vector<1x4x8xf32>
    %51 = vector.shape_cast %50 : vector<1x4x8xf32> to vector<4x8xf32>
    %cst_35 = arith.constant dense<0.000000e+00> : vector<256x8xf32>
    %52 = tpu.matmul %49, %51, %cst_35 {dimension_numbers = #tpu.dot_dimension_numbers<[1], [0], [0], [1], [0, 0, 1, 1], [], []>} : vector<256x4xf32>, vector<4x8xf32>, vector<256x8xf32> -> vector<256x8xf32>
    %53 = arith.addf %45, %52 : vector<256x8xf32>
    %c2_i32 = arith.constant 2 : i32
    %54 = arith.addi %4, %c2_i32 : i32
    %55 = arith.index_cast %54 : i32 to index
    %c0_36 = arith.constant 0 : index
    %c0_37 = arith.constant 0 : index
    %56 = vector.load %arg7[%55, %c0_36, %c0_37] : memref<18x18x4xf32, #tpu.memory_space<vmem>>, vector<16x16x4xf32>
    %57 = vector.shape_cast %56 : vector<16x16x4xf32> to vector<256x4xf32>
    %c6 = arith.constant 6 : index
    %c0_38 = arith.constant 0 : index
    %c0_39 = arith.constant 0 : index
    %58 = vector.load %arg3[%c6, %c0_38, %c0_39] : memref<9x4x8xf32, #tpu.memory_space<vmem>>, vector<1x4x8xf32>
    %59 = vector.shape_cast %58 : vector<1x4x8xf32> to vector<4x8xf32>
    %cst_40 = arith.constant dense<0.000000e+00> : vector<256x8xf32>
    %60 = tpu.matmul %57, %59, %cst_40 {dimension_numbers = #tpu.dot_dimension_numbers<[1], [0], [0], [1], [0, 0, 1, 1], [], []>} : vector<256x4xf32>, vector<4x8xf32>, vector<256x8xf32> -> vector<256x8xf32>
    %61 = arith.addf %53, %60 : vector<256x8xf32>
    %c2_i32_41 = arith.constant 2 : i32
    %62 = arith.addi %4, %c2_i32_41 : i32
    %63 = arith.index_cast %62 : i32 to index
    %c1_42 = arith.constant 1 : index
    %c0_43 = arith.constant 0 : index
    %64 = vector.load %arg7[%63, %c1_42, %c0_43] : memref<18x18x4xf32, #tpu.memory_space<vmem>>, vector<16x16x4xf32>
    %65 = vector.shape_cast %64 : vector<16x16x4xf32> to vector<256x4xf32>
    %c7 = arith.constant 7 : index
    %c0_44 = arith.constant 0 : index
    %c0_45 = arith.constant 0 : index
    %66 = vector.load %arg3[%c7, %c0_44, %c0_45] : memref<9x4x8xf32, #tpu.memory_space<vmem>>, vector<1x4x8xf32>
    %67 = vector.shape_cast %66 : vector<1x4x8xf32> to vector<4x8xf32>
    %cst_46 = arith.constant dense<0.000000e+00> : vector<256x8xf32>
    %68 = tpu.matmul %65, %67, %cst_46 {dimension_numbers = #tpu.dot_dimension_numbers<[1], [0], [0], [1], [0, 0, 1, 1], [], []>} : vector<256x4xf32>, vector<4x8xf32>, vector<256x8xf32> -> vector<256x8xf32>
    %69 = arith.addf %61, %68 : vector<256x8xf32>
    %c2_i32_47 = arith.constant 2 : i32
    %70 = arith.addi %4, %c2_i32_47 : i32
    %71 = arith.index_cast %70 : i32 to index
    %c2_48 = arith.constant 2 : index
    %c0_49 = arith.constant 0 : index
    %72 = vector.load %arg7[%71, %c2_48, %c0_49] : memref<18x18x4xf32, #tpu.memory_space<vmem>>, vector<16x16x4xf32>
    %73 = vector.shape_cast %72 : vector<16x16x4xf32> to vector<256x4xf32>
    %c8 = arith.constant 8 : index
    %c0_50 = arith.constant 0 : index
    %c0_51 = arith.constant 0 : index
    %74 = vector.load %arg3[%c8, %c0_50, %c0_51] : memref<9x4x8xf32, #tpu.memory_space<vmem>>, vector<1x4x8xf32>
    %75 = vector.shape_cast %74 : vector<1x4x8xf32> to vector<4x8xf32>
    %cst_52 = arith.constant dense<0.000000e+00> : vector<256x8xf32>
    %76 = tpu.matmul %73, %75, %cst_52 {dimension_numbers = #tpu.dot_dimension_numbers<[1], [0], [0], [1], [0, 0, 1, 1], [], []>} : vector<256x4xf32>, vector<4x8xf32>, vector<256x8xf32> -> vector<256x8xf32>
    %77 = arith.addf %69, %76 : vector<256x8xf32>
    %c0_53 = arith.constant 0 : index
    %c0_54 = arith.constant 0 : index
    %78 = vector.load %arg4[%c0_53, %c0_54] : memref<1x8xf32, #tpu.memory_space<vmem>>, vector<1x8xf32>
    %79 = vector.broadcast %78 : vector<1x8xf32> to vector<256x8xf32>
    %80 = arith.mulf %77, %79 : vector<256x8xf32>
    %c0_55 = arith.constant 0 : index
    %c0_56 = arith.constant 0 : index
    %81 = vector.load %arg5[%c0_55, %c0_56] : memref<1x8xf32, #tpu.memory_space<vmem>>, vector<1x8xf32>
    %82 = vector.broadcast %81 : vector<1x8xf32> to vector<256x8xf32>
    %83 = arith.addf %80, %82 : vector<256x8xf32>
    %cst_57 = arith.constant 0.000000e+00 : f32
    %84 = vector.broadcast %cst_57 : f32 to vector<256x8xf32>
    %85 = arith.maximumf %83, %84 : vector<256x8xf32>
    %86 = vector.shape_cast %85 : vector<256x8xf32> to vector<16x16x8xf32>
    %c0_58 = arith.constant 0 : index
    %c0_59 = arith.constant 0 : index
    %c0_60 = arith.constant 0 : index
    %c0_61 = arith.constant 0 : index
    %87 = vector.load %arg6[%c0_58, %c0_59, %c0_60, %c0_61] : memref<1x16x16x8xf32, #tpu.memory_space<vmem>>, vector<1x16x16x8xf32>
    %88 = vector.shape_cast %87 : vector<1x16x16x8xf32> to vector<16x16x8xf32>
    %89 = vector.shape_cast %86 : vector<16x16x8xf32> to vector<1x16x16x8xf32>
    tpu.vector_store %arg6[%c0_58, %c0_59, %c0_60, %c0_61], %89 {strides = array<i32>} : memref<1x16x16x8xf32, #tpu.memory_space<vmem>>, vector<1x16x16x8xf32>,
    return
  }
  func.func @transform_0(%arg0: i32, %arg1: i32) -> (i32, i32, i32, i32) {
    %c0_i32 = arith.constant 0 : i32
    %c0_i32_0 = arith.constant 0 : i32
    %c0_i32_1 = arith.constant 0 : i32
    %c0_i32_2 = arith.constant 0 : i32
    return %arg0, %c0_i32, %c0_i32_0, %c0_i32_1 : i32, i32, i32, i32
  }
  func.func @transform_1(%arg0: i32, %arg1: i32) -> (i32, i32, i32) {
    %c0_i32 = arith.constant 0 : i32
    %c0_i32_0 = arith.constant 0 : i32
    %c0_i32_1 = arith.constant 0 : i32
    %c0_i32_2 = arith.constant 0 : i32
    return %c0_i32, %c0_i32_0, %c0_i32_1 : i32, i32, i32
  }
  func.func @transform_2(%arg0: i32, %arg1: i32) -> (i32, i32) {
    %c0_i32 = arith.constant 0 : i32
    %c0_i32_0 = arith.constant 0 : i32
    %c0_i32_1 = arith.constant 0 : i32
    return %c0_i32, %c0_i32_0 : i32, i32
  }
  func.func @transform_3(%arg0: i32, %arg1: i32) -> (i32, i32) {
    %c0_i32 = arith.constant 0 : i32
    %c0_i32_0 = arith.constant 0 : i32
    %c0_i32_1 = arith.constant 0 : i32
    return %c0_i32, %c0_i32_0 : i32, i32
  }
  func.func @transform_4(%arg0: i32, %arg1: i32) -> (i32, i32, i32, i32) {
    %c0_i32 = arith.constant 0 : i32
    %c0_i32_0 = arith.constant 0 : i32
    %c0_i32_1 = arith.constant 0 : i32
    return %arg0, %arg1, %c0_i32, %c0_i32_0 : i32, i32, i32, i32
  }
}

module attributes {stable_mosaic.version = 11 : i64} {
  func.func @conv3x3_bn_relu_kernel(%arg0: i32, %arg1: i32, %arg2: memref<1x8x8x16xf32, #tpu.memory_space<vmem>>, %arg3: memref<9x16x16xf32, #tpu.memory_space<vmem>>, %arg4: memref<1x16xf32, #tpu.memory_space<vmem>>, %arg5: memref<1x16xf32, #tpu.memory_space<vmem>>, %arg6: memref<1x8x8x16xf32, #tpu.memory_space<vmem>>, %arg7: memref<1x4x4x16xf32, #tpu.memory_space<vmem>>, %arg8: memref<10x10x16xf32, #tpu.memory_space<vmem>>) attributes {dimension_semantics = [#tpu.dimension_semantics<parallel>, #tpu.dimension_semantics<arbitrary>], iteration_bounds = array<i64: 2, 1>, scalar_prefetch = 0 : i64, scratch_operands = 1 : i64, tpu.core_type = #tpu.core_type<tc>, window_params = [{transform_indices = @transform_0, window_bounds = array<i64: 1, 8, 8, 16>}, {pipeline_mode = #tpu.pipeline_mode<synchronous>, transform_indices = @transform_1, window_bounds = array<i64: 9, 16, 16>}, {pipeline_mode = #tpu.pipeline_mode<synchronous>, transform_indices = @transform_2, window_bounds = array<i64: 1, 16>}, {pipeline_mode = #tpu.pipeline_mode<synchronous>, transform_indices = @transform_3, window_bounds = array<i64: 1, 16>}, {transform_indices = @transform_4, window_bounds = array<i64: 1, 8, 8, 16>}, {transform_indices = @transform_5, window_bounds = array<i64: 1, 4, 4, 16>}]} {
    %c0_i32 = arith.constant 0 : i32
    %0 = arith.cmpi eq, %arg1, %c0_i32 : i32
    %1 = arith.extui %0 : i1 to i32
    %c0_i32_0 = arith.constant 0 : i32
    %2 = arith.cmpi ne, %1, %c0_i32_0 : i32
    scf.if %2 {
      %cst_66 = arith.constant 0.000000e+00 : f32
      %105 = vector.broadcast %cst_66 : f32 to vector<1x10x16xf32>
      %cst_67 = arith.constant 0.000000e+00 : f32
      %106 = vector.broadcast %cst_67 : f32 to vector<10x1x16xf32>
      %c0_68 = arith.constant 0 : index
      %c0_69 = arith.constant 0 : index
      %c0_70 = arith.constant 0 : index
      %107 = vector.load %arg8[%c0_68, %c0_69, %c0_70] : memref<10x10x16xf32, #tpu.memory_space<vmem>>, vector<1x10x16xf32>
      tpu.vector_store %arg8[%c0_68, %c0_69, %c0_70], %105 {strides = array<i32>} : memref<10x10x16xf32, #tpu.memory_space<vmem>>, vector<1x10x16xf32>,
      %c9 = arith.constant 9 : index
      %c0_71 = arith.constant 0 : index
      %c0_72 = arith.constant 0 : index
      %108 = vector.load %arg8[%c9, %c0_71, %c0_72] : memref<10x10x16xf32, #tpu.memory_space<vmem>>, vector<1x10x16xf32>
      tpu.vector_store %arg8[%c9, %c0_71, %c0_72], %105 {strides = array<i32>} : memref<10x10x16xf32, #tpu.memory_space<vmem>>, vector<1x10x16xf32>,
      %c0_73 = arith.constant 0 : index
      %c0_74 = arith.constant 0 : index
      %c0_75 = arith.constant 0 : index
      %109 = vector.load %arg8[%c0_73, %c0_74, %c0_75] : memref<10x10x16xf32, #tpu.memory_space<vmem>>, vector<10x1x16xf32>
      tpu.vector_store %arg8[%c0_73, %c0_74, %c0_75], %106 {strides = array<i32>} : memref<10x10x16xf32, #tpu.memory_space<vmem>>, vector<10x1x16xf32>,
      %c0_76 = arith.constant 0 : index
      %c9_77 = arith.constant 9 : index
      %c0_78 = arith.constant 0 : index
      %110 = vector.load %arg8[%c0_76, %c9_77, %c0_78] : memref<10x10x16xf32, #tpu.memory_space<vmem>>, vector<10x1x16xf32>
      tpu.vector_store %arg8[%c0_76, %c9_77, %c0_78], %106 {strides = array<i32>} : memref<10x10x16xf32, #tpu.memory_space<vmem>>, vector<10x1x16xf32>,
      %c0_79 = arith.constant 0 : index
      %c0_80 = arith.constant 0 : index
      %c0_81 = arith.constant 0 : index
      %c0_82 = arith.constant 0 : index
      %111 = vector.load %arg2[%c0_79, %c0_80, %c0_81, %c0_82] : memref<1x8x8x16xf32, #tpu.memory_space<vmem>>, vector<1x8x8x16xf32>
      %112 = vector.shape_cast %111 : vector<1x8x8x16xf32> to vector<8x8x16xf32>
      %c1_83 = arith.constant 1 : index
      %c1_84 = arith.constant 1 : index
      %c0_85 = arith.constant 0 : index
      %113 = vector.load %arg8[%c1_83, %c1_84, %c0_85] : memref<10x10x16xf32, #tpu.memory_space<vmem>>, vector<8x8x16xf32>
      tpu.vector_store %arg8[%c1_83, %c1_84, %c0_85], %112 {strides = array<i32>} : memref<10x10x16xf32, #tpu.memory_space<vmem>>, vector<8x8x16xf32>,
    } else {
    }
    %c8_i32 = arith.constant 8 : i32
    %3 = arith.muli %arg1, %c8_i32 : i32
    %4 = tpu.assume_multiple %3, 8 : i32
    %cst = arith.constant 0.000000e+00 : f32
    %5 = vector.broadcast %cst : f32 to vector<64x16xf32>
    %c0_i32_1 = arith.constant 0 : i32
    %6 = arith.addi %4, %c0_i32_1 : i32
    %7 = arith.index_cast %6 : i32 to index
    %c0 = arith.constant 0 : index
    %c0_2 = arith.constant 0 : index
    %8 = vector.load %arg8[%7, %c0, %c0_2] : memref<10x10x16xf32, #tpu.memory_space<vmem>>, vector<8x8x16xf32>
    %9 = vector.shape_cast %8 : vector<8x8x16xf32> to vector<64x16xf32>
    %c0_3 = arith.constant 0 : index
    %c0_4 = arith.constant 0 : index
    %c0_5 = arith.constant 0 : index
    %10 = vector.load %arg3[%c0_3, %c0_4, %c0_5] : memref<9x16x16xf32, #tpu.memory_space<vmem>>, vector<1x16x16xf32>
    %11 = vector.shape_cast %10 : vector<1x16x16xf32> to vector<16x16xf32>
    %cst_6 = arith.constant dense<0.000000e+00> : vector<64x16xf32>
    %12 = tpu.matmul %9, %11, %cst_6 {dimension_numbers = #tpu.dot_dimension_numbers<[1], [0], [0], [1], [0, 0, 1, 1], [], []>} : vector<64x16xf32>, vector<16x16xf32>, vector<64x16xf32> -> vector<64x16xf32>
    %13 = arith.addf %5, %12 : vector<64x16xf32>
    %c0_i32_7 = arith.constant 0 : i32
    %14 = arith.addi %4, %c0_i32_7 : i32
    %15 = arith.index_cast %14 : i32 to index
    %c1 = arith.constant 1 : index
    %c0_8 = arith.constant 0 : index
    %16 = vector.load %arg8[%15, %c1, %c0_8] : memref<10x10x16xf32, #tpu.memory_space<vmem>>, vector<8x8x16xf32>
    %17 = vector.shape_cast %16 : vector<8x8x16xf32> to vector<64x16xf32>
    %c1_9 = arith.constant 1 : index
    %c0_10 = arith.constant 0 : index
    %c0_11 = arith.constant 0 : index
    %18 = vector.load %arg3[%c1_9, %c0_10, %c0_11] : memref<9x16x16xf32, #tpu.memory_space<vmem>>, vector<1x16x16xf32>
    %19 = vector.shape_cast %18 : vector<1x16x16xf32> to vector<16x16xf32>
    %cst_12 = arith.constant dense<0.000000e+00> : vector<64x16xf32>
    %20 = tpu.matmul %17, %19, %cst_12 {dimension_numbers = #tpu.dot_dimension_numbers<[1], [0], [0], [1], [0, 0, 1, 1], [], []>} : vector<64x16xf32>, vector<16x16xf32>, vector<64x16xf32> -> vector<64x16xf32>
    %21 = arith.addf %13, %20 : vector<64x16xf32>
    %c0_i32_13 = arith.constant 0 : i32
    %22 = arith.addi %4, %c0_i32_13 : i32
    %23 = arith.index_cast %22 : i32 to index
    %c2 = arith.constant 2 : index
    %c0_14 = arith.constant 0 : index
    %24 = vector.load %arg8[%23, %c2, %c0_14] : memref<10x10x16xf32, #tpu.memory_space<vmem>>, vector<8x8x16xf32>
    %25 = vector.shape_cast %24 : vector<8x8x16xf32> to vector<64x16xf32>
    %c2_15 = arith.constant 2 : index
    %c0_16 = arith.constant 0 : index
    %c0_17 = arith.constant 0 : index
    %26 = vector.load %arg3[%c2_15, %c0_16, %c0_17] : memref<9x16x16xf32, #tpu.memory_space<vmem>>, vector<1x16x16xf32>
    %27 = vector.shape_cast %26 : vector<1x16x16xf32> to vector<16x16xf32>
    %cst_18 = arith.constant dense<0.000000e+00> : vector<64x16xf32>
    %28 = tpu.matmul %25, %27, %cst_18 {dimension_numbers = #tpu.dot_dimension_numbers<[1], [0], [0], [1], [0, 0, 1, 1], [], []>} : vector<64x16xf32>, vector<16x16xf32>, vector<64x16xf32> -> vector<64x16xf32>
    %29 = arith.addf %21, %28 : vector<64x16xf32>
    %c1_i32 = arith.constant 1 : i32
    %30 = arith.addi %4, %c1_i32 : i32
    %31 = arith.index_cast %30 : i32 to index
    %c0_19 = arith.constant 0 : index
    %c0_20 = arith.constant 0 : index
    %32 = vector.load %arg8[%31, %c0_19, %c0_20] : memref<10x10x16xf32, #tpu.memory_space<vmem>>, vector<8x8x16xf32>
    %33 = vector.shape_cast %32 : vector<8x8x16xf32> to vector<64x16xf32>
    %c3 = arith.constant 3 : index
    %c0_21 = arith.constant 0 : index
    %c0_22 = arith.constant 0 : index
    %34 = vector.load %arg3[%c3, %c0_21, %c0_22] : memref<9x16x16xf32, #tpu.memory_space<vmem>>, vector<1x16x16xf32>
    %35 = vector.shape_cast %34 : vector<1x16x16xf32> to vector<16x16xf32>
    %cst_23 = arith.constant dense<0.000000e+00> : vector<64x16xf32>
    %36 = tpu.matmul %33, %35, %cst_23 {dimension_numbers = #tpu.dot_dimension_numbers<[1], [0], [0], [1], [0, 0, 1, 1], [], []>} : vector<64x16xf32>, vector<16x16xf32>, vector<64x16xf32> -> vector<64x16xf32>
    %37 = arith.addf %29, %36 : vector<64x16xf32>
    %c1_i32_24 = arith.constant 1 : i32
    %38 = arith.addi %4, %c1_i32_24 : i32
    %39 = arith.index_cast %38 : i32 to index
    %c1_25 = arith.constant 1 : index
    %c0_26 = arith.constant 0 : index
    %40 = vector.load %arg8[%39, %c1_25, %c0_26] : memref<10x10x16xf32, #tpu.memory_space<vmem>>, vector<8x8x16xf32>
    %41 = vector.shape_cast %40 : vector<8x8x16xf32> to vector<64x16xf32>
    %c4 = arith.constant 4 : index
    %c0_27 = arith.constant 0 : index
    %c0_28 = arith.constant 0 : index
    %42 = vector.load %arg3[%c4, %c0_27, %c0_28] : memref<9x16x16xf32, #tpu.memory_space<vmem>>, vector<1x16x16xf32>
    %43 = vector.shape_cast %42 : vector<1x16x16xf32> to vector<16x16xf32>
    %cst_29 = arith.constant dense<0.000000e+00> : vector<64x16xf32>
    %44 = tpu.matmul %41, %43, %cst_29 {dimension_numbers = #tpu.dot_dimension_numbers<[1], [0], [0], [1], [0, 0, 1, 1], [], []>} : vector<64x16xf32>, vector<16x16xf32>, vector<64x16xf32> -> vector<64x16xf32>
    %45 = arith.addf %37, %44 : vector<64x16xf32>
    %c1_i32_30 = arith.constant 1 : i32
    %46 = arith.addi %4, %c1_i32_30 : i32
    %47 = arith.index_cast %46 : i32 to index
    %c2_31 = arith.constant 2 : index
    %c0_32 = arith.constant 0 : index
    %48 = vector.load %arg8[%47, %c2_31, %c0_32] : memref<10x10x16xf32, #tpu.memory_space<vmem>>, vector<8x8x16xf32>
    %49 = vector.shape_cast %48 : vector<8x8x16xf32> to vector<64x16xf32>
    %c5 = arith.constant 5 : index
    %c0_33 = arith.constant 0 : index
    %c0_34 = arith.constant 0 : index
    %50 = vector.load %arg3[%c5, %c0_33, %c0_34] : memref<9x16x16xf32, #tpu.memory_space<vmem>>, vector<1x16x16xf32>
    %51 = vector.shape_cast %50 : vector<1x16x16xf32> to vector<16x16xf32>
    %cst_35 = arith.constant dense<0.000000e+00> : vector<64x16xf32>
    %52 = tpu.matmul %49, %51, %cst_35 {dimension_numbers = #tpu.dot_dimension_numbers<[1], [0], [0], [1], [0, 0, 1, 1], [], []>} : vector<64x16xf32>, vector<16x16xf32>, vector<64x16xf32> -> vector<64x16xf32>
    %53 = arith.addf %45, %52 : vector<64x16xf32>
    %c2_i32 = arith.constant 2 : i32
    %54 = arith.addi %4, %c2_i32 : i32
    %55 = arith.index_cast %54 : i32 to index
    %c0_36 = arith.constant 0 : index
    %c0_37 = arith.constant 0 : index
    %56 = vector.load %arg8[%55, %c0_36, %c0_37] : memref<10x10x16xf32, #tpu.memory_space<vmem>>, vector<8x8x16xf32>
    %57 = vector.shape_cast %56 : vector<8x8x16xf32> to vector<64x16xf32>
    %c6 = arith.constant 6 : index
    %c0_38 = arith.constant 0 : index
    %c0_39 = arith.constant 0 : index
    %58 = vector.load %arg3[%c6, %c0_38, %c0_39] : memref<9x16x16xf32, #tpu.memory_space<vmem>>, vector<1x16x16xf32>
    %59 = vector.shape_cast %58 : vector<1x16x16xf32> to vector<16x16xf32>
    %cst_40 = arith.constant dense<0.000000e+00> : vector<64x16xf32>
    %60 = tpu.matmul %57, %59, %cst_40 {dimension_numbers = #tpu.dot_dimension_numbers<[1], [0], [0], [1], [0, 0, 1, 1], [], []>} : vector<64x16xf32>, vector<16x16xf32>, vector<64x16xf32> -> vector<64x16xf32>
    %61 = arith.addf %53, %60 : vector<64x16xf32>
    %c2_i32_41 = arith.constant 2 : i32
    %62 = arith.addi %4, %c2_i32_41 : i32
    %63 = arith.index_cast %62 : i32 to index
    %c1_42 = arith.constant 1 : index
    %c0_43 = arith.constant 0 : index
    %64 = vector.load %arg8[%63, %c1_42, %c0_43] : memref<10x10x16xf32, #tpu.memory_space<vmem>>, vector<8x8x16xf32>
    %65 = vector.shape_cast %64 : vector<8x8x16xf32> to vector<64x16xf32>
    %c7 = arith.constant 7 : index
    %c0_44 = arith.constant 0 : index
    %c0_45 = arith.constant 0 : index
    %66 = vector.load %arg3[%c7, %c0_44, %c0_45] : memref<9x16x16xf32, #tpu.memory_space<vmem>>, vector<1x16x16xf32>
    %67 = vector.shape_cast %66 : vector<1x16x16xf32> to vector<16x16xf32>
    %cst_46 = arith.constant dense<0.000000e+00> : vector<64x16xf32>
    %68 = tpu.matmul %65, %67, %cst_46 {dimension_numbers = #tpu.dot_dimension_numbers<[1], [0], [0], [1], [0, 0, 1, 1], [], []>} : vector<64x16xf32>, vector<16x16xf32>, vector<64x16xf32> -> vector<64x16xf32>
    %69 = arith.addf %61, %68 : vector<64x16xf32>
    %c2_i32_47 = arith.constant 2 : i32
    %70 = arith.addi %4, %c2_i32_47 : i32
    %71 = arith.index_cast %70 : i32 to index
    %c2_48 = arith.constant 2 : index
    %c0_49 = arith.constant 0 : index
    %72 = vector.load %arg8[%71, %c2_48, %c0_49] : memref<10x10x16xf32, #tpu.memory_space<vmem>>, vector<8x8x16xf32>
    %73 = vector.shape_cast %72 : vector<8x8x16xf32> to vector<64x16xf32>
    %c8 = arith.constant 8 : index
    %c0_50 = arith.constant 0 : index
    %c0_51 = arith.constant 0 : index
    %74 = vector.load %arg3[%c8, %c0_50, %c0_51] : memref<9x16x16xf32, #tpu.memory_space<vmem>>, vector<1x16x16xf32>
    %75 = vector.shape_cast %74 : vector<1x16x16xf32> to vector<16x16xf32>
    %cst_52 = arith.constant dense<0.000000e+00> : vector<64x16xf32>
    %76 = tpu.matmul %73, %75, %cst_52 {dimension_numbers = #tpu.dot_dimension_numbers<[1], [0], [0], [1], [0, 0, 1, 1], [], []>} : vector<64x16xf32>, vector<16x16xf32>, vector<64x16xf32> -> vector<64x16xf32>
    %77 = arith.addf %69, %76 : vector<64x16xf32>
    %c0_53 = arith.constant 0 : index
    %c0_54 = arith.constant 0 : index
    %78 = vector.load %arg4[%c0_53, %c0_54] : memref<1x16xf32, #tpu.memory_space<vmem>>, vector<1x16xf32>
    %79 = vector.broadcast %78 : vector<1x16xf32> to vector<64x16xf32>
    %80 = arith.mulf %77, %79 : vector<64x16xf32>
    %c0_55 = arith.constant 0 : index
    %c0_56 = arith.constant 0 : index
    %81 = vector.load %arg5[%c0_55, %c0_56] : memref<1x16xf32, #tpu.memory_space<vmem>>, vector<1x16xf32>
    %82 = vector.broadcast %81 : vector<1x16xf32> to vector<64x16xf32>
    %83 = arith.addf %80, %82 : vector<64x16xf32>
    %cst_57 = arith.constant 0.000000e+00 : f32
    %84 = vector.broadcast %cst_57 : f32 to vector<64x16xf32>
    %85 = arith.maximumf %83, %84 : vector<64x16xf32>
    %86 = vector.shape_cast %85 : vector<64x16xf32> to vector<8x8x16xf32>
    %c0_58 = arith.constant 0 : index
    %c0_59 = arith.constant 0 : index
    %c0_60 = arith.constant 0 : index
    %c0_61 = arith.constant 0 : index
    %87 = vector.load %arg6[%c0_58, %c0_59, %c0_60, %c0_61] : memref<1x8x8x16xf32, #tpu.memory_space<vmem>>, vector<1x8x8x16xf32>
    %88 = vector.shape_cast %87 : vector<1x8x8x16xf32> to vector<8x8x16xf32>
    %89 = vector.shape_cast %86 : vector<8x8x16xf32> to vector<1x8x8x16xf32>
    tpu.vector_store %arg6[%c0_58, %c0_59, %c0_60, %c0_61], %89 {strides = array<i32>} : memref<1x8x8x16xf32, #tpu.memory_space<vmem>>, vector<1x8x8x16xf32>,
    %90 = vector.shape_cast %86 : vector<8x8x16xf32> to vector<4x2x8x16xf32>
    %91 = vector.extract_strided_slice %90 {offsets = [0, 0, 0, 0], sizes = [4, 1, 8, 16], strides = [1, 1, 1, 1]} : vector<4x2x8x16xf32> to vector<4x1x8x16xf32>
    %92 = vector.shape_cast %91 : vector<4x1x8x16xf32> to vector<4x8x16xf32>
    %93 = vector.extract_strided_slice %90 {offsets = [0, 1, 0, 0], sizes = [4, 1, 8, 16], strides = [1, 1, 1, 1]} : vector<4x2x8x16xf32> to vector<4x1x8x16xf32>
    %94 = vector.shape_cast %93 : vector<4x1x8x16xf32> to vector<4x8x16xf32>
    %95 = arith.maximumf %92, %94 : vector<4x8x16xf32>
    %96 = vector.shape_cast %95 : vector<4x8x16xf32> to vector<4x4x2x16xf32>
    %97 = vector.extract_strided_slice %96 {offsets = [0, 0, 0, 0], sizes = [4, 4, 1, 16], strides = [1, 1, 1, 1]} : vector<4x4x2x16xf32> to vector<4x4x1x16xf32>
    %98 = vector.shape_cast %97 : vector<4x4x1x16xf32> to vector<4x4x16xf32>
    %99 = vector.extract_strided_slice %96 {offsets = [0, 0, 1, 0], sizes = [4, 4, 1, 16], strides = [1, 1, 1, 1]} : vector<4x4x2x16xf32> to vector<4x4x1x16xf32>
    %100 = vector.shape_cast %99 : vector<4x4x1x16xf32> to vector<4x4x16xf32>
    %101 = arith.maximumf %98, %100 : vector<4x4x16xf32>
    %c0_62 = arith.constant 0 : index
    %c0_63 = arith.constant 0 : index
    %c0_64 = arith.constant 0 : index
    %c0_65 = arith.constant 0 : index
    %102 = vector.load %arg7[%c0_62, %c0_63, %c0_64, %c0_65] : memref<1x4x4x16xf32, #tpu.memory_space<vmem>>, vector<1x4x4x16xf32>
    %103 = vector.shape_cast %102 : vector<1x4x4x16xf32> to vector<4x4x16xf32>
    %104 = vector.shape_cast %101 : vector<4x4x16xf32> to vector<1x4x4x16xf32>
    tpu.vector_store %arg7[%c0_62, %c0_63, %c0_64, %c0_65], %104 {strides = array<i32>} : memref<1x4x4x16xf32, #tpu.memory_space<vmem>>, vector<1x4x4x16xf32>,
    return
  }
  func.func @transform_0(%arg0: i32, %arg1: i32) -> (i32, i32, i32, i32) {
    %c0_i32 = arith.constant 0 : i32
    %c0_i32_0 = arith.constant 0 : i32
    %c0_i32_1 = arith.constant 0 : i32
    %c0_i32_2 = arith.constant 0 : i32
    return %arg0, %c0_i32, %c0_i32_0, %c0_i32_1 : i32, i32, i32, i32
  }
  func.func @transform_1(%arg0: i32, %arg1: i32) -> (i32, i32, i32) {
    %c0_i32 = arith.constant 0 : i32
    %c0_i32_0 = arith.constant 0 : i32
    %c0_i32_1 = arith.constant 0 : i32
    %c0_i32_2 = arith.constant 0 : i32
    return %c0_i32, %c0_i32_0, %c0_i32_1 : i32, i32, i32
  }
  func.func @transform_2(%arg0: i32, %arg1: i32) -> (i32, i32) {
    %c0_i32 = arith.constant 0 : i32
    %c0_i32_0 = arith.constant 0 : i32
    %c0_i32_1 = arith.constant 0 : i32
    return %c0_i32, %c0_i32_0 : i32, i32
  }
  func.func @transform_3(%arg0: i32, %arg1: i32) -> (i32, i32) {
    %c0_i32 = arith.constant 0 : i32
    %c0_i32_0 = arith.constant 0 : i32
    %c0_i32_1 = arith.constant 0 : i32
    return %c0_i32, %c0_i32_0 : i32, i32
  }
  func.func @transform_4(%arg0: i32, %arg1: i32) -> (i32, i32, i32, i32) {
    %c0_i32 = arith.constant 0 : i32
    %c0_i32_0 = arith.constant 0 : i32
    %c0_i32_1 = arith.constant 0 : i32
    return %arg0, %arg1, %c0_i32, %c0_i32_0 : i32, i32, i32, i32
  }
  func.func @transform_5(%arg0: i32, %arg1: i32) -> (i32, i32, i32, i32) {
    %c0_i32 = arith.constant 0 : i32
    %c0_i32_0 = arith.constant 0 : i32
    %c0_i32_1 = arith.constant 0 : i32
    return %arg0, %arg1, %c0_i32, %c0_i32_0 : i32, i32, i32, i32
  }
}

module attributes {stable_mosaic.version = 11 : i64} {
  func.func @conv3x3_bn_relu_kernel(%arg0: i32, %arg1: i32, %arg2: memref<1x4x4x16xf32, #tpu.memory_space<vmem>>, %arg3: memref<9x16x32xf32, #tpu.memory_space<vmem>>, %arg4: memref<1x32xf32, #tpu.memory_space<vmem>>, %arg5: memref<1x32xf32, #tpu.memory_space<vmem>>, %arg6: memref<1x4x4x32xf32, #tpu.memory_space<vmem>>, %arg7: memref<6x6x16xf32, #tpu.memory_space<vmem>>) attributes {dimension_semantics = [#tpu.dimension_semantics<parallel>, #tpu.dimension_semantics<arbitrary>], iteration_bounds = array<i64: 2, 1>, scalar_prefetch = 0 : i64, scratch_operands = 1 : i64, tpu.core_type = #tpu.core_type<tc>, window_params = [{transform_indices = @transform_0, window_bounds = array<i64: 1, 4, 4, 16>}, {pipeline_mode = #tpu.pipeline_mode<synchronous>, transform_indices = @transform_1, window_bounds = array<i64: 9, 16, 32>}, {pipeline_mode = #tpu.pipeline_mode<synchronous>, transform_indices = @transform_2, window_bounds = array<i64: 1, 32>}, {pipeline_mode = #tpu.pipeline_mode<synchronous>, transform_indices = @transform_3, window_bounds = array<i64: 1, 32>}, {transform_indices = @transform_4, window_bounds = array<i64: 1, 4, 4, 32>}]} {
    %c0_i32 = arith.constant 0 : i32
    %0 = arith.cmpi eq, %arg1, %c0_i32 : i32
    %1 = arith.extui %0 : i1 to i32
    %c0_i32_0 = arith.constant 0 : i32
    %2 = arith.cmpi ne, %1, %c0_i32_0 : i32
    scf.if %2 {
      %cst_62 = arith.constant 0.000000e+00 : f32
      %90 = vector.broadcast %cst_62 : f32 to vector<1x6x16xf32>
      %cst_63 = arith.constant 0.000000e+00 : f32
      %91 = vector.broadcast %cst_63 : f32 to vector<6x1x16xf32>
      %c0_64 = arith.constant 0 : index
      %c0_65 = arith.constant 0 : index
      %c0_66 = arith.constant 0 : index
      %92 = vector.load %arg7[%c0_64, %c0_65, %c0_66] : memref<6x6x16xf32, #tpu.memory_space<vmem>>, vector<1x6x16xf32>
      tpu.vector_store %arg7[%c0_64, %c0_65, %c0_66], %90 {strides = array<i32>} : memref<6x6x16xf32, #tpu.memory_space<vmem>>, vector<1x6x16xf32>,
      %c5_67 = arith.constant 5 : index
      %c0_68 = arith.constant 0 : index
      %c0_69 = arith.constant 0 : index
      %93 = vector.load %arg7[%c5_67, %c0_68, %c0_69] : memref<6x6x16xf32, #tpu.memory_space<vmem>>, vector<1x6x16xf32>
      tpu.vector_store %arg7[%c5_67, %c0_68, %c0_69], %90 {strides = array<i32>} : memref<6x6x16xf32, #tpu.memory_space<vmem>>, vector<1x6x16xf32>,
      %c0_70 = arith.constant 0 : index
      %c0_71 = arith.constant 0 : index
      %c0_72 = arith.constant 0 : index
      %94 = vector.load %arg7[%c0_70, %c0_71, %c0_72] : memref<6x6x16xf32, #tpu.memory_space<vmem>>, vector<6x1x16xf32>
      tpu.vector_store %arg7[%c0_70, %c0_71, %c0_72], %91 {strides = array<i32>} : memref<6x6x16xf32, #tpu.memory_space<vmem>>, vector<6x1x16xf32>,
      %c0_73 = arith.constant 0 : index
      %c5_74 = arith.constant 5 : index
      %c0_75 = arith.constant 0 : index
      %95 = vector.load %arg7[%c0_73, %c5_74, %c0_75] : memref<6x6x16xf32, #tpu.memory_space<vmem>>, vector<6x1x16xf32>
      tpu.vector_store %arg7[%c0_73, %c5_74, %c0_75], %91 {strides = array<i32>} : memref<6x6x16xf32, #tpu.memory_space<vmem>>, vector<6x1x16xf32>,
      %c0_76 = arith.constant 0 : index
      %c0_77 = arith.constant 0 : index
      %c0_78 = arith.constant 0 : index
      %c0_79 = arith.constant 0 : index
      %96 = vector.load %arg2[%c0_76, %c0_77, %c0_78, %c0_79] : memref<1x4x4x16xf32, #tpu.memory_space<vmem>>, vector<1x4x4x16xf32>
      %97 = vector.shape_cast %96 : vector<1x4x4x16xf32> to vector<4x4x16xf32>
      %c1_80 = arith.constant 1 : index
      %c1_81 = arith.constant 1 : index
      %c0_82 = arith.constant 0 : index
      %98 = vector.load %arg7[%c1_80, %c1_81, %c0_82] : memref<6x6x16xf32, #tpu.memory_space<vmem>>, vector<4x4x16xf32>
      tpu.vector_store %arg7[%c1_80, %c1_81, %c0_82], %97 {strides = array<i32>} : memref<6x6x16xf32, #tpu.memory_space<vmem>>, vector<4x4x16xf32>,
    } else {
    }
    %c4_i32 = arith.constant 4 : i32
    %3 = arith.muli %arg1, %c4_i32 : i32
    %4 = tpu.assume_multiple %3, 4 : i32
    %cst = arith.constant 0.000000e+00 : f32
    %5 = vector.broadcast %cst : f32 to vector<16x32xf32>
    %c0_i32_1 = arith.constant 0 : i32
    %6 = arith.addi %4, %c0_i32_1 : i32
    %7 = arith.index_cast %6 : i32 to index
    %c0 = arith.constant 0 : index
    %c0_2 = arith.constant 0 : index
    %8 = vector.load %arg7[%7, %c0, %c0_2] : memref<6x6x16xf32, #tpu.memory_space<vmem>>, vector<4x4x16xf32>
    %9 = vector.shape_cast %8 : vector<4x4x16xf32> to vector<16x16xf32>
    %c0_3 = arith.constant 0 : index
    %c0_4 = arith.constant 0 : index
    %c0_5 = arith.constant 0 : index
    %10 = vector.load %arg3[%c0_3, %c0_4, %c0_5] : memref<9x16x32xf32, #tpu.memory_space<vmem>>, vector<1x16x32xf32>
    %11 = vector.shape_cast %10 : vector<1x16x32xf32> to vector<16x32xf32>
    %cst_6 = arith.constant dense<0.000000e+00> : vector<16x32xf32>
    %12 = tpu.matmul %9, %11, %cst_6 {dimension_numbers = #tpu.dot_dimension_numbers<[1], [0], [0], [1], [0, 0, 1, 1], [], []>} : vector<16x16xf32>, vector<16x32xf32>, vector<16x32xf32> -> vector<16x32xf32>
    %13 = arith.addf %5, %12 : vector<16x32xf32>
    %c0_i32_7 = arith.constant 0 : i32
    %14 = arith.addi %4, %c0_i32_7 : i32
    %15 = arith.index_cast %14 : i32 to index
    %c1 = arith.constant 1 : index
    %c0_8 = arith.constant 0 : index
    %16 = vector.load %arg7[%15, %c1, %c0_8] : memref<6x6x16xf32, #tpu.memory_space<vmem>>, vector<4x4x16xf32>
    %17 = vector.shape_cast %16 : vector<4x4x16xf32> to vector<16x16xf32>
    %c1_9 = arith.constant 1 : index
    %c0_10 = arith.constant 0 : index
    %c0_11 = arith.constant 0 : index
    %18 = vector.load %arg3[%c1_9, %c0_10, %c0_11] : memref<9x16x32xf32, #tpu.memory_space<vmem>>, vector<1x16x32xf32>
    %19 = vector.shape_cast %18 : vector<1x16x32xf32> to vector<16x32xf32>
    %cst_12 = arith.constant dense<0.000000e+00> : vector<16x32xf32>
    %20 = tpu.matmul %17, %19, %cst_12 {dimension_numbers = #tpu.dot_dimension_numbers<[1], [0], [0], [1], [0, 0, 1, 1], [], []>} : vector<16x16xf32>, vector<16x32xf32>, vector<16x32xf32> -> vector<16x32xf32>
    %21 = arith.addf %13, %20 : vector<16x32xf32>
    %c0_i32_13 = arith.constant 0 : i32
    %22 = arith.addi %4, %c0_i32_13 : i32
    %23 = arith.index_cast %22 : i32 to index
    %c2 = arith.constant 2 : index
    %c0_14 = arith.constant 0 : index
    %24 = vector.load %arg7[%23, %c2, %c0_14] : memref<6x6x16xf32, #tpu.memory_space<vmem>>, vector<4x4x16xf32>
    %25 = vector.shape_cast %24 : vector<4x4x16xf32> to vector<16x16xf32>
    %c2_15 = arith.constant 2 : index
    %c0_16 = arith.constant 0 : index
    %c0_17 = arith.constant 0 : index
    %26 = vector.load %arg3[%c2_15, %c0_16, %c0_17] : memref<9x16x32xf32, #tpu.memory_space<vmem>>, vector<1x16x32xf32>
    %27 = vector.shape_cast %26 : vector<1x16x32xf32> to vector<16x32xf32>
    %cst_18 = arith.constant dense<0.000000e+00> : vector<16x32xf32>
    %28 = tpu.matmul %25, %27, %cst_18 {dimension_numbers = #tpu.dot_dimension_numbers<[1], [0], [0], [1], [0, 0, 1, 1], [], []>} : vector<16x16xf32>, vector<16x32xf32>, vector<16x32xf32> -> vector<16x32xf32>
    %29 = arith.addf %21, %28 : vector<16x32xf32>
    %c1_i32 = arith.constant 1 : i32
    %30 = arith.addi %4, %c1_i32 : i32
    %31 = arith.index_cast %30 : i32 to index
    %c0_19 = arith.constant 0 : index
    %c0_20 = arith.constant 0 : index
    %32 = vector.load %arg7[%31, %c0_19, %c0_20] : memref<6x6x16xf32, #tpu.memory_space<vmem>>, vector<4x4x16xf32>
    %33 = vector.shape_cast %32 : vector<4x4x16xf32> to vector<16x16xf32>
    %c3 = arith.constant 3 : index
    %c0_21 = arith.constant 0 : index
    %c0_22 = arith.constant 0 : index
    %34 = vector.load %arg3[%c3, %c0_21, %c0_22] : memref<9x16x32xf32, #tpu.memory_space<vmem>>, vector<1x16x32xf32>
    %35 = vector.shape_cast %34 : vector<1x16x32xf32> to vector<16x32xf32>
    %cst_23 = arith.constant dense<0.000000e+00> : vector<16x32xf32>
    %36 = tpu.matmul %33, %35, %cst_23 {dimension_numbers = #tpu.dot_dimension_numbers<[1], [0], [0], [1], [0, 0, 1, 1], [], []>} : vector<16x16xf32>, vector<16x32xf32>, vector<16x32xf32> -> vector<16x32xf32>
    %37 = arith.addf %29, %36 : vector<16x32xf32>
    %c1_i32_24 = arith.constant 1 : i32
    %38 = arith.addi %4, %c1_i32_24 : i32
    %39 = arith.index_cast %38 : i32 to index
    %c1_25 = arith.constant 1 : index
    %c0_26 = arith.constant 0 : index
    %40 = vector.load %arg7[%39, %c1_25, %c0_26] : memref<6x6x16xf32, #tpu.memory_space<vmem>>, vector<4x4x16xf32>
    %41 = vector.shape_cast %40 : vector<4x4x16xf32> to vector<16x16xf32>
    %c4 = arith.constant 4 : index
    %c0_27 = arith.constant 0 : index
    %c0_28 = arith.constant 0 : index
    %42 = vector.load %arg3[%c4, %c0_27, %c0_28] : memref<9x16x32xf32, #tpu.memory_space<vmem>>, vector<1x16x32xf32>
    %43 = vector.shape_cast %42 : vector<1x16x32xf32> to vector<16x32xf32>
    %cst_29 = arith.constant dense<0.000000e+00> : vector<16x32xf32>
    %44 = tpu.matmul %41, %43, %cst_29 {dimension_numbers = #tpu.dot_dimension_numbers<[1], [0], [0], [1], [0, 0, 1, 1], [], []>} : vector<16x16xf32>, vector<16x32xf32>, vector<16x32xf32> -> vector<16x32xf32>
    %45 = arith.addf %37, %44 : vector<16x32xf32>
    %c1_i32_30 = arith.constant 1 : i32
    %46 = arith.addi %4, %c1_i32_30 : i32
    %47 = arith.index_cast %46 : i32 to index
    %c2_31 = arith.constant 2 : index
    %c0_32 = arith.constant 0 : index
    %48 = vector.load %arg7[%47, %c2_31, %c0_32] : memref<6x6x16xf32, #tpu.memory_space<vmem>>, vector<4x4x16xf32>
    %49 = vector.shape_cast %48 : vector<4x4x16xf32> to vector<16x16xf32>
    %c5 = arith.constant 5 : index
    %c0_33 = arith.constant 0 : index
    %c0_34 = arith.constant 0 : index
    %50 = vector.load %arg3[%c5, %c0_33, %c0_34] : memref<9x16x32xf32, #tpu.memory_space<vmem>>, vector<1x16x32xf32>
    %51 = vector.shape_cast %50 : vector<1x16x32xf32> to vector<16x32xf32>
    %cst_35 = arith.constant dense<0.000000e+00> : vector<16x32xf32>
    %52 = tpu.matmul %49, %51, %cst_35 {dimension_numbers = #tpu.dot_dimension_numbers<[1], [0], [0], [1], [0, 0, 1, 1], [], []>} : vector<16x16xf32>, vector<16x32xf32>, vector<16x32xf32> -> vector<16x32xf32>
    %53 = arith.addf %45, %52 : vector<16x32xf32>
    %c2_i32 = arith.constant 2 : i32
    %54 = arith.addi %4, %c2_i32 : i32
    %55 = arith.index_cast %54 : i32 to index
    %c0_36 = arith.constant 0 : index
    %c0_37 = arith.constant 0 : index
    %56 = vector.load %arg7[%55, %c0_36, %c0_37] : memref<6x6x16xf32, #tpu.memory_space<vmem>>, vector<4x4x16xf32>
    %57 = vector.shape_cast %56 : vector<4x4x16xf32> to vector<16x16xf32>
    %c6 = arith.constant 6 : index
    %c0_38 = arith.constant 0 : index
    %c0_39 = arith.constant 0 : index
    %58 = vector.load %arg3[%c6, %c0_38, %c0_39] : memref<9x16x32xf32, #tpu.memory_space<vmem>>, vector<1x16x32xf32>
    %59 = vector.shape_cast %58 : vector<1x16x32xf32> to vector<16x32xf32>
    %cst_40 = arith.constant dense<0.000000e+00> : vector<16x32xf32>
    %60 = tpu.matmul %57, %59, %cst_40 {dimension_numbers = #tpu.dot_dimension_numbers<[1], [0], [0], [1], [0, 0, 1, 1], [], []>} : vector<16x16xf32>, vector<16x32xf32>, vector<16x32xf32> -> vector<16x32xf32>
    %61 = arith.addf %53, %60 : vector<16x32xf32>
    %c2_i32_41 = arith.constant 2 : i32
    %62 = arith.addi %4, %c2_i32_41 : i32
    %63 = arith.index_cast %62 : i32 to index
    %c1_42 = arith.constant 1 : index
    %c0_43 = arith.constant 0 : index
    %64 = vector.load %arg7[%63, %c1_42, %c0_43] : memref<6x6x16xf32, #tpu.memory_space<vmem>>, vector<4x4x16xf32>
    %65 = vector.shape_cast %64 : vector<4x4x16xf32> to vector<16x16xf32>
    %c7 = arith.constant 7 : index
    %c0_44 = arith.constant 0 : index
    %c0_45 = arith.constant 0 : index
    %66 = vector.load %arg3[%c7, %c0_44, %c0_45] : memref<9x16x32xf32, #tpu.memory_space<vmem>>, vector<1x16x32xf32>
    %67 = vector.shape_cast %66 : vector<1x16x32xf32> to vector<16x32xf32>
    %cst_46 = arith.constant dense<0.000000e+00> : vector<16x32xf32>
    %68 = tpu.matmul %65, %67, %cst_46 {dimension_numbers = #tpu.dot_dimension_numbers<[1], [0], [0], [1], [0, 0, 1, 1], [], []>} : vector<16x16xf32>, vector<16x32xf32>, vector<16x32xf32> -> vector<16x32xf32>
    %69 = arith.addf %61, %68 : vector<16x32xf32>
    %c2_i32_47 = arith.constant 2 : i32
    %70 = arith.addi %4, %c2_i32_47 : i32
    %71 = arith.index_cast %70 : i32 to index
    %c2_48 = arith.constant 2 : index
    %c0_49 = arith.constant 0 : index
    %72 = vector.load %arg7[%71, %c2_48, %c0_49] : memref<6x6x16xf32, #tpu.memory_space<vmem>>, vector<4x4x16xf32>
    %73 = vector.shape_cast %72 : vector<4x4x16xf32> to vector<16x16xf32>
    %c8 = arith.constant 8 : index
    %c0_50 = arith.constant 0 : index
    %c0_51 = arith.constant 0 : index
    %74 = vector.load %arg3[%c8, %c0_50, %c0_51] : memref<9x16x32xf32, #tpu.memory_space<vmem>>, vector<1x16x32xf32>
    %75 = vector.shape_cast %74 : vector<1x16x32xf32> to vector<16x32xf32>
    %cst_52 = arith.constant dense<0.000000e+00> : vector<16x32xf32>
    %76 = tpu.matmul %73, %75, %cst_52 {dimension_numbers = #tpu.dot_dimension_numbers<[1], [0], [0], [1], [0, 0, 1, 1], [], []>} : vector<16x16xf32>, vector<16x32xf32>, vector<16x32xf32> -> vector<16x32xf32>
    %77 = arith.addf %69, %76 : vector<16x32xf32>
    %c0_53 = arith.constant 0 : index
    %c0_54 = arith.constant 0 : index
    %78 = vector.load %arg4[%c0_53, %c0_54] : memref<1x32xf32, #tpu.memory_space<vmem>>, vector<1x32xf32>
    %79 = vector.broadcast %78 : vector<1x32xf32> to vector<16x32xf32>
    %80 = arith.mulf %77, %79 : vector<16x32xf32>
    %c0_55 = arith.constant 0 : index
    %c0_56 = arith.constant 0 : index
    %81 = vector.load %arg5[%c0_55, %c0_56] : memref<1x32xf32, #tpu.memory_space<vmem>>, vector<1x32xf32>
    %82 = vector.broadcast %81 : vector<1x32xf32> to vector<16x32xf32>
    %83 = arith.addf %80, %82 : vector<16x32xf32>
    %cst_57 = arith.constant 0.000000e+00 : f32
    %84 = vector.broadcast %cst_57 : f32 to vector<16x32xf32>
    %85 = arith.maximumf %83, %84 : vector<16x32xf32>
    %86 = vector.shape_cast %85 : vector<16x32xf32> to vector<4x4x32xf32>
    %c0_58 = arith.constant 0 : index
    %c0_59 = arith.constant 0 : index
    %c0_60 = arith.constant 0 : index
    %c0_61 = arith.constant 0 : index
    %87 = vector.load %arg6[%c0_58, %c0_59, %c0_60, %c0_61] : memref<1x4x4x32xf32, #tpu.memory_space<vmem>>, vector<1x4x4x32xf32>
    %88 = vector.shape_cast %87 : vector<1x4x4x32xf32> to vector<4x4x32xf32>
    %89 = vector.shape_cast %86 : vector<4x4x32xf32> to vector<1x4x4x32xf32>
    tpu.vector_store %arg6[%c0_58, %c0_59, %c0_60, %c0_61], %89 {strides = array<i32>} : memref<1x4x4x32xf32, #tpu.memory_space<vmem>>, vector<1x4x4x32xf32>,
    return
  }
  func.func @transform_0(%arg0: i32, %arg1: i32) -> (i32, i32, i32, i32) {
    %c0_i32 = arith.constant 0 : i32
    %c0_i32_0 = arith.constant 0 : i32
    %c0_i32_1 = arith.constant 0 : i32
    %c0_i32_2 = arith.constant 0 : i32
    return %arg0, %c0_i32, %c0_i32_0, %c0_i32_1 : i32, i32, i32, i32
  }
  func.func @transform_1(%arg0: i32, %arg1: i32) -> (i32, i32, i32) {
    %c0_i32 = arith.constant 0 : i32
    %c0_i32_0 = arith.constant 0 : i32
    %c0_i32_1 = arith.constant 0 : i32
    %c0_i32_2 = arith.constant 0 : i32
    return %c0_i32, %c0_i32_0, %c0_i32_1 : i32, i32, i32
  }
  func.func @transform_2(%arg0: i32, %arg1: i32) -> (i32, i32) {
    %c0_i32 = arith.constant 0 : i32
    %c0_i32_0 = arith.constant 0 : i32
    %c0_i32_1 = arith.constant 0 : i32
    return %c0_i32, %c0_i32_0 : i32, i32
  }
  func.func @transform_3(%arg0: i32, %arg1: i32) -> (i32, i32) {
    %c0_i32 = arith.constant 0 : i32
    %c0_i32_0 = arith.constant 0 : i32
    %c0_i32_1 = arith.constant 0 : i32
    return %c0_i32, %c0_i32_0 : i32, i32
  }
  func.func @transform_4(%arg0: i32, %arg1: i32) -> (i32, i32, i32, i32) {
    %c0_i32 = arith.constant 0 : i32
    %c0_i32_0 = arith.constant 0 : i32
    %c0_i32_1 = arith.constant 0 : i32
    return %arg0, %arg1, %c0_i32, %c0_i32_0 : i32, i32, i32, i32
  }
}

module attributes {stable_mosaic.version = 11 : i64} {
  func.func @conv3x3_bn_relu_kernel(%arg0: i32, %arg1: i32, %arg2: memref<1x4x4x32xf32, #tpu.memory_space<vmem>>, %arg3: memref<9x32x32xf32, #tpu.memory_space<vmem>>, %arg4: memref<1x32xf32, #tpu.memory_space<vmem>>, %arg5: memref<1x32xf32, #tpu.memory_space<vmem>>, %arg6: memref<1x4x4x32xf32, #tpu.memory_space<vmem>>, %arg7: memref<6x6x32xf32, #tpu.memory_space<vmem>>) attributes {dimension_semantics = [#tpu.dimension_semantics<parallel>, #tpu.dimension_semantics<arbitrary>], iteration_bounds = array<i64: 2, 1>, scalar_prefetch = 0 : i64, scratch_operands = 1 : i64, tpu.core_type = #tpu.core_type<tc>, window_params = [{transform_indices = @transform_0, window_bounds = array<i64: 1, 4, 4, 32>}, {pipeline_mode = #tpu.pipeline_mode<synchronous>, transform_indices = @transform_1, window_bounds = array<i64: 9, 32, 32>}, {pipeline_mode = #tpu.pipeline_mode<synchronous>, transform_indices = @transform_2, window_bounds = array<i64: 1, 32>}, {pipeline_mode = #tpu.pipeline_mode<synchronous>, transform_indices = @transform_3, window_bounds = array<i64: 1, 32>}, {transform_indices = @transform_4, window_bounds = array<i64: 1, 4, 4, 32>}]} {
    %c0_i32 = arith.constant 0 : i32
    %0 = arith.cmpi eq, %arg1, %c0_i32 : i32
    %1 = arith.extui %0 : i1 to i32
    %c0_i32_0 = arith.constant 0 : i32
    %2 = arith.cmpi ne, %1, %c0_i32_0 : i32
    scf.if %2 {
      %cst_62 = arith.constant 0.000000e+00 : f32
      %90 = vector.broadcast %cst_62 : f32 to vector<1x6x32xf32>
      %cst_63 = arith.constant 0.000000e+00 : f32
      %91 = vector.broadcast %cst_63 : f32 to vector<6x1x32xf32>
      %c0_64 = arith.constant 0 : index
      %c0_65 = arith.constant 0 : index
      %c0_66 = arith.constant 0 : index
      %92 = vector.load %arg7[%c0_64, %c0_65, %c0_66] : memref<6x6x32xf32, #tpu.memory_space<vmem>>, vector<1x6x32xf32>
      tpu.vector_store %arg7[%c0_64, %c0_65, %c0_66], %90 {strides = array<i32>} : memref<6x6x32xf32, #tpu.memory_space<vmem>>, vector<1x6x32xf32>,
      %c5_67 = arith.constant 5 : index
      %c0_68 = arith.constant 0 : index
      %c0_69 = arith.constant 0 : index
      %93 = vector.load %arg7[%c5_67, %c0_68, %c0_69] : memref<6x6x32xf32, #tpu.memory_space<vmem>>, vector<1x6x32xf32>
      tpu.vector_store %arg7[%c5_67, %c0_68, %c0_69], %90 {strides = array<i32>} : memref<6x6x32xf32, #tpu.memory_space<vmem>>, vector<1x6x32xf32>,
      %c0_70 = arith.constant 0 : index
      %c0_71 = arith.constant 0 : index
      %c0_72 = arith.constant 0 : index
      %94 = vector.load %arg7[%c0_70, %c0_71, %c0_72] : memref<6x6x32xf32, #tpu.memory_space<vmem>>, vector<6x1x32xf32>
      tpu.vector_store %arg7[%c0_70, %c0_71, %c0_72], %91 {strides = array<i32>} : memref<6x6x32xf32, #tpu.memory_space<vmem>>, vector<6x1x32xf32>,
      %c0_73 = arith.constant 0 : index
      %c5_74 = arith.constant 5 : index
      %c0_75 = arith.constant 0 : index
      %95 = vector.load %arg7[%c0_73, %c5_74, %c0_75] : memref<6x6x32xf32, #tpu.memory_space<vmem>>, vector<6x1x32xf32>
      tpu.vector_store %arg7[%c0_73, %c5_74, %c0_75], %91 {strides = array<i32>} : memref<6x6x32xf32, #tpu.memory_space<vmem>>, vector<6x1x32xf32>,
      %c0_76 = arith.constant 0 : index
      %c0_77 = arith.constant 0 : index
      %c0_78 = arith.constant 0 : index
      %c0_79 = arith.constant 0 : index
      %96 = vector.load %arg2[%c0_76, %c0_77, %c0_78, %c0_79] : memref<1x4x4x32xf32, #tpu.memory_space<vmem>>, vector<1x4x4x32xf32>
      %97 = vector.shape_cast %96 : vector<1x4x4x32xf32> to vector<4x4x32xf32>
      %c1_80 = arith.constant 1 : index
      %c1_81 = arith.constant 1 : index
      %c0_82 = arith.constant 0 : index
      %98 = vector.load %arg7[%c1_80, %c1_81, %c0_82] : memref<6x6x32xf32, #tpu.memory_space<vmem>>, vector<4x4x32xf32>
      tpu.vector_store %arg7[%c1_80, %c1_81, %c0_82], %97 {strides = array<i32>} : memref<6x6x32xf32, #tpu.memory_space<vmem>>, vector<4x4x32xf32>,
    } else {
    }
    %c4_i32 = arith.constant 4 : i32
    %3 = arith.muli %arg1, %c4_i32 : i32
    %4 = tpu.assume_multiple %3, 4 : i32
    %cst = arith.constant 0.000000e+00 : f32
    %5 = vector.broadcast %cst : f32 to vector<16x32xf32>
    %c0_i32_1 = arith.constant 0 : i32
    %6 = arith.addi %4, %c0_i32_1 : i32
    %7 = arith.index_cast %6 : i32 to index
    %c0 = arith.constant 0 : index
    %c0_2 = arith.constant 0 : index
    %8 = vector.load %arg7[%7, %c0, %c0_2] : memref<6x6x32xf32, #tpu.memory_space<vmem>>, vector<4x4x32xf32>
    %9 = vector.shape_cast %8 : vector<4x4x32xf32> to vector<16x32xf32>
    %c0_3 = arith.constant 0 : index
    %c0_4 = arith.constant 0 : index
    %c0_5 = arith.constant 0 : index
    %10 = vector.load %arg3[%c0_3, %c0_4, %c0_5] : memref<9x32x32xf32, #tpu.memory_space<vmem>>, vector<1x32x32xf32>
    %11 = vector.shape_cast %10 : vector<1x32x32xf32> to vector<32x32xf32>
    %cst_6 = arith.constant dense<0.000000e+00> : vector<16x32xf32>
    %12 = tpu.matmul %9, %11, %cst_6 {dimension_numbers = #tpu.dot_dimension_numbers<[1], [0], [0], [1], [0, 0, 1, 1], [], []>} : vector<16x32xf32>, vector<32x32xf32>, vector<16x32xf32> -> vector<16x32xf32>
    %13 = arith.addf %5, %12 : vector<16x32xf32>
    %c0_i32_7 = arith.constant 0 : i32
    %14 = arith.addi %4, %c0_i32_7 : i32
    %15 = arith.index_cast %14 : i32 to index
    %c1 = arith.constant 1 : index
    %c0_8 = arith.constant 0 : index
    %16 = vector.load %arg7[%15, %c1, %c0_8] : memref<6x6x32xf32, #tpu.memory_space<vmem>>, vector<4x4x32xf32>
    %17 = vector.shape_cast %16 : vector<4x4x32xf32> to vector<16x32xf32>
    %c1_9 = arith.constant 1 : index
    %c0_10 = arith.constant 0 : index
    %c0_11 = arith.constant 0 : index
    %18 = vector.load %arg3[%c1_9, %c0_10, %c0_11] : memref<9x32x32xf32, #tpu.memory_space<vmem>>, vector<1x32x32xf32>
    %19 = vector.shape_cast %18 : vector<1x32x32xf32> to vector<32x32xf32>
    %cst_12 = arith.constant dense<0.000000e+00> : vector<16x32xf32>
    %20 = tpu.matmul %17, %19, %cst_12 {dimension_numbers = #tpu.dot_dimension_numbers<[1], [0], [0], [1], [0, 0, 1, 1], [], []>} : vector<16x32xf32>, vector<32x32xf32>, vector<16x32xf32> -> vector<16x32xf32>
    %21 = arith.addf %13, %20 : vector<16x32xf32>
    %c0_i32_13 = arith.constant 0 : i32
    %22 = arith.addi %4, %c0_i32_13 : i32
    %23 = arith.index_cast %22 : i32 to index
    %c2 = arith.constant 2 : index
    %c0_14 = arith.constant 0 : index
    %24 = vector.load %arg7[%23, %c2, %c0_14] : memref<6x6x32xf32, #tpu.memory_space<vmem>>, vector<4x4x32xf32>
    %25 = vector.shape_cast %24 : vector<4x4x32xf32> to vector<16x32xf32>
    %c2_15 = arith.constant 2 : index
    %c0_16 = arith.constant 0 : index
    %c0_17 = arith.constant 0 : index
    %26 = vector.load %arg3[%c2_15, %c0_16, %c0_17] : memref<9x32x32xf32, #tpu.memory_space<vmem>>, vector<1x32x32xf32>
    %27 = vector.shape_cast %26 : vector<1x32x32xf32> to vector<32x32xf32>
    %cst_18 = arith.constant dense<0.000000e+00> : vector<16x32xf32>
    %28 = tpu.matmul %25, %27, %cst_18 {dimension_numbers = #tpu.dot_dimension_numbers<[1], [0], [0], [1], [0, 0, 1, 1], [], []>} : vector<16x32xf32>, vector<32x32xf32>, vector<16x32xf32> -> vector<16x32xf32>
    %29 = arith.addf %21, %28 : vector<16x32xf32>
    %c1_i32 = arith.constant 1 : i32
    %30 = arith.addi %4, %c1_i32 : i32
    %31 = arith.index_cast %30 : i32 to index
    %c0_19 = arith.constant 0 : index
    %c0_20 = arith.constant 0 : index
    %32 = vector.load %arg7[%31, %c0_19, %c0_20] : memref<6x6x32xf32, #tpu.memory_space<vmem>>, vector<4x4x32xf32>
    %33 = vector.shape_cast %32 : vector<4x4x32xf32> to vector<16x32xf32>
    %c3 = arith.constant 3 : index
    %c0_21 = arith.constant 0 : index
    %c0_22 = arith.constant 0 : index
    %34 = vector.load %arg3[%c3, %c0_21, %c0_22] : memref<9x32x32xf32, #tpu.memory_space<vmem>>, vector<1x32x32xf32>
    %35 = vector.shape_cast %34 : vector<1x32x32xf32> to vector<32x32xf32>
    %cst_23 = arith.constant dense<0.000000e+00> : vector<16x32xf32>
    %36 = tpu.matmul %33, %35, %cst_23 {dimension_numbers = #tpu.dot_dimension_numbers<[1], [0], [0], [1], [0, 0, 1, 1], [], []>} : vector<16x32xf32>, vector<32x32xf32>, vector<16x32xf32> -> vector<16x32xf32>
    %37 = arith.addf %29, %36 : vector<16x32xf32>
    %c1_i32_24 = arith.constant 1 : i32
    %38 = arith.addi %4, %c1_i32_24 : i32
    %39 = arith.index_cast %38 : i32 to index
    %c1_25 = arith.constant 1 : index
    %c0_26 = arith.constant 0 : index
    %40 = vector.load %arg7[%39, %c1_25, %c0_26] : memref<6x6x32xf32, #tpu.memory_space<vmem>>, vector<4x4x32xf32>
    %41 = vector.shape_cast %40 : vector<4x4x32xf32> to vector<16x32xf32>
    %c4 = arith.constant 4 : index
    %c0_27 = arith.constant 0 : index
    %c0_28 = arith.constant 0 : index
    %42 = vector.load %arg3[%c4, %c0_27, %c0_28] : memref<9x32x32xf32, #tpu.memory_space<vmem>>, vector<1x32x32xf32>
    %43 = vector.shape_cast %42 : vector<1x32x32xf32> to vector<32x32xf32>
    %cst_29 = arith.constant dense<0.000000e+00> : vector<16x32xf32>
    %44 = tpu.matmul %41, %43, %cst_29 {dimension_numbers = #tpu.dot_dimension_numbers<[1], [0], [0], [1], [0, 0, 1, 1], [], []>} : vector<16x32xf32>, vector<32x32xf32>, vector<16x32xf32> -> vector<16x32xf32>
    %45 = arith.addf %37, %44 : vector<16x32xf32>
    %c1_i32_30 = arith.constant 1 : i32
    %46 = arith.addi %4, %c1_i32_30 : i32
    %47 = arith.index_cast %46 : i32 to index
    %c2_31 = arith.constant 2 : index
    %c0_32 = arith.constant 0 : index
    %48 = vector.load %arg7[%47, %c2_31, %c0_32] : memref<6x6x32xf32, #tpu.memory_space<vmem>>, vector<4x4x32xf32>
    %49 = vector.shape_cast %48 : vector<4x4x32xf32> to vector<16x32xf32>
    %c5 = arith.constant 5 : index
    %c0_33 = arith.constant 0 : index
    %c0_34 = arith.constant 0 : index
    %50 = vector.load %arg3[%c5, %c0_33, %c0_34] : memref<9x32x32xf32, #tpu.memory_space<vmem>>, vector<1x32x32xf32>
    %51 = vector.shape_cast %50 : vector<1x32x32xf32> to vector<32x32xf32>
    %cst_35 = arith.constant dense<0.000000e+00> : vector<16x32xf32>
    %52 = tpu.matmul %49, %51, %cst_35 {dimension_numbers = #tpu.dot_dimension_numbers<[1], [0], [0], [1], [0, 0, 1, 1], [], []>} : vector<16x32xf32>, vector<32x32xf32>, vector<16x32xf32> -> vector<16x32xf32>
    %53 = arith.addf %45, %52 : vector<16x32xf32>
    %c2_i32 = arith.constant 2 : i32
    %54 = arith.addi %4, %c2_i32 : i32
    %55 = arith.index_cast %54 : i32 to index
    %c0_36 = arith.constant 0 : index
    %c0_37 = arith.constant 0 : index
    %56 = vector.load %arg7[%55, %c0_36, %c0_37] : memref<6x6x32xf32, #tpu.memory_space<vmem>>, vector<4x4x32xf32>
    %57 = vector.shape_cast %56 : vector<4x4x32xf32> to vector<16x32xf32>
    %c6 = arith.constant 6 : index
    %c0_38 = arith.constant 0 : index
    %c0_39 = arith.constant 0 : index
    %58 = vector.load %arg3[%c6, %c0_38, %c0_39] : memref<9x32x32xf32, #tpu.memory_space<vmem>>, vector<1x32x32xf32>
    %59 = vector.shape_cast %58 : vector<1x32x32xf32> to vector<32x32xf32>
    %cst_40 = arith.constant dense<0.000000e+00> : vector<16x32xf32>
    %60 = tpu.matmul %57, %59, %cst_40 {dimension_numbers = #tpu.dot_dimension_numbers<[1], [0], [0], [1], [0, 0, 1, 1], [], []>} : vector<16x32xf32>, vector<32x32xf32>, vector<16x32xf32> -> vector<16x32xf32>
    %61 = arith.addf %53, %60 : vector<16x32xf32>
    %c2_i32_41 = arith.constant 2 : i32
    %62 = arith.addi %4, %c2_i32_41 : i32
    %63 = arith.index_cast %62 : i32 to index
    %c1_42 = arith.constant 1 : index
    %c0_43 = arith.constant 0 : index
    %64 = vector.load %arg7[%63, %c1_42, %c0_43] : memref<6x6x32xf32, #tpu.memory_space<vmem>>, vector<4x4x32xf32>
    %65 = vector.shape_cast %64 : vector<4x4x32xf32> to vector<16x32xf32>
    %c7 = arith.constant 7 : index
    %c0_44 = arith.constant 0 : index
    %c0_45 = arith.constant 0 : index
    %66 = vector.load %arg3[%c7, %c0_44, %c0_45] : memref<9x32x32xf32, #tpu.memory_space<vmem>>, vector<1x32x32xf32>
    %67 = vector.shape_cast %66 : vector<1x32x32xf32> to vector<32x32xf32>
    %cst_46 = arith.constant dense<0.000000e+00> : vector<16x32xf32>
    %68 = tpu.matmul %65, %67, %cst_46 {dimension_numbers = #tpu.dot_dimension_numbers<[1], [0], [0], [1], [0, 0, 1, 1], [], []>} : vector<16x32xf32>, vector<32x32xf32>, vector<16x32xf32> -> vector<16x32xf32>
    %69 = arith.addf %61, %68 : vector<16x32xf32>
    %c2_i32_47 = arith.constant 2 : i32
    %70 = arith.addi %4, %c2_i32_47 : i32
    %71 = arith.index_cast %70 : i32 to index
    %c2_48 = arith.constant 2 : index
    %c0_49 = arith.constant 0 : index
    %72 = vector.load %arg7[%71, %c2_48, %c0_49] : memref<6x6x32xf32, #tpu.memory_space<vmem>>, vector<4x4x32xf32>
    %73 = vector.shape_cast %72 : vector<4x4x32xf32> to vector<16x32xf32>
    %c8 = arith.constant 8 : index
    %c0_50 = arith.constant 0 : index
    %c0_51 = arith.constant 0 : index
    %74 = vector.load %arg3[%c8, %c0_50, %c0_51] : memref<9x32x32xf32, #tpu.memory_space<vmem>>, vector<1x32x32xf32>
    %75 = vector.shape_cast %74 : vector<1x32x32xf32> to vector<32x32xf32>
    %cst_52 = arith.constant dense<0.000000e+00> : vector<16x32xf32>
    %76 = tpu.matmul %73, %75, %cst_52 {dimension_numbers = #tpu.dot_dimension_numbers<[1], [0], [0], [1], [0, 0, 1, 1], [], []>} : vector<16x32xf32>, vector<32x32xf32>, vector<16x32xf32> -> vector<16x32xf32>
    %77 = arith.addf %69, %76 : vector<16x32xf32>
    %c0_53 = arith.constant 0 : index
    %c0_54 = arith.constant 0 : index
    %78 = vector.load %arg4[%c0_53, %c0_54] : memref<1x32xf32, #tpu.memory_space<vmem>>, vector<1x32xf32>
    %79 = vector.broadcast %78 : vector<1x32xf32> to vector<16x32xf32>
    %80 = arith.mulf %77, %79 : vector<16x32xf32>
    %c0_55 = arith.constant 0 : index
    %c0_56 = arith.constant 0 : index
    %81 = vector.load %arg5[%c0_55, %c0_56] : memref<1x32xf32, #tpu.memory_space<vmem>>, vector<1x32xf32>
    %82 = vector.broadcast %81 : vector<1x32xf32> to vector<16x32xf32>
    %83 = arith.addf %80, %82 : vector<16x32xf32>
    %cst_57 = arith.constant 0.000000e+00 : f32
    %84 = vector.broadcast %cst_57 : f32 to vector<16x32xf32>
    %85 = arith.maximumf %83, %84 : vector<16x32xf32>
    %86 = vector.shape_cast %85 : vector<16x32xf32> to vector<4x4x32xf32>
    %c0_58 = arith.constant 0 : index
    %c0_59 = arith.constant 0 : index
    %c0_60 = arith.constant 0 : index
    %c0_61 = arith.constant 0 : index
    %87 = vector.load %arg6[%c0_58, %c0_59, %c0_60, %c0_61] : memref<1x4x4x32xf32, #tpu.memory_space<vmem>>, vector<1x4x4x32xf32>
    %88 = vector.shape_cast %87 : vector<1x4x4x32xf32> to vector<4x4x32xf32>
    %89 = vector.shape_cast %86 : vector<4x4x32xf32> to vector<1x4x4x32xf32>
    tpu.vector_store %arg6[%c0_58, %c0_59, %c0_60, %c0_61], %89 {strides = array<i32>} : memref<1x4x4x32xf32, #tpu.memory_space<vmem>>, vector<1x4x4x32xf32>,
    return
  }
  func.func @transform_0(%arg0: i32, %arg1: i32) -> (i32, i32, i32, i32) {
    %c0_i32 = arith.constant 0 : i32
    %c0_i32_0 = arith.constant 0 : i32
    %c0_i32_1 = arith.constant 0 : i32
    %c0_i32_2 = arith.constant 0 : i32
    return %arg0, %c0_i32, %c0_i32_0, %c0_i32_1 : i32, i32, i32, i32
  }
  func.func @transform_1(%arg0: i32, %arg1: i32) -> (i32, i32, i32) {
    %c0_i32 = arith.constant 0 : i32
    %c0_i32_0 = arith.constant 0 : i32
    %c0_i32_1 = arith.constant 0 : i32
    %c0_i32_2 = arith.constant 0 : i32
    return %c0_i32, %c0_i32_0, %c0_i32_1 : i32, i32, i32
  }
  func.func @transform_2(%arg0: i32, %arg1: i32) -> (i32, i32) {
    %c0_i32 = arith.constant 0 : i32
    %c0_i32_0 = arith.constant 0 : i32
    %c0_i32_1 = arith.constant 0 : i32
    return %c0_i32, %c0_i32_0 : i32, i32
  }
  func.func @transform_3(%arg0: i32, %arg1: i32) -> (i32, i32) {
    %c0_i32 = arith.constant 0 : i32
    %c0_i32_0 = arith.constant 0 : i32
    %c0_i32_1 = arith.constant 0 : i32
    return %c0_i32, %c0_i32_0 : i32, i32
  }
  func.func @transform_4(%arg0: i32, %arg1: i32) -> (i32, i32, i32, i32) {
    %c0_i32 = arith.constant 0 : i32
    %c0_i32_0 = arith.constant 0 : i32
    %c0_i32_1 = arith.constant 0 : i32
    return %arg0, %arg1, %c0_i32, %c0_i32_0 : i32, i32, i32, i32
  }
}

</mosaic_0001>

<bundles_post_ra>
// kernel: encoder_forward.8
= control target key start
LH: loop header
LB: loop body
LE: loop exit
PB: predicated region body
PF: predicated region fallthrough
CT: control target
= control target key end

     0   :  { %s1363_s15 = smov 0   ;;  %s1365_s16 = smov 0   ;;  %s1709_s0 = inlined_call_operand.vmem [shape: f32[2,8,8,8], index: 0, kind: input, shape index: {}]   ;;  %s1710_s1 = inlined_call_operand.vmem [shape: f32[9,8,16], index: 1, kind: input, shape index: {}]   ;;  %s1711_s2 = inlined_call_operand.vmem [shape: f32[1,16], index: 2, kind: input, shape index: {}]   ;;  %s1712_s3 = inlined_call_operand.vmem [shape: f32[1,16], index: 3, kind: input, shape index: {}]   ;;  %s1713_s4 = inlined_call_operand.vmem [shape: f32[2,8,8,16], index: 4, kind: output, shape index: {}]  }
   0x1   :  { %s1367_s17 = smov 0  }
   0x2 LB: > { %s26_s18 = sadd.s32 1, %s1331_s16  ;;  %p1146_p0 = scmp.ge.s32.totalorder %s1335_s17, 1  ;;  %s1335_s17 = sphi %s1367_s17, %s14_s17   ;;  %s1331_s16 = sphi %s1365_s16, %s1715_s16   ;;  %s1327_s15 = sphi %s1363_s15, %s1714_s15  }
   0x3   : > { %p28_p1 = scmp.ge.s32.totalorder %s26_s18, 2  ;;  %p176_p2 = scmp.lt.s32.totalorder %s1335_s17, 3 }
   0x5   : > { %s1717_s18 = smov (%p28_p1, %s26_s18), 0  ;;  %p177_p3 = pnand %p1146_p0, %p176_p2 }
   0x6   : > { %p206_p4 = scmp.lt.s32.totalorder (!%p177_p3), %s1327_s15, 1 }
   0x7   : > { %180 = sbr.rel (%p177_p3) target bundleno = 315 (0x13b), region = 36 }
   0xc   : > { %v1151_v0 = vld [vmem:[%s1710_s1 + $0x8] sm:$0xff]  ;;  %vm225_vm0 = vcmask 64512   ;;  %v1168_v1 = vld [vmem:[%s1710_s1 + $0x10] sm:$0xff]  ;;  %v1185_v2 = vld [vmem:[%s1710_s1 + $0x18] sm:$0xff]  ;;  %v1337_v4 = vmov 0.0   ;;  %vm227_vm1 = vcmask 58368  }
   0xd   : > { %1283 = vmatpush.msra.mxu1 %v1151_v0  ;;  %1284 = vmatpush.msra.mxu2 %v1151_v0  ;;  %v281_v3 = vld [vmem:[%s1710_s1] sm:$0xff]  ;;  %226 = vst.msk [vmem:[#allocation2] sm:$0xff] %vm225_vm0, %v1337_v4  ;;  %s1719_s15 = smov (!%p206_p4, %s1327_s15), 1  ;;  %vm232_vm2 = vcmask 57344   ;;  %v1219_v13 = vld [vmem:[%s1710_s1 + $0x28] sm:$0xff]  ;;  %v1236_v15 = vld [vmem:[%s1710_s1 + $0x30] sm:$0xff] }
   0xe   : > { %v1202_v5 = vld [vmem:[%s1710_s1 + $0x20] sm:$0xff]  ;;  %1285 = vmatpush.msra.mxu3 %v1151_v0  ;;  %228 = vst.msk [vmem:[#allocation2 + $0x8] sm:$0x3] %vm227_vm1, %v1337_v4  ;;  %s1281_s29 = sshll.u32 %s1719_s15, 6  ;;  %332 = vmatpush.msra.mxu0 %v1151_v0  ;;  %v1253_v17 = vld [vmem:[%s1710_s1 + $0x38] sm:$0xff]  ;;  %vm1042_vm3 = vcmask 130048  }
   0xf   : > { %472 = vmatpush.msrb.mxu2 %v1168_v1  ;;  %397 = vmatpush.msrb.mxu1 %v281_v3  ;;  %230 = vst.msk [vmem:[#allocation2 + $0x90] sm:$0xff] %vm225_vm0, %v1337_v4  ;;  %s1410_s6 = scalar_lea.vmem %s1709_s0, %s1281_s29  ;;  %v1270_v18 = vld [vmem:[%s1710_s1 + $0x40] sm:$0xff]  ;;  %s1647_s25 = scalar_lea.vmem %s1713_s4, %s1281_s29 }
  0x10   : > { %558 = vmatpush.msrb.mxu3 %v1185_v2  ;;  %231 = vst.msk [vmem:[#allocation2 + $0x98] sm:$0x3] %vm227_vm1, %v1337_v4  ;;  %641 = vmatpush.msrb.mxu0 %v1202_v5  ;;  %v254_v6 = vld [vmem:[%s1410_s6 + $0x8] sm:$0xff]  ;;  %v256_v7 = vld [vmem:[%s1410_s6 + $0x18] sm:$0xff]  ;;  %v255_v9 = vld [vmem:[%s1410_s6 + $0x10] sm:$0xff] }
  0x11   : > { %233 = vst.msk [vmem:[#allocation2] sm:$0x1] %vm232_vm2, %v1337_v4  ;;  %v258_v8 = vld [vmem:[%s1410_s6 + $0x28] sm:$0xff]  ;;  %v257_v10 = vld [vmem:[%s1410_s6 + $0x20] sm:$0xff]  ;;  %v259_v12 = vld [vmem:[%s1410_s6 + $0x30] sm:$0xff] }
  0x12   : > { %234 = vst.msk [vmem:[#allocation2 + $0x10] sm:$0x1] %vm232_vm2, %v1337_v4  ;;  %v253_v24 = vld [vmem:[%s1410_s6] sm:$0xff]  ;;  %v260_v33 = vld [vmem:[%s1410_s6 + $0x38] sm:$0xff] }
  0x13   : > { %263 = vst.msk [vmem:[#allocation2 + $0x21] sm:$0xff] %vm225_vm0, %v254_v6 }
  0x14   : > { %265 = vst.msk [vmem:[#allocation2 + $0x41] sm:$0xff] %vm225_vm0, %v256_v7 }
  0x15   : > { %267 = vst.msk [vmem:[#allocation2 + $0x61] sm:$0xff] %vm225_vm0, %v258_v8  ;;  %v282_v11 = vld [vmem:[#allocation2 + $0x1] sm:$0xff] }
  0x16   : > { %264 = vst.msk [vmem:[#allocation2 + $0x31] sm:$0xff] %vm225_vm0, %v255_v9  ;;  %1152 = vmatmul.msk.f32.vlgmr.msra.gmra.mxu0 %vm225_vm0, %v282_v11 }
  0x17   : > { %266 = vst.msk [vmem:[#allocation2 + $0x51] sm:$0xff] %vm225_vm0, %v257_v10  ;;  %976 = vmatpush.msra.mxu0 %v1270_v18  ;;  %v1252_v52 = vld [vmem:[#allocation2 + $0x91] sm:$0xff] }
  0x18   : > { %268 = vst.msk [vmem:[#allocation2 + $0x71] sm:$0xff] %vm225_vm0, %v259_v12  ;;  %v273_v23 = vld [vmem:[#allocation2] sm:$0xff] }
  0x19   : > { %235 = vst.msk [vmem:[#allocation2 + $0x20] sm:$0x1] %vm232_vm2, %v1337_v4 }
  0x1a   : > { %v1434_v14 = vld [vmem:[#allocation2 + $0x21] sm:$0xff]  ;;  %236 = vst.msk [vmem:[#allocation2 + $0x30] sm:$0x1] %vm232_vm2, %v1337_v4 }
  0x1b   : > { %1154 = vmatmul.msk.f32.vlgmr.msra.gmra.mxu1 %vm225_vm0, %v1434_v14  ;;  %v1443_v16 = vld [vmem:[#allocation2 + $0x41] sm:$0xff]  ;;  %237 = vst.msk [vmem:[#allocation2 + $0x40] sm:$0x1] %vm232_vm2, %v1337_v4 }
  0x1c   : > { %1156 = vmatmul.msk.f32.vlgmr.msra.gmra.mxu2 %vm225_vm0, %v1443_v16  ;;  %v1455_v19 = vld [vmem:[#allocation2 + $0x61] sm:$0xff]  ;;  %238 = vst.msk [vmem:[#allocation2 + $0x50] sm:$0x1] %vm232_vm2, %v1337_v4  ;;  %724 = vmatpush.msra.mxu1 %v1219_v13 }
  0x1d   : > { %1158 = vmatmul.msk.f32.vlgmr.msra.gmra.mxu3 %vm225_vm0, %v1455_v19  ;;  %239 = vst.msk [vmem:[#allocation2 + $0x60] sm:$0x1] %vm232_vm2, %v1337_v4  ;;  %810 = vmatpush.msra.mxu2 %v1236_v15  ;;  %v1467_v20 = vld [vmem:[#allocation2 + $0x31] sm:$0xff] }
  0x1e   : > { %240 = vst.msk [vmem:[#allocation2 + $0x70] sm:$0x1] %vm232_vm2, %v1337_v4  ;;  %893 = vmatpush.msra.mxu3 %v1253_v17  ;;  %v1471_v21 = vld [vmem:[#allocation2 + $0x51] sm:$0xff] }
  0x1f   : > { %241 = vst.msk [vmem:[#allocation2 + $0x80] sm:$0x1] %vm232_vm2, %v1337_v4  ;;  %v1475_v22 = vld [vmem:[#allocation2 + $0x71] sm:$0xff] }
  0x20   : > { %242 = vst.msk [vmem:[#allocation2 + $0x90] sm:$0x1] %vm232_vm2, %v1337_v4  ;;  %v1178_v29 = vld [vmem:[#allocation2 + $0x20] sm:$0xff] }
  0x21   : > { %243 = vst.msk [vmem:[#allocation2 + $0x9] sm:$0x1] %vm232_vm2, %v1337_v4  ;;  %v1179_v31 = vld [vmem:[#allocation2 + $0x30] sm:$0xff] }
  0x22   : > { %244 = vst.msk [vmem:[#allocation2 + $0x19] sm:$0x1] %vm232_vm2, %v1337_v4  ;;  %v1180_v34 = vld [vmem:[#allocation2 + $0x40] sm:$0xff] }
  0x23   : > { %1155 = vmatmul.msk.f32.gmra.mxu1 %vm225_vm0, %v1467_v20  ;;  %245 = vst.msk [vmem:[#allocation2 + $0x29] sm:$0x1] %vm232_vm2, %v1337_v4  ;;  %v1181_v36 = vld [vmem:[#allocation2 + $0x50] sm:$0xff] }
  0x24   : > { %1157 = vmatmul.msk.f32.gmra.mxu2 %vm225_vm0, %v1471_v21  ;;  %246 = vst.msk [vmem:[#allocation2 + $0x39] sm:$0x1] %vm232_vm2, %v1337_v4  ;;  %v1182_v38 = vld [vmem:[#allocation2 + $0x60] sm:$0xff] }
  0x25   : > { %1159 = vmatmul.msk.f32.gmra.mxu3 %vm225_vm0, %v1475_v22  ;;  %247 = vst.msk [vmem:[#allocation2 + $0x49] sm:$0x1] %vm232_vm2, %v1337_v4  ;;  %v1183_v40 = vld [vmem:[#allocation2 + $0x70] sm:$0xff] }
  0x26   : > { %248 = vst.msk [vmem:[#allocation2 + $0x59] sm:$0x1] %vm232_vm2, %v1337_v4 }
  0x27   : > { %249 = vst.msk [vmem:[#allocation2 + $0x69] sm:$0x1] %vm232_vm2, %v1337_v4  ;;  %v1235_v48 = vld [vmem:[#allocation2 + $0x90] sm:$0xff] }
  0x28   : > { %250 = vst.msk [vmem:[#allocation2 + $0x79] sm:$0x1] %vm232_vm2, %v1337_v4  ;;  %v423_v25 = vld [vmem:[#allocation2 + $0x2] sm:$0xff] }
  0x29   : > { %251 = vst.msk [vmem:[#allocation2 + $0x89] sm:$0x1] %vm232_vm2, %v1337_v4 }
  0x2a   : > { %252 = vst.msk [vmem:[#allocation2 + $0x99] sm:$0x1] %vm232_vm2, %v1337_v4  ;;  %v425_v30 = vld [vmem:[#allocation2 + $0x22] sm:$0xff] }
  0x2b   : > { %1160 = vmatmul.msk.f32.vlgmr.msrb.gmra.mxu1 %vm225_vm0, %v273_v23  ;;  %262 = vst.msk [vmem:[#allocation2 + $0x11] sm:$0xff] %vm225_vm0, %v253_v24  ;;  %v426_v32 = vld [vmem:[#allocation2 + $0x32] sm:$0xff] }
  0x2c   : > { %1169 = vmatmul.msk.f32.vlgmr.msrb.gmra.mxu2 %vm225_vm0, %v423_v25  ;;  %269 = vst.msk [vmem:[#allocation2 + $0x81] sm:$0xff] %vm225_vm0, %v260_v33  ;;  %v427_v35 = vld [vmem:[#allocation2 + $0x42] sm:$0xff] }
  0x2d   : > { %v428_v37 = vld [vmem:[#allocation2 + $0x52] sm:$0xff] }
  0x2e   : > { %v429_v39 = vld [vmem:[#allocation2 + $0x62] sm:$0xff] }
  0x2f   : > { %v430_v41 = vld [vmem:[#allocation2 + $0x72] sm:$0xff] }
  0x31   : > { %v1269_v57 = vld [vmem:[#allocation2 + $0x92] sm:$0xff] }
  0x32   : > { %v283_v26 = vld [vmem:[#allocation2 + $0x11] sm:$0xff] }
  0x33   : > { %v1177_v27 = vld [vmem:[#allocation2 + $0x10] sm:$0xff]  ;;  %1153 = vmatmul.msk.f32.gmra.mxu0 %vm225_vm0, %v283_v26  ;;  %v1184_v42 = vld [vmem:[#allocation2 + $0x80] sm:$0xff] }
  0x34   : > { %v424_v28 = vld [vmem:[#allocation2 + $0x12] sm:$0xff]  ;;  %1186 = vmatmul.msk.f32.vlgmr.msrb.gmra.mxu3 %vm225_vm0, %v1177_v27  ;;  %1161 = vmatmul.msk.f32.gmra.mxu1 %vm225_vm0, %v1177_v27  ;;  %v1201_v43 = vld [vmem:[#allocation2 + $0x81] sm:$0xff] }
  0x35   : > { %1170 = vmatmul.msk.f32.gmra.mxu2 %vm225_vm0, %v424_v28  ;;  %v1218_v47 = vld [vmem:[#allocation2 + $0x82] sm:$0xff] }
  0x3b   : > { %1203 = vmatmul.msk.f32.vlgmr.msrb.gmra.mxu0 %vm225_vm0, %v283_v26 }
  0x3c   : > { %1187 = vmatmul.msk.f32.gmra.mxu3 %vm225_vm0, %v1178_v29  ;;  %1162 = vmatmul.msk.f32.gmra.mxu1 %vm225_vm0, %v1178_v29 }
  0x3d   : > { %1171 = vmatmul.msk.f32.gmra.mxu2 %vm225_vm0, %v425_v30 }
  0x43   : > { %1204 = vmatmul.msk.f32.gmra.mxu0 %vm225_vm0, %v1434_v14 }
  0x44   : > { %1188 = vmatmul.msk.f32.gmra.mxu3 %vm225_vm0, %v1179_v31  ;;  %1163 = vmatmul.msk.f32.gmra.mxu1 %vm225_vm0, %v1179_v31 }
  0x45   : > { %1172 = vmatmul.msk.f32.gmra.mxu2 %vm225_vm0, %v426_v32 }
  0x4b   : > { %1205 = vmatmul.msk.f32.gmra.mxu0 %vm225_vm0, %v1467_v20 }
  0x4c   : > { %1189 = vmatmul.msk.f32.gmra.mxu3 %vm225_vm0, %v1180_v34  ;;  %1164 = vmatmul.msk.f32.gmra.mxu1 %vm225_vm0, %v1180_v34 }
  0x4d   : > { %1173 = vmatmul.msk.f32.gmra.mxu2 %vm225_vm0, %v427_v35 }
  0x53   : > { %1206 = vmatmul.msk.f32.gmra.mxu0 %vm225_vm0, %v1443_v16 }
  0x54   : > { %1190 = vmatmul.msk.f32.gmra.mxu3 %vm225_vm0, %v1181_v36  ;;  %1165 = vmatmul.msk.f32.gmra.mxu1 %vm225_vm0, %v1181_v36 }
  0x55   : > { %1174 = vmatmul.msk.f32.gmra.mxu2 %vm225_vm0, %v428_v37 }
  0x5b   : > { %1207 = vmatmul.msk.f32.gmra.mxu0 %vm225_vm0, %v1471_v21 }
  0x5c   : > { %1191 = vmatmul.msk.f32.gmra.mxu3 %vm225_vm0, %v1182_v38  ;;  %1166 = vmatmul.msk.f32.gmra.mxu1 %vm225_vm0, %v1182_v38 }
  0x5d   : > { %1175 = vmatmul.msk.f32.gmra.mxu2 %vm225_vm0, %v429_v39 }
  0x63   : > { %1208 = vmatmul.msk.f32.gmra.mxu0 %vm225_vm0, %v1455_v19 }
  0x64   : > { %1192 = vmatmul.msk.f32.gmra.mxu3 %vm225_vm0, %v1183_v40  ;;  %1167 = vmatmul.msk.f32.gmra.mxu1 %vm225_vm0, %v1183_v40 }
  0x65   : > { %1176 = vmatmul.msk.f32.gmra.mxu2 %vm225_vm0, %v430_v41 }
  0x6b   : > { %1209 = vmatmul.msk.f32.gmra.mxu0 %vm225_vm0, %v1475_v22 }
  0x6c   : > { %1193 = vmatmul.msk.f32.gmra.mxu3 %vm225_vm0, %v1184_v42  ;;  %1220 = vmatmul.msk.f32.vlgmr.msra.gmra.mxu1 %vm225_vm0, %v424_v28 }
  0x6d   : > { %1237 = vmatmul.msk.f32.vlgmr.msra.gmra.mxu2 %vm225_vm0, %v1178_v29 }
  0x73   : > { %1210 = vmatmul.msk.f32.gmra.mxu0 %vm225_vm0, %v1201_v43 }
  0x74   : > { %1254 = vmatmul.msk.f32.vlgmr.msra.gmra.mxu3 %vm225_vm0, %v1434_v14  ;;  %1221 = vmatmul.msk.f32.gmra.mxu1 %vm225_vm0, %v425_v30 }
  0x75   : > { %1238 = vmatmul.msk.f32.gmra.mxu2 %vm225_vm0, %v1179_v31 }
  0x7b   : > { %1271 = vmatmul.msk.f32.vlgmr.msra.gmra.mxu0 %vm225_vm0, %v425_v30 }
  0x7c   : > { %1255 = vmatmul.msk.f32.gmra.mxu3 %vm225_vm0, %v1467_v20  ;;  %1222 = vmatmul.msk.f32.gmra.mxu1 %vm225_vm0, %v426_v32 }
  0x7d   : > { %1239 = vmatmul.msk.f32.gmra.mxu2 %vm225_vm0, %v1180_v34 }
  0x83   : > { %1272 = vmatmul.msk.f32.gmra.mxu0 %vm225_vm0, %v426_v32 }
  0x84   : > { %1256 = vmatmul.msk.f32.gmra.mxu3 %vm225_vm0, %v1443_v16  ;;  %1223 = vmatmul.msk.f32.gmra.mxu1 %vm225_vm0, %v427_v35 }
  0x85   : > { %1240 = vmatmul.msk.f32.gmra.mxu2 %vm225_vm0, %v1181_v36 }
  0x8b   : > { %1273 = vmatmul.msk.f32.gmra.mxu0 %vm225_vm0, %v427_v35 }
  0x8c   : > { %1257 = vmatmul.msk.f32.gmra.mxu3 %vm225_vm0, %v1471_v21  ;;  %1224 = vmatmul.msk.f32.gmra.mxu1 %vm225_vm0, %v428_v37 }
  0x8d   : > { %1241 = vmatmul.msk.f32.gmra.mxu2 %vm225_vm0, %v1182_v38 }
  0x93   : > { %1274 = vmatmul.msk.f32.gmra.mxu0 %vm225_vm0, %v428_v37  ;;  %v334_v50 = vpop.f32.mrf.mxu0 }
  0x94   : > { %1258 = vmatmul.msk.f32.gmra.mxu3 %vm225_vm0, %v1455_v19  ;;  %1225 = vmatmul.msk.f32.gmra.mxu1 %vm225_vm0, %v429_v39 }
  0x95   : > { %1242 = vmatmul.msk.f32.gmra.mxu2 %vm225_vm0, %v1183_v40 }
  0x98   : > { %v1570_v44 = vpop.f32.mrf.mxu1 }
  0x9b   : > { %1275 = vmatmul.msk.f32.gmra.mxu0 %vm225_vm0, %v429_v39 }
  0x9c   : > { %1259 = vmatmul.msk.f32.gmra.mxu3 %vm225_vm0, %v1475_v22  ;;  %1226 = vmatmul.msk.f32.gmra.mxu1 %vm225_vm0, %v430_v41 }
  0x9d   : > { %1243 = vmatmul.msk.f32.gmra.mxu2 %vm225_vm0, %v1184_v42 }
  0x9f   : > { %v1577_v45 = vpop.f32.mrf.mxu2 }
  0xa0   : > { %v1579_v46 = vpop.f32.mrf.mxu1  ;;  %v1581_v49 = vpop.f32.mrf.mxu3 }
  0xa3   : > { %1276 = vmatmul.msk.f32.gmra.mxu0 %vm225_vm0, %v430_v41  ;;  %v1632_v41 = vld [vmem:[%s1711_s2] ss:$0 sm:$0xff] }
  0xa4   : > { %1260 = vmatmul.msk.f32.gmra.mxu3 %vm225_vm0, %v1201_v43  ;;  %1227 = vmatmul.msk.f32.gmra.mxu1 %vm225_vm0, %v1218_v47 }
  0xa5   : > { %1244 = vmatmul.msk.f32.gmra.mxu2 %vm225_vm0, %v1235_v48 }
  0xa7   : > { %v1587_v51 = vpop.f32.mrf.mxu2 }
  0xa8   : > { %v399_v53 = vpop.f32.mrf.mxu1  ;;  %v1591_v54 = vpop.f32.mrf.mxu3 }
  0xa9   : > { %v400_v19 = vadd.f32 %v399_v53, %v334_v50  ;;  %v1637_v50 = vld [vmem:[%s1712_s3] ss:$0 sm:$0xff] }
  0xab   : > { %1277 = vmatmul.msk.f32.gmra.mxu0 %vm225_vm0, %v1218_v47 }
  0xac   : > { %1261 = vmatmul.msk.f32.gmra.mxu3 %vm225_vm0, %v1252_v52 }
  0xaf   : > { %v474_v55 = vpop.f32.mrf.mxu2 }
  0xb0   : > { %v337_v56 = vpop.f32.mrf.mxu0  ;;  %v498_v21 = vadd.f32 %v474_v55, %v400_v19 }
  0xb1   : > { %v402_v58 = vpop.f32.mrf.mxu1 }
  0xb2   : > { %v403_v26 = vadd.f32 %v402_v58, %v337_v56 }
  0xb3   : > { %1278 = vmatmul.msk.f32.gmra.mxu0 %vm225_vm0, %v1269_v57 }
  0xb7   : > { %v560_v59 = vpop.f32.mrf.mxu3 }
  0xb8   : > { %v477_v60 = vpop.f32.mrf.mxu2  ;;  %v643_v61 = vpop.f32.mrf.mxu0  ;;  %v584_v25 = vadd.f32 %v560_v59, %v498_v21 }
  0xb9   : > { %v405_v62 = vpop.f32.mrf.mxu1  ;;  %v499_v29 = vadd.f32 %v477_v60, %v403_v26 }
  0xba   : > { %v667_v28 = vadd.f32 %v643_v61, %v584_v25  ;;  %v406_v36 = vadd.f32 %v405_v62, %v1570_v44 }
  0xbf   : > { %v563_v63 = vpop.f32.mrf.mxu3 }
  0xc0   : > { %v480_v0 = vpop.f32.mrf.mxu2  ;;  %v646_v1 = vpop.f32.mrf.mxu0  ;;  %v585_v34 = vadd.f32 %v563_v63, %v499_v29 }
  0xc1   : > { %v408_v2 = vpop.f32.mrf.mxu1  ;;  %v500_v39 = vadd.f32 %v480_v0, %v406_v36 }
  0xc2   : > { %v668_v38 = vadd.f32 %v646_v1, %v585_v34  ;;  %v409_v56 = vadd.f32 %v408_v2, %v1579_v46 }
  0xc7   : > { %v566_v3 = vpop.f32.mrf.mxu3 }
  0xc8   : > { %v483_v4 = vpop.f32.mrf.mxu2  ;;  %v649_v5 = vpop.f32.mrf.mxu0  ;;  %v586_v52 = vadd.f32 %v566_v3, %v500_v39 }
  0xc9   : > { %v1594_v6 = vpop.f32.mrf.mxu1  ;;  %v501_v60 = vadd.f32 %v483_v4, %v409_v56 }
  0xca   : > { %v669_v59 = vadd.f32 %v649_v5, %v586_v52 }
  0xcf   : > { %v569_v7 = vpop.f32.mrf.mxu3 }
  0xd0   : > { %v1596_v8 = vpop.f32.mrf.mxu2  ;;  %v1598_v9 = vpop.f32.mrf.mxu0  ;;  %v587_v3 = vadd.f32 %v569_v7, %v501_v60 }
  0xd1   : > { %v1600_v10 = vpop.f32.mrf.mxu1 }
  0xd2   : > { %v670_v25 = vadd.f32 %v1598_v9, %v587_v3  ;;  %v415_v9 = vadd.f32 %v1600_v10, %v1587_v51 }
  0xd7   : > { %v1602_v11 = vpop.f32.mrf.mxu3 }
  0xd8   : > { %v1604_v12 = vpop.f32.mrf.mxu2  ;;  %v1606_v13 = vpop.f32.mrf.mxu0 }
  0xd9   : > { %v1608_v14 = vpop.f32.mrf.mxu1 }
  0xdf   : > { %v1610_v15 = vpop.f32.mrf.mxu3 }
  0xe0   : > { %v1612_v16 = vpop.f32.mrf.mxu2  ;;  %v1614_v17 = vpop.f32.mrf.mxu0 }
  0xe1   : > { %v1616_v18 = vpop.f32.mrf.mxu1 }
  0xe7   : > { %v1618_v20 = vpop.f32.mrf.mxu3 }
  0xe8   : > { %v1620_v22 = vpop.f32.mrf.mxu2  ;;  %v1622_v23 = vpop.f32.mrf.mxu0 }
  0xe9   : > { %v726_v24 = vpop.f32.mrf.mxu1 }
  0xea   : > { %v750_v32 = vadd.f32 %v726_v24, %v667_v28  ;;  %v412_v24 = vadd.f32 %v1594_v6, %v1577_v45 }
  0xec   : > { %v502_v26 = vadd.f32 %v1596_v8, %v412_v24 }
  0xef   : > { %v1624_v27 = vpop.f32.mrf.mxu3 }
  0xf0   : > { %v812_v30 = vpop.f32.mrf.mxu2  ;;  %v1626_v31 = vpop.f32.mrf.mxu0 }
  0xf1   : > { %v729_v33 = vpop.f32.mrf.mxu1  ;;  %v836_v35 = vadd.f32 %v812_v30, %v750_v32 }
  0xf2   : > { %v751_v47 = vadd.f32 %v729_v33, %v668_v38  ;;  %v503_v38 = vadd.f32 %v1604_v12, %v415_v9 }
  0xf7   : > { %v895_v37 = vpop.f32.mrf.mxu3 }
  0xf8   : > { %v919_v40 = vadd.f32 %v895_v37, %v836_v35  ;;  %v815_v42 = vpop.f32.mrf.mxu2  ;;  %v978_v43 = vpop.f32.mrf.mxu0  ;;  %v588_v35 = vadd.f32 %v1602_v11, %v502_v26 }
  0xf9   : > { %v732_v44 = vpop.f32.mrf.mxu1  ;;  %v837_v55 = vadd.f32 %v815_v42, %v751_v47 }
  0xfa   : > { %v1002_v48 = vadd.f32 %v978_v43, %v919_v40  ;;  %v752_v46 = vadd.f32 %v732_v44, %v669_v59  ;;  %v671_v37 = vadd.f32 %v1606_v13, %v588_v35  ;;  %v589_v44 = vadd.f32 %v1610_v15, %v503_v38 }
  0xfb   : > { %v418_v13 = vadd.f32 %v1608_v14, %v1581_v49 }
  0xfc   : > { %v1014_v53 = vmul.f32 %v1632_v41, %v1002_v48 }
  0xfe   : > { %v1026_v57 = vadd.f32 %v1637_v50, %v1014_v53  ;;  %v672_v53 = vadd.f32 %v1614_v17, %v589_v44  ;;  %v421_v17 = vadd.f32 %v1616_v18, %v1591_v54 }
  0xff   : > { %v898_v58 = vpop.f32.mrf.mxu3 }
 0x100   : > { %v1034_v61 = vmax.f32 %v1026_v57, 0.0  ;;  %v920_v62 = vadd.f32 %v898_v58, %v837_v55  ;;  %v818_v63 = vpop.f32.mrf.mxu2  ;;  %v981_v0 = vpop.f32.mrf.mxu0  ;;  %v504_v55 = vadd.f32 %v1612_v16, %v418_v13 }
 0x101   : > { %v735_v2 = vpop.f32.mrf.mxu1  ;;  %v838_v21 = vadd.f32 %v818_v63, %v752_v46  ;;  %v505_v46 = vadd.f32 %v1620_v22, %v421_v17 }
 0x102   : > { %1043 = vst.msk [vmem:[%s1647_s25] sm:$0xff] %vm1042_vm3, %v1034_v61  ;;  %v1003_v1 = vadd.f32 %v981_v0, %v920_v62  ;;  %v753_v7 = vadd.f32 %v735_v2, %v670_v25  ;;  %v590_v61 = vadd.f32 %v1618_v20, %v504_v55 }
 0x103   : > { %v591_v24 = vadd.f32 %v1624_v27, %v505_v46 }
 0x104   : > { %v1015_v19 = vmul.f32 %v1632_v41, %v1003_v1  ;;  %v673_v0 = vadd.f32 %v1622_v23, %v590_v61 }
 0x105   : > { %v674_v22 = vadd.f32 %v1626_v31, %v591_v24 }
 0x106   : > { %v1027_v5 = vadd.f32 %v1637_v50, %v1015_v19 }
 0x107   : > { %v901_v4 = vpop.f32.mrf.mxu3 }
 0x108   : > { %v1035_v28 = vmax.f32 %v1027_v5, 0.0  ;;  %v921_v29 = vadd.f32 %v901_v4, %v838_v21  ;;  %v821_v30 = vpop.f32.mrf.mxu2  ;;  %v984_v32 = vpop.f32.mrf.mxu0 }
 0x109   : > { %v738_v34 = vpop.f32.mrf.mxu1  ;;  %v839_v6 = vadd.f32 %v821_v30, %v753_v7 }
 0x10a   : > { %1044 = vst.msk [vmem:[%s1647_s25 + $0x8] sm:$0xff] %vm1042_vm3, %v1035_v28  ;;  %v1004_v33 = vadd.f32 %v984_v32, %v921_v29  ;;  %v754_v11 = vadd.f32 %v738_v34, %v671_v37 }
 0x10c   : > { %v1016_v45 = vmul.f32 %v1632_v41, %v1004_v33 }
 0x10e   : > { %v1028_v8 = vadd.f32 %v1637_v50, %v1016_v45 }
 0x10f   : > { %v904_v36 = vpop.f32.mrf.mxu3 }
 0x110   : > { %v1036_v39 = vmax.f32 %v1028_v8, 0.0  ;;  %v922_v40 = vadd.f32 %v904_v36, %v839_v6  ;;  %v824_v42 = vpop.f32.mrf.mxu2  ;;  %v987_v43 = vpop.f32.mrf.mxu0 }
 0x111   : > { %v741_v48 = vpop.f32.mrf.mxu1  ;;  %v840_v10 = vadd.f32 %v824_v42, %v754_v11 }
 0x112   : > { %1045 = vst.msk [vmem:[%s1647_s25 + $0x10] sm:$0xff] %vm1042_vm3, %v1036_v39  ;;  %v1005_v47 = vadd.f32 %v987_v43, %v922_v40  ;;  %v755_v15 = vadd.f32 %v741_v48, %v672_v53 }
 0x114   : > { %v1017_v51 = vmul.f32 %v1632_v41, %v1005_v47 }
 0x116   : > { %v1029_v12 = vadd.f32 %v1637_v50, %v1017_v51 }
 0x117   : > { %v907_v52 = vpop.f32.mrf.mxu3 }
 0x118   : > { %v1037_v56 = vmax.f32 %v1029_v12, 0.0  ;;  %v923_v57 = vadd.f32 %v907_v52, %v840_v10  ;;  %v827_v58 = vpop.f32.mrf.mxu2  ;;  %v990_v59 = vpop.f32.mrf.mxu0 }
 0x119   : > { %v841_v14 = vadd.f32 %v827_v58, %v755_v15  ;;  %v744_v62 = vpop.f32.mrf.mxu1 }
 0x11a   : > { %1046 = vst.msk [vmem:[%s1647_s25 + $0x18] sm:$0xff] %vm1042_vm3, %v1037_v56  ;;  %v1006_v60 = vadd.f32 %v990_v59, %v923_v57  ;;  %v756_v20 = vadd.f32 %v744_v62, %v673_v0 }
 0x11c   : > { %v1018_v49 = vmul.f32 %v1632_v41, %v1006_v60 }
 0x11e   : > { %v1030_v16 = vadd.f32 %v1637_v50, %v1018_v49 }
 0x11f   : > { %v910_v63 = vpop.f32.mrf.mxu3 }
 0x120   : > { %v1038_v1 = vmax.f32 %v1030_v16, 0.0  ;;  %v924_v2 = vadd.f32 %v910_v63, %v841_v14  ;;  %v830_v3 = vpop.f32.mrf.mxu2  ;;  %v993_v19 = vpop.f32.mrf.mxu0 }
 0x121   : > { %v842_v18 = vadd.f32 %v830_v3, %v756_v20  ;;  %v747_v4 = vpop.f32.mrf.mxu1 }
 0x122   : > { %1047 = vst.msk [vmem:[%s1647_s25 + $0x20] sm:$0xff] %vm1042_vm3, %v1038_v1  ;;  %v1007_v21 = vadd.f32 %v993_v19, %v924_v2  ;;  %v757_v30 = vadd.f32 %v747_v4, %v674_v22 }
 0x124   : > { %v1019_v54 = vmul.f32 %v1632_v41, %v1007_v21 }
 0x126   : > { %v1031_v5 = vadd.f32 %v1637_v50, %v1019_v54 }
 0x127   : > { %v913_v23 = vpop.f32.mrf.mxu3 }
 0x128   : > { %v1039_v25 = vmax.f32 %v1031_v5, 0.0  ;;  %v925_v26 = vadd.f32 %v913_v23, %v842_v18  ;;  %v996_v28 = vpop.f32.mrf.mxu0  ;;  %v833_v29 = vpop.f32.mrf.mxu2 }
 0x129   : > { %v843_v7 = vadd.f32 %v833_v29, %v757_v30 }
 0x12a   : > { %1048 = vst.msk [vmem:[%s1647_s25 + $0x28] sm:$0xff] %vm1042_vm3, %v1039_v25  ;;  %v1008_v32 = vadd.f32 %v996_v28, %v925_v26 }
 0x12c   : > { %v1020_v27 = vmul.f32 %v1632_v41, %v1008_v32 }
 0x12e   : > { %v1032_v33 = vadd.f32 %v1637_v50, %v1020_v27 }
 0x12f   : > { %v916_v34 = vpop.f32.mrf.mxu3 }
 0x130   : > { %v1040_v35 = vmax.f32 %v1032_v33, 0.0  ;;  %v926_v45 = vadd.f32 %v916_v34, %v843_v7  ;;  %v999_v6 = vpop.f32.mrf.mxu0 }
 0x132   : > { %1049 = vst.msk [vmem:[%s1647_s25 + $0x30] sm:$0xff] %vm1042_vm3, %v1040_v35  ;;  %v1009_v31 = vadd.f32 %v999_v6, %v926_v45 }
 0x134   : > { %v1021_v9 = vmul.f32 %v1632_v41, %v1009_v31 }
 0x136   : > { %v1033_v8 = vadd.f32 %v1637_v50, %v1021_v9 }
 0x138   : > { %v1041_v36 = vmax.f32 %v1033_v8, 0.0 }
 0x13a   : > { %1050 = vst.msk [vmem:[%s1647_s25 + $0x38] sm:$0xff] %vm1042_vm3, %v1041_v36 }
 0x13b PF: > { %s14_s17 = sadd.s32 1, %s1335_s17   ;;  %s1714_s15 = smov %s1331_s16 }
 0x13c   : > { %p11_p5 = scmp.ge.s32.totalorder %s14_s17, 4   ;;  %s1715_s16 = smov %s1717_s18 }
 0x13e   :  { %13 = sbr.rel (!%p11_p5) target bundleno = 2 (0x2), region = 83 }

// kernel: encoder_forward.9
= control target key start
LH: loop header
LB: loop body
LE: loop exit
PB: predicated region body
PF: predicated region fallthrough
CT: control target
= control target key end

     0   :  { %11 = vsyncpa [#allocation4], 0  ;;  %s2219_s0 = inlined_call_operand.vmem [shape: f32[2,8,8,16], index: 0, kind: input, shape index: {}]   ;;  %s2220_s1 = inlined_call_operand.vmem [shape: f32[9,16,16], index: 1, kind: input, shape index: {}]   ;;  %s2221_s2 = inlined_call_operand.vmem [shape: f32[1,16], index: 2, kind: input, shape index: {}]   ;;  %s2222_s3 = inlined_call_operand.vmem [shape: f32[1,16], index: 3, kind: input, shape index: {}]   ;;  %s2223_s4 = inlined_call_operand.hbm [shape: f32[2,8,8,16], index: 4, kind: output, shape index: {0}]   ;;  %s2224_s5 = inlined_call_operand.vmem [shape: f32[2,4,4,16], index: 5, kind: output, shape index: {1}]  }
   0x1   :  { %13 = vsyncpa [#allocation4 + $0x1], 0  ;;  %s1752_s18 = smov 0   ;;  %s1754_s19 = smov 0  }
   0x2   :  { %s1756_s20 = smov 0   ;;  %s1758_s21 = smov 0  }
   0x3   :  { %s1760_s22 = smov 0   ;;  %s1762_s23 = smov 0  }
   0x4 LB: > { %s1403_s24 = sadd.s32 4294967295, %s1717_s23   ;;  %s1404_s25 = sadd.s32 4294967294, %s1717_s23   ;;  %s1717_s23 = sphi %s1762_s23, %s19_s23   ;;  %s1713_s22 = sphi %s1760_s22, %s2231_s22   ;;  %s1709_s21 = sphi %s1758_s21, %s2230_s21   ;;  %s1705_s20 = sphi %s1756_s20, %s2229_s20   ;;  %s1701_s19 = sphi %s1754_s19, %s2228_s19   ;;  %s1697_s18 = sphi %s1752_s18, %s2227_s18  }
   0x5   : > { %s31_s26 = sadd.s32 1, %s1713_s22  ;;  %s129_s27 = sadd.s32 1, %s1705_s20 }
   0x6   : > { %p33_p0 = scmp.ge.s32.totalorder %s31_s26, 2  ;;  %p139_p1 = scmp.ne.s32.totalorder %s1705_s20, %s1701_s19 }
   0x7   : > { %p140_p2 = scmp.eq.s32.totalorder %s1403_s24, 1  ;;  %p145_p3 = scmp.ne.s32.totalorder %s1701_s19, %s1697_s18 }
   0x8   : > { %s2233_s26 = smov (%p33_p0, %s31_s26), 0  ;;  %p146_p5 = scmp.eq.s32.totalorder %s1404_s25, 1 }
   0x9   : > { %p1792_p4 = por %p140_p2, %p139_p1  ;;  %s124_s29 = ssub.s32 %s1713_s22, %s2233_s26 }
   0xa   : > { %p1407_p6 = scmp.ge.s32.totalorder %s1717_s23, 1  ;;  %p127_p7 = scmp.eq.s32.totalorder %s124_s29, 0 }
   0xb   : > { %p1799_p8 = por %p146_p5, %p145_p3  ;;  %p209_p9 = scmp.lt.s32.totalorder %s1717_s23, 3 }
   0xc   : > { %s1805_s6 = scalar_select %p127_p7, %s1705_s20, %s129_s27  }
   0xd   : > { %p210_p10 = pnand %p1407_p6, %p209_p9 }
   0xe   : > { %p246_p11 = scmp.lt.s32.totalorder (!%p210_p10), %s1709_s21, 1  ;;  %s232_s7 = sand.u32 (!%p210_p10), 1, %s1701_s19  }
   0xf   : > { %213 = sbr.rel (%p210_p10) target bundleno = 336 (0x150), region = 36  ;;  %s1408_s10 = sshll.u32 (!%p210_p10), %s232_s7, 6 }
  0x10   : > { %s2100_s11 = scalar_lea.vmem (!%p210_p10), [#allocation3], %s1408_s10  ;;  %s1253_s29 = scalar_lea.sflag (!%p210_p10), [#allocation4], %s232_s7 }
  0x11   : > { %s1659_s15 = scalar_lea.hbm (!%p210_p10), %s2223_s4, 128 }
  0x14   : > { %v1414_v0 = vld [vmem:[%s2220_s1 + $0x18] sm:$0xff]  ;;  %v1413_v1 = vld [vmem:[%s2220_s1 + $0x10] sm:$0xff]  ;;  %vm266_vm0 = vcmask 130048   ;;  %v1432_v2 = vld [vmem:[%s2220_s1 + $0x28] sm:$0xff]  ;;  %v1719_v3 = vmov 0.0   ;;  %vm268_vm1 = vcmask 123904  }
  0x15   : > { %1573 = vmatpush.msra.mxu1 %v1414_v0  ;;  %1574 = vmatpush.msra.mxu2 %v1414_v0  ;;  %267 = vst.msk [vmem:[#allocation2] sm:$0xff] %vm266_vm0, %v1719_v3  ;;  %s1820_s13 = scalar_select %p246_p11, %s1709_s21, 1  ;;  %v1450_v4 = vld [vmem:[%s2220_s1 + $0x38] sm:$0xff]  ;;  %v323_v5 = vld [vmem:[%s2220_s1 + $0x8] sm:$0xff]  ;;  %vm273_vm2 = vcmask 122880   ;;  %v1431_v6 = vld [vmem:[%s2220_s1 + $0x20] sm:$0xff] }
  0x16   : > { %1575 = vmatpush.msra.mxu3 %v1414_v0  ;;  %374 = vmatpush.msra.mxu0 %v1414_v0  ;;  %269 = vst.msk [vmem:[#allocation2 + $0x8] sm:$0x3] %vm268_vm1, %v1719_v3  ;;  %v1449_v7 = vld [vmem:[%s2220_s1 + $0x30] sm:$0xff]  ;;  %v1468_v8 = vld [vmem:[%s2220_s1 + $0x48] sm:$0xff]  ;;  %v322_v9 = vld [vmem:[%s2220_s1] sm:$0xff]  ;;  %vm1228_vm3 = vcmask 1041409  }
  0x17   : > { %1576 = vmatpush.msra.mxu1 %v1413_v1  ;;  %1577 = vmatpush.msra.mxu2 %v1413_v1  ;;  %271 = vst.msk [vmem:[#allocation2 + $0x90] sm:$0xff] %vm266_vm0, %v1719_v3  ;;  %s1570_s27 = sshll.u32 %s1820_s13, 6  ;;  %v1467_v15 = vld [vmem:[%s2220_s1 + $0x40] sm:$0xff]  ;;  %v1486_v18 = vld [vmem:[%s2220_s1 + $0x58] sm:$0xff]  ;;  %v1504_v20 = vld [vmem:[%s2220_s1 + $0x68] sm:$0xff]  ;;  %s1571_s14 = sshll.u32 %s1820_s13, 4 }
  0x18   : > { %1578 = vmatpush.msra.mxu3 %v1413_v1  ;;  %272 = vst.msk [vmem:[#allocation2 + $0x98] sm:$0x3] %vm268_vm1, %v1719_v3  ;;  %s1845_s12 = scalar_lea.vmem %s2219_s0, %s1570_s27  ;;  %375 = vmatpush.msra.mxu0 %v1413_v1  ;;  %v1522_v22 = vld [vmem:[%s2220_s1 + $0x78] sm:$0xff]  ;;  %v1540_v23 = vld [vmem:[%s2220_s1 + $0x88] sm:$0xff]  ;;  %v1503_v31 = vld [vmem:[%s2220_s1 + $0x60] sm:$0xff]  ;;  %vm1230_vm4 = vcmask 1042434   ;;  %s2127_s17 = scalar_lea.vmem %s2224_s5, %s1571_s14 }
  0x19   : > { %515 = vmatpush.msrb.mxu2 %v1432_v2  ;;  %439 = vmatpush.msrb.mxu1 %v323_v5  ;;  %274 = vst.msk [vmem:[#allocation2] sm:$0x1] %vm273_vm2, %v1719_v3  ;;  %v295_v10 = vld [vmem:[%s1845_s12 + $0x8] sm:$0xff]  ;;  %v297_v11 = vld [vmem:[%s1845_s12 + $0x18] sm:$0xff]  ;;  %v296_v13 = vld [vmem:[%s1845_s12 + $0x10] sm:$0xff]  ;;  %vm1232_vm5 = vcmask 1043459  }
  0x1a   : > { %602 = vmatpush.msrb.mxu3 %v1450_v4  ;;  %v299_v12 = vld [vmem:[%s1845_s12 + $0x28] sm:$0xff]  ;;  %275 = vst.msk [vmem:[#allocation2 + $0x10] sm:$0x1] %vm273_vm2, %v1719_v3  ;;  %686 = vmatpush.msrb.mxu0 %v1468_v8  ;;  %v298_v14 = vld [vmem:[%s1845_s12 + $0x20] sm:$0xff]  ;;  %v300_v17 = vld [vmem:[%s1845_s12 + $0x30] sm:$0xff]  ;;  %vm1247_vm6 = vcmask 125952  }
  0x1b   : > { %516 = vmatpush.msrb.mxu2 %v1431_v6  ;;  %304 = vst.msk [vmem:[#allocation2 + $0x21] sm:$0xff] %vm266_vm0, %v295_v10  ;;  %440 = vmatpush.msrb.mxu1 %v322_v9  ;;  %v294_v29 = vld [vmem:[%s1845_s12] sm:$0xff]  ;;  %v1521_v35 = vld [vmem:[%s2220_s1 + $0x70] sm:$0xff]  ;;  %v301_v42 = vld [vmem:[%s1845_s12 + $0x38] sm:$0xff]  ;;  %s1572_s13 = sshll.u32 %s1709_s21, 6  ;;  %s1276_s21 = sshll.u32 %s2100_s11, 4  ;;  %s1277_s21 = int_to_ptr.vmem [resolvable:$true] %s1276_s21 }
  0x1c   : > { %603 = vmatpush.msrb.mxu3 %v1449_v7  ;;  %306 = vst.msk [vmem:[#allocation2 + $0x41] sm:$0xff] %vm266_vm0, %v297_v11  ;;  %687 = vmatpush.msrb.mxu0 %v1467_v15  ;;  %v1485_v36 = vld [vmem:[%s2220_s1 + $0x50] sm:$0xff]  ;;  %v1539_v39 = vld [vmem:[%s2220_s1 + $0x80] sm:$0xff]  ;;  %s1275_s27 = scalar_lea.hbm %s2223_s4, %s1572_s13 }
  0x1d   : > { %308 = vst.msk [vmem:[#allocation2 + $0x61] sm:$0xff] %vm266_vm0, %v299_v12  ;;  %v324_v16 = vld [vmem:[#allocation2 + $0x1] sm:$0xff]  ;;  %s1278_s12 = sshll.u32 %s1275_s27, 4  ;;  %s1279_s12 = int_to_ptr.hbm [resolvable:$true] %s1278_s12 }
  0x1e   : > { %305 = vst.msk [vmem:[#allocation2 + $0x31] sm:$0xff] %vm266_vm0, %v296_v13  ;;  %1415 = vmatmul.msk.f32.vlgmr.msra.gmra.mxu0 %vm266_vm0, %v324_v16  ;;  %s1653_s8 = sshra.s32 %s1279_s12, 4  ;;  %s1654_s8 = int_to_ptr.hbm [resolvable:$true] %s1653_s8 }
  0x1f   : > { %307 = vst.msk [vmem:[#allocation2 + $0x51] sm:$0xff] %vm266_vm0, %v298_v14  ;;  %1025 = vmatpush.msra.mxu0 %v1540_v23  ;;  %v1520_v61 = vld [vmem:[#allocation2 + $0x91] sm:$0xff]  ;;  %s1655_s9 = scalar_lea.hbm %s1654_s8, 64  ;;  %p1660_p1 = scmp.lt.s32.totalorder %s1654_s8, %s2223_s4 }
  0x20   : > { %309 = vst.msk [vmem:[#allocation2 + $0x71] sm:$0xff] %vm266_vm0, %v300_v17  ;;  %v314_v28 = vld [vmem:[#allocation2] sm:$0xff]  ;;  %p1656_p12 = scmp.ne.s32.totalorder %s1654_s8, %s1655_s9  ;;  %p1661_p2 = scmp.lt.s32.totalorder %s1659_s15, %s1655_s9 }
  0x21   : > { %276 = vst.msk [vmem:[#allocation2 + $0x20] sm:$0x1] %vm273_vm2, %v1719_v3  ;;  %1026 = vmatpush.msra.mxu0 %v1539_v39 }
  0x22   : > { %v1875_v19 = vld [vmem:[#allocation2 + $0x21] sm:$0xff]  ;;  %277 = vst.msk [vmem:[#allocation2 + $0x30] sm:$0x1] %vm273_vm2, %v1719_v3  ;;  %p1657_p13 = pnand %p1656_p12, %p1792_p4  ;;  %p1662_p3 = por %p1661_p2, %p1660_p1 }
  0x23   : > { %1417 = vmatmul.msk.f32.vlgmr.msra.gmra.mxu1 %vm266_vm0, %v1875_v19  ;;  %v1884_v21 = vld [vmem:[#allocation2 + $0x41] sm:$0xff]  ;;  %278 = vst.msk [vmem:[#allocation2 + $0x40] sm:$0x1] %vm273_vm2, %v1719_v3 }
  0x24   : > { %1419 = vmatmul.msk.f32.vlgmr.msra.gmra.mxu2 %vm266_vm0, %v1884_v21  ;;  %v1896_v24 = vld [vmem:[#allocation2 + $0x61] sm:$0xff]  ;;  %279 = vst.msk [vmem:[#allocation2 + $0x50] sm:$0x1] %vm273_vm2, %v1719_v3  ;;  %770 = vmatpush.msra.mxu1 %v1486_v18  ;;  %p1658_p0 = pneg %p1657_p13 }
  0x25   : > { %1421 = vmatmul.msk.f32.vlgmr.msra.gmra.mxu3 %vm266_vm0, %v1896_v24  ;;  %280 = vst.msk [vmem:[#allocation2 + $0x60] sm:$0x1] %vm273_vm2, %v1719_v3  ;;  %857 = vmatpush.msra.mxu2 %v1504_v20  ;;  %v1908_v25 = vld [vmem:[#allocation2 + $0x31] sm:$0xff] }
  0x26   : > { %281 = vst.msk [vmem:[#allocation2 + $0x70] sm:$0x1] %vm273_vm2, %v1719_v3  ;;  %941 = vmatpush.msra.mxu3 %v1522_v22  ;;  %v1912_v26 = vld [vmem:[#allocation2 + $0x51] sm:$0xff]  ;;  %771 = vmatpush.msra.mxu1 %v1485_v36  ;;  %p1663_p5 = pnand %p1662_p3, %p1658_p0 }
  0x27   : > { %282 = vst.msk [vmem:[#allocation2 + $0x80] sm:$0x1] %vm273_vm2, %v1719_v3  ;;  %v1916_v27 = vld [vmem:[#allocation2 + $0x71] sm:$0xff]  ;;  %858 = vmatpush.msra.mxu2 %v1503_v31 }
  0x28   : > { %283 = vst.msk [vmem:[#allocation2 + $0x90] sm:$0x1] %vm273_vm2, %v1719_v3  ;;  %942 = vmatpush.msra.mxu3 %v1521_v35  ;;  %v1442_v37 = vld [vmem:[#allocation2 + $0x20] sm:$0xff] }
  0x29   : > { %284 = vst.msk [vmem:[#allocation2 + $0x9] sm:$0x1] %vm273_vm2, %v1719_v3  ;;  %v1443_v40 = vld [vmem:[#allocation2 + $0x30] sm:$0xff] }
  0x2a   : > { %285 = vst.msk [vmem:[#allocation2 + $0x19] sm:$0x1] %vm273_vm2, %v1719_v3  ;;  %v1444_v43 = vld [vmem:[#allocation2 + $0x40] sm:$0xff] }
  0x2b   : > { %1418 = vmatmul.msk.f32.gmra.mxu1 %vm266_vm0, %v1908_v25  ;;  %286 = vst.msk [vmem:[#allocation2 + $0x29] sm:$0x1] %vm273_vm2, %v1719_v3  ;;  %v1445_v45 = vld [vmem:[#allocation2 + $0x50] sm:$0xff] }
  0x2c   : > { %1420 = vmatmul.msk.f32.gmra.mxu2 %vm266_vm0, %v1912_v26  ;;  %287 = vst.msk [vmem:[#allocation2 + $0x39] sm:$0x1] %vm273_vm2, %v1719_v3  ;;  %v1446_v47 = vld [vmem:[#allocation2 + $0x60] sm:$0xff] }
  0x2d   : > { %1422 = vmatmul.msk.f32.gmra.mxu3 %vm266_vm0, %v1916_v27  ;;  %288 = vst.msk [vmem:[#allocation2 + $0x49] sm:$0x1] %vm273_vm2, %v1719_v3  ;;  %v1447_v49 = vld [vmem:[#allocation2 + $0x70] sm:$0xff] }
  0x2e   : > { %289 = vst.msk [vmem:[#allocation2 + $0x59] sm:$0x1] %vm273_vm2, %v1719_v3 }
  0x2f   : > { %290 = vst.msk [vmem:[#allocation2 + $0x69] sm:$0x1] %vm273_vm2, %v1719_v3  ;;  %v1502_v57 = vld [vmem:[#allocation2 + $0x90] sm:$0xff] }
  0x30   : > { %291 = vst.msk [vmem:[#allocation2 + $0x79] sm:$0x1] %vm273_vm2, %v1719_v3  ;;  %v466_v30 = vld [vmem:[#allocation2 + $0x2] sm:$0xff] }
  0x31   : > { %292 = vst.msk [vmem:[#allocation2 + $0x89] sm:$0x1] %vm273_vm2, %v1719_v3 }
  0x32   : > { %293 = vst.msk [vmem:[#allocation2 + $0x99] sm:$0x1] %vm273_vm2, %v1719_v3  ;;  %v468_v38 = vld [vmem:[#allocation2 + $0x22] sm:$0xff] }
  0x33   : > { %1423 = vmatmul.msk.f32.vlgmr.msrb.gmra.mxu1 %vm266_vm0, %v314_v28  ;;  %303 = vst.msk [vmem:[#allocation2 + $0x11] sm:$0xff] %vm266_vm0, %v294_v29  ;;  %v469_v41 = vld [vmem:[#allocation2 + $0x32] sm:$0xff] }
  0x34   : > { %1433 = vmatmul.msk.f32.vlgmr.msrb.gmra.mxu2 %vm266_vm0, %v466_v30  ;;  %310 = vst.msk [vmem:[#allocation2 + $0x81] sm:$0xff] %vm266_vm0, %v301_v42  ;;  %v470_v44 = vld [vmem:[#allocation2 + $0x42] sm:$0xff] }
  0x35   : > { %v471_v46 = vld [vmem:[#allocation2 + $0x52] sm:$0xff] }
  0x36   : > { %v472_v48 = vld [vmem:[#allocation2 + $0x62] sm:$0xff] }
  0x37   : > { %v473_v50 = vld [vmem:[#allocation2 + $0x72] sm:$0xff] }
  0x39   : > { %v1538_v2 = vld [vmem:[#allocation2 + $0x92] sm:$0xff] }
  0x3a   : > { %v325_v32 = vld [vmem:[#allocation2 + $0x11] sm:$0xff] }
  0x3b   : > { %v1441_v33 = vld [vmem:[#allocation2 + $0x10] sm:$0xff]  ;;  %1416 = vmatmul.msk.f32.gmra.mxu0 %vm266_vm0, %v325_v32  ;;  %v1448_v51 = vld [vmem:[#allocation2 + $0x80] sm:$0xff] }
  0x3c   : > { %v467_v34 = vld [vmem:[#allocation2 + $0x12] sm:$0xff]  ;;  %1451 = vmatmul.msk.f32.vlgmr.msrb.gmra.mxu3 %vm266_vm0, %v1441_v33  ;;  %1424 = vmatmul.msk.f32.gmra.mxu1 %vm266_vm0, %v1441_v33  ;;  %v1466_v52 = vld [vmem:[#allocation2 + $0x81] sm:$0xff] }
  0x3d   : > { %1434 = vmatmul.msk.f32.gmra.mxu2 %vm266_vm0, %v467_v34  ;;  %v1484_v56 = vld [vmem:[#allocation2 + $0x82] sm:$0xff] }
  0x43   : > { %1469 = vmatmul.msk.f32.vlgmr.msrb.gmra.mxu0 %vm266_vm0, %v325_v32 }
  0x44   : > { %1452 = vmatmul.msk.f32.gmra.mxu3 %vm266_vm0, %v1442_v37  ;;  %1425 = vmatmul.msk.f32.gmra.mxu1 %vm266_vm0, %v1442_v37 }
  0x45   : > { %1435 = vmatmul.msk.f32.gmra.mxu2 %vm266_vm0, %v468_v38 }
  0x4b   : > { %1470 = vmatmul.msk.f32.gmra.mxu0 %vm266_vm0, %v1875_v19 }
  0x4c   : > { %1453 = vmatmul.msk.f32.gmra.mxu3 %vm266_vm0, %v1443_v40  ;;  %1426 = vmatmul.msk.f32.gmra.mxu1 %vm266_vm0, %v1443_v40 }
  0x4d   : > { %1436 = vmatmul.msk.f32.gmra.mxu2 %vm266_vm0, %v469_v41 }
  0x53   : > { %1471 = vmatmul.msk.f32.gmra.mxu0 %vm266_vm0, %v1908_v25 }
  0x54   : > { %1454 = vmatmul.msk.f32.gmra.mxu3 %vm266_vm0, %v1444_v43  ;;  %1427 = vmatmul.msk.f32.gmra.mxu1 %vm266_vm0, %v1444_v43 }
  0x55   : > { %1437 = vmatmul.msk.f32.gmra.mxu2 %vm266_vm0, %v470_v44 }
  0x5b   : > { %1472 = vmatmul.msk.f32.gmra.mxu0 %vm266_vm0, %v1884_v21 }
  0x5c   : > { %1455 = vmatmul.msk.f32.gmra.mxu3 %vm266_vm0, %v1445_v45  ;;  %1428 = vmatmul.msk.f32.gmra.mxu1 %vm266_vm0, %v1445_v45 }
  0x5d   : > { %1438 = vmatmul.msk.f32.gmra.mxu2 %vm266_vm0, %v471_v46 }
  0x63   : > { %1473 = vmatmul.msk.f32.gmra.mxu0 %vm266_vm0, %v1912_v26 }
  0x64   : > { %1456 = vmatmul.msk.f32.gmra.mxu3 %vm266_vm0, %v1446_v47  ;;  %1429 = vmatmul.msk.f32.gmra.mxu1 %vm266_vm0, %v1446_v47 }
  0x65   : > { %1439 = vmatmul.msk.f32.gmra.mxu2 %vm266_vm0, %v472_v48 }
  0x6b   : > { %1474 = vmatmul.msk.f32.gmra.mxu0 %vm266_vm0, %v1896_v24 }
  0x6c   : > { %1457 = vmatmul.msk.f32.gmra.mxu3 %vm266_vm0, %v1447_v49  ;;  %1430 = vmatmul.msk.f32.gmra.mxu1 %vm266_vm0, %v1447_v49 }
  0x6d   : > { %1440 = vmatmul.msk.f32.gmra.mxu2 %vm266_vm0, %v473_v50 }
  0x73   : > { %1475 = vmatmul.msk.f32.gmra.mxu0 %vm266_vm0, %v1916_v27 }
  0x74   : > { %1458 = vmatmul.msk.f32.gmra.mxu3 %vm266_vm0, %v1448_v51  ;;  %1487 = vmatmul.msk.f32.vlgmr.msra.gmra.mxu1 %vm266_vm0, %v467_v34 }
  0x75   : > { %1505 = vmatmul.msk.f32.vlgmr.msra.gmra.mxu2 %vm266_vm0, %v1442_v37 }
  0x7b   : > { %1476 = vmatmul.msk.f32.gmra.mxu0 %vm266_vm0, %v1466_v52 }
  0x7c   : > { %1523 = vmatmul.msk.f32.vlgmr.msra.gmra.mxu3 %vm266_vm0, %v1875_v19  ;;  %1488 = vmatmul.msk.f32.gmra.mxu1 %vm266_vm0, %v468_v38 }
  0x7d   : > { %1506 = vmatmul.msk.f32.gmra.mxu2 %vm266_vm0, %v1443_v40 }
  0x83   : > { %1541 = vmatmul.msk.f32.vlgmr.msra.gmra.mxu0 %vm266_vm0, %v468_v38 }
  0x84   : > { %1524 = vmatmul.msk.f32.gmra.mxu3 %vm266_vm0, %v1908_v25  ;;  %1489 = vmatmul.msk.f32.gmra.mxu1 %vm266_vm0, %v469_v41 }
  0x85   : > { %1507 = vmatmul.msk.f32.gmra.mxu2 %vm266_vm0, %v1444_v43 }
  0x8b   : > { %1542 = vmatmul.msk.f32.gmra.mxu0 %vm266_vm0, %v469_v41 }
  0x8c   : > { %1525 = vmatmul.msk.f32.gmra.mxu3 %vm266_vm0, %v1884_v21  ;;  %1490 = vmatmul.msk.f32.gmra.mxu1 %vm266_vm0, %v470_v44 }
  0x8d   : > { %1508 = vmatmul.msk.f32.gmra.mxu2 %vm266_vm0, %v1445_v45 }
  0x93   : > { %1543 = vmatmul.msk.f32.gmra.mxu0 %vm266_vm0, %v470_v44 }
  0x94   : > { %1526 = vmatmul.msk.f32.gmra.mxu3 %vm266_vm0, %v1912_v26  ;;  %1491 = vmatmul.msk.f32.gmra.mxu1 %vm266_vm0, %v471_v46 }
  0x95   : > { %1509 = vmatmul.msk.f32.gmra.mxu2 %vm266_vm0, %v1446_v47 }
  0x9b   : > { %1544 = vmatmul.msk.f32.gmra.mxu0 %vm266_vm0, %v471_v46  ;;  %v377_v59 = vpop.f32.mrf.mxu0 }
  0x9c   : > { %1527 = vmatmul.msk.f32.gmra.mxu3 %vm266_vm0, %v1896_v24  ;;  %1492 = vmatmul.msk.f32.gmra.mxu1 %vm266_vm0, %v472_v48 }
  0x9d   : > { %1510 = vmatmul.msk.f32.gmra.mxu2 %vm266_vm0, %v1447_v49 }
  0xa0   : > { %v2023_v53 = vpop.f32.mrf.mxu1 }
  0xa3   : > { %1545 = vmatmul.msk.f32.gmra.mxu0 %vm266_vm0, %v472_v48 }
  0xa4   : > { %1528 = vmatmul.msk.f32.gmra.mxu3 %vm266_vm0, %v1916_v27  ;;  %1493 = vmatmul.msk.f32.gmra.mxu1 %vm266_vm0, %v473_v50 }
  0xa5   : > { %1511 = vmatmul.msk.f32.gmra.mxu2 %vm266_vm0, %v1448_v51 }
  0xa7   : > { %v2030_v54 = vpop.f32.mrf.mxu2 }
  0xa8   : > { %v2032_v55 = vpop.f32.mrf.mxu1  ;;  %v2034_v58 = vpop.f32.mrf.mxu3 }
  0xab   : > { %1546 = vmatmul.msk.f32.gmra.mxu0 %vm266_vm0, %v473_v50  ;;  %v2087_v50 = vld [vmem:[%s2221_s2] ss:$0 sm:$0xff] }
  0xac   : > { %1529 = vmatmul.msk.f32.gmra.mxu3 %vm266_vm0, %v1466_v52  ;;  %1494 = vmatmul.msk.f32.gmra.mxu1 %vm266_vm0, %v1484_v56 }
  0xad   : > { %1512 = vmatmul.msk.f32.gmra.mxu2 %vm266_vm0, %v1502_v57 }
  0xaf   : > { %v2040_v60 = vpop.f32.mrf.mxu2 }
  0xb0   : > { %v442_v62 = vpop.f32.mrf.mxu1  ;;  %v2044_v63 = vpop.f32.mrf.mxu3 }
  0xb1   : > { %v443_v28 = vadd.f32 %v442_v62, %v377_v59  ;;  %v2093_v59 = vld [vmem:[%s2222_s3] ss:$0 sm:$0xff] }
  0xb3   : > { %1547 = vmatmul.msk.f32.gmra.mxu0 %vm266_vm0, %v1484_v56 }
  0xb4   : > { %1530 = vmatmul.msk.f32.gmra.mxu3 %vm266_vm0, %v1520_v61 }
  0xb7   : > { %v518_v0 = vpop.f32.mrf.mxu2 }
  0xb8   : > { %v380_v1 = vpop.f32.mrf.mxu0  ;;  %v542_v30 = vadd.f32 %v518_v0, %v443_v28 }
  0xb9   : > { %v445_v3 = vpop.f32.mrf.mxu1 }
  0xba   : > { %v446_v35 = vadd.f32 %v445_v3, %v380_v1 }
  0xbb   : > { %1548 = vmatmul.msk.f32.gmra.mxu0 %vm266_vm0, %v1538_v2 }
  0xbf   : > { %v605_v4 = vpop.f32.mrf.mxu3 }
  0xc0   : > { %v521_v5 = vpop.f32.mrf.mxu2  ;;  %v689_v6 = vpop.f32.mrf.mxu0  ;;  %v629_v34 = vadd.f32 %v605_v4, %v542_v30 }
  0xc1   : > { %v448_v7 = vpop.f32.mrf.mxu1  ;;  %v543_v38 = vadd.f32 %v521_v5, %v446_v35 }
  0xc2   : > { %v713_v37 = vadd.f32 %v689_v6, %v629_v34  ;;  %v449_v45 = vadd.f32 %v448_v7, %v2023_v53 }
  0xc7   : > { %v608_v8 = vpop.f32.mrf.mxu3 }
  0xc8   : > { %v524_v9 = vpop.f32.mrf.mxu2  ;;  %v692_v10 = vpop.f32.mrf.mxu0  ;;  %v630_v43 = vadd.f32 %v608_v8, %v543_v38 }
  0xc9   : > { %v451_v11 = vpop.f32.mrf.mxu1  ;;  %v544_v48 = vadd.f32 %v524_v9, %v449_v45 }
  0xca   : > { %v714_v47 = vadd.f32 %v692_v10, %v630_v43  ;;  %v452_v2 = vadd.f32 %v451_v11, %v2032_v55 }
  0xcf   : > { %v611_v12 = vpop.f32.mrf.mxu3 }
  0xd0   : > { %v527_v13 = vpop.f32.mrf.mxu2  ;;  %v695_v14 = vpop.f32.mrf.mxu0  ;;  %v631_v61 = vadd.f32 %v611_v12, %v544_v48 }
  0xd1   : > { %v2047_v15 = vpop.f32.mrf.mxu1  ;;  %v545_v8 = vadd.f32 %v527_v13, %v452_v2 }
  0xd2   : > { %v715_v4 = vadd.f32 %v695_v14, %v631_v61  ;;  %v455_v55 = vadd.f32 %v2047_v15, %v2030_v54 }
  0xd7   : > { %v2049_v16 = vpop.f32.mrf.mxu3 }
  0xd8   : > { %v2051_v17 = vpop.f32.mrf.mxu2  ;;  %v2053_v18 = vpop.f32.mrf.mxu0  ;;  %v632_v11 = vadd.f32 %v2049_v16, %v545_v8 }
  0xd9   : > { %v2055_v19 = vpop.f32.mrf.mxu1  ;;  %v546_v14 = vadd.f32 %v2051_v17, %v455_v55 }
  0xda   : > { %v458_v17 = vadd.f32 %v2055_v19, %v2040_v60 }
  0xdf   : > { %v2057_v20 = vpop.f32.mrf.mxu3 }
  0xe0   : > { %v2059_v21 = vpop.f32.mrf.mxu2  ;;  %v2061_v22 = vpop.f32.mrf.mxu0  ;;  %v633_v54 = vadd.f32 %v2057_v20, %v546_v14 }
  0xe1   : > { %v2063_v23 = vpop.f32.mrf.mxu1 }
  0xe2   : > { %v717_v61 = vadd.f32 %v2061_v22, %v633_v54 }
  0xe7   : > { %v2065_v24 = vpop.f32.mrf.mxu3 }
  0xe8   : > { %v2067_v25 = vpop.f32.mrf.mxu2  ;;  %v2069_v26 = vpop.f32.mrf.mxu0 }
  0xe9   : > { %v2071_v27 = vpop.f32.mrf.mxu1 }
  0xef   : > { %v2073_v29 = vpop.f32.mrf.mxu3 }
  0xf0   : > { %v2075_v31 = vpop.f32.mrf.mxu2  ;;  %v2077_v32 = vpop.f32.mrf.mxu0 }
  0xf1   : > { %v773_v33 = vpop.f32.mrf.mxu1 }
  0xf2   : > { %v797_v41 = vadd.f32 %v773_v33, %v713_v37 }
  0xf7   : > { %v2079_v36 = vpop.f32.mrf.mxu3 }
  0xf8   : > { %v860_v39 = vpop.f32.mrf.mxu2  ;;  %v2081_v40 = vpop.f32.mrf.mxu0 }
  0xf9   : > { %v776_v42 = vpop.f32.mrf.mxu1  ;;  %v884_v44 = vadd.f32 %v860_v39, %v797_v41  ;;  %v716_v39 = vadd.f32 %v2053_v18, %v632_v11 }
  0xfa   : > { %v798_v56 = vadd.f32 %v776_v42, %v714_v47 }
  0xff   : > { %v944_v46 = vpop.f32.mrf.mxu3 }
 0x100   : > { %v968_v49 = vadd.f32 %v944_v46, %v884_v44  ;;  %v863_v51 = vpop.f32.mrf.mxu2  ;;  %v1028_v52 = vpop.f32.mrf.mxu0 }
 0x101   : > { %v779_v53 = vpop.f32.mrf.mxu1  ;;  %v885_v0 = vadd.f32 %v863_v51, %v798_v56 }
 0x102   : > { %v1052_v57 = vadd.f32 %v1028_v52, %v968_v49  ;;  %v799_v10 = vadd.f32 %v779_v53, %v715_v4 }
 0x104   : > { %v1064_v62 = vmul.f32 %v2087_v50, %v1052_v57  ;;  %v547_v57 = vadd.f32 %v2059_v21, %v458_v17 }
 0x106   : > { %v1076_v1 = vadd.f32 %v2093_v59, %v1064_v62 }
 0x107   : > { %v947_v3 = vpop.f32.mrf.mxu3 }
 0x108   : > { %v1084_v5 = vmax.f32 %v1076_v1, 0.0  ;;  %v969_v6 = vadd.f32 %v947_v3, %v885_v0  ;;  %v866_v7 = vpop.f32.mrf.mxu2  ;;  %v1031_v9 = vpop.f32.mrf.mxu0 }
 0x109   : > { %v782_v28 = vpop.f32.mrf.mxu1  ;;  %v886_v33 = vadd.f32 %v866_v7, %v799_v10  ;;  %v634_v7 = vadd.f32 %v2065_v24, %v547_v57 }
 0x10a   : > { %1092 = vst.msk [vmem:[%s2100_s11] sm:$0xff] %vm266_vm0, %v1084_v5  ;;  %v1053_v12 = vadd.f32 %v1031_v9, %v969_v6  ;;  %v800_v15 = vadd.f32 %v782_v28, %v716_v39 }
 0x10c   : > { %v1065_v30 = vmul.f32 %v2087_v50, %v1053_v12 }
 0x10e   : > { %v1077_v13 = vadd.f32 %v2093_v59, %v1065_v30  ;;  %v461_v30 = vadd.f32 %v2063_v23, %v2034_v58 }
 0x10f   : > { %v950_v34 = vpop.f32.mrf.mxu3 }
 0x110   : > { %v1085_v35 = vmax.f32 %v1077_v13, 0.0  ;;  %v970_v37 = vadd.f32 %v950_v34, %v886_v33  ;;  %v869_v38 = vpop.f32.mrf.mxu2  ;;  %v1034_v41 = vpop.f32.mrf.mxu0  ;;  %v718_v13 = vadd.f32 %v2069_v26, %v634_v7  ;;  %v548_v14 = vadd.f32 %v2067_v25, %v461_v30 }
 0x111   : > { %v785_v44 = vpop.f32.mrf.mxu1  ;;  %v887_v18 = vadd.f32 %v869_v38, %v800_v15  ;;  %v464_v25 = vadd.f32 %v2071_v27, %v2044_v63 }
 0x112   : > { %1093 = vst.msk [vmem:[%s2100_s11 + $0x8] sm:$0xff] %vm266_vm0, %v1085_v35  ;;  %v1100_v42 = vmax.f32 %v1084_v5, %v1085_v35  ;;  %v1054_v43 = vadd.f32 %v1034_v41, %v970_v37  ;;  %v801_v21 = vadd.f32 %v785_v44, %v717_v61  ;;  %v635_v23 = vadd.f32 %v2073_v29, %v548_v14 }
 0x114   : > { %v1108_v16 = vrot.slane %v1100_v42, 2  ;;  %v1109_v45 = vrot.slane %v1100_v42, 4  ;;  %v1110_v46 = vrot.slane %v1100_v42, 6  ;;  %v1549_v47 = vrot.slane %v1100_v42, 9 }
 0x115   : > { %v1066_v48 = vmul.f32 %v2087_v50, %v1054_v43  ;;  %v719_v29 = vadd.f32 %v2077_v32, %v635_v23 }
 0x116   : > { %v1550_v49 = vrot.slane %v1108_v16, 9  ;;  %v1551_v51 = vrot.slane %v1109_v45, 9  ;;  %v1552_v52 = vrot.slane %v1110_v46, 9  ;;  %v1180_v56 = vmax.f32 %v1100_v42, %v1549_v47 }
 0x117   : > { %v1078_v20 = vadd.f32 %v2093_v59, %v1066_v48  ;;  %v953_v53 = vpop.f32.mrf.mxu3 }
 0x118   : > { %v1181_v62 = vmax.f32 %v1108_v16, %v1550_v49  ;;  %v1182_v0 = vmax.f32 %v1109_v45, %v1551_v51  ;;  %v1183_v1 = vmax.f32 %v1110_v46, %v1552_v52  ;;  %v872_v2 = vpop.f32.mrf.mxu2  ;;  %v971_v19 = vadd.f32 %v953_v53, %v887_v18  ;;  %v1037_v3 = vpop.f32.mrf.mxu0 }
 0x119   : > { %v1086_v60 = vmax.f32 %v1078_v20, 0.0  ;;  %v1212_v4 = vperm.slane %v1180_v56, 0  ;;  %v888_v10 = vadd.f32 %v872_v2, %v801_v21  ;;  %v788_v12 = vpop.f32.mrf.mxu1  ;;  %v549_v56 = vadd.f32 %v2075_v31, %v464_v25 }
 0x11a   : > { %v1213_v5 = vperm.slane %v1181_v62, 0  ;;  %v1214_v6 = vperm.slane %v1182_v0, 0  ;;  %v1055_v22 = vadd.f32 %v1037_v3, %v971_v19  ;;  %v1215_v8 = vperm.slane %v1183_v1, 0 }
 0x11b   : > { %1094 = vst.msk [vmem:[%s2100_s11 + $0x10] sm:$0xff] %vm266_vm0, %v1086_v60  ;;  %v802_v39 = vadd.f32 %v788_v12, %v718_v13 }
 0x11c   : > { %v1229_v9 = vsel %vm1228_vm3, %v1213_v5, %v1212_v4  ;;  %v1067_v24 = vmul.f32 %v2087_v50, %v1055_v22 }
 0x11d   : > { %v1231_v28 = vsel %vm1230_vm4, %v1214_v6, %v1229_v9 }
 0x11e   : > { %v1233_v33 = vsel %vm1232_vm5, %v1215_v8, %v1231_v28  ;;  %v1079_v55 = vadd.f32 %v2093_v59, %v1067_v24 }
 0x11f   : > { %1248 = vst.msk [vmem:[%s2127_s17] sm:$0xf] %vm1247_vm6, %v1233_v33  ;;  %v956_v11 = vpop.f32.mrf.mxu3 }
 0x120   : > { %v972_v34 = vadd.f32 %v956_v11, %v888_v10  ;;  %v875_v35 = vpop.f32.mrf.mxu2  ;;  %v1087_v37 = vmax.f32 %v1079_v55, 0.0  ;;  %v1040_v38 = vpop.f32.mrf.mxu0 }
 0x121   : > { %v889_v43 = vadd.f32 %v875_v35, %v802_v39  ;;  %v791_v45 = vpop.f32.mrf.mxu1 }
 0x122   : > { %v1056_v41 = vadd.f32 %v1040_v38, %v972_v34  ;;  %1095 = vst.msk [vmem:[%s2100_s11 + $0x18] sm:$0xff] %vm266_vm0, %v1087_v37  ;;  %v1101_v58 = vmax.f32 %v1086_v60, %v1087_v37  ;;  %v803_v27 = vadd.f32 %v791_v45, %v719_v29  ;;  %v636_v60 = vadd.f32 %v2079_v36, %v549_v56 }
 0x124   : > { %v1068_v42 = vmul.f32 %v2087_v50, %v1056_v41  ;;  %v1111_v44 = vrot.slane %v1101_v58, 2  ;;  %v1112_v54 = vrot.slane %v1101_v58, 4  ;;  %v1113_v15 = vrot.slane %v1101_v58, 6 }
 0x125   : > { %v1553_v26 = vrot.slane %v1101_v58, 9  ;;  %v720_v8 = vadd.f32 %v2081_v40, %v636_v60 }
 0x126   : > { %v1080_v16 = vadd.f32 %v2093_v59, %v1068_v42  ;;  %v1554_v46 = vrot.slane %v1111_v44, 9  ;;  %v1555_v47 = vrot.slane %v1112_v54, 9  ;;  %v1556_v17 = vrot.slane %v1113_v15, 9 }
 0x127   : > { %v1184_v48 = vmax.f32 %v1101_v58, %v1553_v26  ;;  %v959_v18 = vpop.f32.mrf.mxu3 }
 0x128   : > { %v1088_v49 = vmax.f32 %v1080_v16, 0.0  ;;  %v973_v51 = vadd.f32 %v959_v18, %v889_v43  ;;  %v878_v52 = vpop.f32.mrf.mxu2  ;;  %v1185_v57 = vmax.f32 %v1111_v44, %v1554_v46  ;;  %v1186_v20 = vmax.f32 %v1112_v54, %v1555_v47  ;;  %v1043_v63 = vpop.f32.mrf.mxu0 }
 0x129   : > { %v1187_v53 = vmax.f32 %v1113_v15, %v1556_v17  ;;  %v1216_v62 = vperm.slane %v1184_v48, 0  ;;  %v890_v2 = vadd.f32 %v878_v52, %v803_v27  ;;  %v794_v7 = vpop.f32.mrf.mxu1 }
 0x12a   : > { %1096 = vst.msk [vmem:[%s2100_s11 + $0x20] sm:$0xff] %vm266_vm0, %v1088_v49  ;;  %v1057_v61 = vadd.f32 %v1043_v63, %v973_v51  ;;  %v1217_v0 = vperm.slane %v1185_v57, 0  ;;  %v1218_v1 = vperm.slane %v1186_v20, 0  ;;  %v804_v28 = vadd.f32 %v794_v7, %v720_v8 }
 0x12b   : > { %v1219_v19 = vperm.slane %v1187_v53, 0 }
 0x12c   : > { %v1069_v32 = vmul.f32 %v2087_v50, %v1057_v61  ;;  %v1234_v31 = vsel %vm1228_vm3, %v1217_v0, %v1216_v62 }
 0x12d   : > { %v1235_v3 = vsel %vm1230_vm4, %v1218_v1, %v1234_v31 }
 0x12e   : > { %v1081_v4 = vadd.f32 %v2093_v59, %v1069_v32  ;;  %v1236_v5 = vsel %vm1232_vm5, %v1219_v19, %v1235_v3 }
 0x12f   : > { %v962_v6 = vpop.f32.mrf.mxu3  ;;  %1249 = vst.msk [vmem:[%s2127_s17 + $0x4] sm:$0xf] %vm1247_vm6, %v1236_v5 }
 0x130   : > { %v1089_v21 = vmax.f32 %v1081_v4, 0.0  ;;  %v974_v22 = vadd.f32 %v962_v6, %v890_v2  ;;  %v1046_v9 = vpop.f32.mrf.mxu0  ;;  %v881_v12 = vpop.f32.mrf.mxu2 }
 0x131   : > { %v891_v13 = vadd.f32 %v881_v12, %v804_v28 }
 0x132   : > { %1097 = vst.msk [vmem:[%s2100_s11 + $0x28] sm:$0xff] %vm266_vm0, %v1089_v21  ;;  %v1102_v36 = vmax.f32 %v1088_v49, %v1089_v21  ;;  %v1058_v10 = vadd.f32 %v1046_v9, %v974_v22 }
 0x134   : > { %v1114_v24 = vrot.slane %v1102_v36, 2  ;;  %v1115_v30 = vrot.slane %v1102_v36, 4  ;;  %v1116_v33 = vrot.slane %v1102_v36, 6  ;;  %v1557_v55 = vrot.slane %v1102_v36, 9 }
 0x135   : > { %v1070_v11 = vmul.f32 %v2087_v50, %v1058_v10 }
 0x136   : > { %v1558_v14 = vrot.slane %v1114_v24, 9  ;;  %v1559_v34 = vrot.slane %v1115_v30, 9  ;;  %v1560_v35 = vrot.slane %v1116_v33, 9  ;;  %v1188_v40 = vmax.f32 %v1102_v36, %v1557_v55 }
 0x137   : > { %v1082_v37 = vadd.f32 %v2093_v59, %v1070_v11  ;;  %v965_v38 = vpop.f32.mrf.mxu3 }
 0x138   : > { %v1189_v39 = vmax.f32 %v1114_v24, %v1558_v14  ;;  %v1190_v41 = vmax.f32 %v1115_v30, %v1559_v34  ;;  %v1191_v58 = vmax.f32 %v1116_v33, %v1560_v35  ;;  %v975_v42 = vadd.f32 %v965_v38, %v891_v13  ;;  %v1049_v43 = vpop.f32.mrf.mxu0 }
 0x139   : > { %v1090_v23 = vmax.f32 %v1082_v37, 0.0  ;;  %v1220_v44 = vperm.slane %v1188_v40, 0 }
 0x13a   : > { %v1221_v54 = vperm.slane %v1189_v39, 0  ;;  %v1222_v15 = vperm.slane %v1190_v41, 0  ;;  %v1059_v26 = vadd.f32 %v1049_v43, %v975_v42  ;;  %v1223_v25 = vperm.slane %v1191_v58, 0 }
 0x13b   : > { %1098 = vst.msk [vmem:[%s2100_s11 + $0x30] sm:$0xff] %vm266_vm0, %v1090_v23 }
 0x13c   : > { %v1237_v16 = vsel %vm1228_vm3, %v1221_v54, %v1220_v44  ;;  %v1071_v46 = vmul.f32 %v2087_v50, %v1059_v26 }
 0x13d   : > { %v1238_v45 = vsel %vm1230_vm4, %v1222_v15, %v1237_v16 }
 0x13e   : > { %v1239_v47 = vsel %vm1232_vm5, %v1223_v25, %v1238_v45  ;;  %v1083_v17 = vadd.f32 %v2093_v59, %v1071_v46 }
 0x13f   : > { %1250 = vst.msk [vmem:[%s2127_s17 + $0x8] sm:$0xf] %vm1247_vm6, %v1239_v47 }
 0x140   : > { %v1091_v48 = vmax.f32 %v1083_v17, 0.0 }
 0x142   : > { %1099 = vst.msk [vmem:[%s2100_s11 + $0x38] sm:$0xff] %vm266_vm0, %v1091_v48  ;;  %v1103_v18 = vmax.f32 %v1090_v23, %v1091_v48 }
 0x143   : > { %1666 = shalt.err (!%p1663_p5)
}
 0x144   : > { %s1720_s7 = smov 128   ;;  %s1721_s11 = smov 8   ;;  %v1117_v50 = vrot.slane %v1103_v18, 2  ;;  %v1118_v59 = vrot.slane %v1103_v18, 4  ;;  %v1119_v29 = vrot.slane %v1103_v18, 6  ;;  %v1561_v49 = vrot.slane %v1103_v18, 9 }
 0x145   : > { %1579 = dma.vmem_to_hbm [thread:$0]  (%p1792_p4), %s1277_s21, 1024, %s1279_s12, %s1253_s29, %s1720_s7, %s1720_s7, %s1721_s11  }
 0x146   : > { %v1562_v51 = vrot.slane %v1117_v50, 9  ;;  %v1563_v52 = vrot.slane %v1118_v59, 9  ;;  %v1564_v56 = vrot.slane %v1119_v29, 9  ;;  %v1192_v57 = vmax.f32 %v1103_v18, %v1561_v49 }
 0x148   : > { %v1193_v20 = vmax.f32 %v1117_v50, %v1562_v51  ;;  %v1194_v53 = vmax.f32 %v1118_v59, %v1563_v52  ;;  %v1195_v63 = vmax.f32 %v1119_v29, %v1564_v56  ;;  %v1224_v27 = vperm.slane %v1192_v57, 0 }
 0x14a   : > { %v1225_v61 = vperm.slane %v1193_v20, 0  ;;  %v1226_v62 = vperm.slane %v1194_v53, 0  ;;  %v1227_v0 = vperm.slane %v1195_v63, 0 }
 0x14c   : > { %v1240_v1 = vsel %vm1228_vm3, %v1225_v61, %v1224_v27 }
 0x14d   : > { %v1241_v32 = vsel %vm1230_vm4, %v1226_v62, %v1240_v1 }
 0x14e   : > { %v1242_v2 = vsel %vm1232_vm5, %v1227_v0, %v1241_v32 }
 0x14f   : > { %1251 = vst.msk [vmem:[%s2127_s17 + $0xc] sm:$0xf] %vm1247_vm6, %v1242_v2 }
 0x150 PF: > { %p1585_p4 = scmp.ge.s32.totalorder %s1717_s23, 2  ;;  %s1297_s28 = sand.u32 1, %s1697_s18  }
 0x151   : > { %s1298_s24 = scalar_lea.sflag [#allocation4], %s1297_s28 }
 0x152   : > { %p1582_p6 = pnand %p1585_p4, %p1799_p8 }
 0x154   : > { %p1583_p7 = pneg %p1582_p6 }
 0x156   : > { %1692 = dma.done.wait (%p1583_p7), %s1298_s24, 1024  }
 0x157   : > { %1694 = vsyncadd (%p1583_p7), %s1298_s24, 4294966272  ;;  %s19_s23 = sadd.s32 1, %s1717_s23   ;;  %s2227_s18 = smov %s1701_s19 }
 0x158   : > { %p16_p9 = scmp.ge.s32.totalorder %s19_s23, 4   ;;  %s2228_s19 = smov %s1705_s20 }
 0x159   : > { %s2229_s20 = smov %s1805_s6  ;;  %s2230_s21 = smov %s1713_s22 }
 0x15a   : > { %s2231_s22 = smov %s2233_s26  ;;  %18 = sbr.rel (!%p16_p9) target bundleno = 4 (0x4), region = 100 }
 0x15f   :  { %1316 = vsyncpa [#allocation4], 1 }
 0x160   :  { %1318 = vsyncpa [#allocation4 + $0x1], 1 }

// kernel: encoder_forward.6
= control target key start
LH: loop header
LB: loop body
LE: loop exit
PB: predicated region body
PF: predicated region fallthrough
CT: control target
= control target key end

     0   :  { %s3610_s15 = smov 0   ;;  %s3612_s16 = smov 0   ;;  %s4918_s0 = inlined_call_operand.vmem [shape: f32[2,16,16,4], index: 0, kind: input, shape index: {}]   ;;  %s4919_s1 = inlined_call_operand.vmem [shape: f32[9,4,8], index: 1, kind: input, shape index: {}]   ;;  %s4920_s2 = inlined_call_operand.vmem [shape: f32[1,8], index: 2, kind: input, shape index: {}]   ;;  %s4921_s3 = inlined_call_operand.vmem [shape: f32[1,8], index: 3, kind: input, shape index: {}]   ;;  %s4922_s4 = inlined_call_operand.vmem [shape: f32[2,16,16,8], index: 4, kind: output, shape index: {}]  }
   0x1   :  { %s3614_s17 = smov 0  }
   0x2 LB: > { %s26_s18 = sadd.s32 1, %s3578_s16  ;;  %p3024_p0 = scmp.ge.s32.totalorder %s3582_s17, 1  ;;  %s3582_s17 = sphi %s3614_s17, %s14_s17   ;;  %s3578_s16 = sphi %s3612_s16, %s5060_s16   ;;  %s3574_s15 = sphi %s3610_s15, %s5059_s15  }
   0x3   : > { %p28_p1 = scmp.ge.s32.totalorder %s26_s18, 2  ;;  %p176_p2 = scmp.lt.s32.totalorder %s3582_s17, 3 }
   0x5   : > { %s5062_s18 = smov (%p28_p1, %s26_s18), 0  ;;  %p177_p3 = pnand %p3024_p0, %p176_p2 }
   0x7   : > { %180 = sbr.rel (%p177_p3) target bundleno = 741 (0x2e5), region = 36 }
   0xc   : > { %v3029_v0 = vld [vmem:[%s4919_s1 + $0x4] sm:$0xf]  ;;  %vm505_vm0 = vcmask 1043456   ;;  %p207_p4 = scmp.lt.s32.totalorder %s3574_s15, 1  ;;  %vm227_vm1 = vcmask 31744   ;;  %v3584_v4 = vmov 0.0  }
   0xd   : > { %3530 = vmatpush.msk.msra.mxu1 %vm505_vm0, %v3029_v0  ;;  %3531 = vmatpush.msk.msra.mxu2 %vm505_vm0, %v3029_v0  ;;  %v3096_v1 = vld [vmem:[%s4919_s1 + $0x8] sm:$0xf]  ;;  %v3162_v2 = vld [vmem:[%s4919_s1 + $0xc] sm:$0xf]  ;;  %v373_v3 = vld [vmem:[%s4919_s1] sm:$0xf] }
   0xe   : > { %s5064_s15 = smov (!%p207_p4, %s3574_s15), 1  ;;  %3532 = vmatpush.msk.msra.mxu3 %vm505_vm0, %v3029_v0  ;;  %228 = vst.msk [vmem:[#allocation2] sm:$0xff] %vm227_vm1, %v3584_v4  ;;  %v3228_v5 = vld [vmem:[%s4919_s1 + $0x10] sm:$0xf]  ;;  %vm230_vm2 = vcmask 25600   ;;  %3030 = vmatpush.msk.msra.mxu0 %vm505_vm0, %v3029_v0  ;;  %vm236_vm3 = vcmask 24576  }
   0xf   : > { %3097 = vmatpush.msk.msrb.mxu2 %vm505_vm0, %v3096_v1  ;;  %3063 = vmatpush.msk.msrb.mxu1 %vm505_vm0, %v373_v3  ;;  %229 = vst.msk [vmem:[#allocation2 + $0x8] sm:$0xff] %vm227_vm1, %v3584_v4  ;;  %s3528_s29 = sshll.u32 %s5064_s15, 8  ;;  %v3360_v56 = vld [vmem:[%s4919_s1 + $0x18] sm:$0xf]  ;;  %v3426_v58 = vld [vmem:[%s4919_s1 + $0x1c] sm:$0xf] }
  0x10   : > { %3163 = vmatpush.msk.msrb.mxu3 %vm505_vm0, %v3162_v2  ;;  %233 = vst.msk [vmem:[#allocation2 + $0x198] sm:$0xff] %vm227_vm1, %v3584_v4  ;;  %s3664_s6 = scalar_lea.vmem %s4918_s0, %s3528_s29  ;;  %3229 = vmatpush.msk.msrb.mxu0 %vm505_vm0, %v3228_v5  ;;  %v3294_v59 = vld [vmem:[%s4919_s1 + $0x14] sm:$0xf]  ;;  %v3492_v0 = vld [vmem:[%s4919_s1 + $0x20] sm:$0xf]  ;;  %s4647_s25 = scalar_lea.vmem %s4922_s4, %s3528_s29  ;;  %vm2890_vm4 = vcmask 64512  }
  0x11   : > { %234 = vst.msk [vmem:[#allocation2 + $0x1a0] sm:$0xff] %vm227_vm1, %v3584_v4  ;;  %v279_v6 = vld [vmem:[%s3664_s6 + $0x30] sm:$0xff]  ;;  %v280_v9 = vld [vmem:[%s3664_s6 + $0x38] sm:$0xff]  ;;  %v281_v13 = vld [vmem:[%s3664_s6 + $0x40] sm:$0xff] }
  0x12   : > { %v287_v7 = vld [vmem:[%s3664_s6 + $0x70] sm:$0xff]  ;;  %231 = vst.msk [vmem:[#allocation2 + $0x10] sm:$0x3] %vm230_vm2, %v3584_v4  ;;  %v288_v10 = vld [vmem:[%s3664_s6 + $0x78] sm:$0xff]  ;;  %v289_v14 = vld [vmem:[%s3664_s6 + $0x80] sm:$0xff] }
  0x13   : > { %v295_v8 = vld [vmem:[%s3664_s6 + $0xb0] sm:$0xff]  ;;  %312 = vst.msk [vmem:[#allocation2 + $0x61] sm:$0xff] %vm227_vm1, %v279_v6  ;;  %v296_v11 = vld [vmem:[%s3664_s6 + $0xb8] sm:$0xff]  ;;  %v297_v15 = vld [vmem:[%s3664_s6 + $0xc0] sm:$0xff] }
  0x14   : > { %320 = vst.msk [vmem:[#allocation2 + $0xc1] sm:$0xff] %vm227_vm1, %v287_v7  ;;  %v282_v17 = vld [vmem:[%s3664_s6 + $0x48] sm:$0xff]  ;;  %v273_v22 = vld [vmem:[%s3664_s6] sm:$0xff]  ;;  %v283_v24 = vld [vmem:[%s3664_s6 + $0x50] sm:$0xff] }
  0x15   : > { %328 = vst.msk [vmem:[#allocation2 + $0x121] sm:$0xff] %vm227_vm1, %v295_v8  ;;  %v290_v19 = vld [vmem:[%s3664_s6 + $0x88] sm:$0xff]  ;;  %v291_v25 = vld [vmem:[%s3664_s6 + $0x90] sm:$0xff]  ;;  %v284_v31 = vld [vmem:[%s3664_s6 + $0x58] sm:$0xff] }
  0x16   : > { %313 = vst.msk [vmem:[#allocation2 + $0x69] sm:$0xff] %vm227_vm1, %v280_v9  ;;  %v374_v12 = vld [vmem:[#allocation2 + $0x1] sm:$0xff]  ;;  %v299_v29 = vld [vmem:[%s3664_s6 + $0xd0] sm:$0xff]  ;;  %v292_v32 = vld [vmem:[%s3664_s6 + $0x98] sm:$0xff] }
  0x17   : > { %321 = vst.msk [vmem:[#allocation2 + $0xc9] sm:$0xff] %vm227_vm1, %v288_v10  ;;  %3031 = vmatmul.msk.f32.vlgmr.msra.gmra.mxu0 %vm227_vm1, %v374_v12  ;;  %v298_v23 = vld [vmem:[%s3664_s6 + $0xc8] sm:$0xff]  ;;  %v275_v33 = vld [vmem:[%s3664_s6 + $0x10] sm:$0xff]  ;;  %v300_v34 = vld [vmem:[%s3664_s6 + $0xd8] sm:$0xff] }
  0x18   : > { %329 = vst.msk [vmem:[#allocation2 + $0x129] sm:$0xff] %vm227_vm1, %v296_v11  ;;  %v274_v27 = vld [vmem:[%s3664_s6 + $0x8] sm:$0xff]  ;;  %v285_v36 = vld [vmem:[%s3664_s6 + $0x60] sm:$0xff]  ;;  %v276_v39 = vld [vmem:[%s3664_s6 + $0x18] sm:$0xff]  ;;  %3493 = vmatpush.msk.msra.mxu0 %vm505_vm0, %v3492_v0 }
  0x19   : > { %314 = vst.msk [vmem:[#allocation2 + $0x79] sm:$0xff] %vm227_vm1, %v281_v13  ;;  %v375_v21 = vld [vmem:[#allocation2 + $0x9] sm:$0xff]  ;;  %v293_v37 = vld [vmem:[%s3664_s6 + $0xa0] sm:$0xff] }
  0x1a   : > { %v3688_v16 = vld [vmem:[#allocation2 + $0x61] sm:$0xff]  ;;  %322 = vst.msk [vmem:[#allocation2 + $0xd9] sm:$0xff] %vm227_vm1, %v289_v14 }
  0x1b   : > { %3039 = vmatmul.msk.f32.vlgmr.msra.gmra.mxu1 %vm227_vm1, %v3688_v16  ;;  %v3694_v18 = vld [vmem:[#allocation2 + $0xc1] sm:$0xff]  ;;  %235 = vst.msk [vmem:[#allocation2 + $0x1a8] sm:$0x3] %vm230_vm2, %v3584_v4 }
  0x1c   : > { %3047 = vmatmul.msk.f32.vlgmr.msra.gmra.mxu2 %vm227_vm1, %v3694_v18  ;;  %v3701_v20 = vld [vmem:[#allocation2 + $0x121] sm:$0xff]  ;;  %330 = vst.msk [vmem:[#allocation2 + $0x139] sm:$0xff] %vm227_vm1, %v297_v15  ;;  %3295 = vmatpush.msk.msra.mxu1 %vm505_vm0, %v3294_v59 }
  0x1d   : > { %3055 = vmatmul.msk.f32.vlgmr.msra.gmra.mxu3 %vm227_vm1, %v3701_v20  ;;  %315 = vst.msk [vmem:[#allocation2 + $0x81] sm:$0xff] %vm227_vm1, %v282_v17  ;;  %v3714_v26 = vld [vmem:[#allocation2 + $0x69] sm:$0xff]  ;;  %v301_v41 = vld [vmem:[%s3664_s6 + $0xe0] sm:$0xff]  ;;  %3361 = vmatpush.msk.msra.mxu2 %vm505_vm0, %v3360_v56 }
  0x1e   : > { %323 = vst.msk [vmem:[#allocation2 + $0xe1] sm:$0xff] %vm227_vm1, %v290_v19  ;;  %v3718_v28 = vld [vmem:[#allocation2 + $0xc9] sm:$0xff]  ;;  %v277_v46 = vld [vmem:[%s3664_s6 + $0x20] sm:$0xff]  ;;  %3427 = vmatpush.msk.msra.mxu3 %vm505_vm0, %v3426_v58 }
  0x1f   : > { %3032 = vmatmul.msk.f32.gmra.mxu0 %vm227_vm1, %v375_v21  ;;  %306 = vst.msk [vmem:[#allocation2 + $0x19] sm:$0xff] %vm227_vm1, %v273_v22  ;;  %v3722_v30 = vld [vmem:[#allocation2 + $0x129] sm:$0xff] }
  0x20   : > { %331 = vst.msk [vmem:[#allocation2 + $0x141] sm:$0xff] %vm227_vm1, %v298_v23  ;;  %v3746_v38 = vld [vmem:[#allocation2 + $0x79] sm:$0xff]  ;;  %v286_v43 = vld [vmem:[%s3664_s6 + $0x68] sm:$0xff] }
  0x21   : > { %316 = vst.msk [vmem:[#allocation2 + $0x91] sm:$0xff] %vm227_vm1, %v283_v24  ;;  %v3750_v40 = vld [vmem:[#allocation2 + $0xd9] sm:$0xff]  ;;  %v294_v44 = vld [vmem:[%s3664_s6 + $0xa8] sm:$0xff] }
  0x22   : > { %324 = vst.msk [vmem:[#allocation2 + $0xf1] sm:$0xff] %vm227_vm1, %v291_v25  ;;  %v302_v47 = vld [vmem:[%s3664_s6 + $0xe8] sm:$0xff] }
  0x23   : > { %3040 = vmatmul.msk.f32.gmra.mxu1 %vm227_vm1, %v3714_v26  ;;  %307 = vst.msk [vmem:[#allocation2 + $0x21] sm:$0xff] %vm227_vm1, %v274_v27  ;;  %v3754_v42 = vld [vmem:[#allocation2 + $0x139] sm:$0xff]  ;;  %v278_v7 = vld [vmem:[%s3664_s6 + $0x28] sm:$0xff] }
  0x24   : > { %3048 = vmatmul.msk.f32.gmra.mxu2 %vm227_vm1, %v3718_v28  ;;  %332 = vst.msk [vmem:[#allocation2 + $0x151] sm:$0xff] %vm227_vm1, %v299_v29  ;;  %v3776_v48 = vld [vmem:[#allocation2 + $0x81] sm:$0xff] }
  0x25   : > { %3056 = vmatmul.msk.f32.gmra.mxu3 %vm227_vm1, %v3722_v30  ;;  %317 = vst.msk [vmem:[#allocation2 + $0x99] sm:$0xff] %vm227_vm1, %v284_v31  ;;  %v3779_v49 = vld [vmem:[#allocation2 + $0xe1] sm:$0xff] }
  0x26   : > { %v3738_v35 = vld [vmem:[#allocation2 + $0x19] sm:$0xff]  ;;  %325 = vst.msk [vmem:[#allocation2 + $0xf9] sm:$0xff] %vm227_vm1, %v292_v32  ;;  %v834_v9 = vld [vmem:[#allocation2 + $0x2] sm:$0xff] }
  0x27   : > { %3033 = vmatmul.msk.f32.gmra.mxu0 %vm227_vm1, %v3738_v35  ;;  %308 = vst.msk [vmem:[#allocation2 + $0x31] sm:$0xff] %vm227_vm1, %v275_v33  ;;  %v3781_v50 = vld [vmem:[#allocation2 + $0x141] sm:$0xff] }
  0x28   : > { %333 = vst.msk [vmem:[#allocation2 + $0x159] sm:$0xff] %vm227_vm1, %v300_v34  ;;  %v3801_v52 = vld [vmem:[#allocation2 + $0x91] sm:$0xff]  ;;  %v342_v12 = vld [vmem:[#allocation2 + $0x8] sm:$0xff] }
  0x29   : > { %318 = vst.msk [vmem:[#allocation2 + $0xa9] sm:$0xff] %vm227_vm1, %v285_v36  ;;  %v3805_v53 = vld [vmem:[#allocation2 + $0xf1] sm:$0xff]  ;;  %v4011_v31 = vld [vmem:[#allocation2 + $0x68] sm:$0xff] }
  0x2a   : > { %326 = vst.msk [vmem:[#allocation2 + $0x109] sm:$0xff] %vm227_vm1, %v293_v37  ;;  %v3764_v45 = vld [vmem:[#allocation2 + $0x21] sm:$0xff] }
  0x2b   : > { %3041 = vmatmul.msk.f32.gmra.mxu1 %vm227_vm1, %v3746_v38  ;;  %309 = vst.msk [vmem:[#allocation2 + $0x39] sm:$0xff] %vm227_vm1, %v276_v39  ;;  %v3809_v54 = vld [vmem:[#allocation2 + $0x151] sm:$0xff]  ;;  %v3131_v14 = vld [vmem:[#allocation2 + $0x20] sm:$0xff] }
  0x2c   : > { %3049 = vmatmul.msk.f32.gmra.mxu2 %vm227_vm1, %v3750_v40  ;;  %334 = vst.msk [vmem:[#allocation2 + $0x169] sm:$0xff] %vm227_vm1, %v301_v41  ;;  %v3833_v57 = vld [vmem:[#allocation2 + $0x99] sm:$0xff]  ;;  %v4025_v34 = vld [vmem:[#allocation2 + $0x62] sm:$0xff] }
  0x2d   : > { %3057 = vmatmul.msk.f32.gmra.mxu3 %vm227_vm1, %v3754_v42  ;;  %319 = vst.msk [vmem:[#allocation2 + $0xb1] sm:$0xff] %vm227_vm1, %v286_v43  ;;  %v3847_v60 = vld [vmem:[#allocation2 + $0xf9] sm:$0xff] }
  0x2e   : > { %327 = vst.msk [vmem:[#allocation2 + $0x111] sm:$0xff] %vm227_vm1, %v294_v44  ;;  %v3787_v51 = vld [vmem:[#allocation2 + $0x31] sm:$0xff]  ;;  %v4047_v43 = vld [vmem:[#allocation2 + $0x80] sm:$0xff] }
  0x2f   : > { %3034 = vmatmul.msk.f32.gmra.mxu0 %vm227_vm1, %v3764_v45  ;;  %310 = vst.msk [vmem:[#allocation2 + $0x49] sm:$0xff] %vm227_vm1, %v277_v46  ;;  %v3853_v61 = vld [vmem:[#allocation2 + $0x159] sm:$0xff] }
  0x30   : > { %335 = vst.msk [vmem:[#allocation2 + $0x171] sm:$0xff] %vm227_vm1, %v302_v47  ;;  %v3877_v63 = vld [vmem:[#allocation2 + $0xa9] sm:$0xff]  ;;  %v4063_v46 = vld [vmem:[#allocation2 + $0x7a] sm:$0xff] }
  0x31   : > { %237 = vst.msk [vmem:[#allocation2] sm:$0x1] %vm236_vm3, %v3584_v4  ;;  %v3884_v1 = vld [vmem:[#allocation2 + $0x109] sm:$0xff]  ;;  %v4085_v0 = vld [vmem:[#allocation2 + $0x98] sm:$0xff] }
  0x32   : > { %238 = vst.msk [vmem:[#allocation2 + $0x18] sm:$0x1] %vm236_vm3, %v3584_v4  ;;  %v3819_v55 = vld [vmem:[#allocation2 + $0x39] sm:$0xff] }
  0x33   : > { %3042 = vmatmul.msk.f32.gmra.mxu1 %vm227_vm1, %v3776_v48  ;;  %239 = vst.msk [vmem:[#allocation2 + $0x30] sm:$0x1] %vm236_vm3, %v3584_v4  ;;  %v3889_v2 = vld [vmem:[#allocation2 + $0x169] sm:$0xff]  ;;  %v3964_v19 = vld [vmem:[#allocation2 + $0x38] sm:$0xff] }
  0x34   : > { %3050 = vmatmul.msk.f32.gmra.mxu2 %vm227_vm1, %v3779_v49  ;;  %240 = vst.msk [vmem:[#allocation2 + $0x48] sm:$0x1] %vm236_vm3, %v3584_v4  ;;  %v3909_v3 = vld [vmem:[#allocation2 + $0xb1] sm:$0xff] }
  0x35   : > { %3058 = vmatmul.msk.f32.gmra.mxu3 %vm227_vm1, %v3781_v50  ;;  %241 = vst.msk [vmem:[#allocation2 + $0x60] sm:$0x1] %vm236_vm3, %v3584_v4  ;;  %v3913_v5 = vld [vmem:[#allocation2 + $0x111] sm:$0xff] }
  0x36   : > { %242 = vst.msk [vmem:[#allocation2 + $0x78] sm:$0x1] %vm236_vm3, %v3584_v4  ;;  %v3863_v62 = vld [vmem:[#allocation2 + $0x49] sm:$0xff]  ;;  %v3973_v21 = vld [vmem:[#allocation2 + $0x32] sm:$0xff] }
  0x37   : > { %3035 = vmatmul.msk.f32.gmra.mxu0 %vm227_vm1, %v3787_v51  ;;  %243 = vst.msk [vmem:[#allocation2 + $0x90] sm:$0x1] %vm236_vm3, %v3584_v4  ;;  %v3917_v6 = vld [vmem:[#allocation2 + $0x171] sm:$0xff] }
  0x38   : > { %244 = vst.msk [vmem:[#allocation2 + $0xa8] sm:$0x1] %vm236_vm3, %v3584_v4  ;;  %v341_v8 = vld [vmem:[#allocation2] sm:$0xff] }
  0x39   : > { %245 = vst.msk [vmem:[#allocation2 + $0xc0] sm:$0x1] %vm236_vm3, %v3584_v4  ;;  %v3130_v10 = vld [vmem:[#allocation2 + $0x18] sm:$0xff] }
  0x3a   : > { %246 = vst.msk [vmem:[#allocation2 + $0xd8] sm:$0x1] %vm236_vm3, %v3584_v4  ;;  %v3953_v15 = vld [vmem:[#allocation2 + $0x30] sm:$0xff] }
  0x3b   : > { %3043 = vmatmul.msk.f32.gmra.mxu1 %vm227_vm1, %v3801_v52  ;;  %247 = vst.msk [vmem:[#allocation2 + $0xf0] sm:$0x1] %vm236_vm3, %v3584_v4  ;;  %v3975_v22 = vld [vmem:[#allocation2 + $0x48] sm:$0xff] }
  0x3c   : > { %3051 = vmatmul.msk.f32.gmra.mxu2 %vm227_vm1, %v3805_v53  ;;  %248 = vst.msk [vmem:[#allocation2 + $0x108] sm:$0x1] %vm236_vm3, %v3584_v4  ;;  %v3999_v27 = vld [vmem:[#allocation2 + $0x60] sm:$0xff] }
  0x3d   : > { %3059 = vmatmul.msk.f32.gmra.mxu3 %vm227_vm1, %v3809_v54  ;;  %249 = vst.msk [vmem:[#allocation2 + $0x120] sm:$0x1] %vm236_vm3, %v3584_v4 }
  0x3e   : > { %250 = vst.msk [vmem:[#allocation2 + $0x138] sm:$0x1] %vm236_vm3, %v3584_v4  ;;  %v4065_v47 = vld [vmem:[#allocation2 + $0x90] sm:$0xff] }
  0x3f   : > { %3036 = vmatmul.msk.f32.gmra.mxu0 %vm227_vm1, %v3819_v55  ;;  %251 = vst.msk [vmem:[#allocation2 + $0x150] sm:$0x1] %vm236_vm3, %v3584_v4 }
  0x40   : > { %252 = vst.msk [vmem:[#allocation2 + $0x168] sm:$0x1] %vm236_vm3, %v3584_v4 }
  0x41   : > { %253 = vst.msk [vmem:[#allocation2 + $0x180] sm:$0x1] %vm236_vm3, %v3584_v4 }
  0x42   : > { %254 = vst.msk [vmem:[#allocation2 + $0x198] sm:$0x1] %vm236_vm3, %v3584_v4 }
  0x43   : > { %3044 = vmatmul.msk.f32.gmra.mxu1 %vm227_vm1, %v3833_v57  ;;  %255 = vst.msk [vmem:[#allocation2 + $0x11] sm:$0x1] %vm236_vm3, %v3584_v4 }
  0x44   : > { %3052 = vmatmul.msk.f32.gmra.mxu2 %vm227_vm1, %v3847_v60  ;;  %256 = vst.msk [vmem:[#allocation2 + $0x29] sm:$0x1] %vm236_vm3, %v3584_v4 }
  0x45   : > { %3060 = vmatmul.msk.f32.gmra.mxu3 %vm227_vm1, %v3853_v61  ;;  %257 = vst.msk [vmem:[#allocation2 + $0x41] sm:$0x1] %vm236_vm3, %v3584_v4 }
  0x46   : > { %258 = vst.msk [vmem:[#allocation2 + $0x59] sm:$0x1] %vm236_vm3, %v3584_v4 }
  0x47   : > { %3037 = vmatmul.msk.f32.gmra.mxu0 %vm227_vm1, %v3863_v62  ;;  %259 = vst.msk [vmem:[#allocation2 + $0x71] sm:$0x1] %vm236_vm3, %v3584_v4 }
  0x48   : > { %260 = vst.msk [vmem:[#allocation2 + $0x89] sm:$0x1] %vm236_vm3, %v3584_v4 }
  0x49   : > { %261 = vst.msk [vmem:[#allocation2 + $0xa1] sm:$0x1] %vm236_vm3, %v3584_v4 }
  0x4a   : > { %262 = vst.msk [vmem:[#allocation2 + $0xb9] sm:$0x1] %vm236_vm3, %v3584_v4  ;;  %v835_v13 = vld [vmem:[#allocation2 + $0xa] sm:$0xff] }
  0x4b   : > { %3045 = vmatmul.msk.f32.gmra.mxu1 %vm227_vm1, %v3877_v63  ;;  %263 = vst.msk [vmem:[#allocation2 + $0xd1] sm:$0x1] %vm236_vm3, %v3584_v4  ;;  %v3962_v17 = vld [vmem:[#allocation2 + $0x22] sm:$0xff] }
  0x4c   : > { %3053 = vmatmul.msk.f32.gmra.mxu2 %vm227_vm1, %v3884_v1  ;;  %264 = vst.msk [vmem:[#allocation2 + $0xe9] sm:$0x1] %vm236_vm3, %v3584_v4  ;;  %v3985_v23 = vld [vmem:[#allocation2 + $0x3a] sm:$0xff] }
  0x4d   : > { %3061 = vmatmul.msk.f32.gmra.mxu3 %vm227_vm1, %v3889_v2  ;;  %265 = vst.msk [vmem:[#allocation2 + $0x101] sm:$0x1] %vm236_vm3, %v3584_v4 }
  0x4e   : > { %266 = vst.msk [vmem:[#allocation2 + $0x119] sm:$0x1] %vm236_vm3, %v3584_v4  ;;  %v4043_v39 = vld [vmem:[#allocation2 + $0x6a] sm:$0xff] }
  0x4f   : > { %267 = vst.msk [vmem:[#allocation2 + $0x131] sm:$0x1] %vm236_vm3, %v3584_v4  ;;  %v4083_v59 = vld [vmem:[#allocation2 + $0x82] sm:$0xff] }
  0x50   : > { %268 = vst.msk [vmem:[#allocation2 + $0x149] sm:$0x1] %vm236_vm3, %v3584_v4 }
  0x51   : > { %269 = vst.msk [vmem:[#allocation2 + $0x161] sm:$0x1] %vm236_vm3, %v3584_v4 }
  0x52   : > { %270 = vst.msk [vmem:[#allocation2 + $0x179] sm:$0x1] %vm236_vm3, %v3584_v4 }
  0x53   : > { %3046 = vmatmul.msk.f32.gmra.mxu1 %vm227_vm1, %v3909_v3  ;;  %271 = vst.msk [vmem:[#allocation2 + $0x191] sm:$0x1] %vm236_vm3, %v3584_v4 }
  0x54   : > { %3054 = vmatmul.msk.f32.gmra.mxu2 %vm227_vm1, %v3913_v5  ;;  %272 = vst.msk [vmem:[#allocation2 + $0x1a9] sm:$0x1] %vm236_vm3, %v3584_v4  ;;  %v3951_v4 = vld [vmem:[#allocation2 + $0x1a] sm:$0xff] }
  0x55   : > { %3062 = vmatmul.msk.f32.gmra.mxu3 %vm227_vm1, %v3917_v6  ;;  %311 = vst.msk [vmem:[#allocation2 + $0x51] sm:$0xff] %vm227_vm1, %v278_v7 }
  0x56   : > { %4949 = vst [vmem:[#allocation3_spill] sm:$0xff] %v4025_v34 }
  0x57   : > { %4952 = vst [vmem:[#allocation6_spill] sm:$0xff] %v4043_v39 }
  0x58   : > { %4953 = vst [vmem:[#allocation7_spill] sm:$0xff] %v4047_v43 }
  0x59   : > { %4955 = vst [vmem:[#allocation9_spill] sm:$0xff] %v4063_v46 }
  0x5a   : > { %4956 = vst [vmem:[#allocation10_spill] sm:$0xff] %v4065_v47 }
  0x5b   : > { %3064 = vmatmul.msk.f32.vlgmr.msrb.gmra.mxu1 %vm227_vm1, %v341_v8  ;;  %4958 = vst [vmem:[#allocation12_spill] sm:$0xff] %v4083_v59 }
  0x5c   : > { %3098 = vmatmul.msk.f32.vlgmr.msrb.gmra.mxu2 %vm227_vm1, %v834_v9  ;;  %v3942_v11 = vld [vmem:[#allocation2 + $0x51] sm:$0xff]  ;;  %4959 = vst [vmem:[#allocation13_spill] sm:$0xff] %v4085_v0 }
  0x5d   : > { %3164 = vmatmul.msk.f32.vlgmr.msrb.gmra.mxu3 %vm227_vm1, %v3130_v10  ;;  %3038 = vmatmul.msk.f32.gmra.mxu0 %vm227_vm1, %v3942_v11  ;;  %v3987_v24 = vld [vmem:[#allocation2 + $0x50] sm:$0xff] }
  0x5e   : > { %v3997_v25 = vld [vmem:[#allocation2 + $0x4a] sm:$0xff]  ;;  %v4009_v29 = vld [vmem:[#allocation2 + $0x52] sm:$0xff] }
  0x63   : > { %3065 = vmatmul.msk.f32.gmra.mxu1 %vm227_vm1, %v342_v12  ;;  %v4105_v12 = vld [vmem:[#allocation2 + $0xa8] sm:$0xff] }
  0x64   : > { %3099 = vmatmul.msk.f32.gmra.mxu2 %vm227_vm1, %v835_v13  ;;  %4962 = vst [vmem:[#allocation16_spill] sm:$0xff] %v4105_v12 }
  0x65   : > { %3165 = vmatmul.msk.f32.gmra.mxu3 %vm227_vm1, %v3131_v14  ;;  %3230 = vmatmul.msk.f32.vlgmr.msrb.gmra.mxu0 %vm227_vm1, %v3738_v35  ;;  %v4027_v35 = vld [vmem:[#allocation2 + $0x78] sm:$0xff] }
  0x66   : > { %4950 = vst [vmem:[#allocation4_spill] sm:$0xff] %v4027_v35 }
  0x6b   : > { %3066 = vmatmul.msk.f32.gmra.mxu1 %vm227_vm1, %v3130_v10  ;;  %v4103_v10 = vld [vmem:[#allocation2 + $0x92] sm:$0xff] }
  0x6c   : > { %3100 = vmatmul.msk.f32.gmra.mxu2 %vm227_vm1, %v3951_v4  ;;  %4961 = vst [vmem:[#allocation15_spill] sm:$0xff] %v4103_v10 }
  0x6d   : > { %3166 = vmatmul.msk.f32.gmra.mxu3 %vm227_vm1, %v3953_v15  ;;  %3231 = vmatmul.msk.f32.gmra.mxu0 %vm227_vm1, %v3764_v45 }
  0x73   : > { %3067 = vmatmul.msk.f32.gmra.mxu1 %vm227_vm1, %v3131_v14 }
  0x74   : > { %3101 = vmatmul.msk.f32.gmra.mxu2 %vm227_vm1, %v3962_v17 }
  0x75   : > { %3167 = vmatmul.msk.f32.gmra.mxu3 %vm227_vm1, %v3964_v19  ;;  %3232 = vmatmul.msk.f32.gmra.mxu0 %vm227_vm1, %v3787_v51 }
  0x7b   : > { %3068 = vmatmul.msk.f32.gmra.mxu1 %vm227_vm1, %v3953_v15 }
  0x7c   : > { %3102 = vmatmul.msk.f32.gmra.mxu2 %vm227_vm1, %v3973_v21 }
  0x7d   : > { %3168 = vmatmul.msk.f32.gmra.mxu3 %vm227_vm1, %v3975_v22  ;;  %3233 = vmatmul.msk.f32.gmra.mxu0 %vm227_vm1, %v3819_v55 }
  0x83   : > { %3069 = vmatmul.msk.f32.gmra.mxu1 %vm227_vm1, %v3964_v19 }
  0x84   : > { %3103 = vmatmul.msk.f32.gmra.mxu2 %vm227_vm1, %v3985_v23 }
  0x85   : > { %3169 = vmatmul.msk.f32.gmra.mxu3 %vm227_vm1, %v3987_v24  ;;  %3234 = vmatmul.msk.f32.gmra.mxu0 %vm227_vm1, %v3863_v62 }
  0x8b   : > { %3070 = vmatmul.msk.f32.gmra.mxu1 %vm227_vm1, %v3975_v22 }
  0x8c   : > { %3104 = vmatmul.msk.f32.gmra.mxu2 %vm227_vm1, %v3997_v25 }
  0x8d   : > { %3170 = vmatmul.msk.f32.gmra.mxu3 %vm227_vm1, %v3999_v27  ;;  %3235 = vmatmul.msk.f32.gmra.mxu0 %vm227_vm1, %v3942_v11 }
  0x93   : > { %3071 = vmatmul.msk.f32.gmra.mxu1 %vm227_vm1, %v3987_v24 }
  0x94   : > { %3105 = vmatmul.msk.f32.gmra.mxu2 %vm227_vm1, %v4009_v29  ;;  %v4019_v32 = vpop.f32.mrf.mxu0 }
  0x95   : > { %3171 = vmatmul.msk.f32.gmra.mxu3 %vm227_vm1, %v4011_v31  ;;  %3236 = vmatmul.msk.f32.gmra.mxu0 %vm227_vm1, %v3688_v16 }
  0x98   : > { %v4023_v33 = vpop.f32.mrf.mxu1 }
  0x9b   : > { %3072 = vmatmul.msk.f32.gmra.mxu1 %vm227_vm1, %v3999_v27 }
  0x9c   : > { %3106 = vmatmul.msk.f32.gmra.mxu2 %vm227_vm1, %v4025_v34  ;;  %v4045_v41 = vpop.f32.mrf.mxu0  ;;  %v4198_v34 = vld [vmem:[#allocation2 + $0xe0] sm:$0xff] }
  0x9d   : > { %3172 = vmatmul.msk.f32.gmra.mxu3 %vm227_vm1, %v4027_v35  ;;  %3237 = vmatmul.msk.f32.gmra.mxu0 %vm227_vm1, %v3714_v26 }
  0x9f   : > { %v4035_v36 = vpop.f32.mrf.mxu2 }
  0xa0   : > { %v4039_v16 = vpop.f32.mrf.mxu1  ;;  %v4041_v37 = vpop.f32.mrf.mxu3 }
  0xa1   : > { %4951 = vst [vmem:[#allocation5_spill] sm:$0xff] %v4041_v37  ;;  %v4143_v37 = vld [vmem:[#allocation2 + $0xaa] sm:$0xff] }
  0xa2   : > { %4967 = vst [vmem:[#allocation21_spill] sm:$0xff] %v4143_v37 }
  0xa3   : > { %3073 = vmatmul.msk.f32.gmra.mxu1 %vm227_vm1, %v4011_v31 }
  0xa4   : > { %3107 = vmatmul.msk.f32.gmra.mxu2 %vm227_vm1, %v4043_v39  ;;  %v4069_v51 = vpop.f32.mrf.mxu0  ;;  %v4181_v39 = vld [vmem:[#allocation2 + $0xd8] sm:$0xff] }
  0xa5   : > { %3173 = vmatmul.msk.f32.gmra.mxu3 %vm227_vm1, %v4047_v43  ;;  %3238 = vmatmul.msk.f32.gmra.mxu0 %vm227_vm1, %v3746_v38 }
  0xa7   : > { %v4055_v26 = vpop.f32.mrf.mxu2 }
  0xa8   : > { %v4059_v44 = vpop.f32.mrf.mxu1  ;;  %v4061_v45 = vpop.f32.mrf.mxu3 }
  0xa9   : > { %4954 = vst [vmem:[#allocation8_spill] sm:$0xff] %v4061_v45  ;;  %v4125_v45 = vld [vmem:[#allocation2 + $0xb0] sm:$0xff] }
  0xaa   : > { %4965 = vst [vmem:[#allocation19_spill] sm:$0xff] %v4125_v45 }
  0xab   : > { %3074 = vmatmul.msk.f32.gmra.mxu1 %vm227_vm1, %v4027_v35  ;;  %v4194_v35 = vld [vmem:[#allocation2 + $0xca] sm:$0xff] }
  0xac   : > { %3108 = vmatmul.msk.f32.gmra.mxu2 %vm227_vm1, %v4063_v46  ;;  %v4093_v7 = vpop.f32.mrf.mxu0  ;;  %v4163_v46 = vld [vmem:[#allocation2 + $0xc8] sm:$0xff] }
  0xad   : > { %3174 = vmatmul.msk.f32.gmra.mxu3 %vm227_vm1, %v4065_v47  ;;  %3239 = vmatmul.msk.f32.gmra.mxu0 %vm227_vm1, %v3776_v48 }
  0xaf   : > { %v4075_v38 = vpop.f32.mrf.mxu2 }
  0xb0   : > { %v4079_v56 = vpop.f32.mrf.mxu1  ;;  %v4081_v58 = vpop.f32.mrf.mxu3 }
  0xb1   : > { %4957 = vst [vmem:[#allocation11_spill] sm:$0xff] %v4081_v58  ;;  %v4123_v58 = vld [vmem:[#allocation2 + $0x9a] sm:$0xff] }
  0xb2   : > { %4964 = vst [vmem:[#allocation18_spill] sm:$0xff] %v4123_v58 }
  0xb3   : > { %3075 = vmatmul.msk.f32.gmra.mxu1 %vm227_vm1, %v4047_v43  ;;  %v4179_v43 = vld [vmem:[#allocation2 + $0xc2] sm:$0xff] }
  0xb4   : > { %3109 = vmatmul.msk.f32.gmra.mxu2 %vm227_vm1, %v4083_v59  ;;  %4974 = vst [vmem:[#allocation28_spill] sm:$0xff] %v4179_v43 }
  0xb5   : > { %3175 = vmatmul.msk.f32.gmra.mxu3 %vm227_vm1, %v4085_v0  ;;  %3240 = vmatmul.msk.f32.gmra.mxu0 %vm227_vm1, %v3801_v52  ;;  %v4115_v52 = vpop.f32.mrf.mxu0 }
  0xb7   : > { %v4095_v48 = vpop.f32.mrf.mxu2 }
  0xb8   : > { %v4099_v8 = vpop.f32.mrf.mxu1  ;;  %v4101_v9 = vpop.f32.mrf.mxu3 }
  0xb9   : > { %4960 = vst [vmem:[#allocation14_spill] sm:$0xff] %v4101_v9 }
  0xbb   : > { %3076 = vmatmul.msk.f32.gmra.mxu1 %vm227_vm1, %v4065_v47  ;;  %v4161_v47 = vld [vmem:[#allocation2 + $0xb2] sm:$0xff] }
  0xbc   : > { %3110 = vmatmul.msk.f32.gmra.mxu2 %vm227_vm1, %v4103_v10  ;;  %4971 = vst [vmem:[#allocation25_spill] sm:$0xff] %v4161_v47 }
  0xbd   : > { %3176 = vmatmul.msk.f32.gmra.mxu3 %vm227_vm1, %v4105_v12  ;;  %3241 = vmatmul.msk.f32.gmra.mxu0 %vm227_vm1, %v3833_v57  ;;  %v4141_v59 = vpop.f32.mrf.mxu0 }
  0xbf   : > { %v4113_v13 = vpop.f32.mrf.mxu2 }
  0xc0   : > { %v4119_v14 = vpop.f32.mrf.mxu1  ;;  %v4121_v9 = vpop.f32.mrf.mxu3 }
  0xc1   : > { %4963 = vst [vmem:[#allocation17_spill] sm:$0xff] %v4121_v9 }
  0xc3   : > { %3077 = vmatmul.msk.f32.gmra.mxu1 %vm227_vm1, %v4085_v0  ;;  %v4145_v0 = vld [vmem:[#allocation2 + $0xc0] sm:$0xff] }
  0xc4   : > { %3111 = vmatmul.msk.f32.gmra.mxu2 %vm227_vm1, %v4123_v58  ;;  %4968 = vst [vmem:[#allocation22_spill] sm:$0xff] %v4145_v0 }
  0xc5   : > { %3177 = vmatmul.msk.f32.gmra.mxu3 %vm227_vm1, %v4125_v45  ;;  %3242 = vmatmul.msk.f32.gmra.mxu0 %vm227_vm1, %v3877_v63 }
  0xc7   : > { %v4133_v10 = vpop.f32.mrf.mxu2 }
  0xc8   : > { %v4137_v57 = vpop.f32.mrf.mxu1  ;;  %v4139_v9 = vpop.f32.mrf.mxu3 }
  0xc9   : > { %4966 = vst [vmem:[#allocation20_spill] sm:$0xff] %v4139_v9 }
  0xcb   : > { %3078 = vmatmul.msk.f32.gmra.mxu1 %vm227_vm1, %v4105_v12  ;;  %v4165_v12 = vpop.f32.mrf.mxu0 }
  0xcc   : > { %3112 = vmatmul.msk.f32.gmra.mxu2 %vm227_vm1, %v4143_v37 }
  0xcd   : > { %3178 = vmatmul.msk.f32.gmra.mxu3 %vm227_vm1, %v4145_v0  ;;  %3243 = vmatmul.msk.f32.gmra.mxu0 %vm227_vm1, %v3909_v3 }
  0xcf   : > { %v4153_v63 = vpop.f32.mrf.mxu2 }
  0xd0   : > { %4969 = vst [vmem:[#allocation23_spill] sm:$0xff] %v4153_v63  ;;  %v4157_v9 = vpop.f32.mrf.mxu1  ;;  %v4159_v58 = vpop.f32.mrf.mxu3 }
  0xd1   : > { %4970 = vst [vmem:[#allocation24_spill] sm:$0xff] %v4159_v58 }
  0xd3   : > { %3079 = vmatmul.msk.f32.gmra.mxu1 %vm227_vm1, %v4125_v45 }
  0xd4   : > { %3113 = vmatmul.msk.f32.gmra.mxu2 %vm227_vm1, %v4161_v47 }
  0xd5   : > { %3179 = vmatmul.msk.f32.gmra.mxu3 %vm227_vm1, %v4163_v46  ;;  %3244 = vmatmul.msk.f32.gmra.mxu0 %vm227_vm1, %v3694_v18 }
  0xd7   : > { %v4173_v3 = vpop.f32.mrf.mxu2 }
  0xd8   : > { %4972 = vst [vmem:[#allocation26_spill] sm:$0xff] %v4173_v3  ;;  %v4177_v58 = vpop.f32.mrf.mxu3  ;;  %v738_v37 = vpop.f32.mrf.mxu1 }
  0xd9   : > { %4973 = vst [vmem:[#allocation27_spill] sm:$0xff] %v4177_v58  ;;  %v739_v18 = vadd.f32 %v738_v37, %v4019_v32 }
  0xda   : > { %v4187_v47 = vpop.f32.mrf.mxu0 }
  0xdb   : > { %3080 = vmatmul.msk.f32.gmra.mxu1 %vm227_vm1, %v4145_v0 }
  0xdc   : > { %3114 = vmatmul.msk.f32.gmra.mxu2 %vm227_vm1, %v4179_v43  ;;  %v4215_v43 = vld [vmem:[#allocation2 + $0xf0] sm:$0xff] }
  0xdd   : > { %3180 = vmatmul.msk.f32.gmra.mxu3 %vm227_vm1, %v4181_v39  ;;  %3245 = vmatmul.msk.f32.gmra.mxu0 %vm227_vm1, %v3718_v28 }
  0xdf   : > { %v984_v45 = vpop.f32.mrf.mxu2 }
  0xe0   : > { %v1080_v58 = vadd.f32 %v984_v45, %v739_v18  ;;  %v741_v3 = vpop.f32.mrf.mxu1  ;;  %v1265_v63 = vpop.f32.mrf.mxu3  ;;  %v4211_v18 = vld [vmem:[#allocation2 + $0xda] sm:$0xff] }
  0xe1   : > { %v742_v28 = vadd.f32 %v741_v3, %v4045_v41 }
  0xe2   : > { %v4196_v0 = vadd.f32 %v1265_v63, %v1080_v58  ;;  %v4204_v32 = vpop.f32.mrf.mxu0 }
  0xe3   : > { %3081 = vmatmul.msk.f32.gmra.mxu1 %vm227_vm1, %v4163_v46  ;;  %4976 = vst [vmem:[#allocation30_spill] sm:$0xff] %v4204_v32  ;;  %v4232_v32 = vld [vmem:[#allocation2 + $0xf8] sm:$0xff] }
  0xe4   : > { %4975 = vst [vmem:[#allocation29_spill] sm:$0xff] %v4196_v0  ;;  %3115 = vmatmul.msk.f32.gmra.mxu2 %vm227_vm1, %v4194_v35 }
  0xe5   : > { %3181 = vmatmul.msk.f32.gmra.mxu3 %vm227_vm1, %v4198_v34  ;;  %3246 = vmatmul.msk.f32.gmra.mxu0 %vm227_vm1, %v3750_v40 }
  0xe7   : > { %v987_v37 = vpop.f32.mrf.mxu2 }
  0xe8   : > { %v1081_v45 = vadd.f32 %v987_v37, %v742_v28  ;;  %v744_v58 = vpop.f32.mrf.mxu1  ;;  %v1268_v63 = vpop.f32.mrf.mxu3 }
  0xe9   : > { %v745_v40 = vadd.f32 %v744_v58, %v4069_v51 }
  0xea   : > { %v4213_v0 = vadd.f32 %v1268_v63, %v1081_v45  ;;  %v4221_v41 = vpop.f32.mrf.mxu0  ;;  %v4228_v63 = vld [vmem:[#allocation2 + $0xe2] sm:$0xff] }
  0xeb   : > { %3082 = vmatmul.msk.f32.gmra.mxu1 %vm227_vm1, %v4181_v39  ;;  %4978 = vst [vmem:[#allocation32_spill] sm:$0xff] %v4221_v41  ;;  %v4249_v41 = vld [vmem:[#allocation2 + $0x108] sm:$0xff] }
  0xec   : > { %4977 = vst [vmem:[#allocation31_spill] sm:$0xff] %v4213_v0  ;;  %3116 = vmatmul.msk.f32.gmra.mxu2 %vm227_vm1, %v4211_v18 }
  0xed   : > { %3182 = vmatmul.msk.f32.gmra.mxu3 %vm227_vm1, %v4215_v43  ;;  %3247 = vmatmul.msk.f32.gmra.mxu0 %vm227_vm1, %v3779_v49 }
  0xef   : > { %v990_v3 = vpop.f32.mrf.mxu2 }
  0xf0   : > { %v1082_v28 = vadd.f32 %v990_v3, %v745_v40  ;;  %v747_v37 = vpop.f32.mrf.mxu1  ;;  %v1271_v45 = vpop.f32.mrf.mxu3 }
  0xf1   : > { %v748_v49 = vadd.f32 %v747_v37, %v4093_v7 }
  0xf2   : > { %v4230_v0 = vadd.f32 %v1271_v45, %v1082_v28  ;;  %v4238_v51 = vpop.f32.mrf.mxu0  ;;  %v4245_v45 = vld [vmem:[#allocation2 + $0xf2] sm:$0xff] }
  0xf3   : > { %3083 = vmatmul.msk.f32.gmra.mxu1 %vm227_vm1, %v4198_v34  ;;  %4980 = vst [vmem:[#allocation34_spill] sm:$0xff] %v4238_v51  ;;  %v4266_v51 = vld [vmem:[#allocation2 + $0x110] sm:$0xff] }
  0xf4   : > { %4979 = vst [vmem:[#allocation33_spill] sm:$0xff] %v4230_v0  ;;  %3117 = vmatmul.msk.f32.gmra.mxu2 %vm227_vm1, %v4228_v63 }
  0xf5   : > { %3183 = vmatmul.msk.f32.gmra.mxu3 %vm227_vm1, %v4232_v32  ;;  %3248 = vmatmul.msk.f32.gmra.mxu0 %vm227_vm1, %v3805_v53 }
  0xf7   : > { %v993_v58 = vpop.f32.mrf.mxu2 }
  0xf8   : > { %v1083_v40 = vadd.f32 %v993_v58, %v748_v49  ;;  %v750_v3 = vpop.f32.mrf.mxu1  ;;  %v1274_v28 = vpop.f32.mrf.mxu3 }
  0xf9   : > { %v751_v53 = vadd.f32 %v750_v3, %v4115_v52 }
  0xfa   : > { %v4247_v0 = vadd.f32 %v1274_v28, %v1083_v40  ;;  %v4255_v7 = vpop.f32.mrf.mxu0  ;;  %v4262_v28 = vld [vmem:[#allocation2 + $0xfa] sm:$0xff] }
  0xfb   : > { %3084 = vmatmul.msk.f32.gmra.mxu1 %vm227_vm1, %v4215_v43  ;;  %4982 = vst [vmem:[#allocation36_spill] sm:$0xff] %v4255_v7  ;;  %v4283_v7 = vld [vmem:[#allocation2 + $0x120] sm:$0xff] }
  0xfc   : > { %4981 = vst [vmem:[#allocation35_spill] sm:$0xff] %v4247_v0  ;;  %3118 = vmatmul.msk.f32.gmra.mxu2 %vm227_vm1, %v4245_v45 }
  0xfd   : > { %3184 = vmatmul.msk.f32.gmra.mxu3 %vm227_vm1, %v4249_v41  ;;  %3249 = vmatmul.msk.f32.gmra.mxu0 %vm227_vm1, %v3847_v60 }
  0xff   : > { %v996_v37 = vpop.f32.mrf.mxu2 }
 0x100   : > { %v1084_v49 = vadd.f32 %v996_v37, %v751_v53  ;;  %v753_v58 = vpop.f32.mrf.mxu1  ;;  %v1277_v40 = vpop.f32.mrf.mxu3 }
 0x101   : > { %v754_v60 = vadd.f32 %v753_v58, %v4141_v59 }
 0x102   : > { %v4264_v0 = vadd.f32 %v1277_v40, %v1084_v49  ;;  %v4272_v52 = vpop.f32.mrf.mxu0  ;;  %v4279_v40 = vld [vmem:[#allocation2 + $0x10a] sm:$0xff] }
 0x103   : > { %3085 = vmatmul.msk.f32.gmra.mxu1 %vm227_vm1, %v4232_v32  ;;  %4984 = vst [vmem:[#allocation38_spill] sm:$0xff] %v4272_v52  ;;  %v4300_v52 = vld [vmem:[#allocation2 + $0x128] sm:$0xff] }
 0x104   : > { %4983 = vst [vmem:[#allocation37_spill] sm:$0xff] %v4264_v0  ;;  %3119 = vmatmul.msk.f32.gmra.mxu2 %vm227_vm1, %v4262_v28 }
 0x105   : > { %3185 = vmatmul.msk.f32.gmra.mxu3 %vm227_vm1, %v4266_v51  ;;  %3250 = vmatmul.msk.f32.gmra.mxu0 %vm227_vm1, %v3884_v1 }
 0x107   : > { %v999_v3 = vpop.f32.mrf.mxu2 }
 0x108   : > { %v1085_v53 = vadd.f32 %v999_v3, %v754_v60  ;;  %v756_v37 = vpop.f32.mrf.mxu1  ;;  %v1280_v49 = vpop.f32.mrf.mxu3 }
 0x109   : > { %v757_v1 = vadd.f32 %v756_v37, %v4165_v12 }
 0x10a   : > { %v4281_v0 = vadd.f32 %v1280_v49, %v1085_v53  ;;  %v4289_v59 = vpop.f32.mrf.mxu0  ;;  %v4296_v49 = vld [vmem:[#allocation2 + $0x112] sm:$0xff] }
 0x10b   : > { %3086 = vmatmul.msk.f32.gmra.mxu1 %vm227_vm1, %v4249_v41  ;;  %4986 = vst [vmem:[#allocation40_spill] sm:$0xff] %v4289_v59  ;;  %v4317_v59 = vld [vmem:[#allocation2 + $0x138] sm:$0xff] }
 0x10c   : > { %4985 = vst [vmem:[#allocation39_spill] sm:$0xff] %v4281_v0  ;;  %3120 = vmatmul.msk.f32.gmra.mxu2 %vm227_vm1, %v4279_v40 }
 0x10d   : > { %3186 = vmatmul.msk.f32.gmra.mxu3 %vm227_vm1, %v4283_v7  ;;  %3251 = vmatmul.msk.f32.gmra.mxu0 %vm227_vm1, %v3913_v5 }
 0x10f   : > { %v1002_v58 = vpop.f32.mrf.mxu2 }
 0x110   : > { %v1086_v60 = vadd.f32 %v1002_v58, %v757_v1  ;;  %v759_v3 = vpop.f32.mrf.mxu1  ;;  %v1283_v53 = vpop.f32.mrf.mxu3 }
 0x111   : > { %v760_v5 = vadd.f32 %v759_v3, %v4187_v47 }
 0x112   : > { %v4298_v0 = vadd.f32 %v1283_v53, %v1086_v60  ;;  %v4306_v12 = vpop.f32.mrf.mxu0  ;;  %v4313_v53 = vld [vmem:[#allocation2 + $0x122] sm:$0xff] }
 0x113   : > { %3087 = vmatmul.msk.f32.gmra.mxu1 %vm227_vm1, %v4266_v51  ;;  %4988 = vst [vmem:[#allocation42_spill] sm:$0xff] %v4306_v12  ;;  %v3155_v12 = vld [vmem:[#allocation2 + $0x140] sm:$0xff] }
 0x114   : > { %4987 = vst [vmem:[#allocation41_spill] sm:$0xff] %v4298_v0  ;;  %3121 = vmatmul.msk.f32.gmra.mxu2 %vm227_vm1, %v4296_v49 }
 0x115   : > { %3187 = vmatmul.msk.f32.gmra.mxu3 %vm227_vm1, %v4300_v52  ;;  %3252 = vmatmul.msk.f32.gmra.mxu0 %vm227_vm1, %v3701_v20 }
 0x117   : > { %v1005_v37 = vpop.f32.mrf.mxu2 }
 0x118   : > { %v1087_v1 = vadd.f32 %v1005_v37, %v760_v5  ;;  %v762_v58 = vpop.f32.mrf.mxu1  ;;  %v1286_v60 = vpop.f32.mrf.mxu3 }
 0x119   : > { %v763_v20 = vadd.f32 %v762_v58, %v4023_v33  ;;  %v303_v58 = vld [vmem:[%s3664_s6 + $0xf0] sm:$0xff] }
 0x11a   : > { %v4315_v0 = vadd.f32 %v1286_v60, %v1087_v1  ;;  %v4323_v47 = vpop.f32.mrf.mxu0  ;;  %v4330_v60 = vld [vmem:[#allocation2 + $0x12a] sm:$0xff]  ;;  %336 = vst.msk [vmem:[#allocation2 + $0x181] sm:$0xff] %vm227_vm1, %v303_v58 }
 0x11b   : > { %3088 = vmatmul.msk.f32.gmra.mxu1 %vm227_vm1, %v4283_v7  ;;  %4990 = vst [vmem:[#allocation44_spill] sm:$0xff] %v4323_v47 }
 0x11c   : > { %4989 = vst [vmem:[#allocation43_spill] sm:$0xff] %v4315_v0  ;;  %3122 = vmatmul.msk.f32.gmra.mxu2 %vm227_vm1, %v4313_v53 }
 0x11d   : > { %3188 = vmatmul.msk.f32.gmra.mxu3 %vm227_vm1, %v4317_v59  ;;  %3253 = vmatmul.msk.f32.gmra.mxu0 %vm227_vm1, %v3722_v30 }
 0x11f   : > { %v1008_v3 = vpop.f32.mrf.mxu2 }
 0x120   : > { %v1088_v5 = vadd.f32 %v1008_v3, %v763_v20  ;;  %v765_v37 = vpop.f32.mrf.mxu1  ;;  %v1289_v1 = vpop.f32.mrf.mxu3 }
 0x121   : > { %v766_v30 = vadd.f32 %v765_v37, %v4039_v16 }
 0x122   : > { %v4332_v0 = vadd.f32 %v1289_v1, %v1088_v5  ;;  %v4338_v47 = vpop.f32.mrf.mxu0  ;;  %v4346_v1 = vld [vmem:[#allocation2 + $0x13a] sm:$0xff] }
 0x123   : > { %3089 = vmatmul.msk.f32.gmra.mxu1 %vm227_vm1, %v4300_v52  ;;  %4992 = vst [vmem:[#allocation46_spill] sm:$0xff] %v4338_v47  ;;  %v3156_v47 = vld [vmem:[#allocation2 + $0x150] sm:$0xff] }
 0x124   : > { %4991 = vst [vmem:[#allocation45_spill] sm:$0xff] %v4332_v0  ;;  %3123 = vmatmul.msk.f32.gmra.mxu2 %vm227_vm1, %v4330_v60 }
 0x125   : > { %3189 = vmatmul.msk.f32.gmra.mxu3 %vm227_vm1, %v3155_v12  ;;  %3254 = vmatmul.msk.f32.gmra.mxu0 %vm227_vm1, %v3754_v42  ;;  %4993 = vst [vmem:[#allocation47_spill] sm:$0xff] %v4346_v1 }
 0x127   : > { %v1011_v33 = vpop.f32.mrf.mxu2 }
 0x128   : > { %v1089_v20 = vadd.f32 %v1011_v33, %v766_v30  ;;  %v768_v3 = vpop.f32.mrf.mxu1  ;;  %v1292_v5 = vpop.f32.mrf.mxu3  ;;  %v304_v30 = vld [vmem:[%s3664_s6 + $0xf8] sm:$0xff] }
 0x129   : > { %v769_v42 = vadd.f32 %v768_v3, %v4059_v44  ;;  %337 = vst.msk [vmem:[#allocation2 + $0x189] sm:$0xff] %vm227_vm1, %v304_v30 }
 0x12a   : > { %v4348_v0 = vadd.f32 %v1292_v5, %v1089_v20  ;;  %v4354_v16 = vpop.f32.mrf.mxu0  ;;  %v4362_v5 = vld [vmem:[#allocation2 + $0x142] sm:$0xff] }
 0x12b   : > { %3090 = vmatmul.msk.f32.gmra.mxu1 %vm227_vm1, %v4317_v59 }
 0x12c   : > { %4994 = vst [vmem:[#allocation48_spill] sm:$0xff] %v4348_v0  ;;  %3124 = vmatmul.msk.f32.gmra.mxu2 %vm227_vm1, %v4346_v1  ;;  %v3157_v1 = vld [vmem:[#allocation2 + $0x158] sm:$0xff] }
 0x12d   : > { %3190 = vmatmul.msk.f32.gmra.mxu3 %vm227_vm1, %v3156_v47  ;;  %3255 = vmatmul.msk.f32.gmra.mxu0 %vm227_vm1, %v3781_v50 }
 0x12f   : > { %v1014_v37 = vpop.f32.mrf.mxu2 }
 0x130   : > { %v1090_v33 = vadd.f32 %v1014_v37, %v769_v42  ;;  %v771_v58 = vpop.f32.mrf.mxu1  ;;  %v1295_v20 = vpop.f32.mrf.mxu3 }
 0x131   : > { %v772_v50 = vadd.f32 %v771_v58, %v4079_v56 }
 0x132   : > { %v4364_v0 = vadd.f32 %v1295_v20, %v1090_v33  ;;  %v4369_v44 = vpop.f32.mrf.mxu0  ;;  %v862_v33 = vld [vmem:[#allocation2 + $0x152] sm:$0xff] }
 0x133   : > { %3091 = vmatmul.msk.f32.gmra.mxu1 %vm227_vm1, %v3155_v12  ;;  %4995 = vst [vmem:[#allocation49_spill] sm:$0xff] %v4369_v44  ;;  %v3158_v12 = vld [vmem:[#allocation2 + $0x168] sm:$0xff] }
 0x134   : > { %3125 = vmatmul.msk.f32.gmra.mxu2 %vm227_vm1, %v4362_v5 }
 0x135   : > { %3191 = vmatmul.msk.f32.gmra.mxu3 %vm227_vm1, %v3157_v1  ;;  %3256 = vmatmul.msk.f32.gmra.mxu0 %vm227_vm1, %v3809_v54 }
 0x137   : > { %v1017_v3 = vpop.f32.mrf.mxu2 }
 0x138   : > { %v1091_v42 = vadd.f32 %v1017_v3, %v772_v50  ;;  %v774_v37 = vpop.f32.mrf.mxu1  ;;  %v1298_v30 = vpop.f32.mrf.mxu3 }
 0x139   : > { %v775_v56 = vadd.f32 %v774_v37, %v4099_v8 }
 0x13a   : > { %v4375_v20 = vadd.f32 %v1298_v30, %v1091_v42  ;;  %v4379_v44 = vpop.f32.mrf.mxu0  ;;  %v863_v42 = vld [vmem:[#allocation2 + $0x15a] sm:$0xff] }
 0x13b   : > { %3092 = vmatmul.msk.f32.gmra.mxu1 %vm227_vm1, %v3156_v47 }
 0x13c   : > { %4996 = vst [vmem:[#allocation50_spill] sm:$0xff] %v4375_v20  ;;  %3126 = vmatmul.msk.f32.gmra.mxu2 %vm227_vm1, %v862_v33  ;;  %v3159_v20 = vld [vmem:[#allocation2 + $0x170] sm:$0xff] }
 0x13d   : > { %3192 = vmatmul.msk.f32.gmra.mxu3 %vm227_vm1, %v3158_v12  ;;  %3257 = vmatmul.msk.f32.gmra.mxu0 %vm227_vm1, %v3853_v61 }
 0x13f   : > { %v1020_v58 = vpop.f32.mrf.mxu2 }
 0x140   : > { %v1092_v54 = vadd.f32 %v1020_v58, %v775_v56  ;;  %v777_v50 = vpop.f32.mrf.mxu1  ;;  %v1301_v3 = vpop.f32.mrf.mxu3  ;;  %v864_v58 = vld [vmem:[#allocation2 + $0x16a] sm:$0xff] }
 0x141   : > { %v778_v8 = vadd.f32 %v777_v50, %v4119_v14 }
 0x142   : > { %v4385_v30 = vadd.f32 %v1301_v3, %v1092_v54  ;;  %v4389_v47 = vpop.f32.mrf.mxu0  ;;  %v3160_v3 = vld [vmem:[#allocation2 + $0x180] sm:$0xff] }
 0x143   : > { %3093 = vmatmul.msk.f32.gmra.mxu1 %vm227_vm1, %v3157_v1 }
 0x144   : > { %3127 = vmatmul.msk.f32.gmra.mxu2 %vm227_vm1, %v863_v42 }
 0x145   : > { %3193 = vmatmul.msk.f32.gmra.mxu3 %vm227_vm1, %v3159_v20  ;;  %3258 = vmatmul.msk.f32.gmra.mxu0 %vm227_vm1, %v3889_v2 }
 0x147   : > { %v1023_v37 = vpop.f32.mrf.mxu2 }
 0x148   : > { %v1093_v61 = vadd.f32 %v1023_v37, %v778_v8  ;;  %v780_v33 = vpop.f32.mrf.mxu1  ;;  %v1304_v56 = vpop.f32.mrf.mxu3  ;;  %v865_v37 = vld [vmem:[#allocation2 + $0x172] sm:$0xff] }
 0x149   : > { %v781_v14 = vadd.f32 %v780_v33, %v4137_v57  ;;  %v3226_v57 = vld [vmem:[#allocation2 + $0x181] sm:$0xff] }
 0x14a   : > { %v4395_v54 = vadd.f32 %v1304_v56, %v1093_v61  ;;  %v4399_v1 = vpop.f32.mrf.mxu0  ;;  %v3161_v56 = vld [vmem:[#allocation2 + $0x188] sm:$0xff] }
 0x14b   : > { %3094 = vmatmul.msk.f32.gmra.mxu1 %vm227_vm1, %v3158_v12 }
 0x14c   : > { %3128 = vmatmul.msk.f32.gmra.mxu2 %vm227_vm1, %v864_v58 }
 0x14d   : > { %3194 = vmatmul.msk.f32.gmra.mxu3 %vm227_vm1, %v3160_v3  ;;  %3259 = vmatmul.msk.f32.gmra.mxu0 %vm227_vm1, %v3917_v6 }
 0x14f   : > { %v1026_v50 = vpop.f32.mrf.mxu2 }
 0x150   : > { %v1094_v2 = vadd.f32 %v1026_v50, %v781_v14  ;;  %v783_v42 = vpop.f32.mrf.mxu1  ;;  %v1307_v8 = vpop.f32.mrf.mxu3 }
 0x151   : > { %v784_v33 = vadd.f32 %v783_v42, %v4157_v9 }
 0x152   : > { %v4405_v61 = vadd.f32 %v1307_v8, %v1094_v2  ;;  %v4409_v12 = vpop.f32.mrf.mxu0  ;;  %v3394_v2 = vld [vmem:[#allocation2 + $0x31] sm:$0xff]  ;;  %v3227_v8 = vld [vmem:[#allocation2 + $0x189] sm:$0xff] }
 0x153   : > { %3095 = vmatmul.msk.f32.gmra.mxu1 %vm227_vm1, %v3159_v20 }
 0x154   : > { %3129 = vmatmul.msk.f32.gmra.mxu2 %vm227_vm1, %v865_v37 }
 0x155   : > { %3195 = vmatmul.msk.f32.gmra.mxu3 %vm227_vm1, %v3161_v56  ;;  %3260 = vmatmul.msk.f32.gmra.mxu0 %vm227_vm1, %v3226_v57 }
 0x157   : > { %v1029_v58 = vpop.f32.mrf.mxu2 }
 0x158   : > { %v1095_v6 = vadd.f32 %v1029_v58, %v784_v33  ;;  %v786_v3 = vpop.f32.mrf.mxu1  ;;  %v1310_v14 = vpop.f32.mrf.mxu3 }
 0x159   : > { %v787_v9 = vadd.f32 %v786_v3, %v4035_v36 }
 0x15a   : > { %v4414_v50 = vadd.f32 %v1310_v14, %v1095_v6  ;;  %v4420_v20 = vpop.f32.mrf.mxu0 }
 0x15b   : > { %3296 = vmatmul.msk.f32.vlgmr.msra.gmra.mxu1 %vm227_vm1, %v3951_v4 }
 0x15c   : > { %3362 = vmatmul.msk.f32.vlgmr.msra.gmra.mxu2 %vm227_vm1, %v3953_v15 }
 0x15d   : > { %3428 = vmatmul.msk.f32.vlgmr.msra.gmra.mxu3 %vm227_vm1, %v3394_v2  ;;  %3261 = vmatmul.msk.f32.gmra.mxu0 %vm227_vm1, %v3227_v8 }
 0x15f   : > { %v1032_v42 = vpop.f32.mrf.mxu2 }
 0x160   : > { %v1096_v37 = vadd.f32 %v1032_v42, %v787_v9  ;;  %v789_v56 = vpop.f32.mrf.mxu1  ;;  %v1313_v57 = vpop.f32.mrf.mxu3 }
 0x161   : > { %v790_v15 = vadd.f32 %v789_v56, %v4055_v26 }
 0x162   : > { %v4425_v33 = vadd.f32 %v1313_v57, %v1096_v37  ;;  %v4431_v4 = vpop.f32.mrf.mxu0 }
 0x163   : > { %3297 = vmatmul.msk.f32.gmra.mxu1 %vm227_vm1, %v3962_v17 }
 0x164   : > { %3363 = vmatmul.msk.f32.gmra.mxu2 %vm227_vm1, %v3964_v19 }
 0x165   : > { %3429 = vmatmul.msk.f32.gmra.mxu3 %vm227_vm1, %v3819_v55  ;;  %3494 = vmatmul.msk.f32.vlgmr.msra.gmra.mxu0 %vm227_vm1, %v3973_v21 }
 0x167   : > { %v1035_v36 = vpop.f32.mrf.mxu2 }
 0x168   : > { %v1097_v58 = vadd.f32 %v1035_v36, %v790_v15  ;;  %v792_v6 = vpop.f32.mrf.mxu1  ;;  %v1316_v3 = vpop.f32.mrf.mxu3 }
 0x169   : > { %v793_v55 = vadd.f32 %v792_v6, %v4075_v38  ;;  %v3399_v6 = vld [vmem:[#allocation2 + $0x69] sm:$0xff] }
 0x16a   : > { %v4438_v14 = vadd.f32 %v1316_v3, %v1097_v58  ;;  %v4444_v17 = vpop.f32.mrf.mxu0  ;;  %v4997_v3 = vld [vmem:[#allocation3_spill] sm:$0xff] }
 0x16b   : > { %3298 = vmatmul.msk.f32.gmra.mxu1 %vm227_vm1, %v3973_v21 }
 0x16c   : > { %3364 = vmatmul.msk.f32.gmra.mxu2 %vm227_vm1, %v3975_v22 }
 0x16d   : > { %3430 = vmatmul.msk.f32.gmra.mxu3 %vm227_vm1, %v3863_v62  ;;  %3495 = vmatmul.msk.f32.gmra.mxu0 %vm227_vm1, %v3985_v23 }
 0x16f   : > { %v1038_v19 = vpop.f32.mrf.mxu2 }
 0x170   : > { %v1098_v26 = vadd.f32 %v1038_v19, %v793_v55  ;;  %v795_v2 = vpop.f32.mrf.mxu1  ;;  %v1319_v8 = vpop.f32.mrf.mxu3 }
 0x171   : > { %v796_v62 = vadd.f32 %v795_v2, %v4095_v48 }
 0x172   : > { %v4451_v9 = vadd.f32 %v1319_v8, %v1098_v26  ;;  %v4457_v21 = vpop.f32.mrf.mxu0  ;;  %v3400_v8 = vld [vmem:[#allocation2 + $0x79] sm:$0xff] }
 0x173   : > { %3299 = vmatmul.msk.f32.gmra.mxu1 %vm227_vm1, %v3985_v23  ;;  %v3398_v23 = vld [vmem:[#allocation2 + $0x61] sm:$0xff] }
 0x174   : > { %3365 = vmatmul.msk.f32.gmra.mxu2 %vm227_vm1, %v3987_v24 }
 0x175   : > { %3431 = vmatmul.msk.f32.gmra.mxu3 %vm227_vm1, %v3942_v11  ;;  %3496 = vmatmul.msk.f32.gmra.mxu0 %vm227_vm1, %v3997_v25 }
 0x177   : > { %v1041_v22 = vpop.f32.mrf.mxu2 }
 0x178   : > { %v1099_v38 = vadd.f32 %v1041_v22, %v796_v62  ;;  %v798_v42 = vpop.f32.mrf.mxu1  ;;  %v1322_v37 = vpop.f32.mrf.mxu3 }
 0x179   : > { %v799_v11 = vadd.f32 %v798_v42, %v4113_v13 }
 0x17a   : > { %v4464_v56 = vadd.f32 %v1322_v37, %v1099_v38  ;;  %v4470_v24 = vpop.f32.mrf.mxu0  ;;  %v5000_v38 = vld [vmem:[#allocation6_spill] sm:$0xff] }
 0x17b   : > { %3300 = vmatmul.msk.f32.gmra.mxu1 %vm227_vm1, %v3997_v25 }
 0x17c   : > { %3366 = vmatmul.msk.f32.gmra.mxu2 %vm227_vm1, %v3999_v27 }
 0x17d   : > { %3432 = vmatmul.msk.f32.gmra.mxu3 %vm227_vm1, %v3398_v23  ;;  %3497 = vmatmul.msk.f32.gmra.mxu0 %vm227_vm1, %v4009_v29 }
 0x17f   : > { %v1044_v48 = vpop.f32.mrf.mxu2 }
 0x180   : > { %v1100_v57 = vadd.f32 %v1044_v48, %v799_v11  ;;  %v801_v15 = vpop.f32.mrf.mxu1  ;;  %v1325_v36 = vpop.f32.mrf.mxu3  ;;  %v3401_v48 = vld [vmem:[#allocation2 + $0x81] sm:$0xff] }
 0x181   : > { %v802_v27 = vadd.f32 %v801_v15, %v4133_v10  ;;  %v4999_v10 = vld [vmem:[#allocation23_spill] sm:$0xff] }
 0x182   : > { %v4476_v58 = vadd.f32 %v1325_v36, %v1100_v57  ;;  %v4482_v25 = vpop.f32.mrf.mxu0  ;;  %v5001_v57 = vld [vmem:[#allocation7_spill] sm:$0xff]  ;;  %v5002_v36 = vld [vmem:[#allocation26_spill] sm:$0xff] }
 0x183   : > { %3301 = vmatmul.msk.f32.gmra.mxu1 %vm227_vm1, %v4009_v29  ;;  %v4998_v29 = vld [vmem:[#allocation4_spill] sm:$0xff] }
 0x184   : > { %3367 = vmatmul.msk.f32.gmra.mxu2 %vm227_vm1, %v4011_v31 }
 0x185   : > { %3433 = vmatmul.msk.f32.gmra.mxu3 %vm227_vm1, %v3399_v6  ;;  %3498 = vmatmul.msk.f32.gmra.mxu0 %vm227_vm1, %v4997_v3 }
 0x187   : > { %v1047_v13 = vpop.f32.mrf.mxu2 }
 0x188   : > { %v1101_v55 = vadd.f32 %v1047_v13, %v802_v27  ;;  %v804_v19 = vpop.f32.mrf.mxu1  ;;  %v1328_v26 = vpop.f32.mrf.mxu3  ;;  %v5003_v13 = vld [vmem:[#allocation9_spill] sm:$0xff] }
 0x189   : > { %v805_v62 = vadd.f32 %v804_v19, %v4999_v10 }
 0x18a   : > { %v4488_v2 = vadd.f32 %v1328_v26, %v1101_v55  ;;  %v4494_v31 = vpop.f32.mrf.mxu0 }
 0x18b   : > { %3302 = vmatmul.msk.f32.gmra.mxu1 %vm227_vm1, %v4997_v3 }
 0x18c   : > { %3368 = vmatmul.msk.f32.gmra.mxu2 %vm227_vm1, %v4998_v29  ;;  %v5004_v29 = vld [vmem:[#allocation10_spill] sm:$0xff] }
 0x18d   : > { %3434 = vmatmul.msk.f32.gmra.mxu3 %vm227_vm1, %v3400_v8  ;;  %3499 = vmatmul.msk.f32.gmra.mxu0 %vm227_vm1, %v5000_v38  ;;  %v3402_v8 = vld [vmem:[#allocation2 + $0x91] sm:$0xff] }
 0x18f   : > { %v1050_v22 = vpop.f32.mrf.mxu2 }
 0x190   : > { %v1102_v42 = vadd.f32 %v1050_v22, %v805_v62  ;;  %v807_v37 = vpop.f32.mrf.mxu1  ;;  %v1331_v23 = vpop.f32.mrf.mxu3  ;;  %v5005_v62 = vld [vmem:[#allocation5_spill] sm:$0xff] }
 0x191   : > { %v808_v6 = vadd.f32 %v807_v37, %v5002_v36  ;;  %v3403_v36 = vld [vmem:[#allocation2 + $0x99] sm:$0xff] }
 0x192   : > { %v4500_v11 = vadd.f32 %v1331_v23, %v1102_v42  ;;  %v4506_v15 = vpop.f32.mrf.mxu0  ;;  %v5006_v42 = vld [vmem:[#allocation12_spill] sm:$0xff] }
 0x193   : > { %3303 = vmatmul.msk.f32.gmra.mxu1 %vm227_vm1, %v5000_v38 }
 0x194   : > { %3369 = vmatmul.msk.f32.gmra.mxu2 %vm227_vm1, %v5001_v57 }
 0x195   : > { %3435 = vmatmul.msk.f32.gmra.mxu3 %vm227_vm1, %v3401_v48  ;;  %3500 = vmatmul.msk.f32.gmra.mxu0 %vm227_vm1, %v5003_v13 }
 0x197   : > { %v1053_v27 = vpop.f32.mrf.mxu2 }
 0x198   : > { %v1103_v3 = vadd.f32 %v1053_v27, %v808_v6  ;;  %v810_v55 = vpop.f32.mrf.mxu1  ;;  %v1334_v19 = vpop.f32.mrf.mxu3  ;;  %v5007_v6 = vld [vmem:[#allocation13_spill] sm:$0xff] }
 0x199   : > { %v811_v22 = vadd.f32 %v810_v55, %v5005_v62 }
 0x19a   : > { %v4512_v26 = vadd.f32 %v1334_v19, %v1103_v3  ;;  %v4518_v10 = vpop.f32.mrf.mxu0  ;;  %v5009_v19 = vld [vmem:[#allocation15_spill] sm:$0xff] }
 0x19b   : > { %3304 = vmatmul.msk.f32.gmra.mxu1 %vm227_vm1, %v5003_v13  ;;  %v5008_v13 = vld [vmem:[#allocation8_spill] sm:$0xff] }
 0x19c   : > { %3370 = vmatmul.msk.f32.gmra.mxu2 %vm227_vm1, %v5004_v29 }
 0x19d   : > { %3436 = vmatmul.msk.f32.gmra.mxu3 %vm227_vm1, %v3402_v8  ;;  %3501 = vmatmul.msk.f32.gmra.mxu0 %vm227_vm1, %v5006_v42 }
 0x19f   : > { %v1056_v38 = vpop.f32.mrf.mxu2 }
 0x1a0   : > { %v1104_v37 = vadd.f32 %v1056_v38, %v811_v22  ;;  %v813_v23 = vpop.f32.mrf.mxu1  ;;  %v1337_v48 = vpop.f32.mrf.mxu3  ;;  %v3404_v38 = vld [vmem:[#allocation2 + $0xa9] sm:$0xff] }
 0x1a1   : > { %v814_v3 = vadd.f32 %v813_v23, %v5008_v13  ;;  %v5012_v23 = vld [vmem:[#allocation11_spill] sm:$0xff] }
 0x1a2   : > { %v4524_v57 = vadd.f32 %v1337_v48, %v1104_v37  ;;  %v4530_v27 = vpop.f32.mrf.mxu0 }
 0x1a3   : > { %3305 = vmatmul.msk.f32.gmra.mxu1 %vm227_vm1, %v5006_v42  ;;  %v5010_v42 = vld [vmem:[#allocation16_spill] sm:$0xff] }
 0x1a4   : > { %3371 = vmatmul.msk.f32.gmra.mxu2 %vm227_vm1, %v5007_v6  ;;  %v5013_v6 = vld [vmem:[#allocation18_spill] sm:$0xff] }
 0x1a5   : > { %3437 = vmatmul.msk.f32.gmra.mxu3 %vm227_vm1, %v3403_v36  ;;  %3502 = vmatmul.msk.f32.gmra.mxu0 %vm227_vm1, %v5009_v19 }
 0x1a7   : > { %v1059_v55 = vpop.f32.mrf.mxu2 }
 0x1a8   : > { %v1105_v8 = vadd.f32 %v1059_v55, %v814_v3  ;;  %v816_v29 = vpop.f32.mrf.mxu1  ;;  %v1340_v62 = vpop.f32.mrf.mxu3 }
 0x1a9   : > { %v817_v48 = vadd.f32 %v816_v29, %v5012_v23  ;;  %v5017_v29 = vld [vmem:[#allocation14_spill] sm:$0xff] }
 0x1aa   : > { %v4536_v22 = vadd.f32 %v1340_v62, %v1105_v8  ;;  %v4542_v37 = vpop.f32.mrf.mxu0  ;;  %v3405_v62 = vld [vmem:[#allocation2 + $0xb1] sm:$0xff] }
 0x1ab   : > { %3306 = vmatmul.msk.f32.gmra.mxu1 %vm227_vm1, %v5009_v19  ;;  %5011 = vst [vmem:[#allocation3_spill] sm:$0xff] %v4542_v37  ;;  %v5015_v19 = vld [vmem:[#allocation19_spill] sm:$0xff]  ;;  %v5018_v37 = vld [vmem:[#allocation21_spill] sm:$0xff] }
 0x1ac   : > { %3372 = vmatmul.msk.f32.gmra.mxu2 %vm227_vm1, %v5010_v42 }
 0x1ad   : > { %3438 = vmatmul.msk.f32.gmra.mxu3 %vm227_vm1, %v3404_v38  ;;  %3503 = vmatmul.msk.f32.gmra.mxu0 %vm227_vm1, %v5013_v6 }
 0x1af   : > { %v1062_v36 = vpop.f32.mrf.mxu2 }
 0x1b0   : > { %v1106_v13 = vadd.f32 %v1062_v36, %v817_v48  ;;  %v819_v3 = vpop.f32.mrf.mxu1  ;;  %v1343_v55 = vpop.f32.mrf.mxu3 }
 0x1b1   : > { %v820_v38 = vadd.f32 %v819_v3, %v5017_v29  ;;  %v5021_v3 = vld [vmem:[#allocation17_spill] sm:$0xff] }
 0x1b2   : > { %v4548_v8 = vadd.f32 %v1343_v55, %v1106_v13  ;;  %v4554_v42 = vpop.f32.mrf.mxu0 }
 0x1b3   : > { %3307 = vmatmul.msk.f32.gmra.mxu1 %vm227_vm1, %v5013_v6  ;;  %5016 = vst [vmem:[#allocation23_spill] sm:$0xff] %v4554_v42  ;;  %v5020_v6 = vld [vmem:[#allocation22_spill] sm:$0xff]  ;;  %v5022_v42 = vld [vmem:[#allocation25_spill] sm:$0xff] }
 0x1b4   : > { %5014 = vst [vmem:[#allocation4_spill] sm:$0xff] %v4548_v8  ;;  %3373 = vmatmul.msk.f32.gmra.mxu2 %vm227_vm1, %v5015_v19  ;;  %v3406_v8 = vld [vmem:[#allocation2 + $0xc1] sm:$0xff] }
 0x1b5   : > { %3439 = vmatmul.msk.f32.gmra.mxu3 %vm227_vm1, %v3405_v62  ;;  %3504 = vmatmul.msk.f32.gmra.mxu0 %vm227_vm1, %v5018_v37 }
 0x1b7   : > { %v1065_v23 = vpop.f32.mrf.mxu2 }
 0x1b8   : > { %v1107_v48 = vadd.f32 %v1065_v23, %v820_v38  ;;  %v822_v36 = vpop.f32.mrf.mxu1  ;;  %v1346_v13 = vpop.f32.mrf.mxu3 }
 0x1b9   : > { %v823_v62 = vadd.f32 %v822_v36, %v5021_v3  ;;  %v5025_v3 = vld [vmem:[#allocation28_spill] sm:$0xff] }
 0x1ba   : > { %v4560_v55 = vadd.f32 %v1346_v13, %v1107_v48  ;;  %v4566_v19 = vpop.f32.mrf.mxu0 }
 0x1bb   : > { %3308 = vmatmul.msk.f32.gmra.mxu1 %vm227_vm1, %v5018_v37 }
 0x1bc   : > { %5019 = vst [vmem:[#allocation6_spill] sm:$0xff] %v4560_v55  ;;  %3374 = vmatmul.msk.f32.gmra.mxu2 %vm227_vm1, %v5020_v6  ;;  %v3407_v55 = vld [vmem:[#allocation2 + $0xc9] sm:$0xff] }
 0x1bd   : > { %3440 = vmatmul.msk.f32.gmra.mxu3 %vm227_vm1, %v3406_v8  ;;  %3505 = vmatmul.msk.f32.gmra.mxu0 %vm227_vm1, %v5022_v42  ;;  %v5024_v8 = vld [vmem:[#allocation20_spill] sm:$0xff] }
 0x1bf   : > { %v1068_v29 = vpop.f32.mrf.mxu2 }
 0x1c0   : > { %v1108_v38 = vadd.f32 %v1068_v29, %v823_v62  ;;  %v825_v23 = vpop.f32.mrf.mxu1  ;;  %v1349_v48 = vpop.f32.mrf.mxu3 }
 0x1c1   : > { %v826_v36 = vadd.f32 %v825_v23, %v5024_v8 }
 0x1c2   : > { %v4572_v13 = vadd.f32 %v1349_v48, %v1108_v38  ;;  %v4578_v37 = vpop.f32.mrf.mxu0 }
 0x1c3   : > { %3309 = vmatmul.msk.f32.gmra.mxu1 %vm227_vm1, %v5022_v42  ;;  %v5026_v42 = vld [vmem:[#allocation24_spill] sm:$0xff] }
 0x1c4   : > { %5023 = vst [vmem:[#allocation7_spill] sm:$0xff] %v4572_v13  ;;  %3375 = vmatmul.msk.f32.gmra.mxu2 %vm227_vm1, %v4163_v46  ;;  %v3408_v13 = vld [vmem:[#allocation2 + $0xd9] sm:$0xff] }
 0x1c5   : > { %3441 = vmatmul.msk.f32.gmra.mxu3 %vm227_vm1, %v3407_v55  ;;  %3506 = vmatmul.msk.f32.gmra.mxu0 %vm227_vm1, %v5025_v3 }
 0x1c7   : > { %v1071_v6 = vpop.f32.mrf.mxu2 }
 0x1c8   : > { %v1109_v62 = vadd.f32 %v1071_v6, %v826_v36  ;;  %v828_v29 = vpop.f32.mrf.mxu1  ;;  %v1352_v38 = vpop.f32.mrf.mxu3 }
 0x1c9   : > { %v829_v55 = vadd.f32 %v828_v29, %v5026_v42 }
 0x1ca   : > { %v4584_v48 = vadd.f32 %v1352_v38, %v1109_v62  ;;  %v4590_v46 = vpop.f32.mrf.mxu0  ;;  %v3409_v38 = vld [vmem:[#allocation2 + $0xe1] sm:$0xff] }
 0x1cb   : > { %3310 = vmatmul.msk.f32.gmra.mxu1 %vm227_vm1, %v5025_v3 }
 0x1cc   : > { %3376 = vmatmul.msk.f32.gmra.mxu2 %vm227_vm1, %v4181_v39 }
 0x1cd   : > { %3442 = vmatmul.msk.f32.gmra.mxu3 %vm227_vm1, %v3408_v13  ;;  %3507 = vmatmul.msk.f32.gmra.mxu0 %vm227_vm1, %v4194_v35  ;;  %v5028_v13 = vld [vmem:[#allocation27_spill] sm:$0xff] }
 0x1cf   : > { %v1074_v23 = vpop.f32.mrf.mxu2 }
 0x1d0   : > { %v1110_v8 = vadd.f32 %v1074_v23, %v829_v55  ;;  %v831_v36 = vpop.f32.mrf.mxu1  ;;  %v1355_v6 = vpop.f32.mrf.mxu3 }
 0x1d1   : > { %v832_v3 = vadd.f32 %v831_v36, %v5028_v13 }
 0x1d2   : > { %v4596_v62 = vadd.f32 %v1355_v6, %v1110_v8  ;;  %v4602_v39 = vpop.f32.mrf.mxu0  ;;  %v3410_v6 = vld [vmem:[#allocation2 + $0xf1] sm:$0xff] }
 0x1d3   : > { %3311 = vmatmul.msk.f32.gmra.mxu1 %vm227_vm1, %v4194_v35  ;;  %5027 = vst [vmem:[#allocation26_spill] sm:$0xff] %v4602_v39  ;;  %v5030_v35 = vld [vmem:[#allocation30_spill] sm:$0xff] }
 0x1d4   : > { %3377 = vmatmul.msk.f32.gmra.mxu2 %vm227_vm1, %v4198_v34  ;;  %v5029_v34 = vld [vmem:[#allocation29_spill] sm:$0xff] }
 0x1d5   : > { %3443 = vmatmul.msk.f32.gmra.mxu3 %vm227_vm1, %v3409_v38  ;;  %3508 = vmatmul.msk.f32.gmra.mxu0 %vm227_vm1, %v4211_v18  ;;  %v1639_v39 = vadd.f32 %v5030_v35, %v5029_v34  ;;  %v5032_v34 = vld [vmem:[#allocation31_spill] sm:$0xff]  ;;  %v5033_v35 = vld [vmem:[#allocation32_spill] sm:$0xff] }
 0x1d7   : > { %v1077_v29 = vpop.f32.mrf.mxu2 }
 0x1d8   : > { %v1111_v42 = vadd.f32 %v1077_v29, %v832_v3  ;;  %v1358_v55 = vpop.f32.mrf.mxu3  ;;  %v1821_v23 = vpop.f32.mrf.mxu1 }
 0x1d9   : > { %v1917_v38 = vadd.f32 %v1821_v23, %v1639_v39 }
 0x1da   : > { %v4608_v8 = vadd.f32 %v1358_v55, %v1111_v42  ;;  %v4616_v36 = vpop.f32.mrf.mxu0 }
 0x1db   : > { %3312 = vmatmul.msk.f32.gmra.mxu1 %vm227_vm1, %v4211_v18  ;;  %5031 = vst [vmem:[#allocation9_spill] sm:$0xff] %v4616_v36  ;;  %v3411_v18 = vld [vmem:[#allocation2 + $0xf9] sm:$0xff] }
 0x1dc   : > { %3378 = vmatmul.msk.f32.gmra.mxu2 %vm227_vm1, %v4215_v43  ;;  %v1640_v43 = vadd.f32 %v5033_v35, %v5032_v34 }
 0x1dd   : > { %3444 = vmatmul.msk.f32.gmra.mxu3 %vm227_vm1, %v3410_v6  ;;  %3509 = vmatmul.msk.f32.gmra.mxu0 %vm227_vm1, %v4228_v63  ;;  %v4628_v6 = vld [vmem:[%s4920_s2] ss:$0 sm:$0xff] }
 0x1df   : > { %v2102_v13 = vpop.f32.mrf.mxu2 }
 0x1e0   : > { %v2198_v3 = vadd.f32 %v2102_v13, %v1917_v38  ;;  %v1824_v29 = vpop.f32.mrf.mxu1  ;;  %v2380_v42 = vpop.f32.mrf.mxu3 }
 0x1e1   : > { %v1918_v23 = vadd.f32 %v1824_v29, %v1640_v43  ;;  %v5034_v29 = vld [vmem:[#allocation33_spill] sm:$0xff] }
 0x1e2   : > { %v2476_v55 = vadd.f32 %v2380_v42, %v2198_v3  ;;  %v2658_v39 = vpop.f32.mrf.mxu0 }
 0x1e3   : > { %3313 = vmatmul.msk.f32.gmra.mxu1 %vm227_vm1, %v4228_v63  ;;  %v4636_v63 = vld [vmem:[%s4921_s3] ss:$0 sm:$0xff] }
 0x1e4   : > { %3379 = vmatmul.msk.f32.gmra.mxu2 %vm227_vm1, %v4232_v32  ;;  %v2754_v38 = vadd.f32 %v2658_v39, %v2476_v55  ;;  %v5035_v55 = vld [vmem:[#allocation34_spill] sm:$0xff] }
 0x1e5   : > { %3445 = vmatmul.msk.f32.gmra.mxu3 %vm227_vm1, %v3411_v18  ;;  %3510 = vmatmul.msk.f32.gmra.mxu0 %vm227_vm1, %v4245_v45  ;;  %v3412_v18 = vld [vmem:[#allocation2 + $0x109] sm:$0xff]  ;;  %v1641_v43 = vadd.f32 %v5035_v55, %v5034_v29  ;;  %v3413_v55 = vld [vmem:[#allocation2 + $0x111] sm:$0xff] }
 0x1e6   : > { %v2790_v3 = vmul.f32 %v4628_v6, %v2754_v38 }
 0x1e7   : > { %v2105_v13 = vpop.f32.mrf.mxu2 }
 0x1e8   : > { %v2199_v42 = vadd.f32 %v2105_v13, %v1918_v23  ;;  %v1827_v34 = vpop.f32.mrf.mxu1  ;;  %v2383_v35 = vpop.f32.mrf.mxu3  ;;  %v2826_v32 = vadd.f32 %v4636_v63, %v2790_v3 }
 0x1e9   : > { %v1919_v38 = vadd.f32 %v1827_v34, %v1641_v43  ;;  %v5037_v34 = vld [vmem:[#allocation36_spill] sm:$0xff] }
 0x1ea   : > { %v2477_v36 = vadd.f32 %v2383_v35, %v2199_v42  ;;  %v2858_v39 = vmax.f32 %v2826_v32, 0.0  ;;  %v2661_v23 = vpop.f32.mrf.mxu0 }
 0x1eb   : > { %3314 = vmatmul.msk.f32.gmra.mxu1 %vm227_vm1, %v4245_v45 }
 0x1ec   : > { %3380 = vmatmul.msk.f32.gmra.mxu2 %vm227_vm1, %v4249_v41  ;;  %2891 = vst.msk [vmem:[%s4647_s25] sm:$0xff] %vm2890_vm4, %v2858_v39  ;;  %v2755_v13 = vadd.f32 %v2661_v23, %v2477_v36 }
 0x1ed   : > { %3446 = vmatmul.msk.f32.gmra.mxu3 %vm227_vm1, %v3412_v18  ;;  %3511 = vmatmul.msk.f32.gmra.mxu0 %vm227_vm1, %v4262_v28  ;;  %v5036_v18 = vld [vmem:[#allocation35_spill] sm:$0xff] }
 0x1ee   : > { %v2791_v42 = vmul.f32 %v4628_v6, %v2755_v13  ;;  %v1642_v36 = vadd.f32 %v5037_v34, %v5036_v18 }
 0x1ef   : > { %v2108_v3 = vpop.f32.mrf.mxu2 }
 0x1f0   : > { %v2200_v45 = vadd.f32 %v2108_v3, %v1919_v38  ;;  %v1830_v35 = vpop.f32.mrf.mxu1  ;;  %v2386_v32 = vpop.f32.mrf.mxu3  ;;  %v2827_v29 = vadd.f32 %v4636_v63, %v2791_v42 }
 0x1f1   : > { %v1920_v23 = vadd.f32 %v1830_v35, %v1642_v36  ;;  %v5039_v35 = vld [vmem:[#allocation38_spill] sm:$0xff] }
 0x1f2   : > { %v2478_v41 = vadd.f32 %v2386_v32, %v2200_v45  ;;  %v2859_v43 = vmax.f32 %v2827_v29, 0.0  ;;  %v2664_v39 = vpop.f32.mrf.mxu0  ;;  %v3414_v29 = vld [vmem:[#allocation2 + $0x121] sm:$0xff] }
 0x1f3   : > { %3315 = vmatmul.msk.f32.gmra.mxu1 %vm227_vm1, %v4262_v28 }
 0x1f4   : > { %3381 = vmatmul.msk.f32.gmra.mxu2 %vm227_vm1, %v4266_v51  ;;  %2892 = vst.msk [vmem:[%s4647_s25 + $0x8] sm:$0xff] %vm2890_vm4, %v2859_v43  ;;  %v2756_v38 = vadd.f32 %v2664_v39, %v2478_v41 }
 0x1f5   : > { %3447 = vmatmul.msk.f32.gmra.mxu3 %vm227_vm1, %v3413_v55  ;;  %3512 = vmatmul.msk.f32.gmra.mxu0 %vm227_vm1, %v4279_v40  ;;  %v5038_v55 = vld [vmem:[#allocation37_spill] sm:$0xff] }
 0x1f6   : > { %v2792_v3 = vmul.f32 %v4628_v6, %v2756_v38  ;;  %v1643_v41 = vadd.f32 %v5039_v35, %v5038_v55 }
 0x1f7   : > { %v2111_v13 = vpop.f32.mrf.mxu2 }
 0x1f8   : > { %v2201_v28 = vadd.f32 %v2111_v13, %v1920_v23  ;;  %v1833_v42 = vpop.f32.mrf.mxu1  ;;  %v2389_v45 = vpop.f32.mrf.mxu3  ;;  %v2828_v32 = vadd.f32 %v4636_v63, %v2792_v3 }
 0x1f9   : > { %v1921_v36 = vadd.f32 %v1833_v42, %v1643_v41  ;;  %v5041_v42 = vld [vmem:[#allocation40_spill] sm:$0xff] }
 0x1fa   : > { %v2479_v51 = vadd.f32 %v2389_v45, %v2201_v28  ;;  %v2860_v18 = vmax.f32 %v2828_v32, 0.0  ;;  %v2667_v34 = vpop.f32.mrf.mxu0  ;;  %v3415_v28 = vld [vmem:[#allocation2 + $0x129] sm:$0xff] }
 0x1fb   : > { %3316 = vmatmul.msk.f32.gmra.mxu1 %vm227_vm1, %v4279_v40  ;;  %v5040_v45 = vld [vmem:[#allocation39_spill] sm:$0xff] }
 0x1fc   : > { %3382 = vmatmul.msk.f32.gmra.mxu2 %vm227_vm1, %v4283_v7  ;;  %2893 = vst.msk [vmem:[%s4647_s25 + $0x10] sm:$0xff] %vm2890_vm4, %v2860_v18  ;;  %v2757_v43 = vadd.f32 %v2667_v34, %v2479_v51  ;;  %v1644_v32 = vadd.f32 %v5041_v42, %v5040_v45 }
 0x1fd   : > { %3448 = vmatmul.msk.f32.gmra.mxu3 %vm227_vm1, %v3414_v29  ;;  %3513 = vmatmul.msk.f32.gmra.mxu0 %vm227_vm1, %v4296_v49 }
 0x1fe   : > { %v2793_v23 = vmul.f32 %v4628_v6, %v2757_v43 }
 0x1ff   : > { %v2114_v39 = vpop.f32.mrf.mxu2 }
 0x200   : > { %v2202_v40 = vadd.f32 %v2114_v39, %v1921_v36  ;;  %v1836_v38 = vpop.f32.mrf.mxu1  ;;  %v2392_v13 = vpop.f32.mrf.mxu3  ;;  %v2829_v3 = vadd.f32 %v4636_v63, %v2793_v23  ;;  %v3416_v39 = vld [vmem:[#allocation2 + $0x139] sm:$0xff] }
 0x201   : > { %v1922_v55 = vadd.f32 %v1836_v38, %v1644_v32  ;;  %v5042_v23 = vld [vmem:[#allocation41_spill] sm:$0xff] }
 0x202   : > { %v2480_v7 = vadd.f32 %v2392_v13, %v2202_v40  ;;  %v2861_v51 = vmax.f32 %v2829_v3, 0.0  ;;  %v2670_v29 = vpop.f32.mrf.mxu0  ;;  %v5043_v40 = vld [vmem:[#allocation42_spill] sm:$0xff] }
 0x203   : > { %3317 = vmatmul.msk.f32.gmra.mxu1 %vm227_vm1, %v4296_v49  ;;  %v1645_v38 = vadd.f32 %v5043_v40, %v5042_v23  ;;  %v5046_v40 = vld [vmem:[#allocation47_spill] sm:$0xff] }
 0x204   : > { %3383 = vmatmul.msk.f32.gmra.mxu2 %vm227_vm1, %v4300_v52  ;;  %2894 = vst.msk [vmem:[%s4647_s25 + $0x18] sm:$0xff] %vm2890_vm4, %v2861_v51  ;;  %v2758_v35 = vadd.f32 %v2670_v29, %v2480_v7  ;;  %v3285_v29 = vld [vmem:[#allocation2 + $0x12a] sm:$0xff] }
 0x205   : > { %3449 = vmatmul.msk.f32.gmra.mxu3 %vm227_vm1, %v3415_v28  ;;  %3514 = vmatmul.msk.f32.gmra.mxu0 %vm227_vm1, %v4313_v53 }
 0x206   : > { %v2794_v18 = vmul.f32 %v4628_v6, %v2758_v35 }
 0x207   : > { %v2117_v41 = vpop.f32.mrf.mxu2 }
 0x208   : > { %v2203_v49 = vadd.f32 %v2117_v41, %v1922_v55  ;;  %v1839_v34 = vpop.f32.mrf.mxu1  ;;  %v2395_v36 = vpop.f32.mrf.mxu3  ;;  %v2830_v43 = vadd.f32 %v4636_v63, %v2794_v18  ;;  %v3351_v55 = vld [vmem:[#allocation2 + $0x140] sm:$0xff]  ;;  %v5044_v18 = vld [vmem:[#allocation43_spill] sm:$0xff] }
 0x209   : > { %v1923_v7 = vadd.f32 %v1839_v34, %v1645_v38  ;;  %v3417_v41 = vld [vmem:[#allocation2 + $0x141] sm:$0xff] }
 0x20a   : > { %v2481_v52 = vadd.f32 %v2395_v36, %v2203_v49  ;;  %v2862_v13 = vmax.f32 %v2830_v43, 0.0  ;;  %v2673_v3 = vpop.f32.mrf.mxu0  ;;  %v5045_v49 = vld [vmem:[#allocation44_spill] sm:$0xff] }
 0x20b   : > { %3318 = vmatmul.msk.f32.gmra.mxu1 %vm227_vm1, %v4313_v53  ;;  %v1646_v34 = vadd.f32 %v5045_v49, %v5044_v18 }
 0x20c   : > { %3384 = vmatmul.msk.f32.gmra.mxu2 %vm227_vm1, %v4317_v59  ;;  %2895 = vst.msk [vmem:[%s4647_s25 + $0x20] sm:$0xff] %vm2890_vm4, %v2862_v13  ;;  %v2759_v28 = vadd.f32 %v2673_v3, %v2481_v52 }
 0x20d   : > { %3450 = vmatmul.msk.f32.gmra.mxu3 %vm227_vm1, %v3416_v39  ;;  %3515 = vmatmul.msk.f32.gmra.mxu0 %vm227_vm1, %v4330_v60 }
 0x20e   : > { %v2795_v42 = vmul.f32 %v4628_v6, %v2759_v28  ;;  %v3352_v28 = vld [vmem:[#allocation2 + $0x150] sm:$0xff] }
 0x20f   : > { %v2120_v45 = vpop.f32.mrf.mxu2 }
 0x210   : > { %v2204_v53 = vadd.f32 %v2120_v45, %v1923_v7  ;;  %v1842_v32 = vpop.f32.mrf.mxu1  ;;  %v2398_v51 = vpop.f32.mrf.mxu3  ;;  %v2831_v59 = vadd.f32 %v4636_v63, %v2795_v42  ;;  %v3286_v7 = vld [vmem:[#allocation2 + $0x13a] sm:$0xff] }
 0x211   : > { %v1924_v60 = vadd.f32 %v1842_v32, %v1646_v34  ;;  %v5047_v32 = vld [vmem:[#allocation45_spill] sm:$0xff] }
 0x212   : > { %v2482_v35 = vadd.f32 %v2398_v51, %v2204_v53  ;;  %v2863_v36 = vmax.f32 %v2831_v59, 0.0  ;;  %v2676_v43 = vpop.f32.mrf.mxu0  ;;  %v3418_v53 = vld [vmem:[#allocation2 + $0x151] sm:$0xff]  ;;  %v5048_v51 = vld [vmem:[#allocation46_spill] sm:$0xff] }
 0x213   : > { %3319 = vmatmul.msk.f32.gmra.mxu1 %vm227_vm1, %v3285_v29  ;;  %v1647_v29 = vadd.f32 %v5048_v51, %v5047_v32 }
 0x214   : > { %3385 = vmatmul.msk.f32.gmra.mxu2 %vm227_vm1, %v3351_v55  ;;  %2896 = vst.msk [vmem:[%s4647_s25 + $0x28] sm:$0xff] %vm2890_vm4, %v2863_v36  ;;  %v2760_v52 = vadd.f32 %v2676_v43, %v2482_v35 }
 0x215   : > { %3451 = vmatmul.msk.f32.gmra.mxu3 %vm227_vm1, %v3417_v41  ;;  %3516 = vmatmul.msk.f32.gmra.mxu0 %vm227_vm1, %v5046_v40  ;;  %v3419_v40 = vld [vmem:[#allocation2 + $0x159] sm:$0xff] }
 0x216   : > { %v2796_v23 = vmul.f32 %v4628_v6, %v2760_v52  ;;  %v3353_v52 = vld [vmem:[#allocation2 + $0x158] sm:$0xff] }
 0x217   : > { %v2123_v39 = vpop.f32.mrf.mxu2 }
 0x218   : > { %v2205_v38 = vadd.f32 %v2123_v39, %v1924_v60  ;;  %v1845_v13 = vpop.f32.mrf.mxu1  ;;  %v2401_v3 = vpop.f32.mrf.mxu3  ;;  %v2832_v45 = vadd.f32 %v4636_v63, %v2796_v23  ;;  %v3287_v60 = vld [vmem:[#allocation2 + $0x142] sm:$0xff] }
 0x219   : > { %v1925_v35 = vadd.f32 %v1845_v13, %v1647_v29  ;;  %v3354_v29 = vld [vmem:[#allocation2 + $0x168] sm:$0xff] }
 0x21a   : > { %v2483_v42 = vadd.f32 %v2401_v3, %v2205_v38  ;;  %v2864_v55 = vmax.f32 %v2832_v45, 0.0  ;;  %v2679_v59 = vpop.f32.mrf.mxu0  ;;  %v5049_v38 = vld [vmem:[#allocation48_spill] sm:$0xff] }
 0x21b   : > { %3320 = vmatmul.msk.f32.gmra.mxu1 %vm227_vm1, %v3286_v7  ;;  %v1648_v13 = vadd.f32 %v4354_v16, %v5049_v38  ;;  %v3355_v38 = vld [vmem:[#allocation2 + $0x170] sm:$0xff] }
 0x21c   : > { %3386 = vmatmul.msk.f32.gmra.mxu2 %vm227_vm1, %v3352_v28  ;;  %2897 = vst.msk [vmem:[%s4647_s25 + $0x30] sm:$0xff] %vm2890_vm4, %v2864_v55  ;;  %v2761_v41 = vadd.f32 %v2679_v59, %v2483_v42 }
 0x21d   : > { %3452 = vmatmul.msk.f32.gmra.mxu3 %vm227_vm1, %v3418_v53  ;;  %3517 = vmatmul.msk.f32.gmra.mxu0 %vm227_vm1, %v4362_v5  ;;  %v3484_v5 = vld [vmem:[#allocation2 + $0x152] sm:$0xff] }
 0x21e   : > { %v2797_v49 = vmul.f32 %v4628_v6, %v2761_v41  ;;  %v5050_v41 = vld [vmem:[#allocation49_spill] sm:$0xff] }
 0x21f   : > { %v2126_v18 = vpop.f32.mrf.mxu2 }
 0x220   : > { %v2206_v34 = vadd.f32 %v2126_v18, %v1925_v35  ;;  %v1848_v36 = vpop.f32.mrf.mxu1  ;;  %v2404_v43 = vpop.f32.mrf.mxu3  ;;  %v2833_v39 = vadd.f32 %v4636_v63, %v2797_v49  ;;  %v3420_v35 = vld [vmem:[#allocation2 + $0x169] sm:$0xff]  ;;  %v1649_v18 = vadd.f32 %v5050_v41, %v4364_v0 }
 0x221   : > { %v1926_v28 = vadd.f32 %v1848_v36, %v1648_v13  ;;  %v3485_v36 = vld [vmem:[#allocation2 + $0x15a] sm:$0xff] }
 0x222   : > { %v2484_v23 = vadd.f32 %v2404_v43, %v2206_v34  ;;  %v2865_v3 = vmax.f32 %v2833_v39, 0.0  ;;  %v2682_v7 = vpop.f32.mrf.mxu0 }
 0x223   : > { %3321 = vmatmul.msk.f32.gmra.mxu1 %vm227_vm1, %v3287_v60 }
 0x224   : > { %3387 = vmatmul.msk.f32.gmra.mxu2 %vm227_vm1, %v3353_v52  ;;  %2898 = vst.msk [vmem:[%s4647_s25 + $0x38] sm:$0xff] %vm2890_vm4, %v2865_v3  ;;  %v2762_v45 = vadd.f32 %v2682_v7, %v2484_v23  ;;  %v3421_v7 = vld [vmem:[#allocation2 + $0x171] sm:$0xff] }
 0x225   : > { %3453 = vmatmul.msk.f32.gmra.mxu3 %vm227_vm1, %v3419_v40  ;;  %3518 = vmatmul.msk.f32.gmra.mxu0 %vm227_vm1, %v3484_v5 }
 0x226   : > { %v2798_v53 = vmul.f32 %v4628_v6, %v2762_v45 }
 0x227   : > { %v2129_v42 = vpop.f32.mrf.mxu2 }
 0x228   : > { %v2207_v32 = vadd.f32 %v2129_v42, %v1926_v28  ;;  %v1851_v51 = vpop.f32.mrf.mxu1  ;;  %v2407_v16 = vpop.f32.mrf.mxu3  ;;  %v2834_v55 = vadd.f32 %v4636_v63, %v2798_v53  ;;  %v3486_v53 = vld [vmem:[#allocation2 + $0x16a] sm:$0xff] }
 0x229   : > { %v1927_v43 = vadd.f32 %v1851_v51, %v1649_v18 }
 0x22a   : > { %v2485_v59 = vadd.f32 %v2407_v16, %v2207_v32  ;;  %v2866_v49 = vmax.f32 %v2834_v55, 0.0  ;;  %v2685_v34 = vpop.f32.mrf.mxu0 }
 0x22b   : > { %3322 = vmatmul.msk.f32.gmra.mxu1 %vm227_vm1, %v3484_v5  ;;  %v5051_v5 = vld [vmem:[#allocation50_spill] sm:$0xff] }
 0x22c   : > { %3388 = vmatmul.msk.f32.gmra.mxu2 %vm227_vm1, %v3354_v29  ;;  %2899 = vst.msk [vmem:[%s4647_s25 + $0x40] sm:$0xff] %vm2890_vm4, %v2866_v49  ;;  %v2763_v60 = vadd.f32 %v2685_v34, %v2485_v59  ;;  %v1650_v28 = vadd.f32 %v4379_v44, %v5051_v5  ;;  %v3422_v49 = vld [vmem:[#allocation2 + $0x181] sm:$0xff]  ;;  %v1651_v34 = vadd.f32 %v4389_v47, %v4385_v30 }
 0x22d   : > { %3454 = vmatmul.msk.f32.gmra.mxu3 %vm227_vm1, %v3420_v35  ;;  %3519 = vmatmul.msk.f32.gmra.mxu0 %vm227_vm1, %v3485_v36  ;;  %v3356_v35 = vld [vmem:[#allocation2 + $0x180] sm:$0xff]  ;;  %v3357_v47 = vld [vmem:[#allocation2 + $0x188] sm:$0xff]  ;;  %v1652_v5 = vadd.f32 %v4399_v1, %v4395_v54  ;;  %v3358_v1 = vld [vmem:[#allocation2 + $0x198] sm:$0xff] }
 0x22e   : > { %v2799_v39 = vmul.f32 %v4628_v6, %v2763_v60  ;;  %v3487_v60 = vld [vmem:[#allocation2 + $0x172] sm:$0xff] }
 0x22f   : > { %v2132_v52 = vpop.f32.mrf.mxu2 }
 0x230   : > { %v2208_v23 = vadd.f32 %v2132_v52, %v1927_v43  ;;  %v1854_v40 = vpop.f32.mrf.mxu1  ;;  %v2410_v0 = vpop.f32.mrf.mxu3  ;;  %v2835_v13 = vadd.f32 %v4636_v63, %v2799_v39 }
 0x231   : > { %v1928_v32 = vadd.f32 %v1854_v40, %v1650_v28 }
 0x232   : > { %v2486_v3 = vadd.f32 %v2410_v0, %v2208_v23  ;;  %v2867_v45 = vmax.f32 %v2835_v13, 0.0  ;;  %v2688_v42 = vpop.f32.mrf.mxu0 }
 0x233   : > { %3323 = vmatmul.msk.f32.gmra.mxu1 %vm227_vm1, %v3485_v36 }
 0x234   : > { %3389 = vmatmul.msk.f32.gmra.mxu2 %vm227_vm1, %v3355_v38  ;;  %2900 = vst.msk [vmem:[%s4647_s25 + $0x48] sm:$0xff] %vm2890_vm4, %v2867_v45  ;;  %v2764_v51 = vadd.f32 %v2688_v42, %v2486_v3  ;;  %v3488_v42 = vld [vmem:[#allocation2 + $0x182] sm:$0xff] }
 0x235   : > { %3455 = vmatmul.msk.f32.gmra.mxu3 %vm227_vm1, %v3421_v7  ;;  %3520 = vmatmul.msk.f32.gmra.mxu0 %vm227_vm1, %v3486_v53  ;;  %v3423_v7 = vld [vmem:[#allocation2 + $0x189] sm:$0xff] }
 0x236   : > { %v2800_v29 = vmul.f32 %v4628_v6, %v2764_v51 }
 0x237   : > { %v2135_v16 = vpop.f32.mrf.mxu2 }
 0x238   : > { %v2209_v55 = vadd.f32 %v2135_v16, %v1928_v32  ;;  %v1857_v59 = vpop.f32.mrf.mxu1  ;;  %v2413_v44 = vpop.f32.mrf.mxu3  ;;  %v2836_v41 = vadd.f32 %v4636_v63, %v2800_v29 }
 0x239   : > { %v1929_v52 = vadd.f32 %v1857_v59, %v1651_v34  ;;  %v3489_v34 = vld [vmem:[#allocation2 + $0x18a] sm:$0xff] }
 0x23a   : > { %v2487_v18 = vadd.f32 %v2413_v44, %v2209_v55  ;;  %v2868_v36 = vmax.f32 %v2836_v41, 0.0  ;;  %v2691_v43 = vpop.f32.mrf.mxu0  ;;  %v1653_v41 = vadd.f32 %v4409_v12, %v4405_v61  ;;  %v3359_v12 = vld [vmem:[#allocation2 + $0x1a0] sm:$0xff] }
 0x23b   : > { %3324 = vmatmul.msk.f32.gmra.mxu1 %vm227_vm1, %v3486_v53 }
 0x23c   : > { %3390 = vmatmul.msk.f32.gmra.mxu2 %vm227_vm1, %v3356_v35  ;;  %2901 = vst.msk [vmem:[%s4647_s25 + $0x50] sm:$0xff] %vm2890_vm4, %v2868_v36  ;;  %v2765_v39 = vadd.f32 %v2691_v43, %v2487_v18  ;;  %v3424_v35 = vld [vmem:[#allocation2 + $0x199] sm:$0xff] }
 0x23d   : > { %3456 = vmatmul.msk.f32.gmra.mxu3 %vm227_vm1, %v3422_v49  ;;  %3521 = vmatmul.msk.f32.gmra.mxu0 %vm227_vm1, %v3487_v60 }
 0x23e   : > { %v2801_v40 = vmul.f32 %v4628_v6, %v2765_v39 }
 0x23f   : > { %v2138_v23 = vpop.f32.mrf.mxu2 }
 0x240   : > { %v2210_v0 = vadd.f32 %v2138_v23, %v1929_v52  ;;  %v1860_v38 = vpop.f32.mrf.mxu1  ;;  %v2416_v30 = vpop.f32.mrf.mxu3  ;;  %v2837_v13 = vadd.f32 %v4636_v63, %v2801_v40 }
 0x241   : > { %v1930_v53 = vadd.f32 %v1860_v38, %v1652_v5  ;;  %v3425_v38 = vld [vmem:[#allocation2 + $0x1a1] sm:$0xff] }
 0x242   : > { %v2488_v3 = vadd.f32 %v2416_v30, %v2210_v0  ;;  %v2869_v28 = vmax.f32 %v2837_v13, 0.0  ;;  %v2694_v45 = vpop.f32.mrf.mxu0  ;;  %v1654_v30 = vadd.f32 %v4420_v20, %v4414_v50 }
 0x243   : > { %3325 = vmatmul.msk.f32.gmra.mxu1 %vm227_vm1, %v3487_v60 }
 0x244   : > { %3391 = vmatmul.msk.f32.gmra.mxu2 %vm227_vm1, %v3357_v47  ;;  %2902 = vst.msk [vmem:[%s4647_s25 + $0x58] sm:$0xff] %vm2890_vm4, %v2869_v28  ;;  %v2766_v32 = vadd.f32 %v2694_v45, %v2488_v3  ;;  %v3490_v3 = vld [vmem:[#allocation2 + $0x19a] sm:$0xff] }
 0x245   : > { %3457 = vmatmul.msk.f32.gmra.mxu3 %vm227_vm1, %v3423_v7  ;;  %3522 = vmatmul.msk.f32.gmra.mxu0 %vm227_vm1, %v3488_v42 }
 0x246   : > { %v2802_v16 = vmul.f32 %v4628_v6, %v2766_v32 }
 0x247   : > { %v2141_v51 = vpop.f32.mrf.mxu2 }
 0x248   : > { %v2211_v29 = vadd.f32 %v2141_v51, %v1930_v53  ;;  %v1863_v55 = vpop.f32.mrf.mxu1  ;;  %v2419_v54 = vpop.f32.mrf.mxu3  ;;  %v2838_v59 = vadd.f32 %v4636_v63, %v2802_v16  ;;  %v1655_v51 = vadd.f32 %v4431_v4, %v4425_v33  ;;  %v1656_v33 = vadd.f32 %v4444_v17, %v4438_v14 }
 0x249   : > { %v1931_v36 = vadd.f32 %v1863_v55, %v1653_v41  ;;  %v3491_v55 = vld [vmem:[#allocation2 + $0x1a2] sm:$0xff] }
 0x24a   : > { %v2489_v44 = vadd.f32 %v2419_v54, %v2211_v29  ;;  %v2870_v18 = vmax.f32 %v2838_v59, 0.0  ;;  %v2697_v49 = vpop.f32.mrf.mxu0 }
 0x24b   : > { %3326 = vmatmul.msk.f32.gmra.mxu1 %vm227_vm1, %v3488_v42 }
 0x24c   : > { %3392 = vmatmul.msk.f32.gmra.mxu2 %vm227_vm1, %v3358_v1  ;;  %2903 = vst.msk [vmem:[%s4647_s25 + $0x60] sm:$0xff] %vm2890_vm4, %v2870_v18  ;;  %v2767_v43 = vadd.f32 %v2697_v49, %v2489_v44 }
 0x24d   : > { %3458 = vmatmul.msk.f32.gmra.mxu3 %vm227_vm1, %v3424_v35  ;;  %3523 = vmatmul.msk.f32.gmra.mxu0 %vm227_vm1, %v3489_v34 }
 0x24e   : > { %v2803_v52 = vmul.f32 %v4628_v6, %v2767_v43 }
 0x24f   : > { %v2144_v60 = vpop.f32.mrf.mxu2 }
 0x250   : > { %v2212_v39 = vadd.f32 %v2144_v60, %v1931_v36  ;;  %v1866_v23 = vpop.f32.mrf.mxu1  ;;  %v2422_v61 = vpop.f32.mrf.mxu3  ;;  %v2839_v40 = vadd.f32 %v4636_v63, %v2803_v52 }
 0x251   : > { %v1932_v7 = vadd.f32 %v1866_v23, %v1654_v30 }
 0x252   : > { %v2490_v0 = vadd.f32 %v2422_v61, %v2212_v39  ;;  %v2871_v47 = vmax.f32 %v2839_v40, 0.0  ;;  %v2700_v13 = vpop.f32.mrf.mxu0 }
 0x253   : > { %3327 = vmatmul.msk.f32.gmra.mxu1 %vm227_vm1, %v3489_v34 }
 0x254   : > { %3393 = vmatmul.msk.f32.gmra.mxu2 %vm227_vm1, %v3359_v12  ;;  %2904 = vst.msk [vmem:[%s4647_s25 + $0x68] sm:$0xff] %vm2890_vm4, %v2871_v47  ;;  %v2768_v5 = vadd.f32 %v2700_v13, %v2490_v0 }
 0x255   : > { %3459 = vmatmul.msk.f32.gmra.mxu3 %vm227_vm1, %v3425_v38  ;;  %3524 = vmatmul.msk.f32.gmra.mxu0 %vm227_vm1, %v3490_v3  ;;  %v1657_v38 = vadd.f32 %v4457_v21, %v4451_v9 }
 0x256   : > { %v2804_v45 = vmul.f32 %v4628_v6, %v2768_v5 }
 0x257   : > { %v2147_v28 = vpop.f32.mrf.mxu2 }
 0x258   : > { %v2213_v42 = vadd.f32 %v2147_v28, %v1932_v7  ;;  %v1869_v53 = vpop.f32.mrf.mxu1  ;;  %v2425_v50 = vpop.f32.mrf.mxu3  ;;  %v2840_v20 = vadd.f32 %v4636_v63, %v2804_v45 }
 0x259   : > { %v1933_v54 = vadd.f32 %v1869_v53, %v1655_v51  ;;  %v1658_v53 = vadd.f32 %v4470_v24, %v4464_v56 }
 0x25a   : > { %v2491_v32 = vadd.f32 %v2425_v50, %v2213_v42  ;;  %v2872_v16 = vmax.f32 %v2840_v20, 0.0  ;;  %v2703_v29 = vpop.f32.mrf.mxu0 }
 0x25c   : > { %2905 = vst.msk [vmem:[%s4647_s25 + $0x70] sm:$0xff] %vm2890_vm4, %v2872_v16  ;;  %v2769_v1 = vadd.f32 %v2703_v29, %v2491_v32 }
 0x25d   : > { %3525 = vmatmul.msk.f32.gmra.mxu0 %vm227_vm1, %v3491_v55 }
 0x25e   : > { %v2805_v44 = vmul.f32 %v4628_v6, %v2769_v1 }
 0x25f   : > { %v2150_v59 = vpop.f32.mrf.mxu2 }
 0x260   : > { %v2214_v35 = vadd.f32 %v2150_v59, %v1933_v54  ;;  %v1872_v41 = vpop.f32.mrf.mxu1  ;;  %v2428_v18 = vpop.f32.mrf.mxu3  ;;  %v2841_v49 = vadd.f32 %v4636_v63, %v2805_v44  ;;  %v1659_v59 = vadd.f32 %v4482_v25, %v4476_v58 }
 0x261   : > { %v1934_v43 = vadd.f32 %v1872_v41, %v1656_v33 }
 0x262   : > { %v2492_v34 = vadd.f32 %v2428_v18, %v2214_v35  ;;  %v2873_v4 = vmax.f32 %v2841_v49, 0.0  ;;  %v2706_v36 = vpop.f32.mrf.mxu0 }
 0x264   : > { %2906 = vst.msk [vmem:[%s4647_s25 + $0x78] sm:$0xff] %vm2890_vm4, %v2873_v4  ;;  %v2770_v60 = vadd.f32 %v2706_v36, %v2492_v34 }
 0x266   : > { %v2806_v39 = vmul.f32 %v4628_v6, %v2770_v60 }
 0x267   : > { %v2153_v52 = vpop.f32.mrf.mxu2 }
 0x268   : > { %v2215_v23 = vadd.f32 %v2153_v52, %v1934_v43  ;;  %v1875_v61 = vpop.f32.mrf.mxu1  ;;  %v2431_v12 = vpop.f32.mrf.mxu3  ;;  %v2842_v40 = vadd.f32 %v4636_v63, %v2806_v39  ;;  %v1660_v43 = vadd.f32 %v4494_v31, %v4488_v2 }
 0x269   : > { %v1935_v30 = vadd.f32 %v1875_v61, %v1657_v38 }
 0x26a   : > { %v2493_v0 = vadd.f32 %v2431_v12, %v2215_v23  ;;  %v2874_v14 = vmax.f32 %v2842_v40, 0.0  ;;  %v2709_v17 = vpop.f32.mrf.mxu0 }
 0x26c   : > { %2907 = vst.msk [vmem:[%s4647_s25 + $0x80] sm:$0xff] %vm2890_vm4, %v2874_v14  ;;  %v2771_v47 = vadd.f32 %v2709_v17, %v2493_v0  ;;  %v1661_v14 = vadd.f32 %v4506_v15, %v4500_v11 }
 0x26e   : > { %v2807_v3 = vmul.f32 %v4628_v6, %v2771_v47 }
 0x26f   : > { %v2156_v13 = vpop.f32.mrf.mxu2 }
 0x270   : > { %v2216_v7 = vadd.f32 %v2156_v13, %v1935_v30  ;;  %v1878_v5 = vpop.f32.mrf.mxu1  ;;  %v2434_v28 = vpop.f32.mrf.mxu3  ;;  %v2843_v45 = vadd.f32 %v4636_v63, %v2807_v3 }
 0x271   : > { %v1936_v50 = vadd.f32 %v1878_v5, %v1658_v53 }
 0x272   : > { %v2494_v42 = vadd.f32 %v2434_v28, %v2216_v7  ;;  %v2875_v9 = vmax.f32 %v2843_v45, 0.0  ;;  %v2712_v21 = vpop.f32.mrf.mxu0 }
 0x274   : > { %2908 = vst.msk [vmem:[%s4647_s25 + $0x88] sm:$0xff] %vm2890_vm4, %v2875_v9  ;;  %v2772_v20 = vadd.f32 %v2712_v21, %v2494_v42  ;;  %v1662_v42 = vadd.f32 %v4518_v10, %v4512_v26 }
 0x276   : > { %v2808_v51 = vmul.f32 %v4628_v6, %v2772_v20 }
 0x277   : > { %v2159_v32 = vpop.f32.mrf.mxu2 }
 0x278   : > { %v2217_v16 = vadd.f32 %v2159_v32, %v1936_v50  ;;  %v1881_v29 = vpop.f32.mrf.mxu1  ;;  %v2437_v55 = vpop.f32.mrf.mxu3  ;;  %v2844_v54 = vadd.f32 %v4636_v63, %v2808_v51 }
 0x279   : > { %v1937_v44 = vadd.f32 %v1881_v29, %v1659_v59 }
 0x27a   : > { %v2495_v1 = vadd.f32 %v2437_v55, %v2217_v16  ;;  %v2876_v56 = vmax.f32 %v2844_v54, 0.0  ;;  %v2715_v24 = vpop.f32.mrf.mxu0  ;;  %v1663_v55 = vadd.f32 %v4530_v27, %v4524_v57 }
 0x27c   : > { %2909 = vst.msk [vmem:[%s4647_s25 + $0x90] sm:$0xff] %vm2890_vm4, %v2876_v56  ;;  %v2773_v35 = vadd.f32 %v2715_v24, %v2495_v1 }
 0x27e   : > { %v2809_v18 = vmul.f32 %v4628_v6, %v2773_v35 }
 0x27f   : > { %v2162_v41 = vpop.f32.mrf.mxu2 }
 0x280   : > { %v2218_v49 = vadd.f32 %v2162_v41, %v1937_v44  ;;  %v1884_v34 = vpop.f32.mrf.mxu1  ;;  %v2440_v33 = vpop.f32.mrf.mxu3  ;;  %v2845_v4 = vadd.f32 %v4636_v63, %v2809_v18 }
 0x281   : > { %v1938_v60 = vadd.f32 %v1884_v34, %v1660_v43 }
 0x282   : > { %v2496_v36 = vadd.f32 %v2440_v33, %v2218_v49  ;;  %v2877_v58 = vmax.f32 %v2845_v4, 0.0  ;;  %v2718_v25 = vpop.f32.mrf.mxu0  ;;  %v5052_v49 = vld [vmem:[#allocation3_spill] sm:$0xff] }
 0x283   : > { %v1664_v34 = vadd.f32 %v5052_v49, %v4536_v22 }
 0x284   : > { %2910 = vst.msk [vmem:[%s4647_s25 + $0x98] sm:$0xff] %vm2890_vm4, %v2877_v58  ;;  %v2774_v52 = vadd.f32 %v2718_v25, %v2496_v36 }
 0x286   : > { %v2810_v23 = vmul.f32 %v4628_v6, %v2774_v52 }
 0x287   : > { %v2165_v39 = vpop.f32.mrf.mxu2 }
 0x288   : > { %v2219_v61 = vadd.f32 %v2165_v39, %v1938_v60  ;;  %v1887_v12 = vpop.f32.mrf.mxu1  ;;  %v2443_v40 = vpop.f32.mrf.mxu3  ;;  %v2846_v0 = vadd.f32 %v4636_v63, %v2810_v23  ;;  %v5053_v23 = vld [vmem:[#allocation4_spill] sm:$0xff] }
 0x289   : > { %v1939_v17 = vadd.f32 %v1887_v12, %v1661_v14 }
 0x28a   : > { %v2497_v38 = vadd.f32 %v2443_v40, %v2219_v61  ;;  %v2878_v2 = vmax.f32 %v2846_v0, 0.0  ;;  %v2721_v31 = vpop.f32.mrf.mxu0  ;;  %v5054_v61 = vld [vmem:[#allocation23_spill] sm:$0xff] }
 0x28b   : > { %v1665_v12 = vadd.f32 %v5054_v61, %v5053_v23 }
 0x28c   : > { %2911 = vst.msk [vmem:[%s4647_s25 + $0xa0] sm:$0xff] %vm2890_vm4, %v2878_v2  ;;  %v2775_v30 = vadd.f32 %v2721_v31, %v2497_v38 }
 0x28e   : > { %v2811_v13 = vmul.f32 %v4628_v6, %v2775_v30 }
 0x28f   : > { %v2168_v47 = vpop.f32.mrf.mxu2 }
 0x290   : > { %v2220_v3 = vadd.f32 %v2168_v47, %v1939_v17  ;;  %v1890_v7 = vpop.f32.mrf.mxu1  ;;  %v2446_v5 = vpop.f32.mrf.mxu3  ;;  %v2847_v28 = vadd.f32 %v4636_v63, %v2811_v13 }
 0x291   : > { %v1940_v53 = vadd.f32 %v1890_v7, %v1662_v42 }
 0x292   : > { %v2498_v45 = vadd.f32 %v2446_v5, %v2220_v3  ;;  %v2879_v11 = vmax.f32 %v2847_v28, 0.0  ;;  %v2724_v15 = vpop.f32.mrf.mxu0  ;;  %v5055_v3 = vld [vmem:[#allocation6_spill] sm:$0xff] }
 0x293   : > { %v1666_v7 = vadd.f32 %v4566_v19, %v5055_v3 }
 0x294   : > { %2912 = vst.msk [vmem:[%s4647_s25 + $0xa8] sm:$0xff] %vm2890_vm4, %v2879_v11  ;;  %v2776_v9 = vadd.f32 %v2724_v15, %v2498_v45 }
 0x296   : > { %v2812_v50 = vmul.f32 %v4628_v6, %v2776_v9 }
 0x297   : > { %v2171_v21 = vpop.f32.mrf.mxu2 }
 0x298   : > { %v2221_v20 = vadd.f32 %v2171_v21, %v1940_v53  ;;  %v1893_v32 = vpop.f32.mrf.mxu1  ;;  %v2449_v51 = vpop.f32.mrf.mxu3  ;;  %v2848_v16 = vadd.f32 %v4636_v63, %v2812_v50 }
 0x299   : > { %v1941_v54 = vadd.f32 %v1893_v32, %v1663_v55  ;;  %v5056_v32 = vld [vmem:[#allocation7_spill] sm:$0xff] }
 0x29a   : > { %v2499_v29 = vadd.f32 %v2449_v51, %v2221_v20  ;;  %v2880_v26 = vmax.f32 %v2848_v16, 0.0  ;;  %v2727_v10 = vpop.f32.mrf.mxu0  ;;  %v1667_v51 = vadd.f32 %v4578_v37, %v5056_v32 }
 0x29c   : > { %2913 = vst.msk [vmem:[%s4647_s25 + $0xb0] sm:$0xff] %vm2890_vm4, %v2880_v26  ;;  %v2777_v1 = vadd.f32 %v2727_v10, %v2499_v29 }
 0x29e   : > { %v2813_v56 = vmul.f32 %v4628_v6, %v2777_v1 }
 0x29f   : > { %v2174_v59 = vpop.f32.mrf.mxu2 }
 0x2a0   : > { %v2222_v24 = vadd.f32 %v2174_v59, %v1941_v54  ;;  %v1896_v44 = vpop.f32.mrf.mxu1  ;;  %v2452_v35 = vpop.f32.mrf.mxu3  ;;  %v2849_v41 = vadd.f32 %v4636_v63, %v2813_v56 }
 0x2a1   : > { %v1942_v33 = vadd.f32 %v1896_v44, %v1664_v34  ;;  %v1668_v44 = vadd.f32 %v4590_v46, %v4584_v48 }
 0x2a2   : > { %v2500_v18 = vadd.f32 %v2452_v35, %v2222_v24  ;;  %v2881_v57 = vmax.f32 %v2849_v41, 0.0  ;;  %v2730_v27 = vpop.f32.mrf.mxu0 }
 0x2a4   : > { %2914 = vst.msk [vmem:[%s4647_s25 + $0xb8] sm:$0xff] %vm2890_vm4, %v2881_v57  ;;  %v2778_v4 = vadd.f32 %v2730_v27, %v2500_v18 }
 0x2a6   : > { %v2814_v43 = vmul.f32 %v4628_v6, %v2778_v4 }
 0x2a7   : > { %v2177_v36 = vpop.f32.mrf.mxu2 }
 0x2a8   : > { %v2223_v58 = vadd.f32 %v2177_v36, %v1942_v33  ;;  %v1899_v25 = vpop.f32.mrf.mxu1  ;;  %v2455_v60 = vpop.f32.mrf.mxu3  ;;  %v2850_v52 = vadd.f32 %v4636_v63, %v2814_v43  ;;  %v5057_v43 = vld [vmem:[#allocation26_spill] sm:$0xff] }
 0x2a9   : > { %v1943_v0 = vadd.f32 %v1899_v25, %v1665_v12 }
 0x2aa   : > { %v2501_v39 = vadd.f32 %v2455_v60, %v2223_v58  ;;  %v2882_v22 = vmax.f32 %v2850_v52, 0.0  ;;  %v2733_v40 = vpop.f32.mrf.mxu0  ;;  %v1669_v58 = vadd.f32 %v5057_v43, %v4596_v62 }
 0x2ac   : > { %2915 = vst.msk [vmem:[%s4647_s25 + $0xc0] sm:$0xff] %vm2890_vm4, %v2882_v22  ;;  %v2779_v38 = vadd.f32 %v2733_v40, %v2501_v39 }
 0x2ae   : > { %v2815_v2 = vmul.f32 %v4628_v6, %v2779_v38 }
 0x2af   : > { %v2180_v14 = vpop.f32.mrf.mxu2 }
 0x2b0   : > { %v2224_v31 = vadd.f32 %v2180_v14, %v1943_v0  ;;  %v1902_v17 = vpop.f32.mrf.mxu1  ;;  %v2458_v30 = vpop.f32.mrf.mxu3  ;;  %v2851_v47 = vadd.f32 %v4636_v63, %v2815_v2  ;;  %v5058_v0 = vld [vmem:[#allocation9_spill] sm:$0xff] }
 0x2b1   : > { %v1944_v45 = vadd.f32 %v1902_v17, %v1666_v7  ;;  %v1670_v62 = vadd.f32 %v5058_v0, %v4608_v8 }
 0x2b2   : > { %v2502_v13 = vadd.f32 %v2458_v30, %v2224_v31  ;;  %v2883_v5 = vmax.f32 %v2851_v47, 0.0  ;;  %v2736_v28 = vpop.f32.mrf.mxu0 }
 0x2b4   : > { %2916 = vst.msk [vmem:[%s4647_s25 + $0xc8] sm:$0xff] %vm2890_vm4, %v2883_v5  ;;  %v2780_v42 = vadd.f32 %v2736_v28, %v2502_v13 }
 0x2b6   : > { %v2816_v15 = vmul.f32 %v4628_v6, %v2780_v42 }
 0x2b7   : > { %v2183_v11 = vpop.f32.mrf.mxu2 }
 0x2b8   : > { %v2225_v53 = vadd.f32 %v2183_v11, %v1944_v45  ;;  %v1905_v9 = vpop.f32.mrf.mxu1  ;;  %v2461_v21 = vpop.f32.mrf.mxu3  ;;  %v2852_v50 = vadd.f32 %v4636_v63, %v2816_v15 }
 0x2b9   : > { %v1945_v29 = vadd.f32 %v1905_v9, %v1667_v51 }
 0x2ba   : > { %v2503_v20 = vadd.f32 %v2461_v21, %v2225_v53  ;;  %v2884_v19 = vmax.f32 %v2852_v50, 0.0  ;;  %v2739_v16 = vpop.f32.mrf.mxu0 }
 0x2bc   : > { %2917 = vst.msk [vmem:[%s4647_s25 + $0xd0] sm:$0xff] %vm2890_vm4, %v2884_v19  ;;  %v2781_v55 = vadd.f32 %v2739_v16, %v2503_v20 }
 0x2be   : > { %v2817_v10 = vmul.f32 %v4628_v6, %v2781_v55 }
 0x2bf   : > { %v2186_v26 = vpop.f32.mrf.mxu2 }
 0x2c0   : > { %v2226_v54 = vadd.f32 %v2186_v26, %v1945_v29  ;;  %v1908_v1 = vpop.f32.mrf.mxu1  ;;  %v2464_v59 = vpop.f32.mrf.mxu3  ;;  %v2853_v56 = vadd.f32 %v4636_v63, %v2817_v10 }
 0x2c1   : > { %v1946_v41 = vadd.f32 %v1908_v1, %v1668_v44 }
 0x2c2   : > { %v2504_v24 = vadd.f32 %v2464_v59, %v2226_v54  ;;  %v2885_v37 = vmax.f32 %v2853_v56, 0.0  ;;  %v2742_v35 = vpop.f32.mrf.mxu0 }
 0x2c4   : > { %2918 = vst.msk [vmem:[%s4647_s25 + $0xd8] sm:$0xff] %vm2890_vm4, %v2885_v37  ;;  %v2782_v18 = vadd.f32 %v2742_v35, %v2504_v24 }
 0x2c6   : > { %v2818_v34 = vmul.f32 %v4628_v6, %v2782_v18 }
 0x2c7   : > { %v2189_v49 = vpop.f32.mrf.mxu2 }
 0x2c8   : > { %v2227_v57 = vadd.f32 %v2189_v49, %v1946_v41  ;;  %v2467_v27 = vpop.f32.mrf.mxu3  ;;  %v1911_v33 = vpop.f32.mrf.mxu1  ;;  %v2854_v4 = vadd.f32 %v4636_v63, %v2818_v34 }
 0x2c9   : > { %v1947_v25 = vadd.f32 %v1911_v33, %v1669_v58 }
 0x2ca   : > { %v2505_v36 = vadd.f32 %v2467_v27, %v2227_v57  ;;  %v2886_v48 = vmax.f32 %v2854_v4, 0.0  ;;  %v2745_v46 = vpop.f32.mrf.mxu0 }
 0x2cc   : > { %2919 = vst.msk [vmem:[%s4647_s25 + $0xe0] sm:$0xff] %vm2890_vm4, %v2886_v48  ;;  %v2783_v60 = vadd.f32 %v2745_v46, %v2505_v36 }
 0x2ce   : > { %v2819_v39 = vmul.f32 %v4628_v6, %v2783_v60 }
 0x2cf   : > { %v2192_v52 = vpop.f32.mrf.mxu2 }
 0x2d0   : > { %v2228_v23 = vadd.f32 %v2192_v52, %v1947_v25  ;;  %v2470_v61 = vpop.f32.mrf.mxu3  ;;  %v2855_v12 = vadd.f32 %v4636_v63, %v2819_v39  ;;  %v1914_v40 = vpop.f32.mrf.mxu1 }
 0x2d1   : > { %v1948_v2 = vadd.f32 %v1914_v40, %v1670_v62 }
 0x2d2   : > { %v2506_v22 = vadd.f32 %v2470_v61, %v2228_v23  ;;  %v2887_v38 = vmax.f32 %v2855_v12, 0.0  ;;  %v2748_v14 = vpop.f32.mrf.mxu0 }
 0x2d4   : > { %2920 = vst.msk [vmem:[%s4647_s25 + $0xe8] sm:$0xff] %vm2890_vm4, %v2887_v38  ;;  %v2784_v31 = vadd.f32 %v2748_v14, %v2506_v22 }
 0x2d6   : > { %v2820_v30 = vmul.f32 %v4628_v6, %v2784_v31 }
 0x2d7   : > { %v2195_v17 = vpop.f32.mrf.mxu2 }
 0x2d8   : > { %v2229_v47 = vadd.f32 %v2195_v17, %v1948_v2  ;;  %v2473_v13 = vpop.f32.mrf.mxu3  ;;  %v2856_v3 = vadd.f32 %v4636_v63, %v2820_v30 }
 0x2da   : > { %v2507_v7 = vadd.f32 %v2473_v13, %v2229_v47  ;;  %v2888_v5 = vmax.f32 %v2856_v3, 0.0  ;;  %v2751_v28 = vpop.f32.mrf.mxu0 }
 0x2dc   : > { %2921 = vst.msk [vmem:[%s4647_s25 + $0xf0] sm:$0xff] %vm2890_vm4, %v2888_v5  ;;  %v2785_v8 = vadd.f32 %v2751_v28, %v2507_v7 }
 0x2de   : > { %v2821_v45 = vmul.f32 %v4628_v6, %v2785_v8 }
 0x2e0   : > { %v2857_v42 = vadd.f32 %v4636_v63, %v2821_v45 }
 0x2e2   : > { %v2889_v11 = vmax.f32 %v2857_v42, 0.0 }
 0x2e4   : > { %2922 = vst.msk [vmem:[%s4647_s25 + $0xf8] sm:$0xff] %vm2890_vm4, %v2889_v11 }
 0x2e5 PF: > { %s14_s17 = sadd.s32 1, %s3582_s17   ;;  %s5059_s15 = smov %s3578_s16 }
 0x2e6   : > { %p11_p5 = scmp.ge.s32.totalorder %s14_s17, 4   ;;  %s5060_s16 = smov %s5062_s18 }
 0x2e8   :  { %13 = sbr.rel (!%p11_p5) target bundleno = 2 (0x2), region = 83 }

// kernel: encoder_forward.7
= control target key start
LH: loop header
LB: loop body
LE: loop exit
PB: predicated region body
PF: predicated region fallthrough
CT: control target
= control target key end

     0   :  { %s4338_s18 = smov 0   ;;  %s4340_s19 = smov 0   ;;  %s5702_s0 = inlined_call_operand.vmem [shape: f32[2,16,16,8], index: 0, kind: input, shape index: {}]   ;;  %s5703_s1 = inlined_call_operand.vmem [shape: f32[9,8,8], index: 1, kind: input, shape index: {}]   ;;  %s5704_s2 = inlined_call_operand.vmem [shape: f32[1,8], index: 2, kind: input, shape index: {}]   ;;  %s5705_s3 = inlined_call_operand.vmem [shape: f32[1,8], index: 3, kind: input, shape index: {}]   ;;  %s5706_s4 = inlined_call_operand.vmem [shape: f32[2,16,16,8], index: 4, kind: output, shape index: {0}]   ;;  %s5707_s5 = inlined_call_operand.vmem [shape: f32[2,8,8,8], index: 5, kind: output, shape index: {1}]  }
   0x1   :  { %s4342_s20 = smov 0  }
   0x2 LB: > { %s28_s21 = sadd.s32 1, %s4301_s19  ;;  %p3687_p0 = scmp.ge.s32.totalorder %s4305_s20, 1  ;;  %s4305_s20 = sphi %s4342_s20, %s16_s20   ;;  %s4301_s19 = sphi %s4340_s19, %s5848_s19   ;;  %s4297_s18 = sphi %s4338_s18, %s5847_s18  }
   0x3   : > { %p30_p1 = scmp.ge.s32.totalorder %s28_s21, 2  ;;  %p206_p2 = scmp.lt.s32.totalorder %s4305_s20, 3 }
   0x5   : > { %s5850_s21 = smov (%p30_p1, %s28_s21), 0  ;;  %p207_p3 = pnand %p3687_p0, %p206_p2 }
   0x7   : > { %210 = sbr.rel (%p207_p3) target bundleno = 755 (0x2f3), region = 36 }
   0xc   : > { %v3694_v0 = vld [vmem:[%s5703_s1 + $0x8] sm:$0xff]  ;;  %p248_p4 = scmp.lt.s32.totalorder %s4297_s18, 1  ;;  %vm278_vm0 = vcmask 64512   ;;  %v3759_v1 = vld [vmem:[%s5703_s1 + $0x10] sm:$0xff]  ;;  %v3824_v2 = vld [vmem:[%s5703_s1 + $0x18] sm:$0xff]  ;;  %v4307_v4 = vmov 0.0  }
   0xd   : > { %4251 = vmatpush.msra.mxu1 %v3694_v0  ;;  %4252 = vmatpush.msra.mxu2 %v3694_v0  ;;  %v424_v3 = vld [vmem:[%s5703_s1] sm:$0xff]  ;;  %279 = vst.msk [vmem:[#allocation2] sm:$0xff] %vm278_vm0, %v4307_v4  ;;  %vm281_vm1 = vcmask 58368   ;;  %vm287_vm2 = vcmask 57344   ;;  %v4019_v56 = vld [vmem:[%s5703_s1 + $0x30] sm:$0xff]  ;;  %v4084_v58 = vld [vmem:[%s5703_s1 + $0x38] sm:$0xff] }
   0xe   : > { %s5852_s18 = smov (!%p248_p4, %s4297_s18), 1  ;;  %4253 = vmatpush.msra.mxu3 %v3694_v0  ;;  %280 = vst.msk [vmem:[#allocation2 + $0x8] sm:$0xff] %vm278_vm0, %v4307_v4  ;;  %v3889_v5 = vld [vmem:[%s5703_s1 + $0x20] sm:$0xff]  ;;  %571 = vmatpush.msra.mxu0 %v3694_v0  ;;  %v3954_v59 = vld [vmem:[%s5703_s1 + $0x28] sm:$0xff]  ;;  %vm3457_vm3 = vcmask 1041409   ;;  %vm3459_vm4 = vcmask 1042434  }
   0xf   : > { %1023 = vmatpush.msrb.mxu2 %v3759_v1  ;;  %780 = vmatpush.msrb.mxu1 %v424_v3  ;;  %284 = vst.msk [vmem:[#allocation2 + $0x198] sm:$0xff] %vm278_vm0, %v4307_v4  ;;  %s4248_s7 = sshll.u32 %s5852_s18, 8  ;;  %v4149_v0 = vld [vmem:[%s5703_s1 + $0x40] sm:$0xff]  ;;  %vm3461_vm5 = vcmask 1043459   ;;  %vm3463_vm6 = vcmask 1044484   ;;  %s4250_s30 = sshll.u32 %s5852_s18, 6 }
  0x10   : > { %1301 = vmatpush.msrb.mxu3 %v3824_v2  ;;  %285 = vst.msk [vmem:[#allocation2 + $0x1a0] sm:$0xff] %vm278_vm0, %v4307_v4  ;;  %s4387_s10 = scalar_lea.vmem %s5702_s0, %s4248_s7  ;;  %1576 = vmatpush.msrb.mxu0 %v3889_v5  ;;  %s5330_s29 = scalar_lea.vmem %s5706_s4, %s4248_s7  ;;  %vm3465_vm7 = vcmask 1045509   ;;  %vm3467_vm8 = vcmask 1046534   ;;  %vm3469_vm9 = vcmask 1047559  }
  0x11   : > { %282 = vst.msk [vmem:[#allocation2 + $0x10] sm:$0x3] %vm281_vm1, %v4307_v4  ;;  %v330_v6 = vld [vmem:[%s4387_s10 + $0x30] sm:$0xff]  ;;  %v331_v9 = vld [vmem:[%s4387_s10 + $0x38] sm:$0xff]  ;;  %v332_v13 = vld [vmem:[%s4387_s10 + $0x40] sm:$0xff]  ;;  %s5405_s7 = scalar_lea.vmem %s5707_s5, %s4250_s30 }
  0x12   : > { %v338_v7 = vld [vmem:[%s4387_s10 + $0x70] sm:$0xff]  ;;  %286 = vst.msk [vmem:[#allocation2 + $0x1a8] sm:$0x3] %vm281_vm1, %v4307_v4  ;;  %v339_v10 = vld [vmem:[%s4387_s10 + $0x78] sm:$0xff]  ;;  %v340_v14 = vld [vmem:[%s4387_s10 + $0x80] sm:$0xff] }
  0x13   : > { %v346_v8 = vld [vmem:[%s4387_s10 + $0xb0] sm:$0xff]  ;;  %363 = vst.msk [vmem:[#allocation2 + $0x61] sm:$0xff] %vm278_vm0, %v330_v6  ;;  %v347_v12 = vld [vmem:[%s4387_s10 + $0xb8] sm:$0xff]  ;;  %v348_v15 = vld [vmem:[%s4387_s10 + $0xc0] sm:$0xff] }
  0x14   : > { %371 = vst.msk [vmem:[#allocation2 + $0xc1] sm:$0xff] %vm278_vm0, %v338_v7  ;;  %v333_v16 = vld [vmem:[%s4387_s10 + $0x48] sm:$0xff]  ;;  %v324_v21 = vld [vmem:[%s4387_s10] sm:$0xff]  ;;  %v334_v24 = vld [vmem:[%s4387_s10 + $0x50] sm:$0xff] }
  0x15   : > { %379 = vst.msk [vmem:[#allocation2 + $0x121] sm:$0xff] %vm278_vm0, %v346_v8  ;;  %v425_v11 = vld [vmem:[#allocation2 + $0x1] sm:$0xff]  ;;  %v342_v25 = vld [vmem:[%s4387_s10 + $0x90] sm:$0xff]  ;;  %v335_v30 = vld [vmem:[%s4387_s10 + $0x58] sm:$0xff] }
  0x16   : > { %364 = vst.msk [vmem:[#allocation2 + $0x69] sm:$0xff] %vm278_vm0, %v331_v9  ;;  %3695 = vmatmul.msk.f32.vlgmr.msra.gmra.mxu0 %vm278_vm0, %v425_v11  ;;  %v341_v18 = vld [vmem:[%s4387_s10 + $0x88] sm:$0xff]  ;;  %v350_v28 = vld [vmem:[%s4387_s10 + $0xd0] sm:$0xff]  ;;  %v343_v32 = vld [vmem:[%s4387_s10 + $0x98] sm:$0xff] }
  0x17   : > { %372 = vst.msk [vmem:[#allocation2 + $0xc9] sm:$0xff] %vm278_vm0, %v339_v10  ;;  %v349_v23 = vld [vmem:[%s4387_s10 + $0xc8] sm:$0xff]  ;;  %v326_v33 = vld [vmem:[%s4387_s10 + $0x10] sm:$0xff]  ;;  %v351_v34 = vld [vmem:[%s4387_s10 + $0xd8] sm:$0xff]  ;;  %2679 = vmatpush.msra.mxu0 %v4149_v0 }
  0x18   : > { %380 = vst.msk [vmem:[#allocation2 + $0x129] sm:$0xff] %vm278_vm0, %v347_v12  ;;  %v426_v20 = vld [vmem:[#allocation2 + $0x9] sm:$0xff]  ;;  %v336_v36 = vld [vmem:[%s4387_s10 + $0x60] sm:$0xff]  ;;  %v327_v38 = vld [vmem:[%s4387_s10 + $0x18] sm:$0xff] }
  0x19   : > { %365 = vst.msk [vmem:[#allocation2 + $0x79] sm:$0xff] %vm278_vm0, %v332_v13  ;;  %v325_v26 = vld [vmem:[%s4387_s10 + $0x8] sm:$0xff]  ;;  %v344_v37 = vld [vmem:[%s4387_s10 + $0xa0] sm:$0xff] }
  0x1a   : > { %v4409_v17 = vld [vmem:[#allocation2 + $0x61] sm:$0xff]  ;;  %373 = vst.msk [vmem:[#allocation2 + $0xd9] sm:$0xff] %vm278_vm0, %v340_v14 }
  0x1b   : > { %3703 = vmatmul.msk.f32.vlgmr.msra.gmra.mxu1 %vm278_vm0, %v4409_v17  ;;  %v4415_v19 = vld [vmem:[#allocation2 + $0xc1] sm:$0xff]  ;;  %381 = vst.msk [vmem:[#allocation2 + $0x139] sm:$0xff] %vm278_vm0, %v348_v15 }
  0x1c   : > { %3711 = vmatmul.msk.f32.vlgmr.msra.gmra.mxu2 %vm278_vm0, %v4415_v19  ;;  %v4421_v22 = vld [vmem:[#allocation2 + $0x121] sm:$0xff]  ;;  %366 = vst.msk [vmem:[#allocation2 + $0x81] sm:$0xff] %vm278_vm0, %v333_v16  ;;  %1851 = vmatpush.msra.mxu1 %v3954_v59 }
  0x1d   : > { %3719 = vmatmul.msk.f32.vlgmr.msra.gmra.mxu3 %vm278_vm0, %v4421_v22  ;;  %374 = vst.msk [vmem:[#allocation2 + $0xe1] sm:$0xff] %vm278_vm0, %v341_v18  ;;  %v4434_v27 = vld [vmem:[#allocation2 + $0x69] sm:$0xff]  ;;  %v352_v40 = vld [vmem:[%s4387_s10 + $0xe0] sm:$0xff]  ;;  %2129 = vmatpush.msra.mxu2 %v4019_v56 }
  0x1e   : > { %3696 = vmatmul.msk.f32.gmra.mxu0 %vm278_vm0, %v426_v20  ;;  %357 = vst.msk [vmem:[#allocation2 + $0x19] sm:$0xff] %vm278_vm0, %v324_v21  ;;  %v4438_v29 = vld [vmem:[#allocation2 + $0xc9] sm:$0xff]  ;;  %v328_v46 = vld [vmem:[%s4387_s10 + $0x20] sm:$0xff]  ;;  %2404 = vmatpush.msra.mxu3 %v4084_v58 }
  0x1f   : > { %382 = vst.msk [vmem:[#allocation2 + $0x141] sm:$0xff] %vm278_vm0, %v349_v23  ;;  %v4442_v31 = vld [vmem:[#allocation2 + $0x129] sm:$0xff] }
  0x20   : > { %367 = vst.msk [vmem:[#allocation2 + $0x91] sm:$0xff] %vm278_vm0, %v334_v24  ;;  %v4466_v39 = vld [vmem:[#allocation2 + $0x79] sm:$0xff]  ;;  %v337_v44 = vld [vmem:[%s4387_s10 + $0x68] sm:$0xff] }
  0x21   : > { %375 = vst.msk [vmem:[#allocation2 + $0xf1] sm:$0xff] %vm278_vm0, %v342_v25  ;;  %v4470_v41 = vld [vmem:[#allocation2 + $0xd9] sm:$0xff]  ;;  %v345_v45 = vld [vmem:[%s4387_s10 + $0xa8] sm:$0xff] }
  0x22   : > { %358 = vst.msk [vmem:[#allocation2 + $0x21] sm:$0xff] %vm278_vm0, %v325_v26  ;;  %v4473_v42 = vld [vmem:[#allocation2 + $0x139] sm:$0xff]  ;;  %v353_v47 = vld [vmem:[%s4387_s10 + $0xe8] sm:$0xff] }
  0x23   : > { %3704 = vmatmul.msk.f32.gmra.mxu1 %vm278_vm0, %v4434_v27  ;;  %383 = vst.msk [vmem:[#allocation2 + $0x151] sm:$0xff] %vm278_vm0, %v350_v28  ;;  %v4495_v48 = vld [vmem:[#allocation2 + $0x81] sm:$0xff] }
  0x24   : > { %3712 = vmatmul.msk.f32.gmra.mxu2 %vm278_vm0, %v4438_v29  ;;  %368 = vst.msk [vmem:[#allocation2 + $0x99] sm:$0xff] %vm278_vm0, %v335_v30  ;;  %v4497_v49 = vld [vmem:[#allocation2 + $0xe1] sm:$0xff] }
  0x25   : > { %3720 = vmatmul.msk.f32.gmra.mxu3 %vm278_vm0, %v4442_v31  ;;  %v4456_v35 = vld [vmem:[#allocation2 + $0x19] sm:$0xff]  ;;  %376 = vst.msk [vmem:[#allocation2 + $0xf9] sm:$0xff] %vm278_vm0, %v343_v32  ;;  %v329_v7 = vld [vmem:[%s4387_s10 + $0x28] sm:$0xff] }
  0x26   : > { %3697 = vmatmul.msk.f32.gmra.mxu0 %vm278_vm0, %v4456_v35  ;;  %359 = vst.msk [vmem:[#allocation2 + $0x31] sm:$0xff] %vm278_vm0, %v326_v33  ;;  %v4499_v50 = vld [vmem:[#allocation2 + $0x141] sm:$0xff] }
  0x27   : > { %384 = vst.msk [vmem:[#allocation2 + $0x159] sm:$0xff] %vm278_vm0, %v351_v34  ;;  %v4519_v52 = vld [vmem:[#allocation2 + $0x91] sm:$0xff]  ;;  %v878_v9 = vld [vmem:[#allocation2 + $0x2] sm:$0xff] }
  0x28   : > { %369 = vst.msk [vmem:[#allocation2 + $0xa9] sm:$0xff] %vm278_vm0, %v336_v36  ;;  %v4523_v53 = vld [vmem:[#allocation2 + $0xf1] sm:$0xff]  ;;  %v393_v12 = vld [vmem:[#allocation2 + $0x8] sm:$0xff] }
  0x29   : > { %377 = vst.msk [vmem:[#allocation2 + $0x109] sm:$0xff] %vm278_vm0, %v344_v37  ;;  %v4478_v43 = vld [vmem:[#allocation2 + $0x21] sm:$0xff] }
  0x2a   : > { %360 = vst.msk [vmem:[#allocation2 + $0x39] sm:$0xff] %vm278_vm0, %v327_v38  ;;  %v4527_v54 = vld [vmem:[#allocation2 + $0x151] sm:$0xff]  ;;  %v3793_v14 = vld [vmem:[#allocation2 + $0x20] sm:$0xff]  ;;  %v4725_v30 = vld [vmem:[#allocation2 + $0x68] sm:$0xff] }
  0x2b   : > { %3705 = vmatmul.msk.f32.gmra.mxu1 %vm278_vm0, %v4466_v39  ;;  %385 = vst.msk [vmem:[#allocation2 + $0x169] sm:$0xff] %vm278_vm0, %v352_v40  ;;  %v4554_v57 = vld [vmem:[#allocation2 + $0x99] sm:$0xff]  ;;  %v4739_v34 = vld [vmem:[#allocation2 + $0x62] sm:$0xff] }
  0x2c   : > { %3713 = vmatmul.msk.f32.gmra.mxu2 %vm278_vm0, %v4470_v41  ;;  %370 = vst.msk [vmem:[#allocation2 + $0xb1] sm:$0xff] %vm278_vm0, %v337_v44  ;;  %v4564_v60 = vld [vmem:[#allocation2 + $0xf9] sm:$0xff] }
  0x2d   : > { %3721 = vmatmul.msk.f32.gmra.mxu3 %vm278_vm0, %v4473_v42  ;;  %378 = vst.msk [vmem:[#allocation2 + $0x111] sm:$0xff] %vm278_vm0, %v345_v45  ;;  %v4503_v51 = vld [vmem:[#allocation2 + $0x31] sm:$0xff] }
  0x2e   : > { %3698 = vmatmul.msk.f32.gmra.mxu0 %vm278_vm0, %v4478_v43  ;;  %361 = vst.msk [vmem:[#allocation2 + $0x49] sm:$0xff] %vm278_vm0, %v328_v46  ;;  %v4568_v61 = vld [vmem:[#allocation2 + $0x159] sm:$0xff] }
  0x2f   : > { %386 = vst.msk [vmem:[#allocation2 + $0x171] sm:$0xff] %vm278_vm0, %v353_v47  ;;  %v4592_v63 = vld [vmem:[#allocation2 + $0xa9] sm:$0xff]  ;;  %v4777_v46 = vld [vmem:[#allocation2 + $0x7a] sm:$0xff] }
  0x30   : > { %288 = vst.msk [vmem:[#allocation2] sm:$0x1] %vm287_vm2, %v4307_v4  ;;  %v4599_v1 = vld [vmem:[#allocation2 + $0x109] sm:$0xff]  ;;  %v4799_v0 = vld [vmem:[#allocation2 + $0x98] sm:$0xff] }
  0x31   : > { %289 = vst.msk [vmem:[#allocation2 + $0x18] sm:$0x1] %vm287_vm2, %v4307_v4  ;;  %v4533_v55 = vld [vmem:[#allocation2 + $0x39] sm:$0xff] }
  0x32   : > { %290 = vst.msk [vmem:[#allocation2 + $0x30] sm:$0x1] %vm287_vm2, %v4307_v4  ;;  %v4603_v2 = vld [vmem:[#allocation2 + $0x169] sm:$0xff]  ;;  %v4678_v18 = vld [vmem:[#allocation2 + $0x38] sm:$0xff] }
  0x33   : > { %3706 = vmatmul.msk.f32.gmra.mxu1 %vm278_vm0, %v4495_v48  ;;  %291 = vst.msk [vmem:[#allocation2 + $0x48] sm:$0x1] %vm287_vm2, %v4307_v4  ;;  %v4623_v3 = vld [vmem:[#allocation2 + $0xb1] sm:$0xff] }
  0x34   : > { %3714 = vmatmul.msk.f32.gmra.mxu2 %vm278_vm0, %v4497_v49  ;;  %292 = vst.msk [vmem:[#allocation2 + $0x60] sm:$0x1] %vm287_vm2, %v4307_v4  ;;  %v4627_v5 = vld [vmem:[#allocation2 + $0x111] sm:$0xff] }
  0x35   : > { %3722 = vmatmul.msk.f32.gmra.mxu3 %vm278_vm0, %v4499_v50  ;;  %293 = vst.msk [vmem:[#allocation2 + $0x78] sm:$0x1] %vm287_vm2, %v4307_v4  ;;  %v4574_v62 = vld [vmem:[#allocation2 + $0x49] sm:$0xff]  ;;  %v4687_v20 = vld [vmem:[#allocation2 + $0x32] sm:$0xff] }
  0x36   : > { %3699 = vmatmul.msk.f32.gmra.mxu0 %vm278_vm0, %v4503_v51  ;;  %294 = vst.msk [vmem:[#allocation2 + $0x90] sm:$0x1] %vm287_vm2, %v4307_v4  ;;  %v4631_v6 = vld [vmem:[#allocation2 + $0x171] sm:$0xff] }
  0x37   : > { %295 = vst.msk [vmem:[#allocation2 + $0xa8] sm:$0x1] %vm287_vm2, %v4307_v4  ;;  %v392_v8 = vld [vmem:[#allocation2] sm:$0xff] }
  0x38   : > { %296 = vst.msk [vmem:[#allocation2 + $0xc0] sm:$0x1] %vm287_vm2, %v4307_v4  ;;  %v3792_v10 = vld [vmem:[#allocation2 + $0x18] sm:$0xff] }
  0x39   : > { %297 = vst.msk [vmem:[#allocation2 + $0xd8] sm:$0x1] %vm287_vm2, %v4307_v4  ;;  %v4667_v15 = vld [vmem:[#allocation2 + $0x30] sm:$0xff] }
  0x3a   : > { %298 = vst.msk [vmem:[#allocation2 + $0xf0] sm:$0x1] %vm287_vm2, %v4307_v4  ;;  %v4689_v21 = vld [vmem:[#allocation2 + $0x48] sm:$0xff] }
  0x3b   : > { %3707 = vmatmul.msk.f32.gmra.mxu1 %vm278_vm0, %v4519_v52  ;;  %299 = vst.msk [vmem:[#allocation2 + $0x108] sm:$0x1] %vm287_vm2, %v4307_v4  ;;  %v4713_v26 = vld [vmem:[#allocation2 + $0x60] sm:$0xff] }
  0x3c   : > { %3715 = vmatmul.msk.f32.gmra.mxu2 %vm278_vm0, %v4523_v53  ;;  %300 = vst.msk [vmem:[#allocation2 + $0x120] sm:$0x1] %vm287_vm2, %v4307_v4 }
  0x3d   : > { %3723 = vmatmul.msk.f32.gmra.mxu3 %vm278_vm0, %v4527_v54  ;;  %301 = vst.msk [vmem:[#allocation2 + $0x138] sm:$0x1] %vm287_vm2, %v4307_v4  ;;  %v4779_v47 = vld [vmem:[#allocation2 + $0x90] sm:$0xff] }
  0x3e   : > { %3700 = vmatmul.msk.f32.gmra.mxu0 %vm278_vm0, %v4533_v55  ;;  %302 = vst.msk [vmem:[#allocation2 + $0x150] sm:$0x1] %vm287_vm2, %v4307_v4 }
  0x3f   : > { %303 = vst.msk [vmem:[#allocation2 + $0x168] sm:$0x1] %vm287_vm2, %v4307_v4 }
  0x40   : > { %304 = vst.msk [vmem:[#allocation2 + $0x180] sm:$0x1] %vm287_vm2, %v4307_v4 }
  0x41   : > { %305 = vst.msk [vmem:[#allocation2 + $0x198] sm:$0x1] %vm287_vm2, %v4307_v4 }
  0x42   : > { %306 = vst.msk [vmem:[#allocation2 + $0x11] sm:$0x1] %vm287_vm2, %v4307_v4 }
  0x43   : > { %3708 = vmatmul.msk.f32.gmra.mxu1 %vm278_vm0, %v4554_v57  ;;  %307 = vst.msk [vmem:[#allocation2 + $0x29] sm:$0x1] %vm287_vm2, %v4307_v4 }
  0x44   : > { %3716 = vmatmul.msk.f32.gmra.mxu2 %vm278_vm0, %v4564_v60  ;;  %308 = vst.msk [vmem:[#allocation2 + $0x41] sm:$0x1] %vm287_vm2, %v4307_v4 }
  0x45   : > { %3724 = vmatmul.msk.f32.gmra.mxu3 %vm278_vm0, %v4568_v61  ;;  %309 = vst.msk [vmem:[#allocation2 + $0x59] sm:$0x1] %vm287_vm2, %v4307_v4 }
  0x46   : > { %3701 = vmatmul.msk.f32.gmra.mxu0 %vm278_vm0, %v4574_v62  ;;  %310 = vst.msk [vmem:[#allocation2 + $0x71] sm:$0x1] %vm287_vm2, %v4307_v4 }
  0x47   : > { %311 = vst.msk [vmem:[#allocation2 + $0x89] sm:$0x1] %vm287_vm2, %v4307_v4 }
  0x48   : > { %312 = vst.msk [vmem:[#allocation2 + $0xa1] sm:$0x1] %vm287_vm2, %v4307_v4 }
  0x49   : > { %313 = vst.msk [vmem:[#allocation2 + $0xb9] sm:$0x1] %vm287_vm2, %v4307_v4  ;;  %v879_v13 = vld [vmem:[#allocation2 + $0xa] sm:$0xff] }
  0x4a   : > { %314 = vst.msk [vmem:[#allocation2 + $0xd1] sm:$0x1] %vm287_vm2, %v4307_v4  ;;  %v4676_v16 = vld [vmem:[#allocation2 + $0x22] sm:$0xff] }
  0x4b   : > { %3709 = vmatmul.msk.f32.gmra.mxu1 %vm278_vm0, %v4592_v63  ;;  %315 = vst.msk [vmem:[#allocation2 + $0xe9] sm:$0x1] %vm287_vm2, %v4307_v4  ;;  %v4699_v23 = vld [vmem:[#allocation2 + $0x3a] sm:$0xff] }
  0x4c   : > { %3717 = vmatmul.msk.f32.gmra.mxu2 %vm278_vm0, %v4599_v1  ;;  %316 = vst.msk [vmem:[#allocation2 + $0x101] sm:$0x1] %vm287_vm2, %v4307_v4 }
  0x4d   : > { %3725 = vmatmul.msk.f32.gmra.mxu3 %vm278_vm0, %v4603_v2  ;;  %317 = vst.msk [vmem:[#allocation2 + $0x119] sm:$0x1] %vm287_vm2, %v4307_v4  ;;  %v4757_v38 = vld [vmem:[#allocation2 + $0x6a] sm:$0xff] }
  0x4e   : > { %318 = vst.msk [vmem:[#allocation2 + $0x131] sm:$0x1] %vm287_vm2, %v4307_v4  ;;  %v4797_v59 = vld [vmem:[#allocation2 + $0x82] sm:$0xff] }
  0x4f   : > { %319 = vst.msk [vmem:[#allocation2 + $0x149] sm:$0x1] %vm287_vm2, %v4307_v4 }
  0x50   : > { %320 = vst.msk [vmem:[#allocation2 + $0x161] sm:$0x1] %vm287_vm2, %v4307_v4 }
  0x51   : > { %321 = vst.msk [vmem:[#allocation2 + $0x179] sm:$0x1] %vm287_vm2, %v4307_v4 }
  0x52   : > { %322 = vst.msk [vmem:[#allocation2 + $0x191] sm:$0x1] %vm287_vm2, %v4307_v4 }
  0x53   : > { %3710 = vmatmul.msk.f32.gmra.mxu1 %vm278_vm0, %v4623_v3  ;;  %323 = vst.msk [vmem:[#allocation2 + $0x1a9] sm:$0x1] %vm287_vm2, %v4307_v4  ;;  %v4665_v4 = vld [vmem:[#allocation2 + $0x1a] sm:$0xff] }
  0x54   : > { %3718 = vmatmul.msk.f32.gmra.mxu2 %vm278_vm0, %v4627_v5  ;;  %362 = vst.msk [vmem:[#allocation2 + $0x51] sm:$0xff] %vm278_vm0, %v329_v7 }
  0x55   : > { %3726 = vmatmul.msk.f32.gmra.mxu3 %vm278_vm0, %v4631_v6  ;;  %5734 = vst [vmem:[#allocation3_spill] sm:$0xff] %v4739_v34 }
  0x56   : > { %5737 = vst [vmem:[#allocation6_spill] sm:$0xff] %v4757_v38 }
  0x57   : > { %5740 = vst [vmem:[#allocation9_spill] sm:$0xff] %v4777_v46 }
  0x58   : > { %5741 = vst [vmem:[#allocation10_spill] sm:$0xff] %v4779_v47 }
  0x59   : > { %5743 = vst [vmem:[#allocation12_spill] sm:$0xff] %v4797_v59 }
  0x5a   : > { %5744 = vst [vmem:[#allocation13_spill] sm:$0xff] %v4799_v0 }
  0x5b   : > { %3727 = vmatmul.msk.f32.vlgmr.msrb.gmra.mxu1 %vm278_vm0, %v392_v8  ;;  %v4656_v11 = vld [vmem:[#allocation2 + $0x51] sm:$0xff] }
  0x5c   : > { %3760 = vmatmul.msk.f32.vlgmr.msrb.gmra.mxu2 %vm278_vm0, %v878_v9  ;;  %3702 = vmatmul.msk.f32.gmra.mxu0 %vm278_vm0, %v4656_v11  ;;  %v4701_v24 = vld [vmem:[#allocation2 + $0x50] sm:$0xff] }
  0x5d   : > { %3825 = vmatmul.msk.f32.vlgmr.msrb.gmra.mxu3 %vm278_vm0, %v3792_v10  ;;  %v4711_v25 = vld [vmem:[#allocation2 + $0x4a] sm:$0xff]  ;;  %v4723_v28 = vld [vmem:[#allocation2 + $0x52] sm:$0xff] }
  0x63   : > { %3728 = vmatmul.msk.f32.gmra.mxu1 %vm278_vm0, %v393_v12  ;;  %v4819_v12 = vld [vmem:[#allocation2 + $0xa8] sm:$0xff] }
  0x64   : > { %3761 = vmatmul.msk.f32.gmra.mxu2 %vm278_vm0, %v879_v13  ;;  %3890 = vmatmul.msk.f32.vlgmr.msrb.gmra.mxu0 %vm278_vm0, %v4456_v35  ;;  %v4741_v35 = vld [vmem:[#allocation2 + $0x78] sm:$0xff]  ;;  %5747 = vst [vmem:[#allocation16_spill] sm:$0xff] %v4819_v12 }
  0x65   : > { %3826 = vmatmul.msk.f32.gmra.mxu3 %vm278_vm0, %v3793_v14  ;;  %5735 = vst [vmem:[#allocation4_spill] sm:$0xff] %v4741_v35 }
  0x6b   : > { %3729 = vmatmul.msk.f32.gmra.mxu1 %vm278_vm0, %v3792_v10  ;;  %v4817_v10 = vld [vmem:[#allocation2 + $0x92] sm:$0xff] }
  0x6c   : > { %3762 = vmatmul.msk.f32.gmra.mxu2 %vm278_vm0, %v4665_v4  ;;  %3891 = vmatmul.msk.f32.gmra.mxu0 %vm278_vm0, %v4478_v43  ;;  %v4761_v43 = vld [vmem:[#allocation2 + $0x80] sm:$0xff]  ;;  %5746 = vst [vmem:[#allocation15_spill] sm:$0xff] %v4817_v10 }
  0x6d   : > { %3827 = vmatmul.msk.f32.gmra.mxu3 %vm278_vm0, %v4667_v15  ;;  %5738 = vst [vmem:[#allocation7_spill] sm:$0xff] %v4761_v43 }
  0x73   : > { %3730 = vmatmul.msk.f32.gmra.mxu1 %vm278_vm0, %v3793_v14 }
  0x74   : > { %3763 = vmatmul.msk.f32.gmra.mxu2 %vm278_vm0, %v4676_v16  ;;  %3892 = vmatmul.msk.f32.gmra.mxu0 %vm278_vm0, %v4503_v51 }
  0x75   : > { %3828 = vmatmul.msk.f32.gmra.mxu3 %vm278_vm0, %v4678_v18 }
  0x7b   : > { %3731 = vmatmul.msk.f32.gmra.mxu1 %vm278_vm0, %v4667_v15 }
  0x7c   : > { %3764 = vmatmul.msk.f32.gmra.mxu2 %vm278_vm0, %v4687_v20  ;;  %3893 = vmatmul.msk.f32.gmra.mxu0 %vm278_vm0, %v4533_v55 }
  0x7d   : > { %3829 = vmatmul.msk.f32.gmra.mxu3 %vm278_vm0, %v4689_v21 }
  0x83   : > { %3732 = vmatmul.msk.f32.gmra.mxu1 %vm278_vm0, %v4678_v18 }
  0x84   : > { %3765 = vmatmul.msk.f32.gmra.mxu2 %vm278_vm0, %v4699_v23  ;;  %3894 = vmatmul.msk.f32.gmra.mxu0 %vm278_vm0, %v4574_v62 }
  0x85   : > { %3830 = vmatmul.msk.f32.gmra.mxu3 %vm278_vm0, %v4701_v24 }
  0x8b   : > { %3733 = vmatmul.msk.f32.gmra.mxu1 %vm278_vm0, %v4689_v21 }
  0x8c   : > { %3766 = vmatmul.msk.f32.gmra.mxu2 %vm278_vm0, %v4711_v25  ;;  %3895 = vmatmul.msk.f32.gmra.mxu0 %vm278_vm0, %v4656_v11 }
  0x8d   : > { %3831 = vmatmul.msk.f32.gmra.mxu3 %vm278_vm0, %v4713_v26 }
  0x93   : > { %3734 = vmatmul.msk.f32.gmra.mxu1 %vm278_vm0, %v4701_v24  ;;  %v4733_v32 = vpop.f32.mrf.mxu0 }
  0x94   : > { %3767 = vmatmul.msk.f32.gmra.mxu2 %vm278_vm0, %v4723_v28  ;;  %3896 = vmatmul.msk.f32.gmra.mxu0 %vm278_vm0, %v4409_v17 }
  0x95   : > { %3832 = vmatmul.msk.f32.gmra.mxu3 %vm278_vm0, %v4725_v30 }
  0x98   : > { %v4737_v33 = vpop.f32.mrf.mxu1 }
  0x9b   : > { %3735 = vmatmul.msk.f32.gmra.mxu1 %vm278_vm0, %v4713_v26  ;;  %v4759_v40 = vpop.f32.mrf.mxu0 }
  0x9c   : > { %3768 = vmatmul.msk.f32.gmra.mxu2 %vm278_vm0, %v4739_v34  ;;  %3897 = vmatmul.msk.f32.gmra.mxu0 %vm278_vm0, %v4434_v27  ;;  %v4912_v34 = vld [vmem:[#allocation2 + $0xe0] sm:$0xff] }
  0x9d   : > { %3833 = vmatmul.msk.f32.gmra.mxu3 %vm278_vm0, %v4741_v35 }
  0x9f   : > { %v4749_v36 = vpop.f32.mrf.mxu2 }
  0xa0   : > { %v4753_v17 = vpop.f32.mrf.mxu1  ;;  %v4755_v37 = vpop.f32.mrf.mxu3 }
  0xa1   : > { %5736 = vst [vmem:[#allocation5_spill] sm:$0xff] %v4755_v37  ;;  %v4857_v37 = vld [vmem:[#allocation2 + $0xaa] sm:$0xff] }
  0xa2   : > { %5752 = vst [vmem:[#allocation21_spill] sm:$0xff] %v4857_v37 }
  0xa3   : > { %3736 = vmatmul.msk.f32.gmra.mxu1 %vm278_vm0, %v4725_v30  ;;  %v4783_v51 = vpop.f32.mrf.mxu0 }
  0xa4   : > { %3769 = vmatmul.msk.f32.gmra.mxu2 %vm278_vm0, %v4757_v38  ;;  %3898 = vmatmul.msk.f32.gmra.mxu0 %vm278_vm0, %v4466_v39  ;;  %v4895_v38 = vld [vmem:[#allocation2 + $0xd8] sm:$0xff] }
  0xa5   : > { %3834 = vmatmul.msk.f32.gmra.mxu3 %vm278_vm0, %v4761_v43 }
  0xa7   : > { %v4769_v27 = vpop.f32.mrf.mxu2 }
  0xa8   : > { %v4773_v44 = vpop.f32.mrf.mxu1  ;;  %v4775_v45 = vpop.f32.mrf.mxu3 }
  0xa9   : > { %5739 = vst [vmem:[#allocation8_spill] sm:$0xff] %v4775_v45  ;;  %v4839_v45 = vld [vmem:[#allocation2 + $0xb0] sm:$0xff] }
  0xaa   : > { %5750 = vst [vmem:[#allocation19_spill] sm:$0xff] %v4839_v45 }
  0xab   : > { %3737 = vmatmul.msk.f32.gmra.mxu1 %vm278_vm0, %v4741_v35  ;;  %v4807_v7 = vpop.f32.mrf.mxu0  ;;  %v4908_v35 = vld [vmem:[#allocation2 + $0xca] sm:$0xff] }
  0xac   : > { %3770 = vmatmul.msk.f32.gmra.mxu2 %vm278_vm0, %v4777_v46  ;;  %3899 = vmatmul.msk.f32.gmra.mxu0 %vm278_vm0, %v4495_v48  ;;  %v4877_v46 = vld [vmem:[#allocation2 + $0xc8] sm:$0xff] }
  0xad   : > { %3835 = vmatmul.msk.f32.gmra.mxu3 %vm278_vm0, %v4779_v47 }
  0xaf   : > { %v4789_v39 = vpop.f32.mrf.mxu2 }
  0xb0   : > { %v4793_v56 = vpop.f32.mrf.mxu1  ;;  %v4795_v58 = vpop.f32.mrf.mxu3 }
  0xb1   : > { %5742 = vst [vmem:[#allocation11_spill] sm:$0xff] %v4795_v58  ;;  %v4837_v58 = vld [vmem:[#allocation2 + $0x9a] sm:$0xff] }
  0xb2   : > { %5749 = vst [vmem:[#allocation18_spill] sm:$0xff] %v4837_v58 }
  0xb3   : > { %3738 = vmatmul.msk.f32.gmra.mxu1 %vm278_vm0, %v4761_v43  ;;  %v4893_v43 = vld [vmem:[#allocation2 + $0xc2] sm:$0xff] }
  0xb4   : > { %3771 = vmatmul.msk.f32.gmra.mxu2 %vm278_vm0, %v4797_v59  ;;  %3900 = vmatmul.msk.f32.gmra.mxu0 %vm278_vm0, %v4519_v52  ;;  %v4829_v52 = vpop.f32.mrf.mxu0  ;;  %5759 = vst [vmem:[#allocation28_spill] sm:$0xff] %v4893_v43 }
  0xb5   : > { %3836 = vmatmul.msk.f32.gmra.mxu3 %vm278_vm0, %v4799_v0 }
  0xb7   : > { %v4809_v48 = vpop.f32.mrf.mxu2 }
  0xb8   : > { %v4813_v8 = vpop.f32.mrf.mxu1  ;;  %v4815_v9 = vpop.f32.mrf.mxu3 }
  0xb9   : > { %5745 = vst [vmem:[#allocation14_spill] sm:$0xff] %v4815_v9 }
  0xbb   : > { %3739 = vmatmul.msk.f32.gmra.mxu1 %vm278_vm0, %v4779_v47  ;;  %v4875_v47 = vld [vmem:[#allocation2 + $0xb2] sm:$0xff] }
  0xbc   : > { %3772 = vmatmul.msk.f32.gmra.mxu2 %vm278_vm0, %v4817_v10  ;;  %3901 = vmatmul.msk.f32.gmra.mxu0 %vm278_vm0, %v4554_v57  ;;  %v4855_v59 = vpop.f32.mrf.mxu0  ;;  %5756 = vst [vmem:[#allocation25_spill] sm:$0xff] %v4875_v47 }
  0xbd   : > { %3837 = vmatmul.msk.f32.gmra.mxu3 %vm278_vm0, %v4819_v12 }
  0xbf   : > { %v4827_v13 = vpop.f32.mrf.mxu2 }
  0xc0   : > { %v4833_v14 = vpop.f32.mrf.mxu1  ;;  %v4835_v9 = vpop.f32.mrf.mxu3 }
  0xc1   : > { %5748 = vst [vmem:[#allocation17_spill] sm:$0xff] %v4835_v9 }
  0xc3   : > { %3740 = vmatmul.msk.f32.gmra.mxu1 %vm278_vm0, %v4799_v0  ;;  %v4859_v0 = vld [vmem:[#allocation2 + $0xc0] sm:$0xff] }
  0xc4   : > { %3773 = vmatmul.msk.f32.gmra.mxu2 %vm278_vm0, %v4837_v58  ;;  %3902 = vmatmul.msk.f32.gmra.mxu0 %vm278_vm0, %v4592_v63  ;;  %5753 = vst [vmem:[#allocation22_spill] sm:$0xff] %v4859_v0 }
  0xc5   : > { %3838 = vmatmul.msk.f32.gmra.mxu3 %vm278_vm0, %v4839_v45 }
  0xc7   : > { %v4847_v10 = vpop.f32.mrf.mxu2 }
  0xc8   : > { %v4851_v57 = vpop.f32.mrf.mxu1  ;;  %v4853_v9 = vpop.f32.mrf.mxu3 }
  0xc9   : > { %5751 = vst [vmem:[#allocation20_spill] sm:$0xff] %v4853_v9 }
  0xcb   : > { %3741 = vmatmul.msk.f32.gmra.mxu1 %vm278_vm0, %v4819_v12  ;;  %v4879_v12 = vpop.f32.mrf.mxu0 }
  0xcc   : > { %3774 = vmatmul.msk.f32.gmra.mxu2 %vm278_vm0, %v4857_v37  ;;  %3903 = vmatmul.msk.f32.gmra.mxu0 %vm278_vm0, %v4623_v3 }
  0xcd   : > { %3839 = vmatmul.msk.f32.gmra.mxu3 %vm278_vm0, %v4859_v0 }
  0xcf   : > { %v4867_v63 = vpop.f32.mrf.mxu2 }
  0xd0   : > { %5754 = vst [vmem:[#allocation23_spill] sm:$0xff] %v4867_v63  ;;  %v4871_v9 = vpop.f32.mrf.mxu1  ;;  %v4873_v58 = vpop.f32.mrf.mxu3 }
  0xd1   : > { %5755 = vst [vmem:[#allocation24_spill] sm:$0xff] %v4873_v58 }
  0xd3   : > { %3742 = vmatmul.msk.f32.gmra.mxu1 %vm278_vm0, %v4839_v45 }
  0xd4   : > { %3775 = vmatmul.msk.f32.gmra.mxu2 %vm278_vm0, %v4875_v47  ;;  %3904 = vmatmul.msk.f32.gmra.mxu0 %vm278_vm0, %v4415_v19 }
  0xd5   : > { %3840 = vmatmul.msk.f32.gmra.mxu3 %vm278_vm0, %v4877_v46 }
  0xd7   : > { %v4887_v3 = vpop.f32.mrf.mxu2 }
  0xd8   : > { %5757 = vst [vmem:[#allocation26_spill] sm:$0xff] %v4887_v3  ;;  %v4891_v58 = vpop.f32.mrf.mxu3  ;;  %v782_v37 = vpop.f32.mrf.mxu1 }
  0xd9   : > { %5758 = vst [vmem:[#allocation27_spill] sm:$0xff] %v4891_v58  ;;  %v4901_v47 = vpop.f32.mrf.mxu0  ;;  %v783_v19 = vadd.f32 %v782_v37, %v4733_v32 }
  0xdb   : > { %3743 = vmatmul.msk.f32.gmra.mxu1 %vm278_vm0, %v4859_v0 }
  0xdc   : > { %3776 = vmatmul.msk.f32.gmra.mxu2 %vm278_vm0, %v4893_v43  ;;  %3905 = vmatmul.msk.f32.gmra.mxu0 %vm278_vm0, %v4438_v29  ;;  %v4929_v43 = vld [vmem:[#allocation2 + $0xf0] sm:$0xff] }
  0xdd   : > { %3841 = vmatmul.msk.f32.gmra.mxu3 %vm278_vm0, %v4895_v38 }
  0xdf   : > { %v1025_v45 = vpop.f32.mrf.mxu2 }
  0xe0   : > { %v1121_v58 = vadd.f32 %v1025_v45, %v783_v19  ;;  %v785_v3 = vpop.f32.mrf.mxu1  ;;  %v1303_v63 = vpop.f32.mrf.mxu3  ;;  %v4925_v19 = vld [vmem:[#allocation2 + $0xda] sm:$0xff] }
  0xe1   : > { %v4918_v32 = vpop.f32.mrf.mxu0  ;;  %v786_v29 = vadd.f32 %v785_v3, %v4759_v40 }
  0xe2   : > { %v4910_v0 = vadd.f32 %v1303_v63, %v1121_v58  ;;  %5761 = vst [vmem:[#allocation30_spill] sm:$0xff] %v4918_v32  ;;  %v4946_v32 = vld [vmem:[#allocation2 + $0xf8] sm:$0xff] }
  0xe3   : > { %3744 = vmatmul.msk.f32.gmra.mxu1 %vm278_vm0, %v4877_v46 }
  0xe4   : > { %5760 = vst [vmem:[#allocation29_spill] sm:$0xff] %v4910_v0  ;;  %3777 = vmatmul.msk.f32.gmra.mxu2 %vm278_vm0, %v4908_v35  ;;  %3906 = vmatmul.msk.f32.gmra.mxu0 %vm278_vm0, %v4470_v41 }
  0xe5   : > { %3842 = vmatmul.msk.f32.gmra.mxu3 %vm278_vm0, %v4912_v34 }
  0xe7   : > { %v1028_v37 = vpop.f32.mrf.mxu2 }
  0xe8   : > { %v1122_v45 = vadd.f32 %v1028_v37, %v786_v29  ;;  %v788_v58 = vpop.f32.mrf.mxu1  ;;  %v1306_v63 = vpop.f32.mrf.mxu3 }
  0xe9   : > { %v4935_v40 = vpop.f32.mrf.mxu0  ;;  %v789_v41 = vadd.f32 %v788_v58, %v4783_v51 }
  0xea   : > { %v4927_v0 = vadd.f32 %v1306_v63, %v1122_v45  ;;  %5763 = vst [vmem:[#allocation32_spill] sm:$0xff] %v4935_v40  ;;  %v4942_v63 = vld [vmem:[#allocation2 + $0xe2] sm:$0xff] }
  0xeb   : > { %3745 = vmatmul.msk.f32.gmra.mxu1 %vm278_vm0, %v4895_v38  ;;  %v4963_v40 = vld [vmem:[#allocation2 + $0x108] sm:$0xff] }
  0xec   : > { %5762 = vst [vmem:[#allocation31_spill] sm:$0xff] %v4927_v0  ;;  %3778 = vmatmul.msk.f32.gmra.mxu2 %vm278_vm0, %v4925_v19  ;;  %3907 = vmatmul.msk.f32.gmra.mxu0 %vm278_vm0, %v4497_v49 }
  0xed   : > { %3843 = vmatmul.msk.f32.gmra.mxu3 %vm278_vm0, %v4929_v43 }
  0xef   : > { %v1031_v3 = vpop.f32.mrf.mxu2 }
  0xf0   : > { %v1123_v29 = vadd.f32 %v1031_v3, %v789_v41  ;;  %v791_v37 = vpop.f32.mrf.mxu1  ;;  %v1309_v45 = vpop.f32.mrf.mxu3 }
  0xf1   : > { %v4952_v51 = vpop.f32.mrf.mxu0  ;;  %v792_v49 = vadd.f32 %v791_v37, %v4807_v7 }
  0xf2   : > { %v4944_v0 = vadd.f32 %v1309_v45, %v1123_v29  ;;  %5765 = vst [vmem:[#allocation34_spill] sm:$0xff] %v4952_v51  ;;  %v4959_v45 = vld [vmem:[#allocation2 + $0xf2] sm:$0xff] }
  0xf3   : > { %3746 = vmatmul.msk.f32.gmra.mxu1 %vm278_vm0, %v4912_v34  ;;  %v3813_v51 = vld [vmem:[#allocation2 + $0x110] sm:$0xff] }
  0xf4   : > { %5764 = vst [vmem:[#allocation33_spill] sm:$0xff] %v4944_v0  ;;  %3779 = vmatmul.msk.f32.gmra.mxu2 %vm278_vm0, %v4942_v63  ;;  %3908 = vmatmul.msk.f32.gmra.mxu0 %vm278_vm0, %v4523_v53 }
  0xf5   : > { %3844 = vmatmul.msk.f32.gmra.mxu3 %vm278_vm0, %v4946_v32 }
  0xf7   : > { %v1034_v58 = vpop.f32.mrf.mxu2 }
  0xf8   : > { %v1124_v41 = vadd.f32 %v1034_v58, %v792_v49  ;;  %v794_v3 = vpop.f32.mrf.mxu1  ;;  %v1312_v29 = vpop.f32.mrf.mxu3 }
  0xf9   : > { %v4969_v7 = vpop.f32.mrf.mxu0  ;;  %v795_v53 = vadd.f32 %v794_v3, %v4829_v52 }
  0xfa   : > { %v4961_v0 = vadd.f32 %v1312_v29, %v1124_v41  ;;  %5767 = vst [vmem:[#allocation36_spill] sm:$0xff] %v4969_v7  ;;  %v4976_v29 = vld [vmem:[#allocation2 + $0xfa] sm:$0xff] }
  0xfb   : > { %3747 = vmatmul.msk.f32.gmra.mxu1 %vm278_vm0, %v4929_v43 }
  0xfc   : > { %5766 = vst [vmem:[#allocation35_spill] sm:$0xff] %v4961_v0  ;;  %3780 = vmatmul.msk.f32.gmra.mxu2 %vm278_vm0, %v4959_v45  ;;  %3909 = vmatmul.msk.f32.gmra.mxu0 %vm278_vm0, %v4564_v60 }
  0xfd   : > { %3845 = vmatmul.msk.f32.gmra.mxu3 %vm278_vm0, %v4963_v40 }
  0xff   : > { %v1037_v37 = vpop.f32.mrf.mxu2 }
 0x100   : > { %v1125_v49 = vadd.f32 %v1037_v37, %v795_v53  ;;  %v797_v58 = vpop.f32.mrf.mxu1  ;;  %v1315_v41 = vpop.f32.mrf.mxu3 }
 0x101   : > { %v4984_v7 = vpop.f32.mrf.mxu0  ;;  %v798_v60 = vadd.f32 %v797_v58, %v4855_v59 }
 0x102   : > { %v4978_v0 = vadd.f32 %v1315_v41, %v1125_v49  ;;  %5769 = vst [vmem:[#allocation38_spill] sm:$0xff] %v4984_v7  ;;  %v4990_v49 = vld [vmem:[#allocation2 + $0x10a] sm:$0xff] }
 0x103   : > { %3748 = vmatmul.msk.f32.gmra.mxu1 %vm278_vm0, %v4946_v32 }
 0x104   : > { %5768 = vst [vmem:[#allocation37_spill] sm:$0xff] %v4978_v0  ;;  %3781 = vmatmul.msk.f32.gmra.mxu2 %vm278_vm0, %v4976_v29  ;;  %3910 = vmatmul.msk.f32.gmra.mxu0 %vm278_vm0, %v4599_v1  ;;  %v3814_v0 = vld [vmem:[#allocation2 + $0x120] sm:$0xff] }
 0x105   : > { %3846 = vmatmul.msk.f32.gmra.mxu3 %vm278_vm0, %v3813_v51 }
 0x107   : > { %v1040_v52 = vpop.f32.mrf.mxu2 }
 0x108   : > { %v1126_v3 = vadd.f32 %v1040_v52, %v798_v60  ;;  %v800_v53 = vpop.f32.mrf.mxu1  ;;  %v1318_v37 = vpop.f32.mrf.mxu3 }
 0x109   : > { %v4998_v7 = vpop.f32.mrf.mxu0  ;;  %v801_v1 = vadd.f32 %v800_v53, %v4879_v12 }
 0x10a   : > { %v4992_v41 = vadd.f32 %v1318_v37, %v1126_v3  ;;  %5771 = vst [vmem:[#allocation40_spill] sm:$0xff] %v4998_v7  ;;  %v901_v3 = vld [vmem:[#allocation2 + $0x112] sm:$0xff] }
 0x10b   : > { %3749 = vmatmul.msk.f32.gmra.mxu1 %vm278_vm0, %v4963_v40 }
 0x10c   : > { %5770 = vst [vmem:[#allocation39_spill] sm:$0xff] %v4992_v41  ;;  %3782 = vmatmul.msk.f32.gmra.mxu2 %vm278_vm0, %v4990_v49  ;;  %3911 = vmatmul.msk.f32.gmra.mxu0 %vm278_vm0, %v4627_v5  ;;  %v3815_v41 = vld [vmem:[#allocation2 + $0x128] sm:$0xff] }
 0x10d   : > { %3847 = vmatmul.msk.f32.gmra.mxu3 %vm278_vm0, %v3814_v0 }
 0x10f   : > { %v1043_v59 = vpop.f32.mrf.mxu2 }
 0x110   : > { %v1127_v58 = vadd.f32 %v1043_v59, %v801_v1  ;;  %v803_v60 = vpop.f32.mrf.mxu1  ;;  %v1321_v52 = vpop.f32.mrf.mxu3 }
 0x111   : > { %v5008_v7 = vpop.f32.mrf.mxu0  ;;  %v804_v12 = vadd.f32 %v803_v60, %v4901_v47 }
 0x112   : > { %v5004_v37 = vadd.f32 %v1321_v52, %v1127_v58  ;;  %v902_v58 = vld [vmem:[#allocation2 + $0x122] sm:$0xff] }
 0x113   : > { %3750 = vmatmul.msk.f32.gmra.mxu1 %vm278_vm0, %v3813_v51 }
 0x114   : > { %5772 = vst [vmem:[#allocation41_spill] sm:$0xff] %v5004_v37  ;;  %3783 = vmatmul.msk.f32.gmra.mxu2 %vm278_vm0, %v901_v3  ;;  %3912 = vmatmul.msk.f32.gmra.mxu0 %vm278_vm0, %v4421_v22  ;;  %v3816_v37 = vld [vmem:[#allocation2 + $0x138] sm:$0xff] }
 0x115   : > { %3848 = vmatmul.msk.f32.gmra.mxu3 %vm278_vm0, %v3815_v41 }
 0x117   : > { %v1046_v53 = vpop.f32.mrf.mxu2 }
 0x118   : > { %v1128_v5 = vadd.f32 %v1046_v53, %v804_v12  ;;  %v806_v1 = vpop.f32.mrf.mxu1  ;;  %v1324_v59 = vpop.f32.mrf.mxu3  ;;  %v903_v53 = vld [vmem:[#allocation2 + $0x12a] sm:$0xff] }
 0x119   : > { %v5018_v51 = vpop.f32.mrf.mxu0  ;;  %v807_v47 = vadd.f32 %v806_v1, %v4737_v33 }
 0x11a   : > { %v5014_v52 = vadd.f32 %v1324_v59, %v1128_v5 }
 0x11b   : > { %3751 = vmatmul.msk.f32.gmra.mxu1 %vm278_vm0, %v3814_v0  ;;  %v3817_v0 = vld [vmem:[#allocation2 + $0x140] sm:$0xff] }
 0x11c   : > { %3784 = vmatmul.msk.f32.gmra.mxu2 %vm278_vm0, %v902_v58  ;;  %3913 = vmatmul.msk.f32.gmra.mxu0 %vm278_vm0, %v4442_v31  ;;  %v354_v31 = vld [vmem:[%s4387_s10 + $0xf0] sm:$0xff] }
 0x11d   : > { %3849 = vmatmul.msk.f32.gmra.mxu3 %vm278_vm0, %v3816_v37  ;;  %387 = vst.msk [vmem:[#allocation2 + $0x181] sm:$0xff] %vm278_vm0, %v354_v31 }
 0x11f   : > { %v1049_v60 = vpop.f32.mrf.mxu2 }
 0x120   : > { %v1129_v22 = vadd.f32 %v1049_v60, %v807_v47  ;;  %v809_v3 = vpop.f32.mrf.mxu1  ;;  %v1327_v12 = vpop.f32.mrf.mxu3 }
 0x121   : > { %v5028_v59 = vpop.f32.mrf.mxu0  ;;  %v810_v33 = vadd.f32 %v809_v3, %v4753_v17 }
 0x122   : > { %v5024_v5 = vadd.f32 %v1327_v12, %v1129_v22  ;;  %v3818_v12 = vld [vmem:[#allocation2 + $0x150] sm:$0xff] }
 0x123   : > { %3752 = vmatmul.msk.f32.gmra.mxu1 %vm278_vm0, %v3815_v41  ;;  %v904_v41 = vld [vmem:[#allocation2 + $0x13a] sm:$0xff] }
 0x124   : > { %3785 = vmatmul.msk.f32.gmra.mxu2 %vm278_vm0, %v903_v53  ;;  %3914 = vmatmul.msk.f32.gmra.mxu0 %vm278_vm0, %v4473_v42  ;;  %v355_v53 = vld [vmem:[%s4387_s10 + $0xf8] sm:$0xff] }
 0x125   : > { %3850 = vmatmul.msk.f32.gmra.mxu3 %vm278_vm0, %v3817_v0  ;;  %388 = vst.msk [vmem:[#allocation2 + $0x189] sm:$0xff] %vm278_vm0, %v355_v53  ;;  %v906_v53 = vld [vmem:[#allocation2 + $0x152] sm:$0xff] }
 0x127   : > { %v1052_v1 = vpop.f32.mrf.mxu2 }
 0x128   : > { %v1130_v58 = vadd.f32 %v1052_v1, %v810_v33  ;;  %v812_v47 = vpop.f32.mrf.mxu1  ;;  %v1330_v60 = vpop.f32.mrf.mxu3 }
 0x129   : > { %v5040_v17 = vpop.f32.mrf.mxu0  ;;  %v813_v3 = vadd.f32 %v812_v47, %v4773_v44 }
 0x12a   : > { %v5036_v22 = vadd.f32 %v1330_v60, %v1130_v58  ;;  %v905_v58 = vld [vmem:[#allocation2 + $0x142] sm:$0xff]  ;;  %v3819_v60 = vld [vmem:[#allocation2 + $0x158] sm:$0xff] }
 0x12b   : > { %3753 = vmatmul.msk.f32.gmra.mxu1 %vm278_vm0, %v3816_v37 }
 0x12c   : > { %3786 = vmatmul.msk.f32.gmra.mxu2 %vm278_vm0, %v904_v41  ;;  %3915 = vmatmul.msk.f32.gmra.mxu0 %vm278_vm0, %v4499_v50 }
 0x12d   : > { %3851 = vmatmul.msk.f32.gmra.mxu3 %vm278_vm0, %v3818_v12 }
 0x12f   : > { %v1055_v42 = vpop.f32.mrf.mxu2 }
 0x130   : > { %v1131_v33 = vadd.f32 %v1055_v42, %v813_v3  ;;  %v815_v1 = vpop.f32.mrf.mxu1  ;;  %v1333_v31 = vpop.f32.mrf.mxu3 }
 0x131   : > { %v5052_v41 = vpop.f32.mrf.mxu0  ;;  %v816_v44 = vadd.f32 %v815_v1, %v4793_v56 }
 0x132   : > { %v5048_v37 = vadd.f32 %v1333_v31, %v1131_v33  ;;  %v3820_v31 = vld [vmem:[#allocation2 + $0x168] sm:$0xff] }
 0x133   : > { %3754 = vmatmul.msk.f32.gmra.mxu1 %vm278_vm0, %v3817_v0 }
 0x134   : > { %3787 = vmatmul.msk.f32.gmra.mxu2 %vm278_vm0, %v905_v58  ;;  %3916 = vmatmul.msk.f32.gmra.mxu0 %vm278_vm0, %v4527_v54 }
 0x135   : > { %3852 = vmatmul.msk.f32.gmra.mxu3 %vm278_vm0, %v3819_v60 }
 0x137   : > { %v1058_v50 = vpop.f32.mrf.mxu2 }
 0x138   : > { %v1132_v47 = vadd.f32 %v1058_v50, %v816_v44  ;;  %v818_v3 = vpop.f32.mrf.mxu1  ;;  %v1336_v42 = vpop.f32.mrf.mxu3  ;;  %v907_v50 = vld [vmem:[#allocation2 + $0x15a] sm:$0xff] }
 0x139   : > { %v5062_v0 = vpop.f32.mrf.mxu0  ;;  %v819_v56 = vadd.f32 %v818_v3, %v4813_v8 }
 0x13a   : > { %v5058_v33 = vadd.f32 %v1336_v42, %v1132_v47  ;;  %v3821_v42 = vld [vmem:[#allocation2 + $0x170] sm:$0xff] }
 0x13b   : > { %3755 = vmatmul.msk.f32.gmra.mxu1 %vm278_vm0, %v3818_v12 }
 0x13c   : > { %3788 = vmatmul.msk.f32.gmra.mxu2 %vm278_vm0, %v906_v53  ;;  %3917 = vmatmul.msk.f32.gmra.mxu0 %vm278_vm0, %v4568_v61 }
 0x13d   : > { %3853 = vmatmul.msk.f32.gmra.mxu3 %vm278_vm0, %v3820_v31 }
 0x13f   : > { %v1061_v1 = vpop.f32.mrf.mxu2 }
 0x140   : > { %v1133_v54 = vadd.f32 %v1061_v1, %v819_v56  ;;  %v821_v58 = vpop.f32.mrf.mxu1  ;;  %v1339_v44 = vpop.f32.mrf.mxu3  ;;  %v908_v1 = vld [vmem:[#allocation2 + $0x16a] sm:$0xff] }
 0x141   : > { %v5072_v12 = vpop.f32.mrf.mxu0  ;;  %v822_v8 = vadd.f32 %v821_v58, %v4833_v14 }
 0x142   : > { %v5068_v47 = vadd.f32 %v1339_v44, %v1133_v54  ;;  %v3822_v44 = vld [vmem:[#allocation2 + $0x180] sm:$0xff] }
 0x143   : > { %3756 = vmatmul.msk.f32.gmra.mxu1 %vm278_vm0, %v3819_v60 }
 0x144   : > { %3789 = vmatmul.msk.f32.gmra.mxu2 %vm278_vm0, %v907_v50  ;;  %3918 = vmatmul.msk.f32.gmra.mxu0 %vm278_vm0, %v4603_v2 }
 0x145   : > { %3854 = vmatmul.msk.f32.gmra.mxu3 %vm278_vm0, %v3821_v42 }
 0x147   : > { %v1064_v3 = vpop.f32.mrf.mxu2 }
 0x148   : > { %v1134_v61 = vadd.f32 %v1064_v3, %v822_v8  ;;  %v824_v53 = vpop.f32.mrf.mxu1  ;;  %v1342_v56 = vpop.f32.mrf.mxu3  ;;  %v909_v3 = vld [vmem:[#allocation2 + $0x172] sm:$0xff] }
 0x149   : > { %v5082_v60 = vpop.f32.mrf.mxu0  ;;  %v825_v14 = vadd.f32 %v824_v53, %v4851_v57  ;;  %v3887_v57 = vld [vmem:[#allocation2 + $0x181] sm:$0xff] }
 0x14a   : > { %v5078_v54 = vadd.f32 %v1342_v56, %v1134_v61  ;;  %v3823_v56 = vld [vmem:[#allocation2 + $0x188] sm:$0xff] }
 0x14b   : > { %3757 = vmatmul.msk.f32.gmra.mxu1 %vm278_vm0, %v3820_v31 }
 0x14c   : > { %3790 = vmatmul.msk.f32.gmra.mxu2 %vm278_vm0, %v908_v1  ;;  %3919 = vmatmul.msk.f32.gmra.mxu0 %vm278_vm0, %v4631_v6 }
 0x14d   : > { %3855 = vmatmul.msk.f32.gmra.mxu3 %vm278_vm0, %v3822_v44 }
 0x14f   : > { %v1067_v58 = vpop.f32.mrf.mxu2 }
 0x150   : > { %v1135_v2 = vadd.f32 %v1067_v58, %v825_v14  ;;  %v827_v50 = vpop.f32.mrf.mxu1  ;;  %v1345_v8 = vpop.f32.mrf.mxu3 }
 0x151   : > { %v5092_v31 = vpop.f32.mrf.mxu0  ;;  %v828_v53 = vadd.f32 %v827_v50, %v4871_v9 }
 0x152   : > { %v5088_v61 = vadd.f32 %v1345_v8, %v1135_v2  ;;  %v4052_v2 = vld [vmem:[#allocation2 + $0x31] sm:$0xff]  ;;  %v3888_v8 = vld [vmem:[#allocation2 + $0x189] sm:$0xff] }
 0x153   : > { %3758 = vmatmul.msk.f32.gmra.mxu1 %vm278_vm0, %v3821_v42 }
 0x154   : > { %3791 = vmatmul.msk.f32.gmra.mxu2 %vm278_vm0, %v909_v3  ;;  %3920 = vmatmul.msk.f32.gmra.mxu0 %vm278_vm0, %v3887_v57 }
 0x155   : > { %3856 = vmatmul.msk.f32.gmra.mxu3 %vm278_vm0, %v3823_v56 }
 0x157   : > { %v1070_v1 = vpop.f32.mrf.mxu2 }
 0x158   : > { %v1136_v6 = vadd.f32 %v1070_v1, %v828_v53  ;;  %v830_v44 = vpop.f32.mrf.mxu1  ;;  %v1348_v14 = vpop.f32.mrf.mxu3 }
 0x159   : > { %v5103_v42 = vpop.f32.mrf.mxu0  ;;  %v831_v9 = vadd.f32 %v830_v44, %v4749_v36 }
 0x15a   : > { %v5097_v58 = vadd.f32 %v1348_v14, %v1136_v6 }
 0x15b   : > { %3955 = vmatmul.msk.f32.vlgmr.msra.gmra.mxu1 %vm278_vm0, %v4665_v4 }
 0x15c   : > { %4020 = vmatmul.msk.f32.vlgmr.msra.gmra.mxu2 %vm278_vm0, %v4667_v15  ;;  %3921 = vmatmul.msk.f32.gmra.mxu0 %vm278_vm0, %v3888_v8 }
 0x15d   : > { %4085 = vmatmul.msk.f32.vlgmr.msra.gmra.mxu3 %vm278_vm0, %v4052_v2 }
 0x15f   : > { %v1073_v50 = vpop.f32.mrf.mxu2 }
 0x160   : > { %v1137_v3 = vadd.f32 %v1073_v50, %v831_v9  ;;  %v833_v56 = vpop.f32.mrf.mxu1  ;;  %v1351_v57 = vpop.f32.mrf.mxu3 }
 0x161   : > { %v5114_v4 = vpop.f32.mrf.mxu0  ;;  %v834_v15 = vadd.f32 %v833_v56, %v4769_v27 }
 0x162   : > { %v5108_v53 = vadd.f32 %v1351_v57, %v1137_v3 }
 0x163   : > { %3956 = vmatmul.msk.f32.gmra.mxu1 %vm278_vm0, %v4676_v16 }
 0x164   : > { %4021 = vmatmul.msk.f32.gmra.mxu2 %vm278_vm0, %v4678_v18  ;;  %4150 = vmatmul.msk.f32.vlgmr.msra.gmra.mxu0 %vm278_vm0, %v4687_v20 }
 0x165   : > { %4086 = vmatmul.msk.f32.gmra.mxu3 %vm278_vm0, %v4533_v55 }
 0x167   : > { %v1076_v36 = vpop.f32.mrf.mxu2 }
 0x168   : > { %v1138_v1 = vadd.f32 %v1076_v36, %v834_v15  ;;  %v836_v6 = vpop.f32.mrf.mxu1  ;;  %v1354_v44 = vpop.f32.mrf.mxu3 }
 0x169   : > { %v5127_v16 = vpop.f32.mrf.mxu0  ;;  %v837_v55 = vadd.f32 %v836_v6, %v4789_v39  ;;  %v4057_v6 = vld [vmem:[#allocation2 + $0x69] sm:$0xff] }
 0x16a   : > { %v5121_v14 = vadd.f32 %v1354_v44, %v1138_v1  ;;  %v5773_v44 = vld [vmem:[#allocation3_spill] sm:$0xff] }
 0x16b   : > { %3957 = vmatmul.msk.f32.gmra.mxu1 %vm278_vm0, %v4687_v20 }
 0x16c   : > { %4022 = vmatmul.msk.f32.gmra.mxu2 %vm278_vm0, %v4689_v21  ;;  %4151 = vmatmul.msk.f32.gmra.mxu0 %vm278_vm0, %v4699_v23 }
 0x16d   : > { %4087 = vmatmul.msk.f32.gmra.mxu3 %vm278_vm0, %v4574_v62 }
 0x16f   : > { %v1079_v18 = vpop.f32.mrf.mxu2 }
 0x170   : > { %v1139_v27 = vadd.f32 %v1079_v18, %v837_v55  ;;  %v839_v2 = vpop.f32.mrf.mxu1  ;;  %v1357_v8 = vpop.f32.mrf.mxu3 }
 0x171   : > { %v5140_v20 = vpop.f32.mrf.mxu0  ;;  %v840_v62 = vadd.f32 %v839_v2, %v4809_v48 }
 0x172   : > { %v5134_v9 = vadd.f32 %v1357_v8, %v1139_v27  ;;  %v4058_v8 = vld [vmem:[#allocation2 + $0x79] sm:$0xff] }
 0x173   : > { %3958 = vmatmul.msk.f32.gmra.mxu1 %vm278_vm0, %v4699_v23  ;;  %v4056_v23 = vld [vmem:[#allocation2 + $0x61] sm:$0xff] }
 0x174   : > { %4023 = vmatmul.msk.f32.gmra.mxu2 %vm278_vm0, %v4701_v24  ;;  %4152 = vmatmul.msk.f32.gmra.mxu0 %vm278_vm0, %v4711_v25 }
 0x175   : > { %4088 = vmatmul.msk.f32.gmra.mxu3 %vm278_vm0, %v4656_v11 }
 0x177   : > { %v1082_v21 = vpop.f32.mrf.mxu2 }
 0x178   : > { %v1140_v39 = vadd.f32 %v1082_v21, %v840_v62  ;;  %v842_v50 = vpop.f32.mrf.mxu1  ;;  %v1360_v3 = vpop.f32.mrf.mxu3 }
 0x179   : > { %v5153_v24 = vpop.f32.mrf.mxu0  ;;  %v843_v11 = vadd.f32 %v842_v50, %v4827_v13 }
 0x17a   : > { %v5147_v56 = vadd.f32 %v1360_v3, %v1140_v39  ;;  %v5776_v39 = vld [vmem:[#allocation6_spill] sm:$0xff] }
 0x17b   : > { %3959 = vmatmul.msk.f32.gmra.mxu1 %vm278_vm0, %v4711_v25 }
 0x17c   : > { %4024 = vmatmul.msk.f32.gmra.mxu2 %vm278_vm0, %v4713_v26  ;;  %4153 = vmatmul.msk.f32.gmra.mxu0 %vm278_vm0, %v4723_v28 }
 0x17d   : > { %4089 = vmatmul.msk.f32.gmra.mxu3 %vm278_vm0, %v4056_v23 }
 0x17f   : > { %v1085_v48 = vpop.f32.mrf.mxu2 }
 0x180   : > { %v1141_v57 = vadd.f32 %v1085_v48, %v843_v11  ;;  %v845_v15 = vpop.f32.mrf.mxu1  ;;  %v1363_v36 = vpop.f32.mrf.mxu3  ;;  %v4059_v48 = vld [vmem:[#allocation2 + $0x81] sm:$0xff] }
 0x181   : > { %v5165_v25 = vpop.f32.mrf.mxu0  ;;  %v846_v26 = vadd.f32 %v845_v15, %v4847_v10  ;;  %v5775_v10 = vld [vmem:[#allocation23_spill] sm:$0xff] }
 0x182   : > { %v5159_v1 = vadd.f32 %v1363_v36, %v1141_v57  ;;  %v5777_v57 = vld [vmem:[#allocation7_spill] sm:$0xff]  ;;  %v5778_v36 = vld [vmem:[#allocation26_spill] sm:$0xff] }
 0x183   : > { %3960 = vmatmul.msk.f32.gmra.mxu1 %vm278_vm0, %v4723_v28  ;;  %v5774_v28 = vld [vmem:[#allocation4_spill] sm:$0xff] }
 0x184   : > { %4025 = vmatmul.msk.f32.gmra.mxu2 %vm278_vm0, %v4725_v30  ;;  %4154 = vmatmul.msk.f32.gmra.mxu0 %vm278_vm0, %v5773_v44 }
 0x185   : > { %4090 = vmatmul.msk.f32.gmra.mxu3 %vm278_vm0, %v4057_v6 }
 0x187   : > { %v1088_v13 = vpop.f32.mrf.mxu2 }
 0x188   : > { %v1142_v55 = vadd.f32 %v1088_v13, %v846_v26  ;;  %v848_v18 = vpop.f32.mrf.mxu1  ;;  %v1366_v27 = vpop.f32.mrf.mxu3  ;;  %v5779_v13 = vld [vmem:[#allocation9_spill] sm:$0xff] }
 0x189   : > { %v5177_v30 = vpop.f32.mrf.mxu0  ;;  %v849_v62 = vadd.f32 %v848_v18, %v5775_v10 }
 0x18a   : > { %v5171_v2 = vadd.f32 %v1366_v27, %v1142_v55 }
 0x18b   : > { %3961 = vmatmul.msk.f32.gmra.mxu1 %vm278_vm0, %v5773_v44 }
 0x18c   : > { %4026 = vmatmul.msk.f32.gmra.mxu2 %vm278_vm0, %v5774_v28  ;;  %4155 = vmatmul.msk.f32.gmra.mxu0 %vm278_vm0, %v5776_v39  ;;  %v5780_v28 = vld [vmem:[#allocation10_spill] sm:$0xff] }
 0x18d   : > { %4091 = vmatmul.msk.f32.gmra.mxu3 %vm278_vm0, %v4058_v8  ;;  %v4060_v8 = vld [vmem:[#allocation2 + $0x91] sm:$0xff] }
 0x18f   : > { %v1091_v21 = vpop.f32.mrf.mxu2 }
 0x190   : > { %v1143_v50 = vadd.f32 %v1091_v21, %v849_v62  ;;  %v851_v3 = vpop.f32.mrf.mxu1  ;;  %v1369_v23 = vpop.f32.mrf.mxu3  ;;  %v5782_v62 = vld [vmem:[#allocation5_spill] sm:$0xff] }
 0x191   : > { %v5189_v15 = vpop.f32.mrf.mxu0  ;;  %v852_v6 = vadd.f32 %v851_v3, %v5778_v36  ;;  %v4061_v36 = vld [vmem:[#allocation2 + $0x99] sm:$0xff] }
 0x192   : > { %v5183_v11 = vadd.f32 %v1369_v23, %v1143_v50  ;;  %v5783_v50 = vld [vmem:[#allocation12_spill] sm:$0xff] }
 0x193   : > { %3962 = vmatmul.msk.f32.gmra.mxu1 %vm278_vm0, %v5776_v39 }
 0x194   : > { %4027 = vmatmul.msk.f32.gmra.mxu2 %vm278_vm0, %v5777_v57  ;;  %4156 = vmatmul.msk.f32.gmra.mxu0 %vm278_vm0, %v5779_v13 }
 0x195   : > { %4092 = vmatmul.msk.f32.gmra.mxu3 %vm278_vm0, %v4059_v48 }
 0x197   : > { %v1094_v26 = vpop.f32.mrf.mxu2 }
 0x198   : > { %v1144_v44 = vadd.f32 %v1094_v26, %v852_v6  ;;  %v854_v55 = vpop.f32.mrf.mxu1  ;;  %v1372_v18 = vpop.f32.mrf.mxu3  ;;  %v5785_v6 = vld [vmem:[#allocation13_spill] sm:$0xff] }
 0x199   : > { %v5201_v10 = vpop.f32.mrf.mxu0  ;;  %v855_v21 = vadd.f32 %v854_v55, %v5782_v62 }
 0x19a   : > { %v5195_v27 = vadd.f32 %v1372_v18, %v1144_v44  ;;  %5781 = vst [vmem:[#allocation3_spill] sm:$0xff] %v5201_v10  ;;  %v5788_v18 = vld [vmem:[#allocation15_spill] sm:$0xff] }
 0x19b   : > { %3963 = vmatmul.msk.f32.gmra.mxu1 %vm278_vm0, %v5779_v13  ;;  %v5787_v13 = vld [vmem:[#allocation8_spill] sm:$0xff]  ;;  %v4138_v10 = vld [vmem:[#allocation2 + $0x12a] sm:$0xff] }
 0x19c   : > { %4028 = vmatmul.msk.f32.gmra.mxu2 %vm278_vm0, %v5780_v28  ;;  %4157 = vmatmul.msk.f32.gmra.mxu0 %vm278_vm0, %v5783_v50 }
 0x19d   : > { %4093 = vmatmul.msk.f32.gmra.mxu3 %vm278_vm0, %v4060_v8 }
 0x19f   : > { %v1097_v39 = vpop.f32.mrf.mxu2 }
 0x1a0   : > { %v1145_v3 = vadd.f32 %v1097_v39, %v855_v21  ;;  %v857_v23 = vpop.f32.mrf.mxu1  ;;  %v1375_v48 = vpop.f32.mrf.mxu3  ;;  %v4062_v39 = vld [vmem:[#allocation2 + $0xa9] sm:$0xff] }
 0x1a1   : > { %v5213_v26 = vpop.f32.mrf.mxu0  ;;  %v858_v44 = vadd.f32 %v857_v23, %v5787_v13  ;;  %v5792_v23 = vld [vmem:[#allocation11_spill] sm:$0xff] }
 0x1a2   : > { %v5207_v57 = vadd.f32 %v1375_v48, %v1145_v3  ;;  %5786 = vst [vmem:[#allocation23_spill] sm:$0xff] %v5213_v26 }
 0x1a3   : > { %3964 = vmatmul.msk.f32.gmra.mxu1 %vm278_vm0, %v5783_v50  ;;  %v5790_v50 = vld [vmem:[#allocation16_spill] sm:$0xff] }
 0x1a4   : > { %5784 = vst [vmem:[#allocation4_spill] sm:$0xff] %v5207_v57  ;;  %4029 = vmatmul.msk.f32.gmra.mxu2 %vm278_vm0, %v5785_v6  ;;  %4158 = vmatmul.msk.f32.gmra.mxu0 %vm278_vm0, %v5788_v18  ;;  %v5793_v6 = vld [vmem:[#allocation18_spill] sm:$0xff] }
 0x1a5   : > { %4094 = vmatmul.msk.f32.gmra.mxu3 %vm278_vm0, %v4061_v36 }
 0x1a7   : > { %v1100_v55 = vpop.f32.mrf.mxu2 }
 0x1a8   : > { %v1146_v8 = vadd.f32 %v1100_v55, %v858_v44  ;;  %v860_v28 = vpop.f32.mrf.mxu1  ;;  %v1378_v62 = vpop.f32.mrf.mxu3 }
 0x1a9   : > { %v5225_v3 = vpop.f32.mrf.mxu0  ;;  %v861_v48 = vadd.f32 %v860_v28, %v5792_v23  ;;  %v5797_v28 = vld [vmem:[#allocation14_spill] sm:$0xff] }
 0x1aa   : > { %v5219_v21 = vadd.f32 %v1378_v62, %v1146_v8  ;;  %5791 = vst [vmem:[#allocation7_spill] sm:$0xff] %v5225_v3  ;;  %v4063_v62 = vld [vmem:[#allocation2 + $0xb1] sm:$0xff]  ;;  %v5798_v3 = vld [vmem:[#allocation21_spill] sm:$0xff] }
 0x1ab   : > { %3965 = vmatmul.msk.f32.gmra.mxu1 %vm278_vm0, %v5788_v18  ;;  %v5795_v18 = vld [vmem:[#allocation19_spill] sm:$0xff] }
 0x1ac   : > { %5789 = vst [vmem:[#allocation6_spill] sm:$0xff] %v5219_v21  ;;  %4030 = vmatmul.msk.f32.gmra.mxu2 %vm278_vm0, %v5790_v50  ;;  %4159 = vmatmul.msk.f32.gmra.mxu0 %vm278_vm0, %v5793_v6 }
 0x1ad   : > { %4095 = vmatmul.msk.f32.gmra.mxu3 %vm278_vm0, %v4062_v39 }
 0x1af   : > { %v1103_v36 = vpop.f32.mrf.mxu2 }
 0x1b0   : > { %v1147_v13 = vadd.f32 %v1103_v36, %v861_v48  ;;  %v863_v44 = vpop.f32.mrf.mxu1  ;;  %v1381_v55 = vpop.f32.mrf.mxu3 }
 0x1b1   : > { %v5237_v50 = vpop.f32.mrf.mxu0  ;;  %v864_v39 = vadd.f32 %v863_v44, %v5797_v28  ;;  %v5802_v44 = vld [vmem:[#allocation17_spill] sm:$0xff] }
 0x1b2   : > { %v5231_v8 = vadd.f32 %v1381_v55, %v1147_v13  ;;  %5796 = vst [vmem:[#allocation9_spill] sm:$0xff] %v5237_v50  ;;  %v5803_v50 = vld [vmem:[#allocation25_spill] sm:$0xff] }
 0x1b3   : > { %3966 = vmatmul.msk.f32.gmra.mxu1 %vm278_vm0, %v5793_v6  ;;  %v5800_v6 = vld [vmem:[#allocation22_spill] sm:$0xff] }
 0x1b4   : > { %5794 = vst [vmem:[#allocation26_spill] sm:$0xff] %v5231_v8  ;;  %4031 = vmatmul.msk.f32.gmra.mxu2 %vm278_vm0, %v5795_v18  ;;  %4160 = vmatmul.msk.f32.gmra.mxu0 %vm278_vm0, %v5798_v3  ;;  %v4064_v8 = vld [vmem:[#allocation2 + $0xc1] sm:$0xff] }
 0x1b5   : > { %4096 = vmatmul.msk.f32.gmra.mxu3 %vm278_vm0, %v4063_v62 }
 0x1b7   : > { %v1106_v23 = vpop.f32.mrf.mxu2 }
 0x1b8   : > { %v1148_v48 = vadd.f32 %v1106_v23, %v864_v39  ;;  %v866_v36 = vpop.f32.mrf.mxu1  ;;  %v1384_v13 = vpop.f32.mrf.mxu3 }
 0x1b9   : > { %v5249_v18 = vpop.f32.mrf.mxu0  ;;  %v867_v62 = vadd.f32 %v866_v36, %v5802_v44  ;;  %v5807_v44 = vld [vmem:[#allocation28_spill] sm:$0xff] }
 0x1ba   : > { %v5243_v55 = vadd.f32 %v1384_v13, %v1148_v48  ;;  %5801 = vst [vmem:[#allocation5_spill] sm:$0xff] %v5249_v18  ;;  %v4073_v18 = vld [vmem:[#allocation2 + $0x129] sm:$0xff] }
 0x1bb   : > { %3967 = vmatmul.msk.f32.gmra.mxu1 %vm278_vm0, %v5798_v3 }
 0x1bc   : > { %5799 = vst [vmem:[#allocation10_spill] sm:$0xff] %v5243_v55  ;;  %4032 = vmatmul.msk.f32.gmra.mxu2 %vm278_vm0, %v5800_v6  ;;  %4161 = vmatmul.msk.f32.gmra.mxu0 %vm278_vm0, %v5803_v50  ;;  %v4065_v55 = vld [vmem:[#allocation2 + $0xc9] sm:$0xff] }
 0x1bd   : > { %4097 = vmatmul.msk.f32.gmra.mxu3 %vm278_vm0, %v4064_v8  ;;  %v5806_v8 = vld [vmem:[#allocation20_spill] sm:$0xff] }
 0x1bf   : > { %v1109_v28 = vpop.f32.mrf.mxu2 }
 0x1c0   : > { %v1149_v39 = vadd.f32 %v1109_v28, %v867_v62  ;;  %v869_v23 = vpop.f32.mrf.mxu1  ;;  %v1387_v48 = vpop.f32.mrf.mxu3 }
 0x1c1   : > { %v5261_v3 = vpop.f32.mrf.mxu0  ;;  %v870_v36 = vadd.f32 %v869_v23, %v5806_v8 }
 0x1c2   : > { %v5255_v13 = vadd.f32 %v1387_v48, %v1149_v39  ;;  %5805 = vst [vmem:[#allocation13_spill] sm:$0xff] %v5261_v3 }
 0x1c3   : > { %3968 = vmatmul.msk.f32.gmra.mxu1 %vm278_vm0, %v5803_v50  ;;  %v5810_v50 = vld [vmem:[#allocation24_spill] sm:$0xff] }
 0x1c4   : > { %5804 = vst [vmem:[#allocation12_spill] sm:$0xff] %v5255_v13  ;;  %4033 = vmatmul.msk.f32.gmra.mxu2 %vm278_vm0, %v4877_v46  ;;  %4162 = vmatmul.msk.f32.gmra.mxu0 %vm278_vm0, %v5807_v44  ;;  %v4066_v13 = vld [vmem:[#allocation2 + $0xd9] sm:$0xff] }
 0x1c5   : > { %4098 = vmatmul.msk.f32.gmra.mxu3 %vm278_vm0, %v4065_v55 }
 0x1c7   : > { %v1112_v6 = vpop.f32.mrf.mxu2 }
 0x1c8   : > { %v1150_v62 = vadd.f32 %v1112_v6, %v870_v36  ;;  %v872_v28 = vpop.f32.mrf.mxu1  ;;  %v1390_v39 = vpop.f32.mrf.mxu3 }
 0x1c9   : > { %v5273_v46 = vpop.f32.mrf.mxu0  ;;  %v873_v55 = vadd.f32 %v872_v28, %v5810_v50 }
 0x1ca   : > { %v5267_v48 = vadd.f32 %v1390_v39, %v1150_v62  ;;  %5809 = vst [vmem:[#allocation15_spill] sm:$0xff] %v5273_v46  ;;  %v4067_v39 = vld [vmem:[#allocation2 + $0xe1] sm:$0xff] }
 0x1cb   : > { %3969 = vmatmul.msk.f32.gmra.mxu1 %vm278_vm0, %v5807_v44 }
 0x1cc   : > { %5808 = vst [vmem:[#allocation8_spill] sm:$0xff] %v5267_v48  ;;  %4034 = vmatmul.msk.f32.gmra.mxu2 %vm278_vm0, %v4895_v38  ;;  %4163 = vmatmul.msk.f32.gmra.mxu0 %vm278_vm0, %v4908_v35  ;;  %v4008_v48 = vld [vmem:[#allocation2 + $0x128] sm:$0xff] }
 0x1cd   : > { %4099 = vmatmul.msk.f32.gmra.mxu3 %vm278_vm0, %v4066_v13  ;;  %v5813_v13 = vld [vmem:[#allocation27_spill] sm:$0xff] }
 0x1cf   : > { %v1115_v23 = vpop.f32.mrf.mxu2 }
 0x1d0   : > { %v1151_v8 = vadd.f32 %v1115_v23, %v873_v55  ;;  %v875_v36 = vpop.f32.mrf.mxu1  ;;  %v1393_v6 = vpop.f32.mrf.mxu3 }
 0x1d1   : > { %v5285_v38 = vpop.f32.mrf.mxu0  ;;  %v876_v44 = vadd.f32 %v875_v36, %v5813_v13 }
 0x1d2   : > { %v5279_v62 = vadd.f32 %v1393_v6, %v1151_v8  ;;  %5812 = vst [vmem:[#allocation11_spill] sm:$0xff] %v5285_v38  ;;  %v4068_v6 = vld [vmem:[#allocation2 + $0xf1] sm:$0xff] }
 0x1d3   : > { %3970 = vmatmul.msk.f32.gmra.mxu1 %vm278_vm0, %v4908_v35  ;;  %v5816_v35 = vld [vmem:[#allocation30_spill] sm:$0xff] }
 0x1d4   : > { %5811 = vst [vmem:[#allocation16_spill] sm:$0xff] %v5279_v62  ;;  %4035 = vmatmul.msk.f32.gmra.mxu2 %vm278_vm0, %v4912_v34  ;;  %4164 = vmatmul.msk.f32.gmra.mxu0 %vm278_vm0, %v4925_v19  ;;  %v5815_v34 = vld [vmem:[#allocation29_spill] sm:$0xff] }
 0x1d5   : > { %4100 = vmatmul.msk.f32.gmra.mxu3 %vm278_vm0, %v4067_v39  ;;  %v1674_v38 = vadd.f32 %v5816_v35, %v5815_v34  ;;  %v5818_v34 = vld [vmem:[#allocation31_spill] sm:$0xff]  ;;  %v5819_v35 = vld [vmem:[#allocation32_spill] sm:$0xff]  ;;  %v4072_v62 = vld [vmem:[#allocation2 + $0x121] sm:$0xff] }
 0x1d7   : > { %v1118_v28 = vpop.f32.mrf.mxu2 }
 0x1d8   : > { %v1152_v50 = vadd.f32 %v1118_v28, %v876_v44  ;;  %v1396_v55 = vpop.f32.mrf.mxu3  ;;  %v1853_v23 = vpop.f32.mrf.mxu1 }
 0x1d9   : > { %v5299_v36 = vpop.f32.mrf.mxu0  ;;  %v1949_v39 = vadd.f32 %v1853_v23, %v1674_v38 }
 0x1da   : > { %v5291_v8 = vadd.f32 %v1396_v55, %v1152_v50  ;;  %5817 = vst [vmem:[#allocation19_spill] sm:$0xff] %v5299_v36 }
 0x1db   : > { %3971 = vmatmul.msk.f32.gmra.mxu1 %vm278_vm0, %v4925_v19  ;;  %v4069_v19 = vld [vmem:[#allocation2 + $0xf9] sm:$0xff] }
 0x1dc   : > { %5814 = vst [vmem:[#allocation18_spill] sm:$0xff] %v5291_v8  ;;  %4036 = vmatmul.msk.f32.gmra.mxu2 %vm278_vm0, %v4929_v43  ;;  %4165 = vmatmul.msk.f32.gmra.mxu0 %vm278_vm0, %v4942_v63  ;;  %v1675_v43 = vadd.f32 %v5819_v35, %v5818_v34  ;;  %v4071_v8 = vld [vmem:[#allocation2 + $0x111] sm:$0xff] }
 0x1dd   : > { %4101 = vmatmul.msk.f32.gmra.mxu3 %vm278_vm0, %v4068_v6  ;;  %v5311_v6 = vld [vmem:[%s5704_s2] ss:$0 sm:$0xff] }
 0x1df   : > { %v2131_v13 = vpop.f32.mrf.mxu2 }
 0x1e0   : > { %v2227_v44 = vadd.f32 %v2131_v13, %v1949_v39  ;;  %v1856_v28 = vpop.f32.mrf.mxu1  ;;  %v2406_v50 = vpop.f32.mrf.mxu3 }
 0x1e1   : > { %v2681_v38 = vpop.f32.mrf.mxu0  ;;  %v1950_v23 = vadd.f32 %v1856_v28, %v1675_v43  ;;  %v5820_v28 = vld [vmem:[#allocation33_spill] sm:$0xff] }
 0x1e2   : > { %v2502_v55 = vadd.f32 %v2406_v50, %v2227_v44 }
 0x1e3   : > { %3972 = vmatmul.msk.f32.gmra.mxu1 %vm278_vm0, %v4942_v63  ;;  %v5319_v63 = vld [vmem:[%s5705_s3] ss:$0 sm:$0xff] }
 0x1e4   : > { %4037 = vmatmul.msk.f32.gmra.mxu2 %vm278_vm0, %v4946_v32  ;;  %v2777_v39 = vadd.f32 %v2681_v38, %v2502_v55  ;;  %4166 = vmatmul.msk.f32.gmra.mxu0 %vm278_vm0, %v4959_v45  ;;  %v5821_v55 = vld [vmem:[#allocation34_spill] sm:$0xff] }
 0x1e5   : > { %4102 = vmatmul.msk.f32.gmra.mxu3 %vm278_vm0, %v4069_v19  ;;  %v4070_v19 = vld [vmem:[#allocation2 + $0x109] sm:$0xff]  ;;  %v1676_v43 = vadd.f32 %v5821_v55, %v5820_v28  ;;  %v3941_v28 = vld [vmem:[#allocation2 + $0xfa] sm:$0xff] }
 0x1e6   : > { %v2813_v44 = vmul.f32 %v5311_v6, %v2777_v39  ;;  %v4006_v55 = vld [vmem:[#allocation2 + $0x110] sm:$0xff] }
 0x1e7   : > { %v2134_v13 = vpop.f32.mrf.mxu2 }
 0x1e8   : > { %v2228_v50 = vadd.f32 %v2134_v13, %v1950_v23  ;;  %v1859_v34 = vpop.f32.mrf.mxu1  ;;  %v2409_v35 = vpop.f32.mrf.mxu3  ;;  %v2849_v32 = vadd.f32 %v5319_v63, %v2813_v44 }
 0x1e9   : > { %v2684_v23 = vpop.f32.mrf.mxu0  ;;  %v1951_v39 = vadd.f32 %v1859_v34, %v1676_v43  ;;  %v5823_v34 = vld [vmem:[#allocation36_spill] sm:$0xff] }
 0x1ea   : > { %v2503_v36 = vadd.f32 %v2409_v35, %v2228_v50  ;;  %v2881_v38 = vmax.f32 %v2849_v32, 0.0 }
 0x1eb   : > { %3973 = vmatmul.msk.f32.gmra.mxu1 %vm278_vm0, %v4959_v45 }
 0x1ec   : > { %4038 = vmatmul.msk.f32.gmra.mxu2 %vm278_vm0, %v4963_v40  ;;  %2913 = vst.msk [vmem:[%s5330_s29] sm:$0xff] %vm278_vm0, %v2881_v38  ;;  %v2778_v13 = vadd.f32 %v2684_v23, %v2503_v36  ;;  %4167 = vmatmul.msk.f32.gmra.mxu0 %vm278_vm0, %v4976_v29  ;;  %v5822_v36 = vld [vmem:[#allocation35_spill] sm:$0xff] }
 0x1ed   : > { %4103 = vmatmul.msk.f32.gmra.mxu3 %vm278_vm0, %v4070_v19  ;;  %v1677_v43 = vadd.f32 %v5823_v34, %v5822_v36  ;;  %v4007_v36 = vld [vmem:[#allocation2 + $0x120] sm:$0xff] }
 0x1ee   : > { %v2814_v50 = vmul.f32 %v5311_v6, %v2778_v13 }
 0x1ef   : > { %v2137_v44 = vpop.f32.mrf.mxu2 }
 0x1f0   : > { %v2229_v45 = vadd.f32 %v2137_v44, %v1951_v39  ;;  %v1862_v35 = vpop.f32.mrf.mxu1  ;;  %v2412_v32 = vpop.f32.mrf.mxu3  ;;  %v5345_v40 = vadd.f32 %v5319_v63, %v2814_v50 }
 0x1f1   : > { %v2687_v29 = vpop.f32.mrf.mxu0  ;;  %v1952_v39 = vadd.f32 %v1862_v35, %v1677_v43  ;;  %v5825_v43 = vld [vmem:[#allocation38_spill] sm:$0xff] }
 0x1f2   : > { %v2504_v19 = vadd.f32 %v2412_v32, %v2229_v45  ;;  %v5733_v23 = vmax.f32 %v5345_v40, 0.0 }
 0x1f3   : > { %3974 = vmatmul.msk.f32.gmra.mxu1 %vm278_vm0, %v3941_v28 }
 0x1f4   : > { %4039 = vmatmul.msk.f32.gmra.mxu2 %vm278_vm0, %v4006_v55  ;;  %2914 = vst.msk [vmem:[%s5330_s29 + $0x8] sm:$0xff] %vm278_vm0, %v5733_v23  ;;  %v2779_v13 = vadd.f32 %v2687_v29, %v2504_v19  ;;  %4168 = vmatmul.msk.f32.gmra.mxu0 %vm278_vm0, %v4990_v49  ;;  %v3942_v55 = vld [vmem:[#allocation2 + $0x10a] sm:$0xff]  ;;  %v5824_v19 = vld [vmem:[#allocation37_spill] sm:$0xff]  ;;  %v4136_v49 = vld [vmem:[#allocation2 + $0x112] sm:$0xff] }
 0x1f5   : > { %4104 = vmatmul.msk.f32.gmra.mxu3 %vm278_vm0, %v4071_v8  ;;  %v1678_v29 = vadd.f32 %v5825_v43, %v5824_v19 }
 0x1f6   : > { %v2815_v50 = vmul.f32 %v5311_v6, %v2779_v13 }
 0x1f7   : > { %v2140_v44 = vpop.f32.mrf.mxu2 }
 0x1f8   : > { %v2230_v45 = vadd.f32 %v2140_v44, %v1952_v39  ;;  %v1865_v32 = vpop.f32.mrf.mxu1  ;;  %v2415_v28 = vpop.f32.mrf.mxu3  ;;  %v2851_v8 = vadd.f32 %v5319_v63, %v2815_v50 }
 0x1f9   : > { %v2690_v13 = vpop.f32.mrf.mxu0  ;;  %v1953_v23 = vadd.f32 %v1865_v32, %v1678_v29 }
 0x1fa   : > { %v2505_v34 = vadd.f32 %v2415_v28, %v2230_v45  ;;  %v2883_v35 = vmax.f32 %v2851_v8, 0.0 }
 0x1fb   : > { %3975 = vmatmul.msk.f32.gmra.mxu1 %vm278_vm0, %v3942_v55 }
 0x1fc   : > { %4040 = vmatmul.msk.f32.gmra.mxu2 %vm278_vm0, %v4007_v36  ;;  %2915 = vst.msk [vmem:[%s5330_s29 + $0x10] sm:$0xff] %vm278_vm0, %v2883_v35  ;;  %v2945_v39 = vmax.f32 %v2881_v38, %v2883_v35  ;;  %v2780_v44 = vadd.f32 %v2690_v13, %v2505_v34  ;;  %4169 = vmatmul.msk.f32.gmra.mxu0 %vm278_vm0, %v4136_v49  ;;  %v5826_v34 = vld [vmem:[#allocation39_spill] sm:$0xff]  ;;  %v5827_v35 = vld [vmem:[#allocation40_spill] sm:$0xff] }
 0x1fd   : > { %4105 = vmatmul.msk.f32.gmra.mxu3 %vm278_vm0, %v4072_v62  ;;  %v1679_v29 = vadd.f32 %v5827_v35, %v5826_v34  ;;  %v4009_v34 = vld [vmem:[#allocation2 + $0x138] sm:$0xff]  ;;  %v5829_v35 = vld [vmem:[#allocation41_spill] sm:$0xff] }
 0x1fe   : > { %v2977_v45 = vrot.slane %v2945_v39, 2  ;;  %v2978_v28 = vrot.slane %v2945_v39, 4  ;;  %v2979_v46 = vrot.slane %v2945_v39, 6  ;;  %v4182_v55 = vrot.slane %v2945_v39, 9 }
 0x1ff   : > { %v2143_v50 = vpop.f32.mrf.mxu2  ;;  %v2816_v19 = vmul.f32 %v5311_v6, %v2780_v44 }
 0x200   : > { %v1868_v36 = vpop.f32.mrf.mxu1  ;;  %v2418_v8 = vpop.f32.mrf.mxu3  ;;  %v2231_v43 = vadd.f32 %v2143_v50, %v1953_v23  ;;  %v4183_v62 = vrot.slane %v2977_v45, 9  ;;  %v4184_v3 = vrot.slane %v2978_v28, 9  ;;  %v3265_v21 = vmax.f32 %v2945_v39, %v4182_v55  ;;  %v4137_v50 = vld [vmem:[#allocation2 + $0x122] sm:$0xff] }
 0x201   : > { %v2852_v38 = vadd.f32 %v5319_v63, %v2816_v19  ;;  %v4185_v13 = vrot.slane %v2979_v46, 9  ;;  %v2693_v44 = vpop.f32.mrf.mxu0  ;;  %v1954_v55 = vadd.f32 %v1868_v36, %v1679_v29 }
 0x202   : > { %v2506_v32 = vadd.f32 %v2418_v8, %v2231_v43  ;;  %v3266_v26 = vmax.f32 %v2977_v45, %v4183_v62  ;;  %v3267_v57 = vmax.f32 %v2978_v28, %v4184_v3  ;;  %v3393_v19 = vperm.slane %v3265_v21, 0 }
 0x203   : > { %3976 = vmatmul.msk.f32.gmra.mxu1 %vm278_vm0, %v4136_v49  ;;  %v2884_v23 = vmax.f32 %v2852_v38, 0.0  ;;  %v5828_v49 = vmax.f32 %v5345_v40, 0.0  ;;  %v3268_v3 = vmax.f32 %v2979_v46, %v4185_v13  ;;  %v1680_v40 = vadd.f32 %v5008_v7, %v5829_v35  ;;  %v4074_v46 = vld [vmem:[#allocation2 + $0x139] sm:$0xff] }
 0x204   : > { %4041 = vmatmul.msk.f32.gmra.mxu2 %vm278_vm0, %v4008_v48  ;;  %v3394_v39 = vperm.slane %v3266_v26, 0  ;;  %v2781_v8 = vadd.f32 %v2693_v44, %v2506_v32  ;;  %v3395_v28 = vperm.slane %v3267_v57, 0  ;;  %4170 = vmatmul.msk.f32.gmra.mxu0 %vm278_vm0, %v4137_v50 }
 0x205   : > { %4106 = vmatmul.msk.f32.gmra.mxu3 %vm278_vm0, %v4073_v18  ;;  %2916 = vst.msk [vmem:[%s5330_s29 + $0x18] sm:$0xff] %vm278_vm0, %v2884_v23  ;;  %v2946_v43 = vmax.f32 %v5828_v49, %v2884_v23 }
 0x206   : > { %v2817_v48 = vmul.f32 %v5311_v6, %v2781_v8  ;;  %v3458_v36 = vsel %vm3457_vm3, %v3394_v39, %v3393_v19  ;;  %v3396_v19 = vperm.slane %v3268_v3, 0 }
 0x207   : > { %v2146_v45 = vpop.f32.mrf.mxu2  ;;  %v2980_v38 = vrot.slane %v2946_v43, 2  ;;  %v2981_v21 = vrot.slane %v2946_v43, 4  ;;  %v2982_v32 = vrot.slane %v2946_v43, 6  ;;  %v4186_v29 = vrot.slane %v2946_v43, 9 }
 0x208   : > { %v2232_v18 = vadd.f32 %v2146_v45, %v1954_v55  ;;  %v1871_v62 = vpop.f32.mrf.mxu1  ;;  %v2421_v26 = vpop.f32.mrf.mxu3  ;;  %v5386_v57 = vadd.f32 %v5319_v63, %v2817_v48  ;;  %v3460_v39 = vsel %vm3459_vm4, %v3395_v28, %v3458_v36 }
 0x209   : > { %v4187_v13 = vrot.slane %v2980_v38, 9  ;;  %v4188_v23 = vrot.slane %v2981_v21, 9  ;;  %v4189_v44 = vrot.slane %v2982_v32, 9  ;;  %v3269_v8 = vmax.f32 %v2946_v43, %v4186_v29  ;;  %v2696_v35 = vpop.f32.mrf.mxu0 }
 0x20a   : > { %v2507_v55 = vadd.f32 %v2421_v26, %v2232_v18  ;;  %v2885_v7 = vmax.f32 %v5386_v57, 0.0  ;;  %v3462_v28 = vsel %vm3461_vm5, %v3396_v19, %v3460_v39 }
 0x20b   : > { %3977 = vmatmul.msk.f32.gmra.mxu1 %vm278_vm0, %v4137_v50  ;;  %v3270_v49 = vmax.f32 %v2980_v38, %v4187_v13  ;;  %v3271_v45 = vmax.f32 %v2981_v21, %v4188_v23  ;;  %v3272_v48 = vmax.f32 %v2982_v32, %v4189_v44  ;;  %v3397_v18 = vperm.slane %v3269_v8, 0 }
 0x20c   : > { %4042 = vmatmul.msk.f32.gmra.mxu2 %vm278_vm0, %v4009_v34  ;;  %2917 = vst.msk [vmem:[%s5330_s29 + $0x20] sm:$0xff] %vm278_vm0, %v2885_v7  ;;  %v1955_v50 = vadd.f32 %v1871_v62, %v1680_v40  ;;  %v2782_v43 = vadd.f32 %v2696_v35, %v2507_v55  ;;  %4171 = vmatmul.msk.f32.gmra.mxu0 %vm278_vm0, %v4138_v10  ;;  %v4075_v55 = vld [vmem:[#allocation2 + $0x141] sm:$0xff] }
 0x20d   : > { %4107 = vmatmul.msk.f32.gmra.mxu3 %vm278_vm0, %v4074_v46  ;;  %v3398_v26 = vperm.slane %v3270_v49, 0  ;;  %v3399_v3 = vperm.slane %v3271_v45, 0  ;;  %v3464_v38 = vsel %vm3463_vm6, %v3397_v18, %v3462_v28  ;;  %v3400_v62 = vperm.slane %v3272_v48, 0  ;;  %v4010_v46 = vld [vmem:[#allocation2 + $0x140] sm:$0xff] }
 0x20e   : > { %v2818_v21 = vmul.f32 %v5311_v6, %v2782_v43  ;;  %v1681_v8 = vadd.f32 %v5018_v51, %v5014_v52  ;;  %v4139_v45 = vld [vmem:[#allocation2 + $0x13a] sm:$0xff]  ;;  %v4011_v43 = vld [vmem:[#allocation2 + $0x150] sm:$0xff] }
 0x20f   : > { %v2149_v36 = vpop.f32.mrf.mxu2  ;;  %v3466_v40 = vsel %vm3465_vm7, %v3398_v26, %v3464_v38  ;;  %v1682_v38 = vadd.f32 %v5028_v59, %v5024_v5 }
 0x210   : > { %v2233_v32 = vadd.f32 %v2149_v36, %v1955_v50  ;;  %v1874_v34 = vpop.f32.mrf.mxu1  ;;  %v2424_v29 = vpop.f32.mrf.mxu3  ;;  %v3468_v13 = vsel %vm3467_vm8, %v3399_v3, %v3466_v40  ;;  %v5410_v23 = vadd.f32 %v5319_v63, %v2818_v21  ;;  %v4076_v3 = vld [vmem:[#allocation2 + $0x151] sm:$0xff] }
 0x211   : > { %v3470_v39 = vsel %vm3469_vm9, %v3400_v62, %v3468_v13  ;;  %v2699_v49 = vpop.f32.mrf.mxu0  ;;  %v1956_v48 = vadd.f32 %v1874_v34, %v1681_v8  ;;  %v4012_v8 = vld [vmem:[#allocation2 + $0x158] sm:$0xff] }
 0x212   : > { %v2508_v44 = vadd.f32 %v2424_v29, %v2233_v32  ;;  %3528 = vst.msk [vmem:[%s5405_s7] sm:$0xff] %vm278_vm0, %v3470_v39  ;;  %v2886_v19 = vmax.f32 %v5410_v23, 0.0  ;;  %v4140_v32 = vld [vmem:[#allocation2 + $0x142] sm:$0xff] }
 0x213   : > { %3978 = vmatmul.msk.f32.gmra.mxu1 %vm278_vm0, %v4138_v10 }
 0x214   : > { %4043 = vmatmul.msk.f32.gmra.mxu2 %vm278_vm0, %v4010_v46  ;;  %2918 = vst.msk [vmem:[%s5330_s29 + $0x28] sm:$0xff] %vm278_vm0, %v2886_v19  ;;  %v2783_v35 = vadd.f32 %v2699_v49, %v2508_v44  ;;  %4172 = vmatmul.msk.f32.gmra.mxu0 %vm278_vm0, %v4139_v45 }
 0x215   : > { %4108 = vmatmul.msk.f32.gmra.mxu3 %vm278_vm0, %v4075_v55 }
 0x216   : > { %v2819_v10 = vmul.f32 %v5311_v6, %v2783_v35 }
 0x217   : > { %v2152_v18 = vpop.f32.mrf.mxu2 }
 0x218   : > { %v2234_v52 = vadd.f32 %v2152_v18, %v1956_v48  ;;  %v1877_v51 = vpop.f32.mrf.mxu1  ;;  %v2427_v50 = vpop.f32.mrf.mxu3  ;;  %v2855_v28 = vadd.f32 %v5319_v63, %v2819_v10  ;;  %v4077_v48 = vld [vmem:[#allocation2 + $0x159] sm:$0xff]  ;;  %v1683_v18 = vadd.f32 %v5040_v17, %v5036_v22 }
 0x219   : > { %v2702_v21 = vpop.f32.mrf.mxu0  ;;  %v1957_v62 = vadd.f32 %v1877_v51, %v1682_v38 }
 0x21a   : > { %v2509_v26 = vadd.f32 %v2427_v50, %v2234_v52  ;;  %v2887_v36 = vmax.f32 %v2855_v28, 0.0  ;;  %v4141_v28 = vld [vmem:[#allocation2 + $0x152] sm:$0xff] }
 0x21b   : > { %3979 = vmatmul.msk.f32.gmra.mxu1 %vm278_vm0, %v4139_v45 }
 0x21c   : > { %4044 = vmatmul.msk.f32.gmra.mxu2 %vm278_vm0, %v4011_v43  ;;  %2919 = vst.msk [vmem:[%s5330_s29 + $0x30] sm:$0xff] %vm278_vm0, %v2887_v36  ;;  %v2947_v34 = vmax.f32 %v2885_v7, %v2887_v36  ;;  %v2784_v29 = vadd.f32 %v2702_v21, %v2509_v26  ;;  %4173 = vmatmul.msk.f32.gmra.mxu0 %vm278_vm0, %v4140_v32 }
 0x21d   : > { %4109 = vmatmul.msk.f32.gmra.mxu3 %vm278_vm0, %v4076_v3 }
 0x21e   : > { %v2983_v46 = vrot.slane %v2947_v34, 2  ;;  %v2984_v13 = vrot.slane %v2947_v34, 4  ;;  %v2985_v23 = vrot.slane %v2947_v34, 6  ;;  %v4190_v44 = vrot.slane %v2947_v34, 9 }
 0x21f   : > { %v2155_v40 = vpop.f32.mrf.mxu2  ;;  %v2820_v59 = vmul.f32 %v5311_v6, %v2784_v29 }
 0x220   : > { %v1880_v55 = vpop.f32.mrf.mxu1  ;;  %v2430_v5 = vpop.f32.mrf.mxu3  ;;  %v2235_v39 = vadd.f32 %v2155_v40, %v1957_v62  ;;  %v4191_v49 = vrot.slane %v2983_v46, 9  ;;  %v4192_v45 = vrot.slane %v2984_v13, 9  ;;  %v3273_v57 = vmax.f32 %v2947_v34, %v4190_v44 }
 0x221   : > { %v2856_v7 = vadd.f32 %v5319_v63, %v2820_v59  ;;  %v4193_v10 = vrot.slane %v2985_v23, 9  ;;  %v2705_v43 = vpop.f32.mrf.mxu0  ;;  %v1958_v3 = vadd.f32 %v1880_v55, %v1683_v18 }
 0x222   : > { %v2510_v35 = vadd.f32 %v2430_v5, %v2235_v39  ;;  %v3274_v52 = vmax.f32 %v2983_v46, %v4191_v49  ;;  %v3275_v51 = vmax.f32 %v2984_v13, %v4192_v45  ;;  %v3401_v38 = vperm.slane %v3273_v57, 0  ;;  %v4013_v5 = vld [vmem:[#allocation2 + $0x168] sm:$0xff] }
 0x223   : > { %3980 = vmatmul.msk.f32.gmra.mxu1 %vm278_vm0, %v4140_v32  ;;  %v2888_v50 = vmax.f32 %v2856_v7, 0.0  ;;  %v3276_v34 = vmax.f32 %v2985_v23, %v4193_v10 }
 0x224   : > { %4045 = vmatmul.msk.f32.gmra.mxu2 %vm278_vm0, %v4012_v8  ;;  %v3402_v26 = vperm.slane %v3274_v52, 0  ;;  %v2785_v36 = vadd.f32 %v2705_v43, %v2510_v35  ;;  %v3403_v22 = vperm.slane %v3275_v51, 0  ;;  %4174 = vmatmul.msk.f32.gmra.mxu0 %vm278_vm0, %v4141_v28  ;;  %v4142_v43 = vld [vmem:[#allocation2 + $0x15a] sm:$0xff] }
 0x225   : > { %4110 = vmatmul.msk.f32.gmra.mxu3 %vm278_vm0, %v4077_v48  ;;  %2920 = vst.msk [vmem:[%s5330_s29 + $0x38] sm:$0xff] %vm278_vm0, %v2888_v50  ;;  %v2948_v21 = vmax.f32 %v2886_v19, %v2888_v50  ;;  %v4078_v19 = vld [vmem:[#allocation2 + $0x169] sm:$0xff]  ;;  %v1684_v48 = vadd.f32 %v5052_v41, %v5048_v37  ;;  %v3404_v18 = vperm.slane %v3276_v34, 0 }
 0x226   : > { %v2821_v17 = vmul.f32 %v5311_v6, %v2785_v36  ;;  %v3471_v46 = vsel %vm3457_vm3, %v3402_v26, %v3401_v38 }
 0x227   : > { %v2158_v32 = vpop.f32.mrf.mxu2  ;;  %v2986_v13 = vrot.slane %v2948_v21, 2  ;;  %v2987_v44 = vrot.slane %v2948_v21, 4  ;;  %v2988_v55 = vrot.slane %v2948_v21, 6  ;;  %v4194_v59 = vrot.slane %v2948_v21, 9 }
 0x228   : > { %v2236_v29 = vadd.f32 %v2158_v32, %v1958_v3  ;;  %v1883_v62 = vpop.f32.mrf.mxu1  ;;  %v2433_v40 = vpop.f32.mrf.mxu3  ;;  %v5449_v39 = vadd.f32 %v5319_v63, %v2821_v17  ;;  %v3472_v57 = vsel %vm3459_vm4, %v3403_v22, %v3471_v46 }
 0x229   : > { %v4195_v23 = vrot.slane %v2986_v13, 9  ;;  %v4196_v8 = vrot.slane %v2987_v44, 9  ;;  %v4197_v49 = vrot.slane %v2988_v55, 9  ;;  %v3277_v7 = vmax.f32 %v2948_v21, %v4194_v59  ;;  %v2708_v50 = vpop.f32.mrf.mxu0 }
 0x22a   : > { %v2511_v45 = vadd.f32 %v2433_v40, %v2236_v29  ;;  %v2889_v35 = vmax.f32 %v5449_v39, 0.0  ;;  %v3473_v41 = vsel %vm3461_vm5, %v3404_v18, %v3472_v57  ;;  %v4014_v40 = vld [vmem:[#allocation2 + $0x170] sm:$0xff]  ;;  %v1685_v59 = vadd.f32 %v5062_v0, %v5058_v33 }
 0x22b   : > { %3981 = vmatmul.msk.f32.gmra.mxu1 %vm278_vm0, %v4141_v28  ;;  %v3278_v10 = vmax.f32 %v2986_v13, %v4195_v23  ;;  %v3279_v52 = vmax.f32 %v2987_v44, %v4196_v8  ;;  %v3280_v51 = vmax.f32 %v2988_v55, %v4197_v49  ;;  %v3405_v26 = vperm.slane %v3277_v7, 0  ;;  %v4079_v55 = vld [vmem:[#allocation2 + $0x171] sm:$0xff]  ;;  %v4015_v7 = vld [vmem:[#allocation2 + $0x180] sm:$0xff] }
 0x22c   : > { %4046 = vmatmul.msk.f32.gmra.mxu2 %vm278_vm0, %v4013_v5  ;;  %2921 = vst.msk [vmem:[%s5330_s29 + $0x40] sm:$0xff] %vm278_vm0, %v2889_v35  ;;  %v1959_v28 = vadd.f32 %v1883_v62, %v1684_v48  ;;  %v2786_v37 = vadd.f32 %v2708_v50, %v2511_v45  ;;  %4175 = vmatmul.msk.f32.gmra.mxu0 %vm278_vm0, %v4142_v43  ;;  %v4143_v23 = vld [vmem:[#allocation2 + $0x16a] sm:$0xff] }
 0x22d   : > { %4111 = vmatmul.msk.f32.gmra.mxu3 %vm278_vm0, %v4078_v19  ;;  %v3406_v3 = vperm.slane %v3278_v10, 0  ;;  %v3407_v36 = vperm.slane %v3279_v52, 0  ;;  %v3474_v21 = vsel %vm3463_vm6, %v3405_v26, %v3473_v41  ;;  %v3408_v29 = vperm.slane %v3280_v51, 0  ;;  %v4080_v52 = vld [vmem:[#allocation2 + $0x181] sm:$0xff]  ;;  %v4144_v26 = vld [vmem:[#allocation2 + $0x172] sm:$0xff] }
 0x22e   : > { %v2822_v32 = vmul.f32 %v5311_v6, %v2786_v37  ;;  %v1686_v50 = vadd.f32 %v5072_v12, %v5068_v47 }
 0x22f   : > { %v2161_v38 = vpop.f32.mrf.mxu2  ;;  %v3475_v62 = vsel %vm3465_vm7, %v3406_v3, %v3474_v21 }
 0x230   : > { %v2237_v34 = vadd.f32 %v2161_v38, %v1959_v28  ;;  %v1886_v22 = vpop.f32.mrf.mxu1  ;;  %v2436_v17 = vpop.f32.mrf.mxu3  ;;  %v3476_v46 = vsel %vm3467_vm8, %v3407_v36, %v3475_v62  ;;  %v5467_v13 = vadd.f32 %v5319_v63, %v2822_v32 }
 0x231   : > { %v3477_v5 = vsel %vm3469_vm9, %v3408_v29, %v3476_v46  ;;  %v2711_v19 = vpop.f32.mrf.mxu0  ;;  %v1960_v8 = vadd.f32 %v1886_v22, %v1685_v59 }
 0x232   : > { %v2512_v44 = vadd.f32 %v2436_v17, %v2237_v34  ;;  %3529 = vst.msk [vmem:[%s5405_s7 + $0x8] sm:$0xff] %vm278_vm0, %v3477_v5  ;;  %v2890_v39 = vmax.f32 %v5467_v13, 0.0  ;;  %v4016_v17 = vld [vmem:[#allocation2 + $0x188] sm:$0xff] }
 0x233   : > { %3982 = vmatmul.msk.f32.gmra.mxu1 %vm278_vm0, %v4142_v43 }
 0x234   : > { %4047 = vmatmul.msk.f32.gmra.mxu2 %vm278_vm0, %v4014_v40  ;;  %2922 = vst.msk [vmem:[%s5330_s29 + $0x48] sm:$0xff] %vm278_vm0, %v2890_v39  ;;  %v2787_v49 = vadd.f32 %v2711_v19, %v2512_v44  ;;  %4176 = vmatmul.msk.f32.gmra.mxu0 %vm278_vm0, %v4143_v23  ;;  %v4081_v40 = vld [vmem:[#allocation2 + $0x189] sm:$0xff]  ;;  %v1687_v44 = vadd.f32 %v5082_v60, %v5078_v54 }
 0x235   : > { %4112 = vmatmul.msk.f32.gmra.mxu3 %vm278_vm0, %v4079_v55 }
 0x236   : > { %v2823_v48 = vmul.f32 %v5311_v6, %v2787_v49 }
 0x237   : > { %v2164_v45 = vpop.f32.mrf.mxu2 }
 0x238   : > { %v2238_v33 = vadd.f32 %v2164_v45, %v1960_v8  ;;  %v1889_v0 = vpop.f32.mrf.mxu1  ;;  %v2439_v57 = vpop.f32.mrf.mxu3  ;;  %v2859_v18 = vadd.f32 %v5319_v63, %v2823_v48  ;;  %v4145_v8 = vld [vmem:[#allocation2 + $0x182] sm:$0xff] }
 0x239   : > { %v2714_v43 = vpop.f32.mrf.mxu0  ;;  %v1961_v41 = vadd.f32 %v1889_v0, %v1686_v50 }
 0x23a   : > { %v2513_v10 = vadd.f32 %v2439_v57, %v2238_v33  ;;  %v2891_v51 = vmax.f32 %v2859_v18, 0.0 }
 0x23b   : > { %3983 = vmatmul.msk.f32.gmra.mxu1 %vm278_vm0, %v4143_v23 }
 0x23c   : > { %4048 = vmatmul.msk.f32.gmra.mxu2 %vm278_vm0, %v4015_v7  ;;  %2923 = vst.msk [vmem:[%s5330_s29 + $0x50] sm:$0xff] %vm278_vm0, %v2891_v51  ;;  %v2949_v28 = vmax.f32 %v2889_v35, %v2891_v51  ;;  %v2788_v37 = vadd.f32 %v2714_v43, %v2513_v10  ;;  %4177 = vmatmul.msk.f32.gmra.mxu0 %vm278_vm0, %v4144_v26 }
 0x23d   : > { %4113 = vmatmul.msk.f32.gmra.mxu3 %vm278_vm0, %v4080_v52 }
 0x23e   : > { %v2989_v36 = vrot.slane %v2949_v28, 2  ;;  %v2990_v38 = vrot.slane %v2949_v28, 4  ;;  %v2991_v21 = vrot.slane %v2949_v28, 6  ;;  %v4198_v32 = vrot.slane %v2949_v28, 9 }
 0x23f   : > { %v2167_v3 = vpop.f32.mrf.mxu2  ;;  %v2824_v47 = vmul.f32 %v5311_v6, %v2788_v37 }
 0x240   : > { %v1892_v34 = vpop.f32.mrf.mxu1  ;;  %v2442_v22 = vpop.f32.mrf.mxu3  ;;  %v2239_v12 = vadd.f32 %v2167_v3, %v1961_v41  ;;  %v4199_v29 = vrot.slane %v2989_v36, 9  ;;  %v4200_v62 = vrot.slane %v2990_v38, 9  ;;  %v3281_v46 = vmax.f32 %v2949_v28, %v4198_v32  ;;  %v4017_v28 = vld [vmem:[#allocation2 + $0x198] sm:$0xff] }
 0x241   : > { %v2860_v35 = vadd.f32 %v5319_v63, %v2824_v47  ;;  %v4201_v55 = vrot.slane %v2991_v21, 9  ;;  %v2717_v23 = vpop.f32.mrf.mxu0  ;;  %v1962_v45 = vadd.f32 %v1892_v34, %v1687_v44  ;;  %v1688_v32 = vadd.f32 %v5092_v31, %v5088_v61 }
 0x242   : > { %v2514_v13 = vadd.f32 %v2442_v22, %v2239_v12  ;;  %v3282_v5 = vmax.f32 %v2989_v36, %v4199_v29  ;;  %v3283_v59 = vmax.f32 %v2990_v38, %v4200_v62  ;;  %v3409_v33 = vperm.slane %v3281_v46, 0  ;;  %v4146_v46 = vld [vmem:[#allocation2 + $0x18a] sm:$0xff] }
 0x243   : > { %3984 = vmatmul.msk.f32.gmra.mxu1 %vm278_vm0, %v4144_v26  ;;  %v2892_v19 = vmax.f32 %v2860_v35, 0.0  ;;  %v3284_v7 = vmax.f32 %v2991_v21, %v4201_v55 }
 0x244   : > { %4049 = vmatmul.msk.f32.gmra.mxu2 %vm278_vm0, %v4016_v17  ;;  %v3410_v49 = vperm.slane %v3282_v5, 0  ;;  %v2789_v48 = vadd.f32 %v2717_v23, %v2514_v13  ;;  %v3411_v54 = vperm.slane %v3283_v59, 0  ;;  %4178 = vmatmul.msk.f32.gmra.mxu0 %vm278_vm0, %v4145_v8 }
 0x245   : > { %4114 = vmatmul.msk.f32.gmra.mxu3 %vm278_vm0, %v4081_v40  ;;  %2924 = vst.msk [vmem:[%s5330_s29 + $0x58] sm:$0xff] %vm278_vm0, %v2892_v19  ;;  %v2950_v0 = vmax.f32 %v2890_v39, %v2892_v19  ;;  %v4082_v39 = vld [vmem:[#allocation2 + $0x199] sm:$0xff]  ;;  %v3412_v12 = vperm.slane %v3284_v7, 0 }
 0x246   : > { %v2825_v60 = vmul.f32 %v5311_v6, %v2789_v48  ;;  %v3478_v51 = vsel %vm3457_vm3, %v3410_v49, %v3409_v33  ;;  %v4018_v33 = vld [vmem:[#allocation2 + $0x1a0] sm:$0xff] }
 0x247   : > { %v2170_v57 = vpop.f32.mrf.mxu2  ;;  %v2992_v50 = vrot.slane %v2950_v0, 2  ;;  %v2993_v43 = vrot.slane %v2950_v0, 4  ;;  %v2994_v26 = vrot.slane %v2950_v0, 6  ;;  %v4202_v37 = vrot.slane %v2950_v0, 9 }
 0x248   : > { %v2240_v18 = vadd.f32 %v2170_v57, %v1962_v45  ;;  %v1895_v10 = vpop.f32.mrf.mxu1  ;;  %v2445_v52 = vpop.f32.mrf.mxu3  ;;  %v5504_v41 = vadd.f32 %v5319_v63, %v2825_v60  ;;  %v3479_v34 = vsel %vm3459_vm4, %v3411_v54, %v3478_v51  ;;  %v4083_v54 = vld [vmem:[#allocation2 + $0x1a1] sm:$0xff] }
 0x249   : > { %v4203_v3 = vrot.slane %v2992_v50, 9  ;;  %v4204_v36 = vrot.slane %v2993_v43, 9  ;;  %v4205_v38 = vrot.slane %v2994_v26, 9  ;;  %v3285_v22 = vmax.f32 %v2950_v0, %v4202_v37  ;;  %v2720_v40 = vpop.f32.mrf.mxu0  ;;  %v4147_v51 = vld [vmem:[#allocation2 + $0x19a] sm:$0xff] }
 0x24a   : > { %v2515_v21 = vadd.f32 %v2445_v52, %v2240_v18  ;;  %v2893_v47 = vmax.f32 %v5504_v41, 0.0  ;;  %v1963_v13 = vadd.f32 %v1895_v10, %v1688_v32  ;;  %v3480_v31 = vsel %vm3461_vm5, %v3412_v12, %v3479_v34 }
 0x24b   : > { %3985 = vmatmul.msk.f32.gmra.mxu1 %vm278_vm0, %v4145_v8  ;;  %v3286_v17 = vmax.f32 %v2992_v50, %v4203_v3  ;;  %v3287_v29 = vmax.f32 %v2993_v43, %v4204_v36  ;;  %v3288_v62 = vmax.f32 %v2994_v26, %v4205_v38  ;;  %v3413_v35 = vperm.slane %v3285_v22, 0 }
 0x24c   : > { %4050 = vmatmul.msk.f32.gmra.mxu2 %vm278_vm0, %v4017_v28  ;;  %2925 = vst.msk [vmem:[%s5330_s29 + $0x60] sm:$0xff] %vm278_vm0, %v2893_v47  ;;  %v2790_v61 = vadd.f32 %v2720_v40, %v2515_v21  ;;  %4179 = vmatmul.msk.f32.gmra.mxu0 %vm278_vm0, %v4146_v46  ;;  %v1689_v18 = vadd.f32 %v5103_v42, %v5097_v58  ;;  %v4148_v21 = vld [vmem:[#allocation2 + $0x1a2] sm:$0xff] }
 0x24d   : > { %4115 = vmatmul.msk.f32.gmra.mxu3 %vm278_vm0, %v4082_v39  ;;  %v3414_v44 = vperm.slane %v3286_v17, 0  ;;  %v3415_v55 = vperm.slane %v3287_v29, 0  ;;  %v3481_v59 = vsel %vm3463_vm6, %v3413_v35, %v3480_v31  ;;  %v3416_v45 = vperm.slane %v3288_v62, 0 }
 0x24e   : > { %v2826_v19 = vmul.f32 %v5311_v6, %v2790_v61  ;;  %v1690_v36 = vadd.f32 %v5114_v4, %v5108_v53 }
 0x24f   : > { %v2173_v5 = vpop.f32.mrf.mxu2  ;;  %v3482_v48 = vsel %vm3465_vm7, %v3414_v44, %v3481_v59 }
 0x250   : > { %v2241_v23 = vadd.f32 %v2173_v5, %v1963_v13  ;;  %v1898_v8 = vpop.f32.mrf.mxu1  ;;  %v2448_v49 = vpop.f32.mrf.mxu3  ;;  %v3483_v0 = vsel %vm3467_vm8, %v3415_v55, %v3482_v48  ;;  %v2862_v57 = vadd.f32 %v5319_v63, %v2826_v19  ;;  %v1691_v55 = vadd.f32 %v5127_v16, %v5121_v14 }
 0x251   : > { %v3484_v60 = vsel %vm3469_vm9, %v3416_v45, %v3483_v0  ;;  %v2723_v52 = vpop.f32.mrf.mxu0  ;;  %v1964_v50 = vadd.f32 %v1898_v8, %v1689_v18 }
 0x252   : > { %v2516_v7 = vadd.f32 %v2448_v49, %v2241_v23  ;;  %3530 = vst.msk [vmem:[%s5405_s7 + $0x10] sm:$0xff] %vm278_vm0, %v3484_v60  ;;  %v2894_v10 = vmax.f32 %v2862_v57, 0.0 }
 0x253   : > { %3986 = vmatmul.msk.f32.gmra.mxu1 %vm278_vm0, %v4146_v46 }
 0x254   : > { %4051 = vmatmul.msk.f32.gmra.mxu2 %vm278_vm0, %v4018_v33  ;;  %2926 = vst.msk [vmem:[%s5330_s29 + $0x68] sm:$0xff] %vm278_vm0, %v2894_v10  ;;  %v2791_v43 = vadd.f32 %v2723_v52, %v2516_v7  ;;  %4180 = vmatmul.msk.f32.gmra.mxu0 %vm278_vm0, %v4147_v51 }
 0x255   : > { %4116 = vmatmul.msk.f32.gmra.mxu3 %vm278_vm0, %v4083_v54 }
 0x256   : > { %v2827_v28 = vmul.f32 %v5311_v6, %v2791_v43 }
 0x257   : > { %v2176_v26 = vpop.f32.mrf.mxu2 }
 0x258   : > { %v2242_v58 = vadd.f32 %v2176_v26, %v1964_v50  ;;  %v1901_v42 = vpop.f32.mrf.mxu1  ;;  %v2451_v37 = vpop.f32.mrf.mxu3  ;;  %v2863_v41 = vadd.f32 %v5319_v63, %v2827_v28 }
 0x259   : > { %v2726_v38 = vpop.f32.mrf.mxu0  ;;  %v1965_v22 = vadd.f32 %v1901_v42, %v1690_v36 }
 0x25a   : > { %v2517_v39 = vadd.f32 %v2451_v37, %v2242_v58  ;;  %v2895_v3 = vmax.f32 %v2863_v41, 0.0  ;;  %v1692_v41 = vadd.f32 %v5140_v20, %v5134_v9 }
 0x25c   : > { %2927 = vst.msk [vmem:[%s5330_s29 + $0x70] sm:$0xff] %vm278_vm0, %v2895_v3  ;;  %v2951_v32 = vmax.f32 %v2893_v47, %v2895_v3  ;;  %v2792_v34 = vadd.f32 %v2726_v38, %v2517_v39  ;;  %4181 = vmatmul.msk.f32.gmra.mxu0 %vm278_vm0, %v4148_v21 }
 0x25e   : > { %v2995_v17 = vrot.slane %v2951_v32, 2  ;;  %v2996_v29 = vrot.slane %v2951_v32, 4  ;;  %v2997_v62 = vrot.slane %v2951_v32, 6  ;;  %v4206_v40 = vrot.slane %v2951_v32, 9 }
 0x25f   : > { %v2179_v12 = vpop.f32.mrf.mxu2  ;;  %v2828_v13 = vmul.f32 %v5311_v6, %v2792_v34 }
 0x260   : > { %v1904_v46 = vpop.f32.mrf.mxu1  ;;  %v2454_v35 = vpop.f32.mrf.mxu3  ;;  %v2243_v61 = vadd.f32 %v2179_v12, %v1965_v22  ;;  %v4207_v53 = vrot.slane %v2995_v17, 9  ;;  %v4208_v4 = vrot.slane %v2996_v29, 9  ;;  %v3289_v31 = vmax.f32 %v2951_v32, %v4206_v40 }
 0x261   : > { %v2864_v47 = vadd.f32 %v5319_v63, %v2828_v13  ;;  %v4209_v5 = vrot.slane %v2997_v62, 9  ;;  %v2729_v8 = vpop.f32.mrf.mxu0  ;;  %v1966_v45 = vadd.f32 %v1904_v46, %v1691_v55 }
 0x262   : > { %v2518_v44 = vadd.f32 %v2454_v35, %v2243_v61  ;;  %v3290_v59 = vmax.f32 %v2995_v17, %v4207_v53  ;;  %v3291_v19 = vmax.f32 %v2996_v29, %v4208_v4  ;;  %v3417_v33 = vperm.slane %v3289_v31, 0 }
 0x263   : > { %v2896_v23 = vmax.f32 %v2864_v47, 0.0  ;;  %v3292_v7 = vmax.f32 %v2997_v62, %v4209_v5 }
 0x264   : > { %v3418_v49 = vperm.slane %v3290_v59, 0  ;;  %v2793_v48 = vadd.f32 %v2729_v8, %v2518_v44  ;;  %v3419_v54 = vperm.slane %v3291_v19, 0  ;;  %v1693_v59 = vadd.f32 %v5153_v24, %v5147_v56 }
 0x265   : > { %2928 = vst.msk [vmem:[%s5330_s29 + $0x78] sm:$0xff] %vm278_vm0, %v2896_v23  ;;  %v2952_v0 = vmax.f32 %v2894_v10, %v2896_v23  ;;  %v3420_v38 = vperm.slane %v3292_v7, 0 }
 0x266   : > { %v2829_v60 = vmul.f32 %v5311_v6, %v2793_v48  ;;  %v3485_v16 = vsel %vm3457_vm3, %v3418_v49, %v3417_v33 }
 0x267   : > { %v2182_v57 = vpop.f32.mrf.mxu2  ;;  %v2998_v51 = vrot.slane %v2952_v0, 2  ;;  %v2999_v50 = vrot.slane %v2952_v0, 4  ;;  %v3000_v43 = vrot.slane %v2952_v0, 6  ;;  %v4210_v26 = vrot.slane %v2952_v0, 9 }
 0x268   : > { %v2244_v18 = vadd.f32 %v2182_v57, %v1966_v45  ;;  %v1907_v52 = vpop.f32.mrf.mxu1  ;;  %v2457_v14 = vpop.f32.mrf.mxu3  ;;  %v2865_v28 = vadd.f32 %v5319_v63, %v2829_v60  ;;  %v3486_v39 = vsel %vm3459_vm4, %v3419_v54, %v3485_v16  ;;  %v5570_v45 = vld [vmem:[%s5704_s2] ss:$0 sm:$0xff]  ;;  %v1694_v54 = vadd.f32 %v5165_v25, %v5159_v1 }
 0x269   : > { %v4211_v58 = vrot.slane %v2998_v51, 9  ;;  %v4212_v42 = vrot.slane %v2999_v50, 9  ;;  %v4213_v10 = vrot.slane %v3000_v43, 9  ;;  %v3293_v3 = vmax.f32 %v2952_v0, %v4210_v26  ;;  %v2732_v22 = vpop.f32.mrf.mxu0  ;;  %v5582_v25 = vld [vmem:[%s5705_s3] ss:$0 sm:$0xff] }
 0x26a   : > { %v2519_v37 = vadd.f32 %v2457_v14, %v2244_v18  ;;  %v2897_v36 = vmax.f32 %v2865_v28, 0.0  ;;  %v1967_v17 = vadd.f32 %v1907_v52, %v1692_v41  ;;  %v3487_v62 = vsel %vm3461_vm5, %v3420_v38, %v3486_v39 }
 0x26b   : > { %v3294_v21 = vmax.f32 %v2998_v51, %v4211_v58  ;;  %v3295_v32 = vmax.f32 %v2999_v50, %v4212_v42  ;;  %v3296_v34 = vmax.f32 %v3000_v43, %v4213_v10  ;;  %v3421_v12 = vperm.slane %v3293_v3, 0 }
 0x26c   : > { %2929 = vst.msk [vmem:[%s5330_s29 + $0x80] sm:$0xff] %vm278_vm0, %v2897_v36  ;;  %v2794_v29 = vadd.f32 %v2732_v22, %v2519_v37  ;;  %v1695_v3 = vadd.f32 %v5177_v30, %v5171_v2 }
 0x26d   : > { %v3422_v40 = vperm.slane %v3294_v21, 0  ;;  %v3423_v46 = vperm.slane %v3295_v32, 0  ;;  %v3488_v20 = vsel %vm3463_vm6, %v3421_v12, %v3487_v62  ;;  %v3424_v4 = vperm.slane %v3296_v34, 0 }
 0x26e   : > { %v2830_v35 = vmul.f32 %v5311_v6, %v2794_v29 }
 0x26f   : > { %v2185_v9 = vpop.f32.mrf.mxu2  ;;  %v3489_v31 = vsel %vm3465_vm7, %v3422_v40, %v3488_v20 }
 0x270   : > { %v2245_v13 = vadd.f32 %v2185_v9, %v1967_v17  ;;  %v1910_v61 = vpop.f32.mrf.mxu1  ;;  %v2460_v53 = vpop.f32.mrf.mxu3  ;;  %v3490_v47 = vsel %vm3467_vm8, %v3423_v46, %v3489_v31  ;;  %v2866_v44 = vadd.f32 %v5319_v63, %v2830_v35 }
 0x271   : > { %v3491_v5 = vsel %vm3469_vm9, %v3424_v4, %v3490_v47  ;;  %v2735_v6 = vpop.f32.mrf.mxu0  ;;  %v1968_v23 = vadd.f32 %v1910_v61, %v1693_v59 }
 0x272   : > { %v2520_v55 = vadd.f32 %v2460_v53, %v2245_v13  ;;  %3531 = vst.msk [vmem:[%s5405_s7 + $0x18] sm:$0xff] %vm278_vm0, %v3491_v5  ;;  %v2898_v19 = vmax.f32 %v2866_v44, 0.0 }
 0x274   : > { %2930 = vst.msk [vmem:[%s5330_s29 + $0x88] sm:$0xff] %vm278_vm0, %v2898_v19  ;;  %v2795_v8 = vadd.f32 %v2735_v6, %v2520_v55 }
 0x276   : > { %v2831_v48 = vmul.f32 %v5570_v45, %v2795_v8 }
 0x277   : > { %v2188_v49 = vpop.f32.mrf.mxu2 }
 0x278   : > { %v2246_v33 = vadd.f32 %v2188_v49, %v1968_v23  ;;  %v1913_v0 = vpop.f32.mrf.mxu1  ;;  %v2463_v56 = vpop.f32.mrf.mxu3  ;;  %v2867_v24 = vadd.f32 %v5319_v63, %v2831_v48 }
 0x279   : > { %v2738_v60 = vpop.f32.mrf.mxu0  ;;  %v1969_v14 = vadd.f32 %v1913_v0, %v1694_v54 }
 0x27a   : > { %v2521_v57 = vadd.f32 %v2463_v56, %v2246_v33  ;;  %v2899_v7 = vmax.f32 %v2867_v24, 0.0 }
 0x27c   : > { %2931 = vst.msk [vmem:[%s5330_s29 + $0x90] sm:$0xff] %vm278_vm0, %v2899_v7  ;;  %v2953_v18 = vmax.f32 %v2897_v36, %v2899_v7  ;;  %v2796_v52 = vadd.f32 %v2738_v60, %v2521_v57 }
 0x27e   : > { %v3001_v51 = vrot.slane %v2953_v18, 2  ;;  %v3002_v50 = vrot.slane %v2953_v18, 4  ;;  %v3003_v43 = vrot.slane %v2953_v18, 6  ;;  %v4214_v26 = vrot.slane %v2953_v18, 9 }
 0x27f   : > { %v2191_v16 = vpop.f32.mrf.mxu2  ;;  %v2832_v63 = vmul.f32 %v5570_v45, %v2796_v52 }
 0x280   : > { %v1916_v28 = vpop.f32.mrf.mxu1  ;;  %v2466_v58 = vpop.f32.mrf.mxu3  ;;  %v2247_v42 = vadd.f32 %v2191_v16, %v1969_v14  ;;  %v4215_v10 = vrot.slane %v3001_v51, 9  ;;  %v4216_v37 = vrot.slane %v3002_v50, 9  ;;  %v3297_v1 = vmax.f32 %v2953_v18, %v4214_v26 }
 0x281   : > { %v2868_v41 = vadd.f32 %v5582_v25, %v2832_v63  ;;  %v4217_v36 = vrot.slane %v3003_v43, 9  ;;  %v2741_v34 = vpop.f32.mrf.mxu0  ;;  %v1970_v12 = vadd.f32 %v1916_v28, %v1695_v3 }
 0x282   : > { %v2522_v39 = vadd.f32 %v2466_v58, %v2247_v42  ;;  %v3298_v38 = vmax.f32 %v3001_v51, %v4215_v10  ;;  %v3299_v21 = vmax.f32 %v3002_v50, %v4216_v37  ;;  %v3425_v29 = vperm.slane %v3297_v1, 0  ;;  %v5830_v42 = vld [vmem:[#allocation3_spill] sm:$0xff] }
 0x283   : > { %v2900_v32 = vmax.f32 %v2868_v41, 0.0  ;;  %v3300_v46 = vmax.f32 %v3003_v43, %v4217_v36  ;;  %v1697_v10 = vadd.f32 %v5830_v42, %v5195_v27  ;;  %v5831_v27 = vld [vmem:[#allocation4_spill] sm:$0xff] }
 0x284   : > { %v3426_v22 = vperm.slane %v3298_v38, 0  ;;  %v2797_v17 = vadd.f32 %v2741_v34, %v2522_v39  ;;  %v3427_v9 = vperm.slane %v3299_v21, 0 }
 0x285   : > { %2932 = vst.msk [vmem:[%s5330_s29 + $0x98] sm:$0xff] %vm278_vm0, %v2900_v32  ;;  %v2954_v62 = vmax.f32 %v2898_v19, %v2900_v32  ;;  %v1696_v19 = vadd.f32 %v5189_v15, %v5183_v11  ;;  %v3428_v49 = vperm.slane %v3300_v46, 0 }
 0x286   : > { %v2833_v20 = vmul.f32 %v5570_v45, %v2797_v17  ;;  %v3492_v30 = vsel %vm3457_vm3, %v3426_v22, %v3425_v29  ;;  %v5832_v17 = vld [vmem:[#allocation23_spill] sm:$0xff] }
 0x287   : > { %v2194_v40 = vpop.f32.mrf.mxu2  ;;  %v3004_v61 = vrot.slane %v2954_v62, 2  ;;  %v3005_v53 = vrot.slane %v2954_v62, 4  ;;  %v3006_v4 = vrot.slane %v2954_v62, 6  ;;  %v4218_v31 = vrot.slane %v2954_v62, 9 }
 0x288   : > { %v2248_v35 = vadd.f32 %v2194_v40, %v1970_v12  ;;  %v1919_v13 = vpop.f32.mrf.mxu1  ;;  %v2469_v2 = vpop.f32.mrf.mxu3  ;;  %v2869_v47 = vadd.f32 %v5582_v25, %v2833_v20  ;;  %v3493_v6 = vsel %vm3459_vm4, %v3427_v9, %v3492_v30  ;;  %v1698_v29 = vadd.f32 %v5832_v17, %v5831_v27 }
 0x289   : > { %v4219_v44 = vrot.slane %v3004_v61, 9  ;;  %v4220_v55 = vrot.slane %v3005_v53, 9  ;;  %v4221_v5 = vrot.slane %v3006_v4, 9  ;;  %v3301_v23 = vmax.f32 %v2954_v62, %v4218_v31  ;;  %v2744_v56 = vpop.f32.mrf.mxu0 }
 0x28a   : > { %v2523_v59 = vadd.f32 %v2469_v2, %v2248_v35  ;;  %v2901_v8 = vmax.f32 %v2869_v47, 0.0  ;;  %v1971_v57 = vadd.f32 %v1919_v13, %v1696_v19  ;;  %v3494_v54 = vsel %vm3461_vm5, %v3428_v49, %v3493_v6  ;;  %v5833_v19 = vld [vmem:[#allocation6_spill] sm:$0xff]  ;;  %v5834_v6 = vld [vmem:[#allocation7_spill] sm:$0xff] }
 0x28b   : > { %v3302_v48 = vmax.f32 %v3004_v61, %v4219_v44  ;;  %v3303_v33 = vmax.f32 %v3005_v53, %v4220_v55  ;;  %v3304_v0 = vmax.f32 %v3006_v4, %v4221_v5  ;;  %v3429_v24 = vperm.slane %v3301_v23, 0 }
 0x28c   : > { %2933 = vst.msk [vmem:[%s5330_s29 + $0xa0] sm:$0xff] %vm278_vm0, %v2901_v8  ;;  %v2798_v7 = vadd.f32 %v2744_v56, %v2523_v59  ;;  %v1699_v23 = vadd.f32 %v5834_v6, %v5833_v19 }
 0x28d   : > { %v3430_v60 = vperm.slane %v3302_v48, 0  ;;  %v3431_v18 = vperm.slane %v3303_v33, 0  ;;  %v3495_v15 = vsel %vm3463_vm6, %v3429_v24, %v3494_v54  ;;  %v3432_v50 = vperm.slane %v3304_v0, 0 }
 0x28e   : > { %v2834_v52 = vmul.f32 %v5570_v45, %v2798_v7 }
 0x28f   : > { %v2197_v11 = vpop.f32.mrf.mxu2  ;;  %v3496_v43 = vsel %vm3465_vm7, %v3430_v60, %v3495_v15 }
 0x290   : > { %v2249_v14 = vadd.f32 %v2197_v11, %v1971_v57  ;;  %v1922_v16 = vpop.f32.mrf.mxu1  ;;  %v2472_v51 = vpop.f32.mrf.mxu3  ;;  %v3497_v26 = vsel %vm3467_vm8, %v3431_v18, %v3496_v43  ;;  %v2870_v28 = vadd.f32 %v5582_v25, %v2834_v52 }
 0x291   : > { %v3498_v63 = vsel %vm3469_vm9, %v3432_v50, %v3497_v26  ;;  %v2747_v1 = vpop.f32.mrf.mxu0  ;;  %v1972_v41 = vadd.f32 %v1922_v16, %v1697_v10 }
 0x292   : > { %v2524_v58 = vadd.f32 %v2472_v51, %v2249_v14  ;;  %3532 = vst.msk [vmem:[%s5405_s7 + $0x20] sm:$0xff] %vm278_vm0, %v3498_v63  ;;  %v2902_v37 = vmax.f32 %v2870_v28, 0.0 }
 0x294   : > { %2934 = vst.msk [vmem:[%s5330_s29 + $0xa8] sm:$0xff] %vm278_vm0, %v2902_v37  ;;  %v2799_v39 = vadd.f32 %v2747_v1, %v2524_v58  ;;  %v5835_v1 = vld [vmem:[#allocation26_spill] sm:$0xff] }
 0x296   : > { %v2835_v36 = vmul.f32 %v5570_v45, %v2799_v39 }
 0x297   : > { %v2200_v3 = vpop.f32.mrf.mxu2 }
 0x298   : > { %v2250_v38 = vadd.f32 %v2200_v3, %v1972_v41  ;;  %v1925_v21 = vpop.f32.mrf.mxu1  ;;  %v2475_v32 = vpop.f32.mrf.mxu3  ;;  %v2871_v34 = vadd.f32 %v5582_v25, %v2835_v36  ;;  %v5836_v41 = vld [vmem:[#allocation9_spill] sm:$0xff] }
 0x299   : > { %v2750_v62 = vpop.f32.mrf.mxu0  ;;  %v1973_v9 = vadd.f32 %v1925_v21, %v1698_v29  ;;  %v1700_v39 = vadd.f32 %v5836_v41, %v5835_v1 }
 0x29a   : > { %v2525_v22 = vadd.f32 %v2475_v32, %v2250_v38  ;;  %v2903_v12 = vmax.f32 %v2871_v34, 0.0 }
 0x29c   : > { %2935 = vst.msk [vmem:[%s5330_s29 + $0xb0] sm:$0xff] %vm278_vm0, %v2903_v12  ;;  %v2955_v40 = vmax.f32 %v2901_v8, %v2903_v12  ;;  %v2800_v46 = vadd.f32 %v2750_v62, %v2525_v22 }
 0x29e   : > { %v3007_v35 = vrot.slane %v2955_v40, 2  ;;  %v3008_v13 = vrot.slane %v2955_v40, 4  ;;  %v3009_v2 = vrot.slane %v2955_v40, 6  ;;  %v4222_v30 = vrot.slane %v2955_v40, 9 }
 0x29f   : > { %v2203_v20 = vpop.f32.mrf.mxu2  ;;  %v2836_v4 = vmul.f32 %v5570_v45, %v2800_v46 }
 0x2a0   : > { %v1928_v61 = vpop.f32.mrf.mxu1  ;;  %v2478_v53 = vpop.f32.mrf.mxu3  ;;  %v2251_v31 = vadd.f32 %v2203_v20, %v1973_v9  ;;  %v4223_v47 = vrot.slane %v3007_v35, 9  ;;  %v4224_v44 = vrot.slane %v3008_v13, 9  ;;  %v3305_v55 = vmax.f32 %v2955_v40, %v4222_v30 }
 0x2a1   : > { %v2872_v5 = vadd.f32 %v5582_v25, %v2836_v4  ;;  %v4225_v8 = vrot.slane %v3009_v2, 9  ;;  %v2753_v0 = vpop.f32.mrf.mxu0  ;;  %v1974_v24 = vadd.f32 %v1928_v61, %v1699_v23 }
 0x2a2   : > { %v2526_v59 = vadd.f32 %v2478_v53, %v2251_v31  ;;  %v3306_v49 = vmax.f32 %v3007_v35, %v4223_v47  ;;  %v3307_v48 = vmax.f32 %v3008_v13, %v4224_v44  ;;  %v3433_v7 = vperm.slane %v3305_v55, 0  ;;  %v5837_v55 = vld [vmem:[#allocation10_spill] sm:$0xff] }
 0x2a3   : > { %v2904_v33 = vmax.f32 %v2872_v5, 0.0  ;;  %v3308_v18 = vmax.f32 %v3009_v2, %v4225_v8  ;;  %v5838_v5 = vld [vmem:[#allocation5_spill] sm:$0xff] }
 0x2a4   : > { %v3434_v56 = vperm.slane %v3306_v49, 0  ;;  %v2801_v57 = vadd.f32 %v2753_v0, %v2526_v59  ;;  %v3435_v11 = vperm.slane %v3307_v48, 0  ;;  %v1701_v59 = vadd.f32 %v5838_v5, %v5837_v55 }
 0x2a5   : > { %2936 = vst.msk [vmem:[%s5330_s29 + $0xb8] sm:$0xff] %vm278_vm0, %v2904_v33  ;;  %v2956_v54 = vmax.f32 %v2902_v37, %v2904_v33  ;;  %v3436_v21 = vperm.slane %v3308_v18, 0 }
 0x2a6   : > { %v2837_v15 = vmul.f32 %v5570_v45, %v2801_v57  ;;  %v3499_v51 = vsel %vm3457_vm3, %v3434_v56, %v3433_v7 }
 0x2a7   : > { %v2206_v60 = vpop.f32.mrf.mxu2  ;;  %v3010_v50 = vrot.slane %v2956_v54, 2  ;;  %v3011_v43 = vrot.slane %v2956_v54, 4  ;;  %v3012_v26 = vrot.slane %v2956_v54, 6  ;;  %v4226_v28 = vrot.slane %v2956_v54, 9 }
 0x2a8   : > { %v2252_v52 = vadd.f32 %v2206_v60, %v1974_v24  ;;  %v1931_v14 = vpop.f32.mrf.mxu1  ;;  %v2481_v16 = vpop.f32.mrf.mxu3  ;;  %v2873_v58 = vadd.f32 %v5582_v25, %v2837_v15  ;;  %v3500_v3 = vsel %vm3459_vm4, %v3435_v11, %v3499_v51  ;;  %v5840_v60 = vld [vmem:[#allocation13_spill] sm:$0xff] }
 0x2a9   : > { %v4227_v63 = vrot.slane %v3010_v50, 9  ;;  %v4228_v42 = vrot.slane %v3011_v43, 9  ;;  %v4229_v10 = vrot.slane %v3012_v26, 9  ;;  %v3309_v36 = vmax.f32 %v2956_v54, %v4226_v28  ;;  %v2756_v12 = vpop.f32.mrf.mxu0  ;;  %v5839_v54 = vld [vmem:[#allocation12_spill] sm:$0xff] }
 0x2aa   : > { %v2527_v37 = vadd.f32 %v2481_v16, %v2252_v52  ;;  %v2905_v38 = vmax.f32 %v2873_v58, 0.0  ;;  %v1975_v17 = vadd.f32 %v1931_v14, %v1700_v39  ;;  %v3501_v62 = vsel %vm3461_vm5, %v3436_v21, %v3500_v3  ;;  %v5841_v3 = vld [vmem:[#allocation8_spill] sm:$0xff] }
 0x2ab   : > { %v3310_v32 = vmax.f32 %v3010_v50, %v4227_v63  ;;  %v3311_v34 = vmax.f32 %v3011_v43, %v4228_v42  ;;  %v3312_v22 = vmax.f32 %v3012_v26, %v4229_v10  ;;  %v3437_v27 = vperm.slane %v3309_v36, 0  ;;  %v5842_v36 = vld [vmem:[#allocation15_spill] sm:$0xff] }
 0x2ac   : > { %2937 = vst.msk [vmem:[%s5330_s29 + $0xc0] sm:$0xff] %vm278_vm0, %v2905_v38  ;;  %v2802_v29 = vadd.f32 %v2756_v12, %v2527_v37  ;;  %v1702_v18 = vadd.f32 %v5840_v60, %v5839_v54 }
 0x2ad   : > { %v3438_v40 = vperm.slane %v3310_v32, 0  ;;  %v3439_v46 = vperm.slane %v3311_v34, 0  ;;  %v3502_v20 = vsel %vm3463_vm6, %v3437_v27, %v3501_v62  ;;  %v3440_v61 = vperm.slane %v3312_v22, 0 }
 0x2ae   : > { %v2838_v35 = vmul.f32 %v5570_v45, %v2802_v29 }
 0x2af   : > { %v2209_v9 = vpop.f32.mrf.mxu2  ;;  %v3503_v53 = vsel %vm3465_vm7, %v3438_v40, %v3502_v20 }
 0x2b0   : > { %v2253_v13 = vadd.f32 %v2209_v9, %v1975_v17  ;;  %v1934_v2 = vpop.f32.mrf.mxu1  ;;  %v2484_v30 = vpop.f32.mrf.mxu3  ;;  %v3504_v4 = vsel %vm3467_vm8, %v3439_v46, %v3503_v53  ;;  %v2874_v31 = vadd.f32 %v5582_v25, %v2838_v35 }
 0x2b1   : > { %v3505_v44 = vsel %vm3469_vm9, %v3440_v61, %v3504_v4  ;;  %v2759_v6 = vpop.f32.mrf.mxu0  ;;  %v1976_v23 = vadd.f32 %v1934_v2, %v1701_v59 }
 0x2b2   : > { %v2528_v47 = vadd.f32 %v2484_v30, %v2253_v13  ;;  %3533 = vst.msk [vmem:[%s5405_s7 + $0x28] sm:$0xff] %vm278_vm0, %v3505_v44  ;;  %v2906_v19 = vmax.f32 %v2874_v31, 0.0 }
 0x2b4   : > { %2938 = vst.msk [vmem:[%s5330_s29 + $0xc8] sm:$0xff] %vm278_vm0, %v2906_v19  ;;  %v2803_v8 = vadd.f32 %v2759_v6, %v2528_v47  ;;  %v5843_v6 = vld [vmem:[#allocation16_spill] sm:$0xff] }
 0x2b6   : > { %v2839_v48 = vmul.f32 %v5570_v45, %v2803_v8 }
 0x2b7   : > { %v2212_v49 = vpop.f32.mrf.mxu2 }
 0x2b8   : > { %v2254_v33 = vadd.f32 %v2212_v49, %v1976_v23  ;;  %v1937_v0 = vpop.f32.mrf.mxu1  ;;  %v2487_v56 = vpop.f32.mrf.mxu3  ;;  %v2875_v24 = vadd.f32 %v5582_v25, %v2839_v48  ;;  %v5844_v23 = vld [vmem:[#allocation11_spill] sm:$0xff] }
 0x2b9   : > { %v2762_v11 = vpop.f32.mrf.mxu0  ;;  %v1977_v14 = vadd.f32 %v1937_v0, %v1702_v18  ;;  %v1704_v8 = vadd.f32 %v5844_v23, %v5843_v6 }
 0x2ba   : > { %v2529_v57 = vadd.f32 %v2487_v56, %v2254_v33  ;;  %v2907_v7 = vmax.f32 %v2875_v24, 0.0 }
 0x2bc   : > { %2939 = vst.msk [vmem:[%s5330_s29 + $0xd0] sm:$0xff] %vm278_vm0, %v2907_v7  ;;  %v2957_v15 = vmax.f32 %v2905_v38, %v2907_v7  ;;  %v2804_v52 = vadd.f32 %v2762_v11, %v2529_v57  ;;  %v1703_v38 = vadd.f32 %v5842_v36, %v5841_v3 }
 0x2be   : > { %v3013_v51 = vrot.slane %v2957_v15, 2  ;;  %v3014_v50 = vrot.slane %v2957_v15, 4  ;;  %v3015_v43 = vrot.slane %v2957_v15, 6  ;;  %v4230_v26 = vrot.slane %v2957_v15, 9 }
 0x2bf   : > { %v2215_v16 = vpop.f32.mrf.mxu2  ;;  %v2840_v63 = vmul.f32 %v5570_v45, %v2804_v52 }
 0x2c0   : > { %v1940_v28 = vpop.f32.mrf.mxu1  ;;  %v2490_v58 = vpop.f32.mrf.mxu3  ;;  %v2255_v42 = vadd.f32 %v2215_v16, %v1977_v14  ;;  %v4231_v10 = vrot.slane %v3013_v51, 9  ;;  %v4232_v37 = vrot.slane %v3014_v50, 9  ;;  %v3313_v1 = vmax.f32 %v2957_v15, %v4230_v26 }
 0x2c1   : > { %v2876_v41 = vadd.f32 %v5582_v25, %v2840_v63  ;;  %v4233_v21 = vrot.slane %v3015_v43, 9  ;;  %v2765_v12 = vpop.f32.mrf.mxu0  ;;  %v1978_v17 = vadd.f32 %v1940_v28, %v1703_v38 }
 0x2c2   : > { %v2530_v39 = vadd.f32 %v2490_v58, %v2255_v42  ;;  %v3314_v32 = vmax.f32 %v3013_v51, %v4231_v10  ;;  %v3315_v34 = vmax.f32 %v3014_v50, %v4232_v37  ;;  %v3441_v62 = vperm.slane %v3313_v1, 0  ;;  %v5845_v1 = vld [vmem:[#allocation18_spill] sm:$0xff] }
 0x2c3   : > { %v2908_v22 = vmax.f32 %v2876_v41, 0.0  ;;  %v3316_v9 = vmax.f32 %v3015_v43, %v4233_v21  ;;  %v5846_v41 = vld [vmem:[#allocation19_spill] sm:$0xff] }
 0x2c4   : > { %v3442_v27 = vperm.slane %v3314_v32, 0  ;;  %v2805_v29 = vadd.f32 %v2765_v12, %v2530_v39  ;;  %v3443_v20 = vperm.slane %v3315_v34, 0  ;;  %v1705_v39 = vadd.f32 %v5846_v41, %v5845_v1 }
 0x2c5   : > { %2940 = vst.msk [vmem:[%s5330_s29 + $0xd8] sm:$0xff] %vm278_vm0, %v2908_v22  ;;  %v2958_v40 = vmax.f32 %v2906_v19, %v2908_v22  ;;  %v3444_v0 = vperm.slane %v3316_v9, 0 }
 0x2c6   : > { %v2841_v35 = vmul.f32 %v5570_v45, %v2805_v29  ;;  %v3506_v30 = vsel %vm3457_vm3, %v3442_v27, %v3441_v62 }
 0x2c7   : > { %v2218_v46 = vpop.f32.mrf.mxu2  ;;  %v3016_v61 = vrot.slane %v2958_v40, 2  ;;  %v3017_v53 = vrot.slane %v2958_v40, 4  ;;  %v3018_v4 = vrot.slane %v2958_v40, 6  ;;  %v4234_v47 = vrot.slane %v2958_v40, 9 }
 0x2c8   : > { %v2256_v13 = vadd.f32 %v2218_v46, %v1978_v17  ;;  %v2493_v2 = vpop.f32.mrf.mxu3  ;;  %v1943_v31 = vpop.f32.mrf.mxu1  ;;  %v2877_v44 = vadd.f32 %v5582_v25, %v2841_v35  ;;  %v3507_v49 = vsel %vm3459_vm4, %v3443_v20, %v3506_v30 }
 0x2c9   : > { %v4235_v55 = vrot.slane %v3016_v61, 9  ;;  %v4236_v5 = vrot.slane %v3017_v53, 9  ;;  %v4237_v59 = vrot.slane %v3018_v4, 9  ;;  %v3317_v48 = vmax.f32 %v2958_v40, %v4234_v47  ;;  %v2768_v7 = vpop.f32.mrf.mxu0 }
 0x2ca   : > { %v2531_v19 = vadd.f32 %v2493_v2, %v2256_v13  ;;  %v2909_v33 = vmax.f32 %v2877_v44, 0.0  ;;  %v1979_v60 = vadd.f32 %v1943_v31, %v1704_v8  ;;  %v3508_v11 = vsel %vm3461_vm5, %v3444_v0, %v3507_v49 }
 0x2cb   : > { %v3318_v56 = vmax.f32 %v3016_v61, %v4235_v55  ;;  %v3319_v24 = vmax.f32 %v3017_v53, %v4236_v5  ;;  %v3320_v57 = vmax.f32 %v3018_v4, %v4237_v59  ;;  %v3445_v54 = vperm.slane %v3317_v48, 0 }
 0x2cc   : > { %2941 = vst.msk [vmem:[%s5330_s29 + $0xe0] sm:$0xff] %vm278_vm0, %v2909_v33  ;;  %v2806_v18 = vadd.f32 %v2768_v7, %v2531_v19 }
 0x2cd   : > { %v3446_v15 = vperm.slane %v3318_v56, 0  ;;  %v3447_v52 = vperm.slane %v3319_v24, 0  ;;  %v3509_v16 = vsel %vm3463_vm6, %v3445_v54, %v3508_v11  ;;  %v3448_v26 = vperm.slane %v3320_v57, 0 }
 0x2ce   : > { %v2842_v51 = vmul.f32 %v5570_v45, %v2806_v18 }
 0x2cf   : > { %v2221_v14 = vpop.f32.mrf.mxu2  ;;  %v3510_v28 = vsel %vm3465_vm7, %v3446_v15, %v3509_v16 }
 0x2d0   : > { %v2257_v50 = vadd.f32 %v2221_v14, %v1979_v60  ;;  %v2496_v43 = vpop.f32.mrf.mxu3  ;;  %v3511_v58 = vsel %vm3467_vm8, %v3447_v52, %v3510_v28  ;;  %v2878_v63 = vadd.f32 %v5582_v25, %v2842_v51  ;;  %v1946_v37 = vpop.f32.mrf.mxu1 }
 0x2d1   : > { %v3512_v10 = vsel %vm3469_vm9, %v3448_v26, %v3511_v58  ;;  %v2771_v36 = vpop.f32.mrf.mxu0  ;;  %v1980_v38 = vadd.f32 %v1946_v37, %v1705_v39 }
 0x2d2   : > { %v2532_v42 = vadd.f32 %v2496_v43, %v2257_v50  ;;  %3534 = vst.msk [vmem:[%s5405_s7 + $0x30] sm:$0xff] %vm278_vm0, %v3512_v10  ;;  %v2910_v3 = vmax.f32 %v2878_v63, 0.0 }
 0x2d4   : > { %2942 = vst.msk [vmem:[%s5330_s29 + $0xe8] sm:$0xff] %vm278_vm0, %v2910_v3  ;;  %v2807_v21 = vadd.f32 %v2771_v36, %v2532_v42 }
 0x2d6   : > { %v2843_v34 = vmul.f32 %v5570_v45, %v2807_v21 }
 0x2d7   : > { %v2224_v32 = vpop.f32.mrf.mxu2 }
 0x2d8   : > { %v2258_v22 = vadd.f32 %v2224_v32, %v1980_v38  ;;  %v2499_v12 = vpop.f32.mrf.mxu3  ;;  %v2879_v27 = vadd.f32 %v5582_v25, %v2843_v34 }
 0x2d9   : > { %v2774_v62 = vpop.f32.mrf.mxu0 }
 0x2da   : > { %v2533_v17 = vadd.f32 %v2499_v12, %v2258_v22  ;;  %v2911_v29 = vmax.f32 %v2879_v27, 0.0 }
 0x2dc   : > { %2943 = vst.msk [vmem:[%s5330_s29 + $0xf0] sm:$0xff] %vm278_vm0, %v2911_v29  ;;  %v2959_v40 = vmax.f32 %v2909_v33, %v2911_v29  ;;  %v2808_v46 = vadd.f32 %v2774_v62, %v2533_v17 }
 0x2de   : > { %v3019_v9 = vrot.slane %v2959_v40, 2  ;;  %v3020_v20 = vrot.slane %v2959_v40, 4  ;;  %v3021_v35 = vrot.slane %v2959_v40, 6  ;;  %v4238_v13 = vrot.slane %v2959_v40, 9 }
 0x2df   : > { %v2844_v2 = vmul.f32 %v5570_v45, %v2808_v46 }
 0x2e0   : > { %v4239_v30 = vrot.slane %v3019_v9, 9  ;;  %v4240_v61 = vrot.slane %v3020_v20, 9  ;;  %v3321_v53 = vmax.f32 %v2959_v40, %v4238_v13  ;;  %v4241_v31 = vrot.slane %v3021_v35, 9 }
 0x2e1   : > { %v2880_v4 = vadd.f32 %v5582_v25, %v2844_v2 }
 0x2e2   : > { %v3322_v47 = vmax.f32 %v3019_v9, %v4239_v30  ;;  %v3323_v44 = vmax.f32 %v3020_v20, %v4240_v61  ;;  %v3449_v59 = vperm.slane %v3321_v53, 0  ;;  %v3324_v6 = vmax.f32 %v3021_v35, %v4241_v31 }
 0x2e3   : > { %v2912_v55 = vmax.f32 %v2880_v4, 0.0 }
 0x2e4   : > { %v3450_v5 = vperm.slane %v3322_v47, 0  ;;  %v3451_v23 = vperm.slane %v3323_v44, 0  ;;  %v3452_v7 = vperm.slane %v3324_v6, 0 }
 0x2e5   : > { %2944 = vst.msk [vmem:[%s5330_s29 + $0xf8] sm:$0xff] %vm278_vm0, %v2912_v55  ;;  %v2960_v19 = vmax.f32 %v2910_v3, %v2912_v55 }
 0x2e6   : > { %v3513_v8 = vsel %vm3457_vm3, %v3450_v5, %v3449_v59 }
 0x2e7   : > { %v3022_v49 = vrot.slane %v2960_v19, 2  ;;  %v3023_v45 = vrot.slane %v2960_v19, 4  ;;  %v3024_v48 = vrot.slane %v2960_v19, 6  ;;  %v4242_v33 = vrot.slane %v2960_v19, 9 }
 0x2e8   : > { %v3514_v24 = vsel %vm3459_vm4, %v3451_v23, %v3513_v8 }
 0x2e9   : > { %v4243_v0 = vrot.slane %v3022_v49, 9  ;;  %v4244_v56 = vrot.slane %v3023_v45, 9  ;;  %v4245_v25 = vrot.slane %v3024_v48, 9  ;;  %v3325_v57 = vmax.f32 %v2960_v19, %v4242_v33 }
 0x2ea   : > { %v3515_v15 = vsel %vm3461_vm5, %v3452_v7, %v3514_v24 }
 0x2eb   : > { %v3326_v54 = vmax.f32 %v3022_v49, %v4243_v0  ;;  %v3327_v60 = vmax.f32 %v3023_v45, %v4244_v56  ;;  %v3328_v18 = vmax.f32 %v3024_v48, %v4245_v25  ;;  %v3453_v11 = vperm.slane %v3325_v57, 0 }
 0x2ed   : > { %v3454_v52 = vperm.slane %v3326_v54, 0  ;;  %v3455_v14 = vperm.slane %v3327_v60, 0  ;;  %v3516_v16 = vsel %vm3463_vm6, %v3453_v11, %v3515_v15  ;;  %v3456_v51 = vperm.slane %v3328_v18, 0 }
 0x2ef   : > { %v3517_v50 = vsel %vm3465_vm7, %v3454_v52, %v3516_v16 }
 0x2f0   : > { %v3518_v43 = vsel %vm3467_vm8, %v3455_v14, %v3517_v50 }
 0x2f1   : > { %v3519_v26 = vsel %vm3469_vm9, %v3456_v51, %v3518_v43 }
 0x2f2   : > { %3535 = vst.msk [vmem:[%s5405_s7 + $0x38] sm:$0xff] %vm278_vm0, %v3519_v26 }
 0x2f3 PF: > { %s16_s20 = sadd.s32 1, %s4305_s20   ;;  %s5847_s18 = smov %s4301_s19 }
 0x2f4   : > { %p13_p5 = scmp.ge.s32.totalorder %s16_s20, 4   ;;  %s5848_s19 = smov %s5850_s21 }
 0x2f6   :  { %15 = sbr.rel (!%p13_p5) target bundleno = 2 (0x2), region = 95 }

// kernel: encoder_forward.10
= control target key start
LH: loop header
LB: loop body
LE: loop exit
PB: predicated region body
PF: predicated region fallthrough
CT: control target
= control target key end

     0   :  { %s964_s15 = smov 0   ;;  %s966_s16 = smov 0   ;;  %s1106_s0 = inlined_call_operand.vmem [shape: f32[2,4,4,16], index: 0, kind: input, shape index: {}]   ;;  %s1107_s1 = inlined_call_operand.vmem [shape: f32[9,16,32], index: 1, kind: input, shape index: {}]   ;;  %s1108_s2 = inlined_call_operand.vmem [shape: f32[1,32], index: 2, kind: input, shape index: {}]   ;;  %s1109_s3 = inlined_call_operand.vmem [shape: f32[1,32], index: 3, kind: input, shape index: {}]   ;;  %s1110_s4 = inlined_call_operand.vmem [shape: f32[2,4,4,32], index: 4, kind: output, shape index: {}]  }
   0x1   :  { %s968_s17 = smov 0  }
   0x2 LB: > { %s26_s18 = sadd.s32 1, %s932_s16  ;;  %p818_p0 = scmp.ge.s32.totalorder %s936_s17, 1  ;;  %s936_s17 = sphi %s968_s17, %s14_s17   ;;  %s932_s16 = sphi %s966_s16, %s1112_s16   ;;  %s928_s15 = sphi %s964_s15, %s1111_s15  }
   0x3   : > { %p28_p1 = scmp.ge.s32.totalorder %s26_s18, 2  ;;  %p176_p2 = scmp.lt.s32.totalorder %s936_s17, 3 }
   0x5   : > { %s1114_s18 = smov (%p28_p1, %s26_s18), 0  ;;  %p177_p3 = pnand %p818_p0, %p176_p2 }
   0x6   : > { %p206_p4 = scmp.lt.s32.totalorder (!%p177_p3), %s928_s15, 1 }
   0x7   : > { %180 = sbr.rel (%p177_p3) target bundleno = 254 (0xfe), region = 36 }
   0xc   : > { %v824_v0 = vld [vmem:[%s1107_s1 + $0x18] sm:$0xff]  ;;  %v823_v1 = vld [vmem:[%s1107_s1 + $0x10] sm:$0xff]  ;;  %v830_v2 = vld [vmem:[%s1107_s1 + $0x28] sm:$0xff]  ;;  %vm225_vm0 = vcmask 128000   ;;  %vm229_vm1 = vcmask 122880   ;;  %s1116_s15 = smov (!%p206_p4, %s928_s15), 1 }
   0xd   : > { %885 = vmatpush.msra.mxu1 %v824_v0  ;;  %387 = vmatpush.msra.mxu2 %v830_v2  ;;  %v260_v3 = vld [vmem:[%s1107_s1 + $0x8] sm:$0xff]  ;;  %v829_v4 = vld [vmem:[%s1107_s1 + $0x20] sm:$0xff]  ;;  %v838_v5 = vld [vmem:[%s1107_s1 + $0x38] sm:$0xff]  ;;  %v938_v6 = vmov 0.0   ;;  %s883_s5 = sshll.u32 %s1116_s15, 4  ;;  %vm247_vm2 = vcmask 125952  }
   0xe   : > { %300 = vmatpush.msra.mxu0 %v824_v0  ;;  %439 = vmatpush.msra.mxu3 %v838_v5  ;;  %226 = vst.msk [vmem:[#allocation2] sm:$0x3f] %vm225_vm0, %v938_v6  ;;  %s1011_s8 = scalar_lea.vmem %s1106_s0, %s883_s5  ;;  %v259_v11 = vld [vmem:[%s1107_s1] sm:$0xff]  ;;  %v837_v12 = vld [vmem:[%s1107_s1 + $0x30] sm:$0xff]  ;;  %vm281_vm3 = vcmask 130048   ;;  %v846_v16 = vld [vmem:[%s1107_s1 + $0x48] sm:$0xff]  ;;  %s219_s22 = scalar_lea.vmem %s1110_s4, %s883_s5 }
   0xf   : > { %886 = vmatpush.msra.mxu1 %v823_v1  ;;  %388 = vmatpush.msra.mxu2 %v829_v4  ;;  %230 = vst.msk [vmem:[#allocation2] sm:$0x1] %vm229_vm1, %v938_v6  ;;  %v243_v7 = vld [vmem:[%s1011_s8 + $0x4] sm:$0xf]  ;;  %v244_v8 = vld [vmem:[%s1011_s8 + $0x8] sm:$0xf] }
  0x10   : > { %231 = vst.msk [vmem:[#allocation2 + $0x8] sm:$0x1] %vm229_vm1, %v938_v6  ;;  %301 = vmatpush.msra.mxu0 %v823_v1  ;;  %v242_v9 = vld [vmem:[%s1011_s8] sm:$0xf]  ;;  %440 = vmatpush.msra.mxu3 %v837_v12  ;;  %v245_v18 = vld [vmem:[%s1011_s8 + $0xc] sm:$0xf] }
  0x11   : > { %340 = vmatpush.msrb.mxu1 %v260_v3  ;;  %236 = vst.msk [vmem:[#allocation2 + $0x5] sm:$0x1] %vm229_vm1, %v938_v6  ;;  %v845_v17 = vld [vmem:[%s1107_s1 + $0x40] sm:$0xff]  ;;  %v854_v25 = vld [vmem:[%s1107_s1 + $0x58] sm:$0xff]  ;;  %v862_v26 = vld [vmem:[%s1107_s1 + $0x68] sm:$0xff]  ;;  %vm718_vm4 = vcmask 257024  }
  0x12   : > { %237 = vst.msk [vmem:[#allocation2 + $0xd] sm:$0x1] %vm229_vm1, %v938_v6  ;;  %488 = vmatpush.msrb.mxu0 %v846_v16  ;;  %589 = vmatpush.msrb.mxu2 %v862_v26  ;;  %v853_v28 = vld [vmem:[%s1107_s1 + $0x50] sm:$0xff]  ;;  %v870_v34 = vld [vmem:[%s1107_s1 + $0x78] sm:$0xff]  ;;  %v861_v35 = vld [vmem:[%s1107_s1 + $0x60] sm:$0xff] }
  0x13   : > { %249 = vst.msk [vmem:[#allocation2 + $0x11] sm:$0xf] %vm247_vm2, %v243_v7  ;;  %341 = vmatpush.msrb.mxu1 %v259_v11  ;;  %638 = vmatpush.msrb.mxu3 %v870_v34  ;;  %v869_v42 = vld [vmem:[%s1107_s1 + $0x70] sm:$0xff]  ;;  %v878_v43 = vld [vmem:[%s1107_s1 + $0x88] sm:$0xff]  ;;  %v877_v50 = vld [vmem:[%s1107_s1 + $0x80] sm:$0xff] }
  0x14   : > { %250 = vst.msk [vmem:[#allocation2 + $0x19] sm:$0xf] %vm247_vm2, %v244_v8  ;;  %489 = vmatpush.msrb.mxu0 %v845_v17  ;;  %590 = vmatpush.msrb.mxu2 %v861_v35 }
  0x15   : > { %248 = vst.msk [vmem:[#allocation2 + $0x9] sm:$0xf] %vm247_vm2, %v242_v9  ;;  %v261_v10 = vld [vmem:[#allocation2 + $0x1] sm:$0xf]  ;;  %639 = vmatpush.msrb.mxu3 %v869_v42  ;;  %v913_v42 = vld [vmem:[%s1109_s3] ss:$0 sm:$0xff] }
  0x16   : > { %272 = vst [vmem:[#allocation1] ss:$2 sm:$0xff] %v261_v10  ;;  %v255_v19 = vld [vmem:[#allocation2] sm:$0xf] }
  0x17   : > { %228 = vst.msk [vmem:[#allocation2 + $0x28] sm:$0x3f] %vm225_vm0, %v938_v6 }
  0x18   : > { %232 = vst.msk [vmem:[#allocation2 + $0x10] sm:$0x1] %vm229_vm1, %v938_v6  ;;  %v349_v27 = vld [vmem:[#allocation2 + $0x2] sm:$0xf] }
  0x19   : > { %233 = vst.msk [vmem:[#allocation2 + $0x18] sm:$0x1] %vm229_vm1, %v938_v6 }
  0x1a   : > { %v263_v13 = vld [vmem:[#allocation2 + $0x11] sm:$0xf]  ;;  %234 = vst.msk [vmem:[#allocation2 + $0x20] sm:$0x1] %vm229_vm1, %v938_v6 }
  0x1b   : > { %v264_v14 = vld [vmem:[#allocation2 + $0x19] sm:$0xf]  ;;  %276 = vst [vmem:[#allocation1 + $0x10] ss:$2 sm:$0xff] %v263_v13  ;;  %v842_v45 = vld [vmem:[#allocation2 + $0x11] sm:$0xf] }
  0x1c   : > { %278 = vst [vmem:[#allocation1 + $0x11] ss:$2 sm:$0xff] %v264_v14  ;;  %v262_v15 = vld [vmem:[#allocation2 + $0x9] sm:$0xf]  ;;  %v843_v47 = vld [vmem:[#allocation2 + $0x19] sm:$0xf] }
  0x1d   : > { %274 = vst [vmem:[#allocation1 + $0x1] ss:$2 sm:$0xff] %v262_v15  ;;  %v256_v21 = vld [vmem:[#allocation2 + $0x8] sm:$0xf]  ;;  %v865_v63 = vld [vmem:[#allocation2 + $0x11] sm:$0xf] }
  0x1e   : > { %238 = vst.msk [vmem:[#allocation2 + $0x15] sm:$0x1] %vm229_vm1, %v938_v6  ;;  %v350_v29 = vld [vmem:[#allocation2 + $0xa] sm:$0xf]  ;;  %v866_v0 = vld [vmem:[#allocation2 + $0x19] sm:$0xf] }
  0x1f   : > { %239 = vst.msk [vmem:[#allocation2 + $0x1d] sm:$0x1] %vm229_vm1, %v938_v6  ;;  %v257_v20 = vld [vmem:[#allocation2 + $0x10] sm:$0xf]  ;;  %v833_v36 = vld [vmem:[#allocation2 + $0x8] sm:$0xf] }
  0x20   : > { %240 = vst.msk [vmem:[#allocation2 + $0x25] sm:$0x1] %vm229_vm1, %v938_v6  ;;  %v258_v22 = vld [vmem:[#allocation2 + $0x18] sm:$0xf]  ;;  %v834_v37 = vld [vmem:[#allocation2 + $0x10] sm:$0xf] }
  0x21   : > { %235 = vst.msk [vmem:[#allocation2 + $0x28] sm:$0x1] %vm229_vm1, %v938_v6  ;;  %v835_v39 = vld [vmem:[#allocation2 + $0x18] sm:$0xf]  ;;  %v841_v44 = vld [vmem:[#allocation2 + $0x9] sm:$0xf] }
  0x22   : > { %241 = vst.msk [vmem:[#allocation2 + $0x2d] sm:$0x1] %vm229_vm1, %v938_v6  ;;  %v849_v51 = vld [vmem:[#allocation2 + $0xa] sm:$0xf]  ;;  %v857_v57 = vld [vmem:[#allocation2 + $0x10] sm:$0xf] }
  0x23   : > { %v280_v23 = vld.sshfl [vmem:[#allocation1 + $0x10] sm:$0xff pattern:$0x75316420]  ;;  %251 = vst.msk [vmem:[#allocation2 + $0x21] sm:$0xf] %vm247_vm2, %v245_v18 }
  0x24   : > { %826 = vmatmul.msk.f32.vlgmr.msra.gmra.mxu1 %vm281_vm3, %v280_v23  ;;  %v279_v24 = vld.sshfl [vmem:[#allocation1] sm:$0xff pattern:$0x75316420]  ;;  %317 = vst [vmem:[#allocation1 + $0x10] ss:$2 sm:$0xff] %v257_v20 }
  0x25   : > { %313 = vst [vmem:[#allocation1] ss:$2 sm:$0xff] %v255_v19  ;;  %825 = vmatmul.msk.f32.vlgmr.msra.gmra.mxu0 %vm281_vm3, %v279_v24  ;;  %537 = vmatpush.msra.mxu1 %v854_v25  ;;  %v351_v30 = vld [vmem:[#allocation2 + $0x12] sm:$0xf]  ;;  %v858_v58 = vld [vmem:[#allocation2 + $0x18] sm:$0xf] }
  0x26   : > { %315 = vst [vmem:[#allocation1 + $0x1] ss:$2 sm:$0xff] %v256_v21  ;;  %v352_v32 = vld [vmem:[#allocation2 + $0x1a] sm:$0xf]  ;;  %687 = vmatpush.msra.mxu0 %v878_v43  ;;  %v850_v52 = vld [vmem:[#allocation2 + $0x12] sm:$0xf] }
  0x27   : > { %319 = vst [vmem:[#allocation1 + $0x11] ss:$2 sm:$0xff] %v258_v22  ;;  %538 = vmatpush.msra.mxu1 %v853_v28  ;;  %v851_v54 = vld [vmem:[#allocation2 + $0x1a] sm:$0xf]  ;;  %v868_v3 = vld [vmem:[#allocation2 + $0x29] sm:$0xf] }
  0x28   : > { %688 = vmatpush.msra.mxu0 %v877_v50  ;;  %v860_v61 = vld [vmem:[#allocation2 + $0x28] sm:$0xf]  ;;  %v873_v5 = vld [vmem:[#allocation2 + $0x12] sm:$0xf]  ;;  %v874_v6 = vld [vmem:[#allocation2 + $0x1a] sm:$0xf] }
  0x29   : > { %v876_v9 = vld [vmem:[#allocation2 + $0x2a] sm:$0xf] }
  0x2a   : > { %v836_v40 = vld [vmem:[#allocation2 + $0x20] sm:$0xf] }
  0x2b   : > { %v844_v48 = vld [vmem:[#allocation2 + $0x21] sm:$0xf] }
  0x2c   : > { %v852_v55 = vld [vmem:[#allocation2 + $0x22] sm:$0xf] }
  0x2d   : > { %v320_v31 = vld.sshfl [vmem:[#allocation1] sm:$0xff pattern:$0x75316420]  ;;  %v859_v60 = vld [vmem:[#allocation2 + $0x20] sm:$0xf] }
  0x2e   : > { %360 = vst [vmem:[#allocation1] ss:$2 sm:$0xff] %v349_v27  ;;  %827 = vmatmul.msk.f32.vlgmr.msrb.gmra.mxu1 %vm281_vm3, %v320_v31  ;;  %v321_v33 = vld.sshfl [vmem:[#allocation1 + $0x10] sm:$0xff pattern:$0x75316420] }
  0x2f   : > { %362 = vst [vmem:[#allocation1 + $0x1] ss:$2 sm:$0xff] %v350_v29  ;;  %v867_v2 = vld [vmem:[#allocation2 + $0x21] sm:$0xf] }
  0x30   : > { %364 = vst [vmem:[#allocation1 + $0x10] ss:$2 sm:$0xff] %v351_v30  ;;  %v875_v8 = vld [vmem:[#allocation2 + $0x22] sm:$0xf] }
  0x31   : > { %366 = vst [vmem:[#allocation1 + $0x11] ss:$2 sm:$0xff] %v352_v32 }
  0x36   : > { %v367_v38 = vld.sshfl [vmem:[#allocation1] sm:$0xff pattern:$0x75316420]  ;;  %828 = vmatmul.msk.f32.gmra.mxu1 %vm281_vm3, %v321_v33 }
  0x37   : > { %831 = vmatmul.msk.f32.vlgmr.msra.gmra.mxu2 %vm281_vm3, %v367_v38  ;;  %412 = vst [vmem:[#allocation1] ss:$2 sm:$0xff] %v833_v36 }
  0x38   : > { %414 = vst [vmem:[#allocation1 + $0x1] ss:$2 sm:$0xff] %v834_v37  ;;  %v368_v41 = vld.sshfl [vmem:[#allocation1 + $0x10] sm:$0xff pattern:$0x75316420] }
  0x39   : > { %416 = vst [vmem:[#allocation1 + $0x10] ss:$2 sm:$0xff] %v835_v39  ;;  %v912_v37 = vld [vmem:[%s1108_s2] ss:$0 sm:$0xff] }
  0x3a   : > { %418 = vst [vmem:[#allocation1 + $0x11] ss:$2 sm:$0xff] %v836_v40 }
  0x3f   : > { %v419_v46 = vld.sshfl [vmem:[#allocation1] sm:$0xff pattern:$0x75316420]  ;;  %832 = vmatmul.msk.f32.gmra.mxu2 %vm281_vm3, %v368_v41 }
  0x40   : > { %839 = vmatmul.msk.f32.vlgmr.msra.gmra.mxu3 %vm281_vm3, %v419_v46  ;;  %461 = vst [vmem:[#allocation1] ss:$2 sm:$0xff] %v841_v44 }
  0x41   : > { %v420_v49 = vld.sshfl [vmem:[#allocation1 + $0x10] sm:$0xff pattern:$0x75316420]  ;;  %463 = vst [vmem:[#allocation1 + $0x1] ss:$2 sm:$0xff] %v842_v45 }
  0x42   : > { %465 = vst [vmem:[#allocation1 + $0x10] ss:$2 sm:$0xff] %v843_v47 }
  0x43   : > { %467 = vst [vmem:[#allocation1 + $0x11] ss:$2 sm:$0xff] %v844_v48 }
  0x48   : > { %840 = vmatmul.msk.f32.gmra.mxu3 %vm281_vm3, %v420_v49  ;;  %v468_v53 = vld.sshfl [vmem:[#allocation1] sm:$0xff pattern:$0x75316420] }
  0x49   : > { %847 = vmatmul.msk.f32.vlgmr.msrb.gmra.mxu0 %vm281_vm3, %v468_v53  ;;  %510 = vst [vmem:[#allocation1] ss:$2 sm:$0xff] %v849_v51 }
  0x4a   : > { %512 = vst [vmem:[#allocation1 + $0x1] ss:$2 sm:$0xff] %v850_v52  ;;  %v469_v56 = vld.sshfl [vmem:[#allocation1 + $0x10] sm:$0xff pattern:$0x75316420] }
  0x4b   : > { %514 = vst [vmem:[#allocation1 + $0x10] ss:$2 sm:$0xff] %v851_v54 }
  0x4c   : > { %516 = vst [vmem:[#allocation1 + $0x11] ss:$2 sm:$0xff] %v852_v55 }
  0x51   : > { %848 = vmatmul.msk.f32.gmra.mxu0 %vm281_vm3, %v469_v56  ;;  %v517_v59 = vld.sshfl [vmem:[#allocation1] sm:$0xff pattern:$0x75316420] }
  0x52   : > { %855 = vmatmul.msk.f32.vlgmr.msra.gmra.mxu1 %vm281_vm3, %v517_v59  ;;  %562 = vst [vmem:[#allocation1] ss:$2 sm:$0xff] %v857_v57 }
  0x53   : > { %564 = vst [vmem:[#allocation1 + $0x1] ss:$2 sm:$0xff] %v858_v58  ;;  %v518_v62 = vld.sshfl [vmem:[#allocation1 + $0x10] sm:$0xff pattern:$0x75316420] }
  0x54   : > { %566 = vst [vmem:[#allocation1 + $0x10] ss:$2 sm:$0xff] %v859_v60 }
  0x55   : > { %568 = vst [vmem:[#allocation1 + $0x11] ss:$2 sm:$0xff] %v860_v61 }
  0x5a   : > { %856 = vmatmul.msk.f32.gmra.mxu1 %vm281_vm3, %v518_v62  ;;  %v569_v1 = vld.sshfl [vmem:[#allocation1] sm:$0xff pattern:$0x75316420] }
  0x5b   : > { %863 = vmatmul.msk.f32.vlgmr.msrb.gmra.mxu2 %vm281_vm3, %v569_v1  ;;  %611 = vst [vmem:[#allocation1] ss:$2 sm:$0xff] %v865_v63 }
  0x5c   : > { %613 = vst [vmem:[#allocation1 + $0x1] ss:$2 sm:$0xff] %v866_v0  ;;  %v570_v4 = vld.sshfl [vmem:[#allocation1 + $0x10] sm:$0xff pattern:$0x75316420] }
  0x5d   : > { %615 = vst [vmem:[#allocation1 + $0x10] ss:$2 sm:$0xff] %v867_v2 }
  0x5e   : > { %617 = vst [vmem:[#allocation1 + $0x11] ss:$2 sm:$0xff] %v868_v3 }
  0x63   : > { %864 = vmatmul.msk.f32.gmra.mxu2 %vm281_vm3, %v570_v4  ;;  %v618_v7 = vld.sshfl [vmem:[#allocation1] sm:$0xff pattern:$0x75316420] }
  0x64   : > { %871 = vmatmul.msk.f32.vlgmr.msrb.gmra.mxu3 %vm281_vm3, %v618_v7  ;;  %660 = vst [vmem:[#allocation1] ss:$2 sm:$0xff] %v873_v5 }
  0x65   : > { %662 = vst [vmem:[#allocation1 + $0x1] ss:$2 sm:$0xff] %v874_v6  ;;  %v619_v10 = vld.sshfl [vmem:[#allocation1 + $0x10] sm:$0xff pattern:$0x75316420] }
  0x66   : > { %664 = vst [vmem:[#allocation1 + $0x10] ss:$2 sm:$0xff] %v875_v8 }
  0x67   : > { %666 = vst [vmem:[#allocation1 + $0x11] ss:$2 sm:$0xff] %v876_v9 }
  0x6c   : > { %872 = vmatmul.msk.f32.gmra.mxu3 %vm281_vm3, %v619_v10  ;;  %v667_v11 = vld.sshfl [vmem:[#allocation1] sm:$0xff pattern:$0x75316420] }
  0x6d   : > { %879 = vmatmul.msk.f32.vlgmr.msra.gmra.mxu0 %vm281_vm3, %v667_v11 }
  0x6e   : > { %v668_v12 = vld.sshfl [vmem:[#allocation1 + $0x10] sm:$0xff pattern:$0x75316420] }
  0x75   : > { %880 = vmatmul.msk.f32.gmra.mxu0 %vm281_vm3, %v668_v12 }
  0xa1   : > { %v306_v13 = vpop.f32.mrf.mxu1 }
  0xa2   : > { %v303_v15 = vpop.f32.mrf.mxu0 }
  0xab   : > { %v343_v14 = vpop.f32.mrf.mxu1 }
  0xac   : > { %v344_v17 = vadd.f32 %v343_v14, %v303_v15 }
  0xb3   : > { %v346_v19 = vpop.f32.mrf.mxu1 }
  0xb4   : > { %v347_v24 = vadd.f32 %v346_v19, %v306_v13 }
  0xba   : > { %v390_v16 = vpop.f32.mrf.mxu2 }
  0xbb   : > { %v396_v20 = vadd.f32 %v390_v16, %v344_v17 }
  0xc2   : > { %v393_v22 = vpop.f32.mrf.mxu2 }
  0xc3   : > { %v442_v18 = vpop.f32.mrf.mxu3  ;;  %v397_v29 = vadd.f32 %v393_v22, %v347_v24 }
  0xc4   : > { %v448_v23 = vadd.f32 %v442_v18, %v396_v20 }
  0xc6   : > { %v491_v21 = vpop.f32.mrf.mxu0 }
  0xc7   : > { %v497_v27 = vadd.f32 %v491_v21, %v448_v23 }
  0xcb   : > { %v445_v25 = vpop.f32.mrf.mxu3 }
  0xcc   : > { %v449_v32 = vadd.f32 %v445_v25, %v397_v29 }
  0xce   : > { %v494_v30 = vpop.f32.mrf.mxu0 }
  0xcf   : > { %v540_v26 = vpop.f32.mrf.mxu1  ;;  %v498_v38 = vadd.f32 %v494_v30, %v449_v32 }
  0xd0   : > { %v546_v31 = vadd.f32 %v540_v26, %v497_v27 }
  0xd7   : > { %v543_v36 = vpop.f32.mrf.mxu1 }
  0xd8   : > { %v547_v43 = vadd.f32 %v543_v36, %v498_v38 }
  0xde   : > { %v592_v28 = vpop.f32.mrf.mxu2 }
  0xdf   : > { %v598_v33 = vadd.f32 %v592_v28, %v546_v31 }
  0xe6   : > { %v595_v40 = vpop.f32.mrf.mxu2 }
  0xe7   : > { %v641_v34 = vpop.f32.mrf.mxu3  ;;  %v599_v45 = vadd.f32 %v595_v40, %v547_v43 }
  0xe8   : > { %v647_v35 = vadd.f32 %v641_v34, %v598_v33 }
  0xea   : > { %v690_v39 = vpop.f32.mrf.mxu0 }
  0xeb   : > { %v696_v41 = vadd.f32 %v690_v39, %v647_v35 }
  0xed   : > { %v702_v44 = vmul.f32 %v912_v37, %v696_v41 }
  0xef   : > { %v708_v46 = vadd.f32 %v913_v42, %v702_v44  ;;  %v644_v47 = vpop.f32.mrf.mxu3 }
  0xf0   : > { %v648_v48 = vadd.f32 %v644_v47, %v599_v45 }
  0xf1   : > { %v710_v49 = vmax.f32 %v708_v46, 0.0 }
  0xf2   : > { %v693_v50 = vpop.f32.mrf.mxu0 }
  0xf3   : > { %v714_v51 = vrot.slane %v710_v49, 4  ;;  %719 = vst.msk [vmem:[%s219_s22] sm:$0xf] %vm718_vm4, %v710_v49  ;;  %v697_v52 = vadd.f32 %v693_v50, %v648_v48 }
  0xf5   : > { %720 = vst.msk [vmem:[%s219_s22 + $0x4] sm:$0xf] %vm718_vm4, %v714_v51  ;;  %v703_v53 = vmul.f32 %v912_v37, %v697_v52 }
  0xf7   : > { %v709_v54 = vadd.f32 %v913_v42, %v703_v53 }
  0xf9   : > { %v711_v55 = vmax.f32 %v709_v54, 0.0 }
  0xfb   : > { %v715_v56 = vrot.slane %v711_v55, 4  ;;  %721 = vst.msk [vmem:[%s219_s22 + $0x8] sm:$0xf] %vm718_vm4, %v711_v55 }
  0xfd   : > { %722 = vst.msk [vmem:[%s219_s22 + $0xc] sm:$0xf] %vm718_vm4, %v715_v56 }
  0xfe PF: > { %s14_s17 = sadd.s32 1, %s936_s17   ;;  %s1111_s15 = smov %s932_s16 }
  0xff   : > { %p11_p5 = scmp.ge.s32.totalorder %s14_s17, 4   ;;  %s1112_s16 = smov %s1114_s18 }
 0x101   :  { %13 = sbr.rel (!%p11_p5) target bundleno = 2 (0x2), region = 110 }

// kernel: encoder_forward.11
= control target key start
LH: loop header
LB: loop body
LE: loop exit
PB: predicated region body
PF: predicated region fallthrough
CT: control target
= control target key end

     0   :  { %9 = vsyncpa [#allocation4], 0  ;;  %s1368_s0 = inlined_call_operand.vmem [shape: f32[2,4,4,32], index: 0, kind: input, shape index: {}]   ;;  %s1369_s1 = inlined_call_operand.vmem [shape: f32[9,32,32], index: 1, kind: input, shape index: {}]   ;;  %s1370_s2 = inlined_call_operand.vmem [shape: f32[1,32], index: 2, kind: input, shape index: {}]   ;;  %s1371_s3 = inlined_call_operand.vmem [shape: f32[1,32], index: 3, kind: input, shape index: {}]   ;;  %s1372_s4 = inlined_call_operand.hbm [shape: f32[2,4,4,32], index: 4, kind: output, shape index: {}]  }
   0x1   :  { %11 = vsyncpa [#allocation4 + $0x1], 0  ;;  %s1093_s15 = smov 0   ;;  %s1095_s16 = smov 0  }
   0x2   :  { %s1097_s17 = smov 0   ;;  %s1099_s18 = smov 0  }
   0x3   :  { %s1101_s19 = smov 0   ;;  %s1103_s20 = smov 0  }
   0x4 LB: > { %s832_s21 = sadd.s32 4294967295, %s1063_s20   ;;  %s833_s22 = sadd.s32 4294967294, %s1063_s20   ;;  %s1063_s20 = sphi %s1103_s20, %s17_s20   ;;  %s1059_s19 = sphi %s1101_s19, %s1379_s19   ;;  %s1055_s18 = sphi %s1099_s18, %s1378_s18   ;;  %s1051_s17 = sphi %s1097_s17, %s1377_s17   ;;  %s1047_s16 = sphi %s1095_s16, %s1376_s16   ;;  %s1043_s15 = sphi %s1093_s15, %s1375_s15  }
   0x5   : > { %s29_s23 = sadd.s32 1, %s1059_s19  ;;  %s127_s24 = sadd.s32 1, %s1051_s17 }
   0x6   : > { %p31_p0 = scmp.ge.s32.totalorder %s29_s23, 2  ;;  %p137_p1 = scmp.ne.s32.totalorder %s1051_s17, %s1047_s16 }
   0x7   : > { %p138_p2 = scmp.eq.s32.totalorder %s832_s21, 1  ;;  %p143_p3 = scmp.ne.s32.totalorder %s1047_s16, %s1043_s15 }
   0x8   : > { %s1381_s23 = smov (%p31_p0, %s29_s23), 0  ;;  %p144_p5 = scmp.eq.s32.totalorder %s833_s22, 1 }
   0x9   : > { %p1133_p4 = por %p138_p2, %p137_p1  ;;  %s122_s26 = ssub.s32 %s1059_s19, %s1381_s23 }
   0xa   : > { %p836_p6 = scmp.ge.s32.totalorder %s1063_s20, 1  ;;  %p125_p7 = scmp.eq.s32.totalorder %s122_s26, 0 }
   0xb   : > { %p1140_p8 = por %p144_p5, %p143_p3  ;;  %p179_p9 = scmp.lt.s32.totalorder %s1063_s20, 3 }
   0xc   : > { %s1146_s28 = scalar_select %p125_p7, %s1051_s17, %s127_s24  }
   0xd   : > { %p180_p10 = pnand %p836_p6, %p179_p9 }
   0xe   : > { %p205_p11 = scmp.lt.s32.totalorder (!%p180_p10), %s1055_s18, 1  ;;  %s202_s26 = sand.u32 (!%p180_p10), 1, %s1047_s16  }
   0xf   : > { %183 = sbr.rel (%p180_p10) target bundleno = 265 (0x109), region = 36  ;;  %s837_s5 = sshll.u32 (!%p180_p10), %s202_s26, 4 }
  0x10   : > { %s204_s7 = scalar_lea.vmem (!%p180_p10), [#allocation3], %s837_s5  ;;  %s1005_s24 = scalar_lea.hbm (!%p180_p10), %s1372_s4, 32 }
  0x11   : > { %s746_s12 = sshll.u32 (!%p180_p10), %s204_s7, 4  ;;  %s747_s12 = int_to_ptr.vmem [resolvable:$true] %s746_s12 }
  0x14   : > { %v843_v0 = vld [vmem:[%s1369_s1 + $0x38] sm:$0xff]  ;;  %v842_v1 = vld [vmem:[%s1369_s1 + $0x30] sm:$0xff]  ;;  %vm215_vm0 = vcmask 259072   ;;  %vm219_vm1 = vcmask 253952   ;;  %v841_v3 = vld [vmem:[%s1369_s1 + $0x28] sm:$0xff]  ;;  %s206_s11 = scalar_select %p205_p11, %s1055_s18, 1 }
  0x15   : > { %921 = vmatpush.msra.mxu1 %v843_v0  ;;  %v851_v2 = vld [vmem:[%s1369_s1 + $0x58] sm:$0xff]  ;;  %292 = vmatpush.msra.mxu0 %v843_v0  ;;  %v850_v4 = vld [vmem:[%s1369_s1 + $0x50] sm:$0xff]  ;;  %v1065_v6 = vmov 0.0   ;;  %v840_v7 = vld [vmem:[%s1369_s1 + $0x20] sm:$0xff]  ;;  %vm237_vm2 = vcmask 257024   ;;  %vm275_vm3 = vcmask 261120  }
  0x16   : > { %381 = vmatpush.msra.mxu2 %v851_v2  ;;  %v861_v5 = vld [vmem:[%s1369_s1 + $0x78] sm:$0xff]  ;;  %216 = vst.msk [vmem:[#allocation2] sm:$0x3f] %vm215_vm0, %v1065_v6  ;;  %v849_v8 = vld [vmem:[%s1369_s1 + $0x48] sm:$0xff]  ;;  %v860_v9 = vld [vmem:[%s1369_s1 + $0x70] sm:$0xff]  ;;  %s919_s6 = sshll.u32 %s206_s11, 4 }
  0x17   : > { %922 = vmatpush.msra.mxu1 %v842_v1  ;;  %435 = vmatpush.msra.mxu3 %v861_v5  ;;  %220 = vst.msk [vmem:[#allocation2] sm:$0x1] %vm219_vm1, %v1065_v6  ;;  %v252_v10 = vld [vmem:[%s1369_s1 + $0x18] sm:$0xff]  ;;  %v848_v11 = vld [vmem:[%s1369_s1 + $0x40] sm:$0xff]  ;;  %v859_v12 = vld [vmem:[%s1369_s1 + $0x68] sm:$0xff]  ;;  %s1195_s21 = scalar_lea.vmem %s1368_s0, %s919_s6  ;;  %s920_s6 = sshll.u32 %s1055_s18, 4 }
  0x18   : > { %382 = vmatpush.msra.mxu2 %v850_v4  ;;  %293 = vmatpush.msra.mxu0 %v842_v1  ;;  %221 = vst.msk [vmem:[#allocation2 + $0x8] sm:$0x1] %vm219_vm1, %v1065_v6  ;;  %v233_v13 = vld [vmem:[%s1195_s21 + $0x4] sm:$0xf]  ;;  %v234_v14 = vld [vmem:[%s1195_s21 + $0x8] sm:$0xf]  ;;  %s745_s10 = scalar_lea.hbm %s1372_s4, %s920_s6 }
  0x19   : > { %923 = vmatpush.msra.mxu1 %v841_v3  ;;  %436 = vmatpush.msra.mxu3 %v860_v9  ;;  %226 = vst.msk [vmem:[#allocation2 + $0x5] sm:$0x1] %vm219_vm1, %v1065_v6  ;;  %v251_v15 = vld [vmem:[%s1369_s1 + $0x10] sm:$0xff]  ;;  %v232_v16 = vld [vmem:[%s1195_s21] sm:$0xf]  ;;  %v250_v17 = vld [vmem:[%s1369_s1 + $0x8] sm:$0xff] }
  0x1a   : > { %383 = vmatpush.msra.mxu2 %v849_v8  ;;  %294 = vmatpush.msra.mxu0 %v841_v3  ;;  %227 = vst.msk [vmem:[#allocation2 + $0xd] sm:$0x1] %vm219_vm1, %v1065_v6  ;;  %v249_v19 = vld [vmem:[%s1369_s1] sm:$0xff]  ;;  %v871_v24 = vld [vmem:[%s1369_s1 + $0x98] sm:$0xff]  ;;  %v870_v25 = vld [vmem:[%s1369_s1 + $0x90] sm:$0xff]  ;;  %s748_s13 = sshll.u32 %s745_s10, 4  ;;  %s749_s13 = int_to_ptr.hbm [resolvable:$true] %s748_s13 }
  0x1b   : > { %924 = vmatpush.msra.mxu1 %v840_v7  ;;  %239 = vst.msk [vmem:[#allocation2 + $0x11] sm:$0xf] %vm237_vm2, %v233_v13  ;;  %437 = vmatpush.msra.mxu3 %v859_v12  ;;  %v858_v20 = vld [vmem:[%s1369_s1 + $0x60] sm:$0xff]  ;;  %v235_v26 = vld [vmem:[%s1195_s21 + $0xc] sm:$0xf]  ;;  %v881_v35 = vld [vmem:[%s1369_s1 + $0xb8] sm:$0xff] }
  0x1c   : > { %240 = vst.msk [vmem:[#allocation2 + $0x19] sm:$0xf] %vm237_vm2, %v234_v14  ;;  %384 = vmatpush.msra.mxu2 %v848_v11  ;;  %295 = vmatpush.msra.mxu0 %v840_v7  ;;  %v869_v32 = vld [vmem:[%s1369_s1 + $0x88] sm:$0xff]  ;;  %v868_v34 = vld [vmem:[%s1369_s1 + $0x80] sm:$0xff]  ;;  %v880_v36 = vld [vmem:[%s1369_s1 + $0xb0] sm:$0xff]  ;;  %s732_s18 = scalar_lea.sflag [#allocation4], %s202_s26 }
  0x1d   : > { %332 = vmatpush.msrb.mxu1 %v252_v10  ;;  %238 = vst.msk [vmem:[#allocation2 + $0x9] sm:$0xf] %vm237_vm2, %v232_v16  ;;  %v253_v18 = vld [vmem:[#allocation2 + $0x1] sm:$0xf]  ;;  %438 = vmatpush.msra.mxu3 %v858_v20  ;;  %v891_v38 = vld [vmem:[%s1369_s1 + $0xd8] sm:$0xff]  ;;  %v878_v45 = vld [vmem:[%s1369_s1 + $0xa0] sm:$0xff] }
  0x1e   : > { %266 = vst [vmem:[#allocation1] ss:$2 sm:$0xff] %v253_v18  ;;  %v245_v27 = vld [vmem:[#allocation2] sm:$0xf]  ;;  %486 = vmatpush.msrb.mxu0 %v871_v24  ;;  %591 = vmatpush.msrb.mxu2 %v891_v38  ;;  %v901_v46 = vld [vmem:[%s1369_s1 + $0xf8] sm:$0xff]  ;;  %v890_v47 = vld [vmem:[%s1369_s1 + $0xd0] sm:$0xff] }
  0x1f   : > { %333 = vmatpush.msrb.mxu1 %v251_v15  ;;  %218 = vst.msk [vmem:[#allocation2 + $0x28] sm:$0x3f] %vm215_vm0, %v1065_v6  ;;  %v879_v41 = vld [vmem:[%s1369_s1 + $0xa8] sm:$0xff]  ;;  %v900_v48 = vld [vmem:[%s1369_s1 + $0xf0] sm:$0xff]  ;;  %642 = vmatpush.msrb.mxu3 %v901_v46  ;;  %v888_v55 = vld [vmem:[%s1369_s1 + $0xc0] sm:$0xff]  ;;  %s999_s14 = sshra.s32 %s749_s13, 4  ;;  %s1000_s14 = int_to_ptr.hbm [resolvable:$true] %s999_s14 }
  0x20   : > { %222 = vst.msk [vmem:[#allocation2 + $0x10] sm:$0x1] %vm219_vm1, %v1065_v6  ;;  %487 = vmatpush.msrb.mxu0 %v870_v25  ;;  %v343_v37 = vld [vmem:[#allocation2 + $0x2] sm:$0xf]  ;;  %592 = vmatpush.msrb.mxu2 %v890_v47  ;;  %v911_v58 = vld [vmem:[%s1369_s1 + $0x118] sm:$0xff]  ;;  %v898_v59 = vld [vmem:[%s1369_s1 + $0xe0] sm:$0xff]  ;;  %p1006_p1 = scmp.lt.s32.totalorder %s1000_s14, %s1372_s4 }
  0x21   : > { %334 = vmatpush.msrb.mxu1 %v250_v17  ;;  %223 = vst.msk [vmem:[#allocation2 + $0x18] sm:$0x1] %vm219_vm1, %v1065_v6  ;;  %v889_v51 = vld [vmem:[%s1369_s1 + $0xc8] sm:$0xff]  ;;  %643 = vmatpush.msrb.mxu3 %v900_v48  ;;  %v910_v61 = vld [vmem:[%s1369_s1 + $0x110] sm:$0xff]  ;;  %v908_v4 = vld [vmem:[%s1369_s1 + $0x100] sm:$0xff]  ;;  %s1001_s11 = scalar_lea.hbm %s1000_s14, 16 }
  0x22   : > { %v255_v21 = vld [vmem:[#allocation2 + $0x11] sm:$0xf]  ;;  %224 = vst.msk [vmem:[#allocation2 + $0x20] sm:$0x1] %vm219_vm1, %v1065_v6  ;;  %488 = vmatpush.msrb.mxu0 %v869_v32  ;;  %593 = vmatpush.msrb.mxu2 %v889_v51  ;;  %v899_v57 = vld [vmem:[%s1369_s1 + $0xe8] sm:$0xff]  ;;  %p1002_p12 = scmp.ne.s32.totalorder %s1000_s14, %s1001_s11  ;;  %p1007_p2 = scmp.lt.s32.totalorder %s1005_s24, %s1001_s11 }
  0x23   : > { %335 = vmatpush.msrb.mxu1 %v249_v19  ;;  %v256_v22 = vld [vmem:[#allocation2 + $0x19] sm:$0xf]  ;;  %270 = vst [vmem:[#allocation1 + $0x10] ss:$2 sm:$0xff] %v255_v21  ;;  %644 = vmatpush.msrb.mxu3 %v899_v57  ;;  %v865_v62 = vld [vmem:[#allocation2 + $0x11] sm:$0xf] }
  0x24   : > { %272 = vst [vmem:[#allocation1 + $0x11] ss:$2 sm:$0xff] %v256_v22  ;;  %v254_v23 = vld [vmem:[#allocation2 + $0x9] sm:$0xf]  ;;  %489 = vmatpush.msrb.mxu0 %v868_v34  ;;  %594 = vmatpush.msrb.mxu2 %v888_v55  ;;  %v866_v0 = vld [vmem:[#allocation2 + $0x19] sm:$0xf]  ;;  %p1003_p13 = pnand %p1002_p12, %p1133_p4  ;;  %p1008_p3 = por %p1007_p2, %p1006_p1 }
  0x25   : > { %268 = vst [vmem:[#allocation1 + $0x1] ss:$2 sm:$0xff] %v254_v23  ;;  %v246_v29 = vld [vmem:[#allocation2 + $0x8] sm:$0xf]  ;;  %645 = vmatpush.msrb.mxu3 %v898_v59  ;;  %v909_v3 = vld [vmem:[%s1369_s1 + $0x108] sm:$0xff] }
  0x26   : > { %228 = vst.msk [vmem:[#allocation2 + $0x15] sm:$0x1] %vm219_vm1, %v1065_v6  ;;  %v344_v39 = vld [vmem:[#allocation2 + $0xa] sm:$0xf]  ;;  %v894_v17 = vld [vmem:[#allocation2 + $0x11] sm:$0xf]  ;;  %p1004_p0 = pneg %p1003_p13 }
  0x27   : > { %229 = vst.msk [vmem:[#allocation2 + $0x1d] sm:$0x1] %vm219_vm1, %v1065_v6  ;;  %v247_v28 = vld [vmem:[#allocation2 + $0x10] sm:$0xf]  ;;  %v854_v49 = vld [vmem:[#allocation2 + $0x8] sm:$0xf] }
  0x28   : > { %230 = vst.msk [vmem:[#allocation2 + $0x25] sm:$0x1] %vm219_vm1, %v1065_v6  ;;  %v248_v30 = vld [vmem:[#allocation2 + $0x18] sm:$0xf]  ;;  %v855_v50 = vld [vmem:[#allocation2 + $0x10] sm:$0xf]  ;;  %p1009_p5 = pnand %p1008_p3, %p1004_p0 }
  0x29   : > { %225 = vst.msk [vmem:[#allocation2 + $0x28] sm:$0x1] %vm219_vm1, %v1065_v6  ;;  %v856_v53 = vld [vmem:[#allocation2 + $0x18] sm:$0xf]  ;;  %v864_v60 = vld [vmem:[#allocation2 + $0x9] sm:$0xf] }
  0x2a   : > { %231 = vst.msk [vmem:[#allocation2 + $0x2d] sm:$0x1] %vm219_vm1, %v1065_v6  ;;  %v874_v5 = vld [vmem:[#allocation2 + $0xa] sm:$0xf]  ;;  %v884_v11 = vld [vmem:[#allocation2 + $0x10] sm:$0xf] }
  0x2b   : > { %v274_v31 = vld.sshfl [vmem:[#allocation1 + $0x10] sm:$0xff pattern:$0x75316420]  ;;  %241 = vst.msk [vmem:[#allocation2 + $0x21] sm:$0xf] %vm237_vm2, %v235_v26 }
  0x2c   : > { %845 = vmatmul.msk.f32.vlgmr.msra.gmra.mxu1 %vm275_vm3, %v274_v31  ;;  %v273_v33 = vld.sshfl [vmem:[#allocation1] sm:$0xff pattern:$0x75316420]  ;;  %311 = vst [vmem:[#allocation1 + $0x10] ss:$2 sm:$0xff] %v247_v28 }
  0x2d   : > { %307 = vst [vmem:[#allocation1] ss:$2 sm:$0xff] %v245_v27  ;;  %844 = vmatmul.msk.f32.vlgmr.msra.gmra.mxu0 %vm275_vm3, %v273_v33  ;;  %537 = vmatpush.msra.mxu1 %v881_v35  ;;  %v345_v40 = vld [vmem:[#allocation2 + $0x12] sm:$0xf]  ;;  %v885_v12 = vld [vmem:[#allocation2 + $0x18] sm:$0xf] }
  0x2e   : > { %309 = vst [vmem:[#allocation1 + $0x1] ss:$2 sm:$0xff] %v246_v29  ;;  %v346_v43 = vld [vmem:[#allocation2 + $0x1a] sm:$0xf]  ;;  %693 = vmatpush.msra.mxu0 %v911_v58  ;;  %v875_v6 = vld [vmem:[#allocation2 + $0x12] sm:$0xf] }
  0x2f   : > { %313 = vst [vmem:[#allocation1 + $0x11] ss:$2 sm:$0xff] %v248_v30  ;;  %538 = vmatpush.msra.mxu1 %v880_v36  ;;  %v876_v8 = vld [vmem:[#allocation2 + $0x1a] sm:$0xf]  ;;  %v897_v21 = vld [vmem:[#allocation2 + $0x29] sm:$0xf] }
  0x30   : > { %694 = vmatpush.msra.mxu0 %v910_v61  ;;  %v887_v15 = vld [vmem:[#allocation2 + $0x28] sm:$0xf]  ;;  %v895_v18 = vld [vmem:[#allocation2 + $0x19] sm:$0xf]  ;;  %v904_v23 = vld [vmem:[#allocation2 + $0x12] sm:$0xf] }
  0x31   : > { %539 = vmatpush.msra.mxu1 %v879_v41  ;;  %v905_v24 = vld [vmem:[#allocation2 + $0x1a] sm:$0xf]  ;;  %v907_v27 = vld [vmem:[#allocation2 + $0x2a] sm:$0xf]  ;;  %v983_v55 = vld [vmem:[%s1370_s2] ss:$0 sm:$0xff] }
  0x32   : > { %v857_v54 = vld [vmem:[#allocation2 + $0x20] sm:$0xf]  ;;  %695 = vmatpush.msra.mxu0 %v909_v3 }
  0x33   : > { %540 = vmatpush.msra.mxu1 %v878_v45  ;;  %v867_v1 = vld [vmem:[#allocation2 + $0x21] sm:$0xf] }
  0x34   : > { %696 = vmatpush.msra.mxu0 %v908_v4  ;;  %v877_v9 = vld [vmem:[#allocation2 + $0x22] sm:$0xf] }
  0x35   : > { %v314_v42 = vld.sshfl [vmem:[#allocation1] sm:$0xff pattern:$0x75316420]  ;;  %v886_v14 = vld [vmem:[#allocation2 + $0x20] sm:$0xf] }
  0x36   : > { %356 = vst [vmem:[#allocation1] ss:$2 sm:$0xff] %v343_v37  ;;  %846 = vmatmul.msk.f32.vlgmr.msrb.gmra.mxu1 %vm275_vm3, %v314_v42  ;;  %v315_v44 = vld.sshfl [vmem:[#allocation1 + $0x10] sm:$0xff pattern:$0x75316420] }
  0x37   : > { %358 = vst [vmem:[#allocation1 + $0x1] ss:$2 sm:$0xff] %v344_v39  ;;  %v896_v20 = vld [vmem:[#allocation2 + $0x21] sm:$0xf] }
  0x38   : > { %360 = vst [vmem:[#allocation1 + $0x10] ss:$2 sm:$0xff] %v345_v40  ;;  %v906_v26 = vld [vmem:[#allocation2 + $0x22] sm:$0xf] }
  0x39   : > { %362 = vst [vmem:[#allocation1 + $0x11] ss:$2 sm:$0xff] %v346_v43 }
  0x3e   : > { %v363_v52 = vld.sshfl [vmem:[#allocation1] sm:$0xff pattern:$0x75316420]  ;;  %847 = vmatmul.msk.f32.gmra.mxu1 %vm275_vm3, %v315_v44 }
  0x3f   : > { %852 = vmatmul.msk.f32.vlgmr.msra.gmra.mxu2 %vm275_vm3, %v363_v52  ;;  %410 = vst [vmem:[#allocation1] ss:$2 sm:$0xff] %v854_v49 }
  0x40   : > { %412 = vst [vmem:[#allocation1 + $0x1] ss:$2 sm:$0xff] %v855_v50  ;;  %v364_v56 = vld.sshfl [vmem:[#allocation1 + $0x10] sm:$0xff pattern:$0x75316420] }
  0x41   : > { %414 = vst [vmem:[#allocation1 + $0x10] ss:$2 sm:$0xff] %v856_v53 }
  0x42   : > { %416 = vst [vmem:[#allocation1 + $0x11] ss:$2 sm:$0xff] %v857_v54 }
  0x47   : > { %v417_v63 = vld.sshfl [vmem:[#allocation1] sm:$0xff pattern:$0x75316420]  ;;  %853 = vmatmul.msk.f32.gmra.mxu2 %vm275_vm3, %v364_v56 }
  0x48   : > { %862 = vmatmul.msk.f32.vlgmr.msra.gmra.mxu3 %vm275_vm3, %v417_v63  ;;  %461 = vst [vmem:[#allocation1] ss:$2 sm:$0xff] %v864_v60  ;;  %v984_v60 = vld [vmem:[%s1371_s3] ss:$0 sm:$0xff] }
  0x49   : > { %v418_v2 = vld.sshfl [vmem:[#allocation1 + $0x10] sm:$0xff pattern:$0x75316420]  ;;  %463 = vst [vmem:[#allocation1 + $0x1] ss:$2 sm:$0xff] %v865_v62 }
  0x4a   : > { %465 = vst [vmem:[#allocation1 + $0x10] ss:$2 sm:$0xff] %v866_v0 }
  0x4b   : > { %467 = vst [vmem:[#allocation1 + $0x11] ss:$2 sm:$0xff] %v867_v1 }
  0x50   : > { %863 = vmatmul.msk.f32.gmra.mxu3 %vm275_vm3, %v418_v2  ;;  %v468_v7 = vld.sshfl [vmem:[#allocation1] sm:$0xff pattern:$0x75316420] }
  0x51   : > { %872 = vmatmul.msk.f32.vlgmr.msrb.gmra.mxu0 %vm275_vm3, %v468_v7  ;;  %512 = vst [vmem:[#allocation1] ss:$2 sm:$0xff] %v874_v5 }
  0x52   : > { %514 = vst [vmem:[#allocation1 + $0x1] ss:$2 sm:$0xff] %v875_v6  ;;  %v469_v10 = vld.sshfl [vmem:[#allocation1 + $0x10] sm:$0xff pattern:$0x75316420] }
  0x53   : > { %516 = vst [vmem:[#allocation1 + $0x10] ss:$2 sm:$0xff] %v876_v8 }
  0x54   : > { %518 = vst [vmem:[#allocation1 + $0x11] ss:$2 sm:$0xff] %v877_v9 }
  0x59   : > { %873 = vmatmul.msk.f32.gmra.mxu0 %vm275_vm3, %v469_v10  ;;  %v519_v13 = vld.sshfl [vmem:[#allocation1] sm:$0xff pattern:$0x75316420] }
  0x5a   : > { %882 = vmatmul.msk.f32.vlgmr.msra.gmra.mxu1 %vm275_vm3, %v519_v13  ;;  %566 = vst [vmem:[#allocation1] ss:$2 sm:$0xff] %v884_v11 }
  0x5b   : > { %568 = vst [vmem:[#allocation1 + $0x1] ss:$2 sm:$0xff] %v885_v12  ;;  %v520_v16 = vld.sshfl [vmem:[#allocation1 + $0x10] sm:$0xff pattern:$0x75316420] }
  0x5c   : > { %570 = vst [vmem:[#allocation1 + $0x10] ss:$2 sm:$0xff] %v886_v14 }
  0x5d   : > { %572 = vst [vmem:[#allocation1 + $0x11] ss:$2 sm:$0xff] %v887_v15 }
  0x62   : > { %883 = vmatmul.msk.f32.gmra.mxu1 %vm275_vm3, %v520_v16  ;;  %v573_v19 = vld.sshfl [vmem:[#allocation1] sm:$0xff pattern:$0x75316420] }
  0x63   : > { %892 = vmatmul.msk.f32.vlgmr.msrb.gmra.mxu2 %vm275_vm3, %v573_v19  ;;  %617 = vst [vmem:[#allocation1] ss:$2 sm:$0xff] %v894_v17 }
  0x64   : > { %619 = vst [vmem:[#allocation1 + $0x1] ss:$2 sm:$0xff] %v895_v18  ;;  %v574_v22 = vld.sshfl [vmem:[#allocation1 + $0x10] sm:$0xff pattern:$0x75316420] }
  0x65   : > { %621 = vst [vmem:[#allocation1 + $0x10] ss:$2 sm:$0xff] %v896_v20 }
  0x66   : > { %623 = vst [vmem:[#allocation1 + $0x11] ss:$2 sm:$0xff] %v897_v21 }
  0x6b   : > { %893 = vmatmul.msk.f32.gmra.mxu2 %vm275_vm3, %v574_v22  ;;  %v624_v25 = vld.sshfl [vmem:[#allocation1] sm:$0xff pattern:$0x75316420] }
  0x6c   : > { %902 = vmatmul.msk.f32.vlgmr.msrb.gmra.mxu3 %vm275_vm3, %v624_v25  ;;  %668 = vst [vmem:[#allocation1] ss:$2 sm:$0xff] %v904_v23 }
  0x6d   : > { %670 = vst [vmem:[#allocation1 + $0x1] ss:$2 sm:$0xff] %v905_v24  ;;  %v625_v28 = vld.sshfl [vmem:[#allocation1 + $0x10] sm:$0xff pattern:$0x75316420] }
  0x6e   : > { %672 = vst [vmem:[#allocation1 + $0x10] ss:$2 sm:$0xff] %v906_v26 }
  0x6f   : > { %674 = vst [vmem:[#allocation1 + $0x11] ss:$2 sm:$0xff] %v907_v27 }
  0x74   : > { %903 = vmatmul.msk.f32.gmra.mxu3 %vm275_vm3, %v625_v28  ;;  %v675_v29 = vld.sshfl [vmem:[#allocation1] sm:$0xff pattern:$0x75316420] }
  0x75   : > { %912 = vmatmul.msk.f32.vlgmr.msra.gmra.mxu0 %vm275_vm3, %v675_v29 }
  0x76   : > { %v676_v30 = vld.sshfl [vmem:[#allocation1 + $0x10] sm:$0xff pattern:$0x75316420] }
  0x7d   : > { %913 = vmatmul.msk.f32.gmra.mxu0 %vm275_vm3, %v676_v30 }
  0xa9   : > { %v300_v31 = vpop.f32.mrf.mxu1 }
  0xaa   : > { %v297_v33 = vpop.f32.mrf.mxu0 }
  0xb3   : > { %v337_v32 = vpop.f32.mrf.mxu1 }
  0xb4   : > { %v338_v35 = vadd.f32 %v337_v32, %v297_v33 }
  0xbb   : > { %v340_v37 = vpop.f32.mrf.mxu1 }
  0xbc   : > { %v341_v42 = vadd.f32 %v340_v37, %v300_v31 }
  0xc2   : > { %v386_v34 = vpop.f32.mrf.mxu2 }
  0xc3   : > { %v392_v38 = vadd.f32 %v386_v34, %v338_v35 }
  0xca   : > { %v389_v40 = vpop.f32.mrf.mxu2 }
  0xcb   : > { %v440_v36 = vpop.f32.mrf.mxu3  ;;  %v393_v47 = vadd.f32 %v389_v40, %v341_v42 }
  0xcc   : > { %v446_v41 = vadd.f32 %v440_v36, %v392_v38 }
  0xce   : > { %v491_v39 = vpop.f32.mrf.mxu0 }
  0xcf   : > { %v497_v45 = vadd.f32 %v491_v39, %v446_v41 }
  0xd3   : > { %v443_v43 = vpop.f32.mrf.mxu3 }
  0xd4   : > { %v447_v50 = vadd.f32 %v443_v43, %v393_v47 }
  0xd6   : > { %v494_v48 = vpop.f32.mrf.mxu0 }
  0xd7   : > { %v542_v44 = vpop.f32.mrf.mxu1  ;;  %v498_v56 = vadd.f32 %v494_v48, %v447_v50 }
  0xd8   : > { %v548_v49 = vadd.f32 %v542_v44, %v497_v45 }
  0xdf   : > { %v545_v54 = vpop.f32.mrf.mxu1 }
  0xe0   : > { %v549_v61 = vadd.f32 %v545_v54, %v498_v56 }
  0xe6   : > { %v596_v46 = vpop.f32.mrf.mxu2 }
  0xe7   : > { %v602_v51 = vadd.f32 %v596_v46, %v548_v49 }
  0xee   : > { %v599_v58 = vpop.f32.mrf.mxu2 }
  0xef   : > { %v647_v52 = vpop.f32.mrf.mxu3  ;;  %v603_v63 = vadd.f32 %v599_v58, %v549_v61 }
  0xf0   : > { %v653_v53 = vadd.f32 %v647_v52, %v602_v51 }
  0xf2   : > { %v698_v57 = vpop.f32.mrf.mxu0 }
  0xf3   : > { %v704_v59 = vadd.f32 %v698_v57, %v653_v53 }
  0xf5   : > { %v710_v62 = vmul.f32 %v983_v55, %v704_v59 }
  0xf7   : > { %v716_v0 = vadd.f32 %v984_v60, %v710_v62  ;;  %v650_v1 = vpop.f32.mrf.mxu3 }
  0xf8   : > { %v654_v2 = vadd.f32 %v650_v1, %v603_v63 }
  0xf9   : > { %v718_v3 = vmax.f32 %v716_v0, 0.0 }
  0xfa   : > { %v701_v4 = vpop.f32.mrf.mxu0 }
  0xfb   : > { %v722_v5 = vrot.slane %v718_v3, 4  ;;  %727 = vst.msk [vmem:[%s204_s7] sm:$0xf] %vm237_vm2, %v718_v3  ;;  %v705_v6 = vadd.f32 %v701_v4, %v654_v2 }
  0xfd   : > { %728 = vst.msk [vmem:[%s204_s7 + $0x4] sm:$0xf] %vm237_vm2, %v722_v5  ;;  %v711_v7 = vmul.f32 %v983_v55, %v705_v6 }
  0xff   : > { %v717_v8 = vadd.f32 %v984_v60, %v711_v7 }
 0x101   : > { %v719_v9 = vmax.f32 %v717_v8, 0.0 }
 0x103   : > { %v723_v10 = vrot.slane %v719_v9, 4  ;;  %729 = vst.msk [vmem:[%s204_s7 + $0x8] sm:$0xf] %vm237_vm2, %v719_v9 }
 0x105   : > { %730 = vst.msk [vmem:[%s204_s7 + $0xc] sm:$0xf] %vm237_vm2, %v723_v10 }
 0x106   : > { %1012 = shalt.err (!%p1009_p5)
}
 0x107   : > { %s1066_s26 = smov 64   ;;  %s1067_s5 = smov 4  }
 0x108   : > { %925 = dma.vmem_to_hbm [thread:$0]  (%p1133_p4), %s747_s12, 256, %s749_s13, %s732_s18, %s1066_s26, %s1066_s26, %s1067_s5  }
 0x109 PF: > { %p931_p6 = scmp.ge.s32.totalorder %s1063_s20, 2  ;;  %s763_s6 = sand.u32 1, %s1043_s15  }
 0x10a   : > { %s764_s7 = scalar_lea.sflag [#allocation4], %s763_s6 }
 0x10b   : > { %p928_p7 = pnand %p931_p6, %p1140_p8 }
 0x10d   : > { %p929_p9 = pneg %p928_p7 }
 0x10f   : > { %1038 = dma.done.wait (%p929_p9), %s764_s7, 256  }
 0x110   : > { %1040 = vsyncadd (%p929_p9), %s764_s7, 4294967040  ;;  %s17_s20 = sadd.s32 1, %s1063_s20   ;;  %s1375_s15 = smov %s1047_s16 }
 0x111   : > { %p14_p10 = scmp.ge.s32.totalorder %s17_s20, 4   ;;  %s1376_s16 = smov %s1051_s17 }
 0x112   : > { %s1377_s17 = smov %s1146_s28  ;;  %s1378_s18 = smov %s1059_s19 }
 0x113   : > { %s1379_s19 = smov %s1381_s23  ;;  %16 = sbr.rel (!%p14_p10) target bundleno = 4 (0x4), region = 115 }
 0x118   :  { %770 = vsyncpa [#allocation4], 1 }
 0x119   :  { %772 = vsyncpa [#allocation4 + $0x1], 1 }

</bundles_post_ra>
